<compile_context>
chip_gen: v6e
topology: v6e:2x2x1
jax: 0.10.0
libtpu: 0.0.40
codegen_flags: <defaults>
</compile_context>

<pallas_src>
import functools
import math

import jax
import jax.numpy as jnp
from jax.experimental import pallas as pl
from jax.experimental.pallas import tpu as pltpu


# ----------------------------- fused Pallas kernel ----------------------------

def _make_fused_kernel(num_layers, hidden):
    H = hidden

    def project_inputs(pieces, wih, bias):
        """Hoisted input projection (off the recurrent critical path).

        pieces: list over t of tuples of [B, d_k] arrays (layer input, kept split
                per direction so no lane concat is ever needed).
        wih:    [sum(d_k), 4H]  (pre-transposed W_ih)
        bias:   [1, 4H]         (b_ih + b_hh)
        Returns list over t of per-gate pre-activations (i, f, g, o), each [B, H].
        """
        dims = [int(p.shape[-1]) for p in pieces[0]]
        offs, o = [], 0
        for dk in dims:
            offs.append(o)
            o += dk
        w_blocks = [wih[off:off + dk, :] for off, dk in zip(offs, dims)]
        gates = []
        for pt in pieces:
            g = bias
            for p, wb in zip(pt, w_blocks):
                g = g + jnp.dot(p, wb, preferred_element_type=jnp.float32)
            gates.append((g[:, 0 * H:1 * H], g[:, 1 * H:2 * H],
                          g[:, 2 * H:3 * H], g[:, 3 * H:4 * H]))
        return gates

    def recurrence(gates_in, whh4, reverse):
        """Serial LSTM recurrence; h/c live in registers, loop fully unrolled."""
        T = len(gates_in)
        B = gates_in[0][0].shape[0]
        wi, wf, wg, wo = whh4[0], whh4[1], whh4[2], whh4[3]   # each [H, H]
        h = jnp.zeros((B, H), jnp.float32)
        c = jnp.zeros((B, H), jnp.float32)
        hs = [None] * T
        order = range(T - 1, -1, -1) if reverse else range(T)
        for t in order:  # static, fully unrolled
            gi, gf, gg, go = gates_in[t]
            i = jax.nn.sigmoid(gi + jnp.dot(h, wi, preferred_element_type=jnp.float32))
            f = jax.nn.sigmoid(gf + jnp.dot(h, wf, preferred_element_type=jnp.float32))
            g = jnp.tanh(gg + jnp.dot(h, wg, preferred_element_type=jnp.float32))
            o = jax.nn.sigmoid(go + jnp.dot(h, wo, preferred_element_type=jnp.float32))
            c = f * c + i * g
            h = o * jnp.tanh(c)
            hs[t] = h
        return hs

    def kernel(*refs):
        # ---- unpack refs: x, then (wih, whh, bias) per (layer, direction), linear, out
        x_ref = refs[0]
        idx = 1
        layer_refs = []
        for _ in range(num_layers):
            dirs = []
            for _ in range(2):
                dirs.append((refs[idx], refs[idx + 1], refs[idx + 2]))
                idx += 3
            layer_refs.append(dirs)
        wlin_ref, blin_ref, out_ref = refs[idx], refs[idx + 1], refs[idx + 2]

        T = x_ref.shape[0]
        # layer-0 input: per-timestep rows of x (leading-axis index, free)
        pieces = [(x_ref[t],) for t in range(T)]

        for l in range(num_layers):
            hs_dirs = []
            for d in range(2):
                wih_ref, whh_ref, b_ref = layer_refs[l][d]
                gates_in = project_inputs(pieces, wih_ref[...], b_ref[...])
                hs_dirs.append(recurrence(gates_in, whh_ref[...], reverse=(d == 1)))
            # bidirectional output of this layer, kept split per direction
            pieces = [(hf, hb) for hf, hb in zip(hs_dirs[0], hs_dirs[1])]

        # linear head on lstm_out[:, -1]; head weight rows split to match (hf, hb)
        wlin = wlin_ref[...]                 # [2H, O]
        hf_last, hb_last = pieces[T - 1]
        out_ref[...] = (
            jnp.dot(hf_last, wlin[0:H, :], preferred_element_type=jnp.float32)
            + jnp.dot(hb_last, wlin[H:2 * H, :], preferred_element_type=jnp.float32)
            + blin_ref[...]
        )

    return kernel


# ----------------------------- wrapper ---------------------------------------

_VMEM = pl.BlockSpec(memory_space=pltpu.MemorySpace.VMEM)


@functools.partial(jax.jit, static_argnames=("num_layers", "hidden"))
def enhanced_bilstm_forward(x_btd, params, *, num_layers, hidden):
    """x_btd: [B, T, input_size] (batch_first, like the PyTorch module)."""
    B = x_btd.shape[0]
    x_tbd = jnp.transpose(x_btd, (1, 0, 2)).astype(jnp.float32)   # [T, B, D]

    args = [x_tbd]
    for l in range(num_layers):
        for d in range(2):
            p = params["layers"][l][d]
            args += [p["wih_t"], p["whh_g"], p["bias"]]
    args += [params["lin_w_t"], params["lin_b"]]
    out_dim = params["lin_w_t"].shape[1]

    kernel = _make_fused_kernel(num_layers, hidden)
    return pl.pallas_call(
        kernel,
        out_shape=jax.ShapeDtypeStruct((B, out_dim), jnp.float32),
        in_specs=[_VMEM] * len(args),
        out_specs=_VMEM,
    )(*args)


# ----------------------------- parameters -------------------------------------

def init_raw_params(key, input_size, hidden, output_size, num_layers):
    """PyTorch-shaped parameters (uniform(-1/sqrt(H), 1/sqrt(H)), like nn.LSTM/Linear)."""
    stdv = 1.0 / math.sqrt(hidden)
    layers = []
    for l in range(num_layers):
        d_in = input_size if l == 0 else 2 * hidden
        dirs = []
        for _ in range(2):
            key, k1, k2, k3, k4 = jax.random.split(key, 5)
            dirs.append(dict(
                w_ih=jax.random.uniform(k1, (4 * hidden, d_in), jnp.float32, -stdv, stdv),
                w_hh=jax.random.uniform(k2, (4 * hidden, hidden), jnp.float32, -stdv, stdv),
                b_ih=jax.random.uniform(k3, (4 * hidden,), jnp.float32, -stdv, stdv),
                b_hh=jax.random.uniform(k4, (4 * hidden,), jnp.float32, -stdv, stdv),
            ))
        layers.append(dirs)
    lin_stdv = 1.0 / math.sqrt(2 * hidden)
    key, k1, k2 = jax.random.split(key, 3)
    return {
        "layers": layers,
        "lin_w": jax.random.uniform(k1, (2 * output_size, 2 * hidden), jnp.float32,
                                    -lin_stdv, lin_stdv),
        "lin_b": jax.random.uniform(k2, (2 * output_size,), jnp.float32,
                                    -lin_stdv, lin_stdv),
    }


def prepare_kernel_params(raw, hidden):
    """Pre-transpose / pre-split weights ONCE (loop-invariant across forward calls)."""
    H = hidden
    layers = []
    for dirs in raw["layers"]:
        prepped = []
        for p in dirs:
            prepped.append(dict(
                wih_t=p["w_ih"].T,                                     # [D_in, 4H]
                whh_g=p["w_hh"].reshape(4, H, H).transpose(0, 2, 1),   # [4, H_in, H_out]
                bias=(p["b_ih"] + p["b_hh"])[None, :],                 # [1, 4H]
            ))
        layers.append(prepped)
    return {"layers": layers,
            "lin_w_t": raw["lin_w"].T,                                 # [2H, O]
            "lin_b": raw["lin_b"][None, :]}                            # [1, O]


# ----------------------------- pure-JAX reference -----------------------------

def _lstm_layer_ref(x_tbd, p):
    T, B = x_tbd.shape[0], x_tbd.shape[1]
    H = p["w_hh"].shape[1]
    h = jnp.zeros((B, H), jnp.float32)
    c = jnp.zeros((B, H), jnp.float32)
    outs = []
    for t in range(T):
        g = x_tbd[t] @ p["w_ih"].T + h @ p["w_hh"].T + p["b_ih"] + p["b_hh"]
        i = jax.nn.sigmoid(g[:, :H])
        f = jax.nn.sigmoid(g[:, H:2 * H])
        gg = jnp.tanh(g[:, 2 * H:3 * H])
        o = jax.nn.sigmoid(g[:, 3 * H:])
        c = f * c + i * gg
        h = o * jnp.tanh(c)
        outs.append(h)
    return jnp.stack(outs, 0)


def reference_forward(x_btd, raw, num_layers):
    layer_in = jnp.transpose(x_btd, (1, 0, 2)).astype(jnp.float32)
    for l in range(num_layers):
        fwd = _lstm_layer_ref(layer_in, raw["layers"][l][0])
        bwd = jnp.flip(_lstm_layer_ref(jnp.flip(layer_in, axis=0), raw["layers"][l][1]), axis=0)
        layer_in = jnp.concatenate([fwd, bwd], axis=-1)
    return layer_in[-1] @ raw["lin_w"].T + raw["lin_b"]


# ----------------------------- main -------------------------------------------

if __name__ == "__main__":
    B, T = 2, 8
    INPUT_SIZE, HIDDEN, OUTPUT_SIZE, NUM_LAYERS = 4, 32, 3, 2

    key = jax.random.PRNGKey(0)
    key, pkey, xkey = jax.random.split(key, 3)
    raw = init_raw_params(pkey, INPUT_SIZE, HIDDEN, OUTPUT_SIZE, NUM_LAYERS)
    params = prepare_kernel_params(raw, HIDDEN)
    x = jax.random.normal(xkey, (B, T, INPUT_SIZE), jnp.float32)

    out = enhanced_bilstm_forward(x, params, num_layers=NUM_LAYERS, hidden=HIDDEN)
    out = jax.block_until_ready(out)
    assert out.shape == (B, 2 * OUTPUT_SIZE), out.shape

    ref = reference_forward(x, raw, NUM_LAYERS)
    assert jnp.allclose(out, ref, atol=5e-3, rtol=5e-3), (out, ref)

    print("KERNEL_OK")
</pallas_src>

<mosaic_0001>
module attributes {stable_mosaic.version = 11 : i64} {
  func.func @kernel(%arg0: memref<8x2x4xf32, #tpu.memory_space<vmem>>, %arg1: memref<4x128xf32, #tpu.memory_space<vmem>>, %arg2: memref<4x32x32xf32, #tpu.memory_space<vmem>>, %arg3: memref<1x128xf32, #tpu.memory_space<vmem>>, %arg4: memref<4x128xf32, #tpu.memory_space<vmem>>, %arg5: memref<4x32x32xf32, #tpu.memory_space<vmem>>, %arg6: memref<1x128xf32, #tpu.memory_space<vmem>>, %arg7: memref<64x128xf32, #tpu.memory_space<vmem>>, %arg8: memref<4x32x32xf32, #tpu.memory_space<vmem>>, %arg9: memref<1x128xf32, #tpu.memory_space<vmem>>, %arg10: memref<64x128xf32, #tpu.memory_space<vmem>>, %arg11: memref<4x32x32xf32, #tpu.memory_space<vmem>>, %arg12: memref<1x128xf32, #tpu.memory_space<vmem>>, %arg13: memref<64x6xf32, #tpu.memory_space<vmem>>, %arg14: memref<1x6xf32, #tpu.memory_space<vmem>>, %arg15: memref<2x6xf32, #tpu.memory_space<vmem>>) attributes {dimension_semantics = [], scalar_prefetch = 0 : i64, scratch_operands = 0 : i64, tpu.core_type = #tpu.core_type<tc>} {
    %c0 = arith.constant 0 : index
    %c0_0 = arith.constant 0 : index
    %c0_1 = arith.constant 0 : index
    %0 = vector.load %arg0[%c0, %c0_0, %c0_1] : memref<8x2x4xf32, #tpu.memory_space<vmem>>, vector<1x2x4xf32>
    %1 = vector.shape_cast %0 : vector<1x2x4xf32> to vector<2x4xf32>
    %c1 = arith.constant 1 : index
    %c0_2 = arith.constant 0 : index
    %c0_3 = arith.constant 0 : index
    %2 = vector.load %arg0[%c1, %c0_2, %c0_3] : memref<8x2x4xf32, #tpu.memory_space<vmem>>, vector<1x2x4xf32>
    %3 = vector.shape_cast %2 : vector<1x2x4xf32> to vector<2x4xf32>
    %c2 = arith.constant 2 : index
    %c0_4 = arith.constant 0 : index
    %c0_5 = arith.constant 0 : index
    %4 = vector.load %arg0[%c2, %c0_4, %c0_5] : memref<8x2x4xf32, #tpu.memory_space<vmem>>, vector<1x2x4xf32>
    %5 = vector.shape_cast %4 : vector<1x2x4xf32> to vector<2x4xf32>
    %c3 = arith.constant 3 : index
    %c0_6 = arith.constant 0 : index
    %c0_7 = arith.constant 0 : index
    %6 = vector.load %arg0[%c3, %c0_6, %c0_7] : memref<8x2x4xf32, #tpu.memory_space<vmem>>, vector<1x2x4xf32>
    %7 = vector.shape_cast %6 : vector<1x2x4xf32> to vector<2x4xf32>
    %c4 = arith.constant 4 : index
    %c0_8 = arith.constant 0 : index
    %c0_9 = arith.constant 0 : index
    %8 = vector.load %arg0[%c4, %c0_8, %c0_9] : memref<8x2x4xf32, #tpu.memory_space<vmem>>, vector<1x2x4xf32>
    %9 = vector.shape_cast %8 : vector<1x2x4xf32> to vector<2x4xf32>
    %c5 = arith.constant 5 : index
    %c0_10 = arith.constant 0 : index
    %c0_11 = arith.constant 0 : index
    %10 = vector.load %arg0[%c5, %c0_10, %c0_11] : memref<8x2x4xf32, #tpu.memory_space<vmem>>, vector<1x2x4xf32>
    %11 = vector.shape_cast %10 : vector<1x2x4xf32> to vector<2x4xf32>
    %c6 = arith.constant 6 : index
    %c0_12 = arith.constant 0 : index
    %c0_13 = arith.constant 0 : index
    %12 = vector.load %arg0[%c6, %c0_12, %c0_13] : memref<8x2x4xf32, #tpu.memory_space<vmem>>, vector<1x2x4xf32>
    %13 = vector.shape_cast %12 : vector<1x2x4xf32> to vector<2x4xf32>
    %c7 = arith.constant 7 : index
    %c0_14 = arith.constant 0 : index
    %c0_15 = arith.constant 0 : index
    %14 = vector.load %arg0[%c7, %c0_14, %c0_15] : memref<8x2x4xf32, #tpu.memory_space<vmem>>, vector<1x2x4xf32>
    %15 = vector.shape_cast %14 : vector<1x2x4xf32> to vector<2x4xf32>
    %c0_16 = arith.constant 0 : index
    %c0_17 = arith.constant 0 : index
    %16 = vector.load %arg1[%c0_16, %c0_17] : memref<4x128xf32, #tpu.memory_space<vmem>>, vector<4x128xf32>
    %c0_18 = arith.constant 0 : index
    %c0_19 = arith.constant 0 : index
    %17 = vector.load %arg3[%c0_18, %c0_19] : memref<1x128xf32, #tpu.memory_space<vmem>>, vector<1x128xf32>
    %cst = arith.constant dense<0.000000e+00> : vector<2x128xf32>
    %18 = tpu.matmul %1, %16, %cst {dimension_numbers = #tpu.dot_dimension_numbers<[1], [0], [0], [1], [0, 0, 1, 1], [], []>} : vector<2x4xf32>, vector<4x128xf32>, vector<2x128xf32> -> vector<2x128xf32>
    %19 = vector.broadcast %17 : vector<1x128xf32> to vector<2x128xf32>
    %20 = arith.addf %19, %18 : vector<2x128xf32>
    %21 = vector.extract_strided_slice %20 {offsets = [0, 0], sizes = [2, 32], strides = [1, 1]} : vector<2x128xf32> to vector<2x32xf32>
    %22 = vector.extract_strided_slice %20 {offsets = [0, 32], sizes = [2, 32], strides = [1, 1]} : vector<2x128xf32> to vector<2x32xf32>
    %23 = vector.extract_strided_slice %20 {offsets = [0, 64], sizes = [2, 32], strides = [1, 1]} : vector<2x128xf32> to vector<2x32xf32>
    %24 = vector.extract_strided_slice %20 {offsets = [0, 96], sizes = [2, 32], strides = [1, 1]} : vector<2x128xf32> to vector<2x32xf32>
    %cst_20 = arith.constant dense<0.000000e+00> : vector<2x128xf32>
    %25 = tpu.matmul %3, %16, %cst_20 {dimension_numbers = #tpu.dot_dimension_numbers<[1], [0], [0], [1], [0, 0, 1, 1], [], []>} : vector<2x4xf32>, vector<4x128xf32>, vector<2x128xf32> -> vector<2x128xf32>
    %26 = vector.broadcast %17 : vector<1x128xf32> to vector<2x128xf32>
    %27 = arith.addf %26, %25 : vector<2x128xf32>
    %28 = vector.extract_strided_slice %27 {offsets = [0, 0], sizes = [2, 32], strides = [1, 1]} : vector<2x128xf32> to vector<2x32xf32>
    %29 = vector.extract_strided_slice %27 {offsets = [0, 32], sizes = [2, 32], strides = [1, 1]} : vector<2x128xf32> to vector<2x32xf32>
    %30 = vector.extract_strided_slice %27 {offsets = [0, 64], sizes = [2, 32], strides = [1, 1]} : vector<2x128xf32> to vector<2x32xf32>
    %31 = vector.extract_strided_slice %27 {offsets = [0, 96], sizes = [2, 32], strides = [1, 1]} : vector<2x128xf32> to vector<2x32xf32>
    %cst_21 = arith.constant dense<0.000000e+00> : vector<2x128xf32>
    %32 = tpu.matmul %5, %16, %cst_21 {dimension_numbers = #tpu.dot_dimension_numbers<[1], [0], [0], [1], [0, 0, 1, 1], [], []>} : vector<2x4xf32>, vector<4x128xf32>, vector<2x128xf32> -> vector<2x128xf32>
    %33 = vector.broadcast %17 : vector<1x128xf32> to vector<2x128xf32>
    %34 = arith.addf %33, %32 : vector<2x128xf32>
    %35 = vector.extract_strided_slice %34 {offsets = [0, 0], sizes = [2, 32], strides = [1, 1]} : vector<2x128xf32> to vector<2x32xf32>
    %36 = vector.extract_strided_slice %34 {offsets = [0, 32], sizes = [2, 32], strides = [1, 1]} : vector<2x128xf32> to vector<2x32xf32>
    %37 = vector.extract_strided_slice %34 {offsets = [0, 64], sizes = [2, 32], strides = [1, 1]} : vector<2x128xf32> to vector<2x32xf32>
    %38 = vector.extract_strided_slice %34 {offsets = [0, 96], sizes = [2, 32], strides = [1, 1]} : vector<2x128xf32> to vector<2x32xf32>
    %cst_22 = arith.constant dense<0.000000e+00> : vector<2x128xf32>
    %39 = tpu.matmul %7, %16, %cst_22 {dimension_numbers = #tpu.dot_dimension_numbers<[1], [0], [0], [1], [0, 0, 1, 1], [], []>} : vector<2x4xf32>, vector<4x128xf32>, vector<2x128xf32> -> vector<2x128xf32>
    %40 = vector.broadcast %17 : vector<1x128xf32> to vector<2x128xf32>
    %41 = arith.addf %40, %39 : vector<2x128xf32>
    %42 = vector.extract_strided_slice %41 {offsets = [0, 0], sizes = [2, 32], strides = [1, 1]} : vector<2x128xf32> to vector<2x32xf32>
    %43 = vector.extract_strided_slice %41 {offsets = [0, 32], sizes = [2, 32], strides = [1, 1]} : vector<2x128xf32> to vector<2x32xf32>
    %44 = vector.extract_strided_slice %41 {offsets = [0, 64], sizes = [2, 32], strides = [1, 1]} : vector<2x128xf32> to vector<2x32xf32>
    %45 = vector.extract_strided_slice %41 {offsets = [0, 96], sizes = [2, 32], strides = [1, 1]} : vector<2x128xf32> to vector<2x32xf32>
    %cst_23 = arith.constant dense<0.000000e+00> : vector<2x128xf32>
    %46 = tpu.matmul %9, %16, %cst_23 {dimension_numbers = #tpu.dot_dimension_numbers<[1], [0], [0], [1], [0, 0, 1, 1], [], []>} : vector<2x4xf32>, vector<4x128xf32>, vector<2x128xf32> -> vector<2x128xf32>
    %47 = vector.broadcast %17 : vector<1x128xf32> to vector<2x128xf32>
    %48 = arith.addf %47, %46 : vector<2x128xf32>
    %49 = vector.extract_strided_slice %48 {offsets = [0, 0], sizes = [2, 32], strides = [1, 1]} : vector<2x128xf32> to vector<2x32xf32>
    %50 = vector.extract_strided_slice %48 {offsets = [0, 32], sizes = [2, 32], strides = [1, 1]} : vector<2x128xf32> to vector<2x32xf32>
    %51 = vector.extract_strided_slice %48 {offsets = [0, 64], sizes = [2, 32], strides = [1, 1]} : vector<2x128xf32> to vector<2x32xf32>
    %52 = vector.extract_strided_slice %48 {offsets = [0, 96], sizes = [2, 32], strides = [1, 1]} : vector<2x128xf32> to vector<2x32xf32>
    %cst_24 = arith.constant dense<0.000000e+00> : vector<2x128xf32>
    %53 = tpu.matmul %11, %16, %cst_24 {dimension_numbers = #tpu.dot_dimension_numbers<[1], [0], [0], [1], [0, 0, 1, 1], [], []>} : vector<2x4xf32>, vector<4x128xf32>, vector<2x128xf32> -> vector<2x128xf32>
    %54 = vector.broadcast %17 : vector<1x128xf32> to vector<2x128xf32>
    %55 = arith.addf %54, %53 : vector<2x128xf32>
    %56 = vector.extract_strided_slice %55 {offsets = [0, 0], sizes = [2, 32], strides = [1, 1]} : vector<2x128xf32> to vector<2x32xf32>
    %57 = vector.extract_strided_slice %55 {offsets = [0, 32], sizes = [2, 32], strides = [1, 1]} : vector<2x128xf32> to vector<2x32xf32>
    %58 = vector.extract_strided_slice %55 {offsets = [0, 64], sizes = [2, 32], strides = [1, 1]} : vector<2x128xf32> to vector<2x32xf32>
    %59 = vector.extract_strided_slice %55 {offsets = [0, 96], sizes = [2, 32], strides = [1, 1]} : vector<2x128xf32> to vector<2x32xf32>
    %cst_25 = arith.constant dense<0.000000e+00> : vector<2x128xf32>
    %60 = tpu.matmul %13, %16, %cst_25 {dimension_numbers = #tpu.dot_dimension_numbers<[1], [0], [0], [1], [0, 0, 1, 1], [], []>} : vector<2x4xf32>, vector<4x128xf32>, vector<2x128xf32> -> vector<2x128xf32>
    %61 = vector.broadcast %17 : vector<1x128xf32> to vector<2x128xf32>
    %62 = arith.addf %61, %60 : vector<2x128xf32>
    %63 = vector.extract_strided_slice %62 {offsets = [0, 0], sizes = [2, 32], strides = [1, 1]} : vector<2x128xf32> to vector<2x32xf32>
    %64 = vector.extract_strided_slice %62 {offsets = [0, 32], sizes = [2, 32], strides = [1, 1]} : vector<2x128xf32> to vector<2x32xf32>
    %65 = vector.extract_strided_slice %62 {offsets = [0, 64], sizes = [2, 32], strides = [1, 1]} : vector<2x128xf32> to vector<2x32xf32>
    %66 = vector.extract_strided_slice %62 {offsets = [0, 96], sizes = [2, 32], strides = [1, 1]} : vector<2x128xf32> to vector<2x32xf32>
    %cst_26 = arith.constant dense<0.000000e+00> : vector<2x128xf32>
    %67 = tpu.matmul %15, %16, %cst_26 {dimension_numbers = #tpu.dot_dimension_numbers<[1], [0], [0], [1], [0, 0, 1, 1], [], []>} : vector<2x4xf32>, vector<4x128xf32>, vector<2x128xf32> -> vector<2x128xf32>
    %68 = vector.broadcast %17 : vector<1x128xf32> to vector<2x128xf32>
    %69 = arith.addf %68, %67 : vector<2x128xf32>
    %70 = vector.extract_strided_slice %69 {offsets = [0, 0], sizes = [2, 32], strides = [1, 1]} : vector<2x128xf32> to vector<2x32xf32>
    %71 = vector.extract_strided_slice %69 {offsets = [0, 32], sizes = [2, 32], strides = [1, 1]} : vector<2x128xf32> to vector<2x32xf32>
    %72 = vector.extract_strided_slice %69 {offsets = [0, 64], sizes = [2, 32], strides = [1, 1]} : vector<2x128xf32> to vector<2x32xf32>
    %73 = vector.extract_strided_slice %69 {offsets = [0, 96], sizes = [2, 32], strides = [1, 1]} : vector<2x128xf32> to vector<2x32xf32>
    %c0_27 = arith.constant 0 : index
    %c0_28 = arith.constant 0 : index
    %c0_29 = arith.constant 0 : index
    %74 = vector.load %arg2[%c0_27, %c0_28, %c0_29] : memref<4x32x32xf32, #tpu.memory_space<vmem>>, vector<4x32x32xf32>
    %75 = vector.extract_strided_slice %74 {offsets = [0, 0, 0], sizes = [1, 32, 32], strides = [1, 1, 1]} : vector<4x32x32xf32> to vector<1x32x32xf32>
    %76 = vector.shape_cast %75 : vector<1x32x32xf32> to vector<32x32xf32>
    %77 = vector.extract_strided_slice %74 {offsets = [1, 0, 0], sizes = [1, 32, 32], strides = [1, 1, 1]} : vector<4x32x32xf32> to vector<1x32x32xf32>
    %78 = vector.shape_cast %77 : vector<1x32x32xf32> to vector<32x32xf32>
    %79 = vector.extract_strided_slice %74 {offsets = [2, 0, 0], sizes = [1, 32, 32], strides = [1, 1, 1]} : vector<4x32x32xf32> to vector<1x32x32xf32>
    %80 = vector.shape_cast %79 : vector<1x32x32xf32> to vector<32x32xf32>
    %81 = vector.extract_strided_slice %74 {offsets = [3, 0, 0], sizes = [1, 32, 32], strides = [1, 1, 1]} : vector<4x32x32xf32> to vector<1x32x32xf32>
    %82 = vector.shape_cast %81 : vector<1x32x32xf32> to vector<32x32xf32>
    %cst_30 = arith.constant 0.000000e+00 : f32
    %83 = vector.broadcast %cst_30 : f32 to vector<2x32xf32>
    %cst_31 = arith.constant 0.000000e+00 : f32
    %84 = vector.broadcast %cst_31 : f32 to vector<2x32xf32>
    %cst_32 = arith.constant dense<0.000000e+00> : vector<2x32xf32>
    %85 = tpu.matmul %83, %76, %cst_32 {dimension_numbers = #tpu.dot_dimension_numbers<[1], [0], [0], [1], [0, 0, 1, 1], [], []>} : vector<2x32xf32>, vector<32x32xf32>, vector<2x32xf32> -> vector<2x32xf32>
    %86 = arith.addf %21, %85 : vector<2x32xf32>
    %87 = arith.negf %86 : vector<2x32xf32>
    %88 = math.exp %87 : vector<2x32xf32>
    %cst_33 = arith.constant 1.000000e+00 : f32
    %89 = vector.broadcast %cst_33 : f32 to vector<2x32xf32>
    %90 = arith.addf %89, %88 : vector<2x32xf32>
    %91 = arith.divf %89, %90 : vector<2x32xf32>
    %cst_34 = arith.constant dense<0.000000e+00> : vector<2x32xf32>
    %92 = tpu.matmul %83, %78, %cst_34 {dimension_numbers = #tpu.dot_dimension_numbers<[1], [0], [0], [1], [0, 0, 1, 1], [], []>} : vector<2x32xf32>, vector<32x32xf32>, vector<2x32xf32> -> vector<2x32xf32>
    %93 = arith.addf %22, %92 : vector<2x32xf32>
    %94 = arith.negf %93 : vector<2x32xf32>
    %95 = math.exp %94 : vector<2x32xf32>
    %cst_35 = arith.constant 1.000000e+00 : f32
    %96 = vector.broadcast %cst_35 : f32 to vector<2x32xf32>
    %97 = arith.addf %96, %95 : vector<2x32xf32>
    %98 = arith.divf %96, %97 : vector<2x32xf32>
    %cst_36 = arith.constant dense<0.000000e+00> : vector<2x32xf32>
    %99 = tpu.matmul %83, %80, %cst_36 {dimension_numbers = #tpu.dot_dimension_numbers<[1], [0], [0], [1], [0, 0, 1, 1], [], []>} : vector<2x32xf32>, vector<32x32xf32>, vector<2x32xf32> -> vector<2x32xf32>
    %100 = arith.addf %23, %99 : vector<2x32xf32>
    %101 = math.tanh %100 : vector<2x32xf32>
    %cst_37 = arith.constant dense<0.000000e+00> : vector<2x32xf32>
    %102 = tpu.matmul %83, %82, %cst_37 {dimension_numbers = #tpu.dot_dimension_numbers<[1], [0], [0], [1], [0, 0, 1, 1], [], []>} : vector<2x32xf32>, vector<32x32xf32>, vector<2x32xf32> -> vector<2x32xf32>
    %103 = arith.addf %24, %102 : vector<2x32xf32>
    %104 = arith.negf %103 : vector<2x32xf32>
    %105 = math.exp %104 : vector<2x32xf32>
    %cst_38 = arith.constant 1.000000e+00 : f32
    %106 = vector.broadcast %cst_38 : f32 to vector<2x32xf32>
    %107 = arith.addf %106, %105 : vector<2x32xf32>
    %108 = arith.divf %106, %107 : vector<2x32xf32>
    %109 = arith.mulf %98, %84 : vector<2x32xf32>
    %110 = arith.mulf %91, %101 : vector<2x32xf32>
    %111 = arith.addf %109, %110 : vector<2x32xf32>
    %112 = math.tanh %111 : vector<2x32xf32>
    %113 = arith.mulf %108, %112 : vector<2x32xf32>
    %cst_39 = arith.constant dense<0.000000e+00> : vector<2x32xf32>
    %114 = tpu.matmul %113, %76, %cst_39 {dimension_numbers = #tpu.dot_dimension_numbers<[1], [0], [0], [1], [0, 0, 1, 1], [], []>} : vector<2x32xf32>, vector<32x32xf32>, vector<2x32xf32> -> vector<2x32xf32>
    %115 = arith.addf %28, %114 : vector<2x32xf32>
    %116 = arith.negf %115 : vector<2x32xf32>
    %117 = math.exp %116 : vector<2x32xf32>
    %cst_40 = arith.constant 1.000000e+00 : f32
    %118 = vector.broadcast %cst_40 : f32 to vector<2x32xf32>
    %119 = arith.addf %118, %117 : vector<2x32xf32>
    %120 = arith.divf %118, %119 : vector<2x32xf32>
    %cst_41 = arith.constant dense<0.000000e+00> : vector<2x32xf32>
    %121 = tpu.matmul %113, %78, %cst_41 {dimension_numbers = #tpu.dot_dimension_numbers<[1], [0], [0], [1], [0, 0, 1, 1], [], []>} : vector<2x32xf32>, vector<32x32xf32>, vector<2x32xf32> -> vector<2x32xf32>
    %122 = arith.addf %29, %121 : vector<2x32xf32>
    %123 = arith.negf %122 : vector<2x32xf32>
    %124 = math.exp %123 : vector<2x32xf32>
    %cst_42 = arith.constant 1.000000e+00 : f32
    %125 = vector.broadcast %cst_42 : f32 to vector<2x32xf32>
    %126 = arith.addf %125, %124 : vector<2x32xf32>
    %127 = arith.divf %125, %126 : vector<2x32xf32>
    %cst_43 = arith.constant dense<0.000000e+00> : vector<2x32xf32>
    %128 = tpu.matmul %113, %80, %cst_43 {dimension_numbers = #tpu.dot_dimension_numbers<[1], [0], [0], [1], [0, 0, 1, 1], [], []>} : vector<2x32xf32>, vector<32x32xf32>, vector<2x32xf32> -> vector<2x32xf32>
    %129 = arith.addf %30, %128 : vector<2x32xf32>
    %130 = math.tanh %129 : vector<2x32xf32>
    %cst_44 = arith.constant dense<0.000000e+00> : vector<2x32xf32>
    %131 = tpu.matmul %113, %82, %cst_44 {dimension_numbers = #tpu.dot_dimension_numbers<[1], [0], [0], [1], [0, 0, 1, 1], [], []>} : vector<2x32xf32>, vector<32x32xf32>, vector<2x32xf32> -> vector<2x32xf32>
    %132 = arith.addf %31, %131 : vector<2x32xf32>
    %133 = arith.negf %132 : vector<2x32xf32>
    %134 = math.exp %133 : vector<2x32xf32>
    %cst_45 = arith.constant 1.000000e+00 : f32
    %135 = vector.broadcast %cst_45 : f32 to vector<2x32xf32>
    %136 = arith.addf %135, %134 : vector<2x32xf32>
    %137 = arith.divf %135, %136 : vector<2x32xf32>
    %138 = arith.mulf %127, %111 : vector<2x32xf32>
    %139 = arith.mulf %120, %130 : vector<2x32xf32>
    %140 = arith.addf %138, %139 : vector<2x32xf32>
    %141 = math.tanh %140 : vector<2x32xf32>
    %142 = arith.mulf %137, %141 : vector<2x32xf32>
    %cst_46 = arith.constant dense<0.000000e+00> : vector<2x32xf32>
    %143 = tpu.matmul %142, %76, %cst_46 {dimension_numbers = #tpu.dot_dimension_numbers<[1], [0], [0], [1], [0, 0, 1, 1], [], []>} : vector<2x32xf32>, vector<32x32xf32>, vector<2x32xf32> -> vector<2x32xf32>
    %144 = arith.addf %35, %143 : vector<2x32xf32>
    %145 = arith.negf %144 : vector<2x32xf32>
    %146 = math.exp %145 : vector<2x32xf32>
    %cst_47 = arith.constant 1.000000e+00 : f32
    %147 = vector.broadcast %cst_47 : f32 to vector<2x32xf32>
    %148 = arith.addf %147, %146 : vector<2x32xf32>
    %149 = arith.divf %147, %148 : vector<2x32xf32>
    %cst_48 = arith.constant dense<0.000000e+00> : vector<2x32xf32>
    %150 = tpu.matmul %142, %78, %cst_48 {dimension_numbers = #tpu.dot_dimension_numbers<[1], [0], [0], [1], [0, 0, 1, 1], [], []>} : vector<2x32xf32>, vector<32x32xf32>, vector<2x32xf32> -> vector<2x32xf32>
    %151 = arith.addf %36, %150 : vector<2x32xf32>
    %152 = arith.negf %151 : vector<2x32xf32>
    %153 = math.exp %152 : vector<2x32xf32>
    %cst_49 = arith.constant 1.000000e+00 : f32
    %154 = vector.broadcast %cst_49 : f32 to vector<2x32xf32>
    %155 = arith.addf %154, %153 : vector<2x32xf32>
    %156 = arith.divf %154, %155 : vector<2x32xf32>
    %cst_50 = arith.constant dense<0.000000e+00> : vector<2x32xf32>
    %157 = tpu.matmul %142, %80, %cst_50 {dimension_numbers = #tpu.dot_dimension_numbers<[1], [0], [0], [1], [0, 0, 1, 1], [], []>} : vector<2x32xf32>, vector<32x32xf32>, vector<2x32xf32> -> vector<2x32xf32>
    %158 = arith.addf %37, %157 : vector<2x32xf32>
    %159 = math.tanh %158 : vector<2x32xf32>
    %cst_51 = arith.constant dense<0.000000e+00> : vector<2x32xf32>
    %160 = tpu.matmul %142, %82, %cst_51 {dimension_numbers = #tpu.dot_dimension_numbers<[1], [0], [0], [1], [0, 0, 1, 1], [], []>} : vector<2x32xf32>, vector<32x32xf32>, vector<2x32xf32> -> vector<2x32xf32>
    %161 = arith.addf %38, %160 : vector<2x32xf32>
    %162 = arith.negf %161 : vector<2x32xf32>
    %163 = math.exp %162 : vector<2x32xf32>
    %cst_52 = arith.constant 1.000000e+00 : f32
    %164 = vector.broadcast %cst_52 : f32 to vector<2x32xf32>
    %165 = arith.addf %164, %163 : vector<2x32xf32>
    %166 = arith.divf %164, %165 : vector<2x32xf32>
    %167 = arith.mulf %156, %140 : vector<2x32xf32>
    %168 = arith.mulf %149, %159 : vector<2x32xf32>
    %169 = arith.addf %167, %168 : vector<2x32xf32>
    %170 = math.tanh %169 : vector<2x32xf32>
    %171 = arith.mulf %166, %170 : vector<2x32xf32>
    %cst_53 = arith.constant dense<0.000000e+00> : vector<2x32xf32>
    %172 = tpu.matmul %171, %76, %cst_53 {dimension_numbers = #tpu.dot_dimension_numbers<[1], [0], [0], [1], [0, 0, 1, 1], [], []>} : vector<2x32xf32>, vector<32x32xf32>, vector<2x32xf32> -> vector<2x32xf32>
    %173 = arith.addf %42, %172 : vector<2x32xf32>
    %174 = arith.negf %173 : vector<2x32xf32>
    %175 = math.exp %174 : vector<2x32xf32>
    %cst_54 = arith.constant 1.000000e+00 : f32
    %176 = vector.broadcast %cst_54 : f32 to vector<2x32xf32>
    %177 = arith.addf %176, %175 : vector<2x32xf32>
    %178 = arith.divf %176, %177 : vector<2x32xf32>
    %cst_55 = arith.constant dense<0.000000e+00> : vector<2x32xf32>
    %179 = tpu.matmul %171, %78, %cst_55 {dimension_numbers = #tpu.dot_dimension_numbers<[1], [0], [0], [1], [0, 0, 1, 1], [], []>} : vector<2x32xf32>, vector<32x32xf32>, vector<2x32xf32> -> vector<2x32xf32>
    %180 = arith.addf %43, %179 : vector<2x32xf32>
    %181 = arith.negf %180 : vector<2x32xf32>
    %182 = math.exp %181 : vector<2x32xf32>
    %cst_56 = arith.constant 1.000000e+00 : f32
    %183 = vector.broadcast %cst_56 : f32 to vector<2x32xf32>
    %184 = arith.addf %183, %182 : vector<2x32xf32>
    %185 = arith.divf %183, %184 : vector<2x32xf32>
    %cst_57 = arith.constant dense<0.000000e+00> : vector<2x32xf32>
    %186 = tpu.matmul %171, %80, %cst_57 {dimension_numbers = #tpu.dot_dimension_numbers<[1], [0], [0], [1], [0, 0, 1, 1], [], []>} : vector<2x32xf32>, vector<32x32xf32>, vector<2x32xf32> -> vector<2x32xf32>
    %187 = arith.addf %44, %186 : vector<2x32xf32>
    %188 = math.tanh %187 : vector<2x32xf32>
    %cst_58 = arith.constant dense<0.000000e+00> : vector<2x32xf32>
    %189 = tpu.matmul %171, %82, %cst_58 {dimension_numbers = #tpu.dot_dimension_numbers<[1], [0], [0], [1], [0, 0, 1, 1], [], []>} : vector<2x32xf32>, vector<32x32xf32>, vector<2x32xf32> -> vector<2x32xf32>
    %190 = arith.addf %45, %189 : vector<2x32xf32>
    %191 = arith.negf %190 : vector<2x32xf32>
    %192 = math.exp %191 : vector<2x32xf32>
    %cst_59 = arith.constant 1.000000e+00 : f32
    %193 = vector.broadcast %cst_59 : f32 to vector<2x32xf32>
    %194 = arith.addf %193, %192 : vector<2x32xf32>
    %195 = arith.divf %193, %194 : vector<2x32xf32>
    %196 = arith.mulf %185, %169 : vector<2x32xf32>
    %197 = arith.mulf %178, %188 : vector<2x32xf32>
    %198 = arith.addf %196, %197 : vector<2x32xf32>
    %199 = math.tanh %198 : vector<2x32xf32>
    %200 = arith.mulf %195, %199 : vector<2x32xf32>
    %cst_60 = arith.constant dense<0.000000e+00> : vector<2x32xf32>
    %201 = tpu.matmul %200, %76, %cst_60 {dimension_numbers = #tpu.dot_dimension_numbers<[1], [0], [0], [1], [0, 0, 1, 1], [], []>} : vector<2x32xf32>, vector<32x32xf32>, vector<2x32xf32> -> vector<2x32xf32>
    %202 = arith.addf %49, %201 : vector<2x32xf32>
    %203 = arith.negf %202 : vector<2x32xf32>
    %204 = math.exp %203 : vector<2x32xf32>
    %cst_61 = arith.constant 1.000000e+00 : f32
    %205 = vector.broadcast %cst_61 : f32 to vector<2x32xf32>
    %206 = arith.addf %205, %204 : vector<2x32xf32>
    %207 = arith.divf %205, %206 : vector<2x32xf32>
    %cst_62 = arith.constant dense<0.000000e+00> : vector<2x32xf32>
    %208 = tpu.matmul %200, %78, %cst_62 {dimension_numbers = #tpu.dot_dimension_numbers<[1], [0], [0], [1], [0, 0, 1, 1], [], []>} : vector<2x32xf32>, vector<32x32xf32>, vector<2x32xf32> -> vector<2x32xf32>
    %209 = arith.addf %50, %208 : vector<2x32xf32>
    %210 = arith.negf %209 : vector<2x32xf32>
    %211 = math.exp %210 : vector<2x32xf32>
    %cst_63 = arith.constant 1.000000e+00 : f32
    %212 = vector.broadcast %cst_63 : f32 to vector<2x32xf32>
    %213 = arith.addf %212, %211 : vector<2x32xf32>
    %214 = arith.divf %212, %213 : vector<2x32xf32>
    %cst_64 = arith.constant dense<0.000000e+00> : vector<2x32xf32>
    %215 = tpu.matmul %200, %80, %cst_64 {dimension_numbers = #tpu.dot_dimension_numbers<[1], [0], [0], [1], [0, 0, 1, 1], [], []>} : vector<2x32xf32>, vector<32x32xf32>, vector<2x32xf32> -> vector<2x32xf32>
    %216 = arith.addf %51, %215 : vector<2x32xf32>
    %217 = math.tanh %216 : vector<2x32xf32>
    %cst_65 = arith.constant dense<0.000000e+00> : vector<2x32xf32>
    %218 = tpu.matmul %200, %82, %cst_65 {dimension_numbers = #tpu.dot_dimension_numbers<[1], [0], [0], [1], [0, 0, 1, 1], [], []>} : vector<2x32xf32>, vector<32x32xf32>, vector<2x32xf32> -> vector<2x32xf32>
    %219 = arith.addf %52, %218 : vector<2x32xf32>
    %220 = arith.negf %219 : vector<2x32xf32>
    %221 = math.exp %220 : vector<2x32xf32>
    %cst_66 = arith.constant 1.000000e+00 : f32
    %222 = vector.broadcast %cst_66 : f32 to vector<2x32xf32>
    %223 = arith.addf %222, %221 : vector<2x32xf32>
    %224 = arith.divf %222, %223 : vector<2x32xf32>
    %225 = arith.mulf %214, %198 : vector<2x32xf32>
    %226 = arith.mulf %207, %217 : vector<2x32xf32>
    %227 = arith.addf %225, %226 : vector<2x32xf32>
    %228 = math.tanh %227 : vector<2x32xf32>
    %229 = arith.mulf %224, %228 : vector<2x32xf32>
    %cst_67 = arith.constant dense<0.000000e+00> : vector<2x32xf32>
    %230 = tpu.matmul %229, %76, %cst_67 {dimension_numbers = #tpu.dot_dimension_numbers<[1], [0], [0], [1], [0, 0, 1, 1], [], []>} : vector<2x32xf32>, vector<32x32xf32>, vector<2x32xf32> -> vector<2x32xf32>
    %231 = arith.addf %56, %230 : vector<2x32xf32>
    %232 = arith.negf %231 : vector<2x32xf32>
    %233 = math.exp %232 : vector<2x32xf32>
    %cst_68 = arith.constant 1.000000e+00 : f32
    %234 = vector.broadcast %cst_68 : f32 to vector<2x32xf32>
    %235 = arith.addf %234, %233 : vector<2x32xf32>
    %236 = arith.divf %234, %235 : vector<2x32xf32>
    %cst_69 = arith.constant dense<0.000000e+00> : vector<2x32xf32>
    %237 = tpu.matmul %229, %78, %cst_69 {dimension_numbers = #tpu.dot_dimension_numbers<[1], [0], [0], [1], [0, 0, 1, 1], [], []>} : vector<2x32xf32>, vector<32x32xf32>, vector<2x32xf32> -> vector<2x32xf32>
    %238 = arith.addf %57, %237 : vector<2x32xf32>
    %239 = arith.negf %238 : vector<2x32xf32>
    %240 = math.exp %239 : vector<2x32xf32>
    %cst_70 = arith.constant 1.000000e+00 : f32
    %241 = vector.broadcast %cst_70 : f32 to vector<2x32xf32>
    %242 = arith.addf %241, %240 : vector<2x32xf32>
    %243 = arith.divf %241, %242 : vector<2x32xf32>
    %cst_71 = arith.constant dense<0.000000e+00> : vector<2x32xf32>
    %244 = tpu.matmul %229, %80, %cst_71 {dimension_numbers = #tpu.dot_dimension_numbers<[1], [0], [0], [1], [0, 0, 1, 1], [], []>} : vector<2x32xf32>, vector<32x32xf32>, vector<2x32xf32> -> vector<2x32xf32>
    %245 = arith.addf %58, %244 : vector<2x32xf32>
    %246 = math.tanh %245 : vector<2x32xf32>
    %cst_72 = arith.constant dense<0.000000e+00> : vector<2x32xf32>
    %247 = tpu.matmul %229, %82, %cst_72 {dimension_numbers = #tpu.dot_dimension_numbers<[1], [0], [0], [1], [0, 0, 1, 1], [], []>} : vector<2x32xf32>, vector<32x32xf32>, vector<2x32xf32> -> vector<2x32xf32>
    %248 = arith.addf %59, %247 : vector<2x32xf32>
    %249 = arith.negf %248 : vector<2x32xf32>
    %250 = math.exp %249 : vector<2x32xf32>
    %cst_73 = arith.constant 1.000000e+00 : f32
    %251 = vector.broadcast %cst_73 : f32 to vector<2x32xf32>
    %252 = arith.addf %251, %250 : vector<2x32xf32>
    %253 = arith.divf %251, %252 : vector<2x32xf32>
    %254 = arith.mulf %243, %227 : vector<2x32xf32>
    %255 = arith.mulf %236, %246 : vector<2x32xf32>
    %256 = arith.addf %254, %255 : vector<2x32xf32>
    %257 = math.tanh %256 : vector<2x32xf32>
    %258 = arith.mulf %253, %257 : vector<2x32xf32>
    %cst_74 = arith.constant dense<0.000000e+00> : vector<2x32xf32>
    %259 = tpu.matmul %258, %76, %cst_74 {dimension_numbers = #tpu.dot_dimension_numbers<[1], [0], [0], [1], [0, 0, 1, 1], [], []>} : vector<2x32xf32>, vector<32x32xf32>, vector<2x32xf32> -> vector<2x32xf32>
    %260 = arith.addf %63, %259 : vector<2x32xf32>
    %261 = arith.negf %260 : vector<2x32xf32>
    %262 = math.exp %261 : vector<2x32xf32>
    %cst_75 = arith.constant 1.000000e+00 : f32
    %263 = vector.broadcast %cst_75 : f32 to vector<2x32xf32>
    %264 = arith.addf %263, %262 : vector<2x32xf32>
    %265 = arith.divf %263, %264 : vector<2x32xf32>
    %cst_76 = arith.constant dense<0.000000e+00> : vector<2x32xf32>
    %266 = tpu.matmul %258, %78, %cst_76 {dimension_numbers = #tpu.dot_dimension_numbers<[1], [0], [0], [1], [0, 0, 1, 1], [], []>} : vector<2x32xf32>, vector<32x32xf32>, vector<2x32xf32> -> vector<2x32xf32>
    %267 = arith.addf %64, %266 : vector<2x32xf32>
    %268 = arith.negf %267 : vector<2x32xf32>
    %269 = math.exp %268 : vector<2x32xf32>
    %cst_77 = arith.constant 1.000000e+00 : f32
    %270 = vector.broadcast %cst_77 : f32 to vector<2x32xf32>
    %271 = arith.addf %270, %269 : vector<2x32xf32>
    %272 = arith.divf %270, %271 : vector<2x32xf32>
    %cst_78 = arith.constant dense<0.000000e+00> : vector<2x32xf32>
    %273 = tpu.matmul %258, %80, %cst_78 {dimension_numbers = #tpu.dot_dimension_numbers<[1], [0], [0], [1], [0, 0, 1, 1], [], []>} : vector<2x32xf32>, vector<32x32xf32>, vector<2x32xf32> -> vector<2x32xf32>
    %274 = arith.addf %65, %273 : vector<2x32xf32>
    %275 = math.tanh %274 : vector<2x32xf32>
    %cst_79 = arith.constant dense<0.000000e+00> : vector<2x32xf32>
    %276 = tpu.matmul %258, %82, %cst_79 {dimension_numbers = #tpu.dot_dimension_numbers<[1], [0], [0], [1], [0, 0, 1, 1], [], []>} : vector<2x32xf32>, vector<32x32xf32>, vector<2x32xf32> -> vector<2x32xf32>
    %277 = arith.addf %66, %276 : vector<2x32xf32>
    %278 = arith.negf %277 : vector<2x32xf32>
    %279 = math.exp %278 : vector<2x32xf32>
    %cst_80 = arith.constant 1.000000e+00 : f32
    %280 = vector.broadcast %cst_80 : f32 to vector<2x32xf32>
    %281 = arith.addf %280, %279 : vector<2x32xf32>
    %282 = arith.divf %280, %281 : vector<2x32xf32>
    %283 = arith.mulf %272, %256 : vector<2x32xf32>
    %284 = arith.mulf %265, %275 : vector<2x32xf32>
    %285 = arith.addf %283, %284 : vector<2x32xf32>
    %286 = math.tanh %285 : vector<2x32xf32>
    %287 = arith.mulf %282, %286 : vector<2x32xf32>
    %cst_81 = arith.constant dense<0.000000e+00> : vector<2x32xf32>
    %288 = tpu.matmul %287, %76, %cst_81 {dimension_numbers = #tpu.dot_dimension_numbers<[1], [0], [0], [1], [0, 0, 1, 1], [], []>} : vector<2x32xf32>, vector<32x32xf32>, vector<2x32xf32> -> vector<2x32xf32>
    %289 = arith.addf %70, %288 : vector<2x32xf32>
    %290 = arith.negf %289 : vector<2x32xf32>
    %291 = math.exp %290 : vector<2x32xf32>
    %cst_82 = arith.constant 1.000000e+00 : f32
    %292 = vector.broadcast %cst_82 : f32 to vector<2x32xf32>
    %293 = arith.addf %292, %291 : vector<2x32xf32>
    %294 = arith.divf %292, %293 : vector<2x32xf32>
    %cst_83 = arith.constant dense<0.000000e+00> : vector<2x32xf32>
    %295 = tpu.matmul %287, %78, %cst_83 {dimension_numbers = #tpu.dot_dimension_numbers<[1], [0], [0], [1], [0, 0, 1, 1], [], []>} : vector<2x32xf32>, vector<32x32xf32>, vector<2x32xf32> -> vector<2x32xf32>
    %296 = arith.addf %71, %295 : vector<2x32xf32>
    %297 = arith.negf %296 : vector<2x32xf32>
    %298 = math.exp %297 : vector<2x32xf32>
    %cst_84 = arith.constant 1.000000e+00 : f32
    %299 = vector.broadcast %cst_84 : f32 to vector<2x32xf32>
    %300 = arith.addf %299, %298 : vector<2x32xf32>
    %301 = arith.divf %299, %300 : vector<2x32xf32>
    %cst_85 = arith.constant dense<0.000000e+00> : vector<2x32xf32>
    %302 = tpu.matmul %287, %80, %cst_85 {dimension_numbers = #tpu.dot_dimension_numbers<[1], [0], [0], [1], [0, 0, 1, 1], [], []>} : vector<2x32xf32>, vector<32x32xf32>, vector<2x32xf32> -> vector<2x32xf32>
    %303 = arith.addf %72, %302 : vector<2x32xf32>
    %304 = math.tanh %303 : vector<2x32xf32>
    %cst_86 = arith.constant dense<0.000000e+00> : vector<2x32xf32>
    %305 = tpu.matmul %287, %82, %cst_86 {dimension_numbers = #tpu.dot_dimension_numbers<[1], [0], [0], [1], [0, 0, 1, 1], [], []>} : vector<2x32xf32>, vector<32x32xf32>, vector<2x32xf32> -> vector<2x32xf32>
    %306 = arith.addf %73, %305 : vector<2x32xf32>
    %307 = arith.negf %306 : vector<2x32xf32>
    %308 = math.exp %307 : vector<2x32xf32>
    %cst_87 = arith.constant 1.000000e+00 : f32
    %309 = vector.broadcast %cst_87 : f32 to vector<2x32xf32>
    %310 = arith.addf %309, %308 : vector<2x32xf32>
    %311 = arith.divf %309, %310 : vector<2x32xf32>
    %312 = arith.mulf %301, %285 : vector<2x32xf32>
    %313 = arith.mulf %294, %304 : vector<2x32xf32>
    %314 = arith.addf %312, %313 : vector<2x32xf32>
    %315 = math.tanh %314 : vector<2x32xf32>
    %316 = arith.mulf %311, %315 : vector<2x32xf32>
    %c0_88 = arith.constant 0 : index
    %c0_89 = arith.constant 0 : index
    %317 = vector.load %arg4[%c0_88, %c0_89] : memref<4x128xf32, #tpu.memory_space<vmem>>, vector<4x128xf32>
    %c0_90 = arith.constant 0 : index
    %c0_91 = arith.constant 0 : index
    %318 = vector.load %arg6[%c0_90, %c0_91] : memref<1x128xf32, #tpu.memory_space<vmem>>, vector<1x128xf32>
    %cst_92 = arith.constant dense<0.000000e+00> : vector<2x128xf32>
    %319 = tpu.matmul %1, %317, %cst_92 {dimension_numbers = #tpu.dot_dimension_numbers<[1], [0], [0], [1], [0, 0, 1, 1], [], []>} : vector<2x4xf32>, vector<4x128xf32>, vector<2x128xf32> -> vector<2x128xf32>
    %320 = vector.broadcast %318 : vector<1x128xf32> to vector<2x128xf32>
    %321 = arith.addf %320, %319 : vector<2x128xf32>
    %322 = vector.extract_strided_slice %321 {offsets = [0, 0], sizes = [2, 32], strides = [1, 1]} : vector<2x128xf32> to vector<2x32xf32>
    %323 = vector.extract_strided_slice %321 {offsets = [0, 32], sizes = [2, 32], strides = [1, 1]} : vector<2x128xf32> to vector<2x32xf32>
    %324 = vector.extract_strided_slice %321 {offsets = [0, 64], sizes = [2, 32], strides = [1, 1]} : vector<2x128xf32> to vector<2x32xf32>
    %325 = vector.extract_strided_slice %321 {offsets = [0, 96], sizes = [2, 32], strides = [1, 1]} : vector<2x128xf32> to vector<2x32xf32>
    %cst_93 = arith.constant dense<0.000000e+00> : vector<2x128xf32>
    %326 = tpu.matmul %3, %317, %cst_93 {dimension_numbers = #tpu.dot_dimension_numbers<[1], [0], [0], [1], [0, 0, 1, 1], [], []>} : vector<2x4xf32>, vector<4x128xf32>, vector<2x128xf32> -> vector<2x128xf32>
    %327 = vector.broadcast %318 : vector<1x128xf32> to vector<2x128xf32>
    %328 = arith.addf %327, %326 : vector<2x128xf32>
    %329 = vector.extract_strided_slice %328 {offsets = [0, 0], sizes = [2, 32], strides = [1, 1]} : vector<2x128xf32> to vector<2x32xf32>
    %330 = vector.extract_strided_slice %328 {offsets = [0, 32], sizes = [2, 32], strides = [1, 1]} : vector<2x128xf32> to vector<2x32xf32>
    %331 = vector.extract_strided_slice %328 {offsets = [0, 64], sizes = [2, 32], strides = [1, 1]} : vector<2x128xf32> to vector<2x32xf32>
    %332 = vector.extract_strided_slice %328 {offsets = [0, 96], sizes = [2, 32], strides = [1, 1]} : vector<2x128xf32> to vector<2x32xf32>
    %cst_94 = arith.constant dense<0.000000e+00> : vector<2x128xf32>
    %333 = tpu.matmul %5, %317, %cst_94 {dimension_numbers = #tpu.dot_dimension_numbers<[1], [0], [0], [1], [0, 0, 1, 1], [], []>} : vector<2x4xf32>, vector<4x128xf32>, vector<2x128xf32> -> vector<2x128xf32>
    %334 = vector.broadcast %318 : vector<1x128xf32> to vector<2x128xf32>
    %335 = arith.addf %334, %333 : vector<2x128xf32>
    %336 = vector.extract_strided_slice %335 {offsets = [0, 0], sizes = [2, 32], strides = [1, 1]} : vector<2x128xf32> to vector<2x32xf32>
    %337 = vector.extract_strided_slice %335 {offsets = [0, 32], sizes = [2, 32], strides = [1, 1]} : vector<2x128xf32> to vector<2x32xf32>
    %338 = vector.extract_strided_slice %335 {offsets = [0, 64], sizes = [2, 32], strides = [1, 1]} : vector<2x128xf32> to vector<2x32xf32>
    %339 = vector.extract_strided_slice %335 {offsets = [0, 96], sizes = [2, 32], strides = [1, 1]} : vector<2x128xf32> to vector<2x32xf32>
    %cst_95 = arith.constant dense<0.000000e+00> : vector<2x128xf32>
    %340 = tpu.matmul %7, %317, %cst_95 {dimension_numbers = #tpu.dot_dimension_numbers<[1], [0], [0], [1], [0, 0, 1, 1], [], []>} : vector<2x4xf32>, vector<4x128xf32>, vector<2x128xf32> -> vector<2x128xf32>
    %341 = vector.broadcast %318 : vector<1x128xf32> to vector<2x128xf32>
    %342 = arith.addf %341, %340 : vector<2x128xf32>
    %343 = vector.extract_strided_slice %342 {offsets = [0, 0], sizes = [2, 32], strides = [1, 1]} : vector<2x128xf32> to vector<2x32xf32>
    %344 = vector.extract_strided_slice %342 {offsets = [0, 32], sizes = [2, 32], strides = [1, 1]} : vector<2x128xf32> to vector<2x32xf32>
    %345 = vector.extract_strided_slice %342 {offsets = [0, 64], sizes = [2, 32], strides = [1, 1]} : vector<2x128xf32> to vector<2x32xf32>
    %346 = vector.extract_strided_slice %342 {offsets = [0, 96], sizes = [2, 32], strides = [1, 1]} : vector<2x128xf32> to vector<2x32xf32>
    %cst_96 = arith.constant dense<0.000000e+00> : vector<2x128xf32>
    %347 = tpu.matmul %9, %317, %cst_96 {dimension_numbers = #tpu.dot_dimension_numbers<[1], [0], [0], [1], [0, 0, 1, 1], [], []>} : vector<2x4xf32>, vector<4x128xf32>, vector<2x128xf32> -> vector<2x128xf32>
    %348 = vector.broadcast %318 : vector<1x128xf32> to vector<2x128xf32>
    %349 = arith.addf %348, %347 : vector<2x128xf32>
    %350 = vector.extract_strided_slice %349 {offsets = [0, 0], sizes = [2, 32], strides = [1, 1]} : vector<2x128xf32> to vector<2x32xf32>
    %351 = vector.extract_strided_slice %349 {offsets = [0, 32], sizes = [2, 32], strides = [1, 1]} : vector<2x128xf32> to vector<2x32xf32>
    %352 = vector.extract_strided_slice %349 {offsets = [0, 64], sizes = [2, 32], strides = [1, 1]} : vector<2x128xf32> to vector<2x32xf32>
    %353 = vector.extract_strided_slice %349 {offsets = [0, 96], sizes = [2, 32], strides = [1, 1]} : vector<2x128xf32> to vector<2x32xf32>
    %cst_97 = arith.constant dense<0.000000e+00> : vector<2x128xf32>
    %354 = tpu.matmul %11, %317, %cst_97 {dimension_numbers = #tpu.dot_dimension_numbers<[1], [0], [0], [1], [0, 0, 1, 1], [], []>} : vector<2x4xf32>, vector<4x128xf32>, vector<2x128xf32> -> vector<2x128xf32>
    %355 = vector.broadcast %318 : vector<1x128xf32> to vector<2x128xf32>
    %356 = arith.addf %355, %354 : vector<2x128xf32>
    %357 = vector.extract_strided_slice %356 {offsets = [0, 0], sizes = [2, 32], strides = [1, 1]} : vector<2x128xf32> to vector<2x32xf32>
    %358 = vector.extract_strided_slice %356 {offsets = [0, 32], sizes = [2, 32], strides = [1, 1]} : vector<2x128xf32> to vector<2x32xf32>
    %359 = vector.extract_strided_slice %356 {offsets = [0, 64], sizes = [2, 32], strides = [1, 1]} : vector<2x128xf32> to vector<2x32xf32>
    %360 = vector.extract_strided_slice %356 {offsets = [0, 96], sizes = [2, 32], strides = [1, 1]} : vector<2x128xf32> to vector<2x32xf32>
    %cst_98 = arith.constant dense<0.000000e+00> : vector<2x128xf32>
    %361 = tpu.matmul %13, %317, %cst_98 {dimension_numbers = #tpu.dot_dimension_numbers<[1], [0], [0], [1], [0, 0, 1, 1], [], []>} : vector<2x4xf32>, vector<4x128xf32>, vector<2x128xf32> -> vector<2x128xf32>
    %362 = vector.broadcast %318 : vector<1x128xf32> to vector<2x128xf32>
    %363 = arith.addf %362, %361 : vector<2x128xf32>
    %364 = vector.extract_strided_slice %363 {offsets = [0, 0], sizes = [2, 32], strides = [1, 1]} : vector<2x128xf32> to vector<2x32xf32>
    %365 = vector.extract_strided_slice %363 {offsets = [0, 32], sizes = [2, 32], strides = [1, 1]} : vector<2x128xf32> to vector<2x32xf32>
    %366 = vector.extract_strided_slice %363 {offsets = [0, 64], sizes = [2, 32], strides = [1, 1]} : vector<2x128xf32> to vector<2x32xf32>
    %367 = vector.extract_strided_slice %363 {offsets = [0, 96], sizes = [2, 32], strides = [1, 1]} : vector<2x128xf32> to vector<2x32xf32>
    %cst_99 = arith.constant dense<0.000000e+00> : vector<2x128xf32>
    %368 = tpu.matmul %15, %317, %cst_99 {dimension_numbers = #tpu.dot_dimension_numbers<[1], [0], [0], [1], [0, 0, 1, 1], [], []>} : vector<2x4xf32>, vector<4x128xf32>, vector<2x128xf32> -> vector<2x128xf32>
    %369 = vector.broadcast %318 : vector<1x128xf32> to vector<2x128xf32>
    %370 = arith.addf %369, %368 : vector<2x128xf32>
    %371 = vector.extract_strided_slice %370 {offsets = [0, 0], sizes = [2, 32], strides = [1, 1]} : vector<2x128xf32> to vector<2x32xf32>
    %372 = vector.extract_strided_slice %370 {offsets = [0, 32], sizes = [2, 32], strides = [1, 1]} : vector<2x128xf32> to vector<2x32xf32>
    %373 = vector.extract_strided_slice %370 {offsets = [0, 64], sizes = [2, 32], strides = [1, 1]} : vector<2x128xf32> to vector<2x32xf32>
    %374 = vector.extract_strided_slice %370 {offsets = [0, 96], sizes = [2, 32], strides = [1, 1]} : vector<2x128xf32> to vector<2x32xf32>
    %c0_100 = arith.constant 0 : index
    %c0_101 = arith.constant 0 : index
    %c0_102 = arith.constant 0 : index
    %375 = vector.load %arg5[%c0_100, %c0_101, %c0_102] : memref<4x32x32xf32, #tpu.memory_space<vmem>>, vector<4x32x32xf32>
    %376 = vector.extract_strided_slice %375 {offsets = [0, 0, 0], sizes = [1, 32, 32], strides = [1, 1, 1]} : vector<4x32x32xf32> to vector<1x32x32xf32>
    %377 = vector.shape_cast %376 : vector<1x32x32xf32> to vector<32x32xf32>
    %378 = vector.extract_strided_slice %375 {offsets = [1, 0, 0], sizes = [1, 32, 32], strides = [1, 1, 1]} : vector<4x32x32xf32> to vector<1x32x32xf32>
    %379 = vector.shape_cast %378 : vector<1x32x32xf32> to vector<32x32xf32>
    %380 = vector.extract_strided_slice %375 {offsets = [2, 0, 0], sizes = [1, 32, 32], strides = [1, 1, 1]} : vector<4x32x32xf32> to vector<1x32x32xf32>
    %381 = vector.shape_cast %380 : vector<1x32x32xf32> to vector<32x32xf32>
    %382 = vector.extract_strided_slice %375 {offsets = [3, 0, 0], sizes = [1, 32, 32], strides = [1, 1, 1]} : vector<4x32x32xf32> to vector<1x32x32xf32>
    %383 = vector.shape_cast %382 : vector<1x32x32xf32> to vector<32x32xf32>
    %cst_103 = arith.constant 0.000000e+00 : f32
    %384 = vector.broadcast %cst_103 : f32 to vector<2x32xf32>
    %cst_104 = arith.constant 0.000000e+00 : f32
    %385 = vector.broadcast %cst_104 : f32 to vector<2x32xf32>
    %cst_105 = arith.constant dense<0.000000e+00> : vector<2x32xf32>
    %386 = tpu.matmul %384, %377, %cst_105 {dimension_numbers = #tpu.dot_dimension_numbers<[1], [0], [0], [1], [0, 0, 1, 1], [], []>} : vector<2x32xf32>, vector<32x32xf32>, vector<2x32xf32> -> vector<2x32xf32>
    %387 = arith.addf %371, %386 : vector<2x32xf32>
    %388 = arith.negf %387 : vector<2x32xf32>
    %389 = math.exp %388 : vector<2x32xf32>
    %cst_106 = arith.constant 1.000000e+00 : f32
    %390 = vector.broadcast %cst_106 : f32 to vector<2x32xf32>
    %391 = arith.addf %390, %389 : vector<2x32xf32>
    %392 = arith.divf %390, %391 : vector<2x32xf32>
    %cst_107 = arith.constant dense<0.000000e+00> : vector<2x32xf32>
    %393 = tpu.matmul %384, %379, %cst_107 {dimension_numbers = #tpu.dot_dimension_numbers<[1], [0], [0], [1], [0, 0, 1, 1], [], []>} : vector<2x32xf32>, vector<32x32xf32>, vector<2x32xf32> -> vector<2x32xf32>
    %394 = arith.addf %372, %393 : vector<2x32xf32>
    %395 = arith.negf %394 : vector<2x32xf32>
    %396 = math.exp %395 : vector<2x32xf32>
    %cst_108 = arith.constant 1.000000e+00 : f32
    %397 = vector.broadcast %cst_108 : f32 to vector<2x32xf32>
    %398 = arith.addf %397, %396 : vector<2x32xf32>
    %399 = arith.divf %397, %398 : vector<2x32xf32>
    %cst_109 = arith.constant dense<0.000000e+00> : vector<2x32xf32>
    %400 = tpu.matmul %384, %381, %cst_109 {dimension_numbers = #tpu.dot_dimension_numbers<[1], [0], [0], [1], [0, 0, 1, 1], [], []>} : vector<2x32xf32>, vector<32x32xf32>, vector<2x32xf32> -> vector<2x32xf32>
    %401 = arith.addf %373, %400 : vector<2x32xf32>
    %402 = math.tanh %401 : vector<2x32xf32>
    %cst_110 = arith.constant dense<0.000000e+00> : vector<2x32xf32>
    %403 = tpu.matmul %384, %383, %cst_110 {dimension_numbers = #tpu.dot_dimension_numbers<[1], [0], [0], [1], [0, 0, 1, 1], [], []>} : vector<2x32xf32>, vector<32x32xf32>, vector<2x32xf32> -> vector<2x32xf32>
    %404 = arith.addf %374, %403 : vector<2x32xf32>
    %405 = arith.negf %404 : vector<2x32xf32>
    %406 = math.exp %405 : vector<2x32xf32>
    %cst_111 = arith.constant 1.000000e+00 : f32
    %407 = vector.broadcast %cst_111 : f32 to vector<2x32xf32>
    %408 = arith.addf %407, %406 : vector<2x32xf32>
    %409 = arith.divf %407, %408 : vector<2x32xf32>
    %410 = arith.mulf %399, %385 : vector<2x32xf32>
    %411 = arith.mulf %392, %402 : vector<2x32xf32>
    %412 = arith.addf %410, %411 : vector<2x32xf32>
    %413 = math.tanh %412 : vector<2x32xf32>
    %414 = arith.mulf %409, %413 : vector<2x32xf32>
    %cst_112 = arith.constant dense<0.000000e+00> : vector<2x32xf32>
    %415 = tpu.matmul %414, %377, %cst_112 {dimension_numbers = #tpu.dot_dimension_numbers<[1], [0], [0], [1], [0, 0, 1, 1], [], []>} : vector<2x32xf32>, vector<32x32xf32>, vector<2x32xf32> -> vector<2x32xf32>
    %416 = arith.addf %364, %415 : vector<2x32xf32>
    %417 = arith.negf %416 : vector<2x32xf32>
    %418 = math.exp %417 : vector<2x32xf32>
    %cst_113 = arith.constant 1.000000e+00 : f32
    %419 = vector.broadcast %cst_113 : f32 to vector<2x32xf32>
    %420 = arith.addf %419, %418 : vector<2x32xf32>
    %421 = arith.divf %419, %420 : vector<2x32xf32>
    %cst_114 = arith.constant dense<0.000000e+00> : vector<2x32xf32>
    %422 = tpu.matmul %414, %379, %cst_114 {dimension_numbers = #tpu.dot_dimension_numbers<[1], [0], [0], [1], [0, 0, 1, 1], [], []>} : vector<2x32xf32>, vector<32x32xf32>, vector<2x32xf32> -> vector<2x32xf32>
    %423 = arith.addf %365, %422 : vector<2x32xf32>
    %424 = arith.negf %423 : vector<2x32xf32>
    %425 = math.exp %424 : vector<2x32xf32>
    %cst_115 = arith.constant 1.000000e+00 : f32
    %426 = vector.broadcast %cst_115 : f32 to vector<2x32xf32>
    %427 = arith.addf %426, %425 : vector<2x32xf32>
    %428 = arith.divf %426, %427 : vector<2x32xf32>
    %cst_116 = arith.constant dense<0.000000e+00> : vector<2x32xf32>
    %429 = tpu.matmul %414, %381, %cst_116 {dimension_numbers = #tpu.dot_dimension_numbers<[1], [0], [0], [1], [0, 0, 1, 1], [], []>} : vector<2x32xf32>, vector<32x32xf32>, vector<2x32xf32> -> vector<2x32xf32>
    %430 = arith.addf %366, %429 : vector<2x32xf32>
    %431 = math.tanh %430 : vector<2x32xf32>
    %cst_117 = arith.constant dense<0.000000e+00> : vector<2x32xf32>
    %432 = tpu.matmul %414, %383, %cst_117 {dimension_numbers = #tpu.dot_dimension_numbers<[1], [0], [0], [1], [0, 0, 1, 1], [], []>} : vector<2x32xf32>, vector<32x32xf32>, vector<2x32xf32> -> vector<2x32xf32>
    %433 = arith.addf %367, %432 : vector<2x32xf32>
    %434 = arith.negf %433 : vector<2x32xf32>
    %435 = math.exp %434 : vector<2x32xf32>
    %cst_118 = arith.constant 1.000000e+00 : f32
    %436 = vector.broadcast %cst_118 : f32 to vector<2x32xf32>
    %437 = arith.addf %436, %435 : vector<2x32xf32>
    %438 = arith.divf %436, %437 : vector<2x32xf32>
    %439 = arith.mulf %428, %412 : vector<2x32xf32>
    %440 = arith.mulf %421, %431 : vector<2x32xf32>
    %441 = arith.addf %439, %440 : vector<2x32xf32>
    %442 = math.tanh %441 : vector<2x32xf32>
    %443 = arith.mulf %438, %442 : vector<2x32xf32>
    %cst_119 = arith.constant dense<0.000000e+00> : vector<2x32xf32>
    %444 = tpu.matmul %443, %377, %cst_119 {dimension_numbers = #tpu.dot_dimension_numbers<[1], [0], [0], [1], [0, 0, 1, 1], [], []>} : vector<2x32xf32>, vector<32x32xf32>, vector<2x32xf32> -> vector<2x32xf32>
    %445 = arith.addf %357, %444 : vector<2x32xf32>
    %446 = arith.negf %445 : vector<2x32xf32>
    %447 = math.exp %446 : vector<2x32xf32>
    %cst_120 = arith.constant 1.000000e+00 : f32
    %448 = vector.broadcast %cst_120 : f32 to vector<2x32xf32>
    %449 = arith.addf %448, %447 : vector<2x32xf32>
    %450 = arith.divf %448, %449 : vector<2x32xf32>
    %cst_121 = arith.constant dense<0.000000e+00> : vector<2x32xf32>
    %451 = tpu.matmul %443, %379, %cst_121 {dimension_numbers = #tpu.dot_dimension_numbers<[1], [0], [0], [1], [0, 0, 1, 1], [], []>} : vector<2x32xf32>, vector<32x32xf32>, vector<2x32xf32> -> vector<2x32xf32>
    %452 = arith.addf %358, %451 : vector<2x32xf32>
    %453 = arith.negf %452 : vector<2x32xf32>
    %454 = math.exp %453 : vector<2x32xf32>
    %cst_122 = arith.constant 1.000000e+00 : f32
    %455 = vector.broadcast %cst_122 : f32 to vector<2x32xf32>
    %456 = arith.addf %455, %454 : vector<2x32xf32>
    %457 = arith.divf %455, %456 : vector<2x32xf32>
    %cst_123 = arith.constant dense<0.000000e+00> : vector<2x32xf32>
    %458 = tpu.matmul %443, %381, %cst_123 {dimension_numbers = #tpu.dot_dimension_numbers<[1], [0], [0], [1], [0, 0, 1, 1], [], []>} : vector<2x32xf32>, vector<32x32xf32>, vector<2x32xf32> -> vector<2x32xf32>
    %459 = arith.addf %359, %458 : vector<2x32xf32>
    %460 = math.tanh %459 : vector<2x32xf32>
    %cst_124 = arith.constant dense<0.000000e+00> : vector<2x32xf32>
    %461 = tpu.matmul %443, %383, %cst_124 {dimension_numbers = #tpu.dot_dimension_numbers<[1], [0], [0], [1], [0, 0, 1, 1], [], []>} : vector<2x32xf32>, vector<32x32xf32>, vector<2x32xf32> -> vector<2x32xf32>
    %462 = arith.addf %360, %461 : vector<2x32xf32>
    %463 = arith.negf %462 : vector<2x32xf32>
    %464 = math.exp %463 : vector<2x32xf32>
    %cst_125 = arith.constant 1.000000e+00 : f32
    %465 = vector.broadcast %cst_125 : f32 to vector<2x32xf32>
    %466 = arith.addf %465, %464 : vector<2x32xf32>
    %467 = arith.divf %465, %466 : vector<2x32xf32>
    %468 = arith.mulf %457, %441 : vector<2x32xf32>
    %469 = arith.mulf %450, %460 : vector<2x32xf32>
    %470 = arith.addf %468, %469 : vector<2x32xf32>
    %471 = math.tanh %470 : vector<2x32xf32>
    %472 = arith.mulf %467, %471 : vector<2x32xf32>
    %cst_126 = arith.constant dense<0.000000e+00> : vector<2x32xf32>
    %473 = tpu.matmul %472, %377, %cst_126 {dimension_numbers = #tpu.dot_dimension_numbers<[1], [0], [0], [1], [0, 0, 1, 1], [], []>} : vector<2x32xf32>, vector<32x32xf32>, vector<2x32xf32> -> vector<2x32xf32>
    %474 = arith.addf %350, %473 : vector<2x32xf32>
    %475 = arith.negf %474 : vector<2x32xf32>
    %476 = math.exp %475 : vector<2x32xf32>
    %cst_127 = arith.constant 1.000000e+00 : f32
    %477 = vector.broadcast %cst_127 : f32 to vector<2x32xf32>
    %478 = arith.addf %477, %476 : vector<2x32xf32>
    %479 = arith.divf %477, %478 : vector<2x32xf32>
    %cst_128 = arith.constant dense<0.000000e+00> : vector<2x32xf32>
    %480 = tpu.matmul %472, %379, %cst_128 {dimension_numbers = #tpu.dot_dimension_numbers<[1], [0], [0], [1], [0, 0, 1, 1], [], []>} : vector<2x32xf32>, vector<32x32xf32>, vector<2x32xf32> -> vector<2x32xf32>
    %481 = arith.addf %351, %480 : vector<2x32xf32>
    %482 = arith.negf %481 : vector<2x32xf32>
    %483 = math.exp %482 : vector<2x32xf32>
    %cst_129 = arith.constant 1.000000e+00 : f32
    %484 = vector.broadcast %cst_129 : f32 to vector<2x32xf32>
    %485 = arith.addf %484, %483 : vector<2x32xf32>
    %486 = arith.divf %484, %485 : vector<2x32xf32>
    %cst_130 = arith.constant dense<0.000000e+00> : vector<2x32xf32>
    %487 = tpu.matmul %472, %381, %cst_130 {dimension_numbers = #tpu.dot_dimension_numbers<[1], [0], [0], [1], [0, 0, 1, 1], [], []>} : vector<2x32xf32>, vector<32x32xf32>, vector<2x32xf32> -> vector<2x32xf32>
    %488 = arith.addf %352, %487 : vector<2x32xf32>
    %489 = math.tanh %488 : vector<2x32xf32>
    %cst_131 = arith.constant dense<0.000000e+00> : vector<2x32xf32>
    %490 = tpu.matmul %472, %383, %cst_131 {dimension_numbers = #tpu.dot_dimension_numbers<[1], [0], [0], [1], [0, 0, 1, 1], [], []>} : vector<2x32xf32>, vector<32x32xf32>, vector<2x32xf32> -> vector<2x32xf32>
    %491 = arith.addf %353, %490 : vector<2x32xf32>
    %492 = arith.negf %491 : vector<2x32xf32>
    %493 = math.exp %492 : vector<2x32xf32>
    %cst_132 = arith.constant 1.000000e+00 : f32
    %494 = vector.broadcast %cst_132 : f32 to vector<2x32xf32>
    %495 = arith.addf %494, %493 : vector<2x32xf32>
    %496 = arith.divf %494, %495 : vector<2x32xf32>
    %497 = arith.mulf %486, %470 : vector<2x32xf32>
    %498 = arith.mulf %479, %489 : vector<2x32xf32>
    %499 = arith.addf %497, %498 : vector<2x32xf32>
    %500 = math.tanh %499 : vector<2x32xf32>
    %501 = arith.mulf %496, %500 : vector<2x32xf32>
    %cst_133 = arith.constant dense<0.000000e+00> : vector<2x32xf32>
    %502 = tpu.matmul %501, %377, %cst_133 {dimension_numbers = #tpu.dot_dimension_numbers<[1], [0], [0], [1], [0, 0, 1, 1], [], []>} : vector<2x32xf32>, vector<32x32xf32>, vector<2x32xf32> -> vector<2x32xf32>
    %503 = arith.addf %343, %502 : vector<2x32xf32>
    %504 = arith.negf %503 : vector<2x32xf32>
    %505 = math.exp %504 : vector<2x32xf32>
    %cst_134 = arith.constant 1.000000e+00 : f32
    %506 = vector.broadcast %cst_134 : f32 to vector<2x32xf32>
    %507 = arith.addf %506, %505 : vector<2x32xf32>
    %508 = arith.divf %506, %507 : vector<2x32xf32>
    %cst_135 = arith.constant dense<0.000000e+00> : vector<2x32xf32>
    %509 = tpu.matmul %501, %379, %cst_135 {dimension_numbers = #tpu.dot_dimension_numbers<[1], [0], [0], [1], [0, 0, 1, 1], [], []>} : vector<2x32xf32>, vector<32x32xf32>, vector<2x32xf32> -> vector<2x32xf32>
    %510 = arith.addf %344, %509 : vector<2x32xf32>
    %511 = arith.negf %510 : vector<2x32xf32>
    %512 = math.exp %511 : vector<2x32xf32>
    %cst_136 = arith.constant 1.000000e+00 : f32
    %513 = vector.broadcast %cst_136 : f32 to vector<2x32xf32>
    %514 = arith.addf %513, %512 : vector<2x32xf32>
    %515 = arith.divf %513, %514 : vector<2x32xf32>
    %cst_137 = arith.constant dense<0.000000e+00> : vector<2x32xf32>
    %516 = tpu.matmul %501, %381, %cst_137 {dimension_numbers = #tpu.dot_dimension_numbers<[1], [0], [0], [1], [0, 0, 1, 1], [], []>} : vector<2x32xf32>, vector<32x32xf32>, vector<2x32xf32> -> vector<2x32xf32>
    %517 = arith.addf %345, %516 : vector<2x32xf32>
    %518 = math.tanh %517 : vector<2x32xf32>
    %cst_138 = arith.constant dense<0.000000e+00> : vector<2x32xf32>
    %519 = tpu.matmul %501, %383, %cst_138 {dimension_numbers = #tpu.dot_dimension_numbers<[1], [0], [0], [1], [0, 0, 1, 1], [], []>} : vector<2x32xf32>, vector<32x32xf32>, vector<2x32xf32> -> vector<2x32xf32>
    %520 = arith.addf %346, %519 : vector<2x32xf32>
    %521 = arith.negf %520 : vector<2x32xf32>
    %522 = math.exp %521 : vector<2x32xf32>
    %cst_139 = arith.constant 1.000000e+00 : f32
    %523 = vector.broadcast %cst_139 : f32 to vector<2x32xf32>
    %524 = arith.addf %523, %522 : vector<2x32xf32>
    %525 = arith.divf %523, %524 : vector<2x32xf32>
    %526 = arith.mulf %515, %499 : vector<2x32xf32>
    %527 = arith.mulf %508, %518 : vector<2x32xf32>
    %528 = arith.addf %526, %527 : vector<2x32xf32>
    %529 = math.tanh %528 : vector<2x32xf32>
    %530 = arith.mulf %525, %529 : vector<2x32xf32>
    %cst_140 = arith.constant dense<0.000000e+00> : vector<2x32xf32>
    %531 = tpu.matmul %530, %377, %cst_140 {dimension_numbers = #tpu.dot_dimension_numbers<[1], [0], [0], [1], [0, 0, 1, 1], [], []>} : vector<2x32xf32>, vector<32x32xf32>, vector<2x32xf32> -> vector<2x32xf32>
    %532 = arith.addf %336, %531 : vector<2x32xf32>
    %533 = arith.negf %532 : vector<2x32xf32>
    %534 = math.exp %533 : vector<2x32xf32>
    %cst_141 = arith.constant 1.000000e+00 : f32
    %535 = vector.broadcast %cst_141 : f32 to vector<2x32xf32>
    %536 = arith.addf %535, %534 : vector<2x32xf32>
    %537 = arith.divf %535, %536 : vector<2x32xf32>
    %cst_142 = arith.constant dense<0.000000e+00> : vector<2x32xf32>
    %538 = tpu.matmul %530, %379, %cst_142 {dimension_numbers = #tpu.dot_dimension_numbers<[1], [0], [0], [1], [0, 0, 1, 1], [], []>} : vector<2x32xf32>, vector<32x32xf32>, vector<2x32xf32> -> vector<2x32xf32>
    %539 = arith.addf %337, %538 : vector<2x32xf32>
    %540 = arith.negf %539 : vector<2x32xf32>
    %541 = math.exp %540 : vector<2x32xf32>
    %cst_143 = arith.constant 1.000000e+00 : f32
    %542 = vector.broadcast %cst_143 : f32 to vector<2x32xf32>
    %543 = arith.addf %542, %541 : vector<2x32xf32>
    %544 = arith.divf %542, %543 : vector<2x32xf32>
    %cst_144 = arith.constant dense<0.000000e+00> : vector<2x32xf32>
    %545 = tpu.matmul %530, %381, %cst_144 {dimension_numbers = #tpu.dot_dimension_numbers<[1], [0], [0], [1], [0, 0, 1, 1], [], []>} : vector<2x32xf32>, vector<32x32xf32>, vector<2x32xf32> -> vector<2x32xf32>
    %546 = arith.addf %338, %545 : vector<2x32xf32>
    %547 = math.tanh %546 : vector<2x32xf32>
    %cst_145 = arith.constant dense<0.000000e+00> : vector<2x32xf32>
    %548 = tpu.matmul %530, %383, %cst_145 {dimension_numbers = #tpu.dot_dimension_numbers<[1], [0], [0], [1], [0, 0, 1, 1], [], []>} : vector<2x32xf32>, vector<32x32xf32>, vector<2x32xf32> -> vector<2x32xf32>
    %549 = arith.addf %339, %548 : vector<2x32xf32>
    %550 = arith.negf %549 : vector<2x32xf32>
    %551 = math.exp %550 : vector<2x32xf32>
    %cst_146 = arith.constant 1.000000e+00 : f32
    %552 = vector.broadcast %cst_146 : f32 to vector<2x32xf32>
    %553 = arith.addf %552, %551 : vector<2x32xf32>
    %554 = arith.divf %552, %553 : vector<2x32xf32>
    %555 = arith.mulf %544, %528 : vector<2x32xf32>
    %556 = arith.mulf %537, %547 : vector<2x32xf32>
    %557 = arith.addf %555, %556 : vector<2x32xf32>
    %558 = math.tanh %557 : vector<2x32xf32>
    %559 = arith.mulf %554, %558 : vector<2x32xf32>
    %cst_147 = arith.constant dense<0.000000e+00> : vector<2x32xf32>
    %560 = tpu.matmul %559, %377, %cst_147 {dimension_numbers = #tpu.dot_dimension_numbers<[1], [0], [0], [1], [0, 0, 1, 1], [], []>} : vector<2x32xf32>, vector<32x32xf32>, vector<2x32xf32> -> vector<2x32xf32>
    %561 = arith.addf %329, %560 : vector<2x32xf32>
    %562 = arith.negf %561 : vector<2x32xf32>
    %563 = math.exp %562 : vector<2x32xf32>
    %cst_148 = arith.constant 1.000000e+00 : f32
    %564 = vector.broadcast %cst_148 : f32 to vector<2x32xf32>
    %565 = arith.addf %564, %563 : vector<2x32xf32>
    %566 = arith.divf %564, %565 : vector<2x32xf32>
    %cst_149 = arith.constant dense<0.000000e+00> : vector<2x32xf32>
    %567 = tpu.matmul %559, %379, %cst_149 {dimension_numbers = #tpu.dot_dimension_numbers<[1], [0], [0], [1], [0, 0, 1, 1], [], []>} : vector<2x32xf32>, vector<32x32xf32>, vector<2x32xf32> -> vector<2x32xf32>
    %568 = arith.addf %330, %567 : vector<2x32xf32>
    %569 = arith.negf %568 : vector<2x32xf32>
    %570 = math.exp %569 : vector<2x32xf32>
    %cst_150 = arith.constant 1.000000e+00 : f32
    %571 = vector.broadcast %cst_150 : f32 to vector<2x32xf32>
    %572 = arith.addf %571, %570 : vector<2x32xf32>
    %573 = arith.divf %571, %572 : vector<2x32xf32>
    %cst_151 = arith.constant dense<0.000000e+00> : vector<2x32xf32>
    %574 = tpu.matmul %559, %381, %cst_151 {dimension_numbers = #tpu.dot_dimension_numbers<[1], [0], [0], [1], [0, 0, 1, 1], [], []>} : vector<2x32xf32>, vector<32x32xf32>, vector<2x32xf32> -> vector<2x32xf32>
    %575 = arith.addf %331, %574 : vector<2x32xf32>
    %576 = math.tanh %575 : vector<2x32xf32>
    %cst_152 = arith.constant dense<0.000000e+00> : vector<2x32xf32>
    %577 = tpu.matmul %559, %383, %cst_152 {dimension_numbers = #tpu.dot_dimension_numbers<[1], [0], [0], [1], [0, 0, 1, 1], [], []>} : vector<2x32xf32>, vector<32x32xf32>, vector<2x32xf32> -> vector<2x32xf32>
    %578 = arith.addf %332, %577 : vector<2x32xf32>
    %579 = arith.negf %578 : vector<2x32xf32>
    %580 = math.exp %579 : vector<2x32xf32>
    %cst_153 = arith.constant 1.000000e+00 : f32
    %581 = vector.broadcast %cst_153 : f32 to vector<2x32xf32>
    %582 = arith.addf %581, %580 : vector<2x32xf32>
    %583 = arith.divf %581, %582 : vector<2x32xf32>
    %584 = arith.mulf %573, %557 : vector<2x32xf32>
    %585 = arith.mulf %566, %576 : vector<2x32xf32>
    %586 = arith.addf %584, %585 : vector<2x32xf32>
    %587 = math.tanh %586 : vector<2x32xf32>
    %588 = arith.mulf %583, %587 : vector<2x32xf32>
    %cst_154 = arith.constant dense<0.000000e+00> : vector<2x32xf32>
    %589 = tpu.matmul %588, %377, %cst_154 {dimension_numbers = #tpu.dot_dimension_numbers<[1], [0], [0], [1], [0, 0, 1, 1], [], []>} : vector<2x32xf32>, vector<32x32xf32>, vector<2x32xf32> -> vector<2x32xf32>
    %590 = arith.addf %322, %589 : vector<2x32xf32>
    %591 = arith.negf %590 : vector<2x32xf32>
    %592 = math.exp %591 : vector<2x32xf32>
    %cst_155 = arith.constant 1.000000e+00 : f32
    %593 = vector.broadcast %cst_155 : f32 to vector<2x32xf32>
    %594 = arith.addf %593, %592 : vector<2x32xf32>
    %595 = arith.divf %593, %594 : vector<2x32xf32>
    %cst_156 = arith.constant dense<0.000000e+00> : vector<2x32xf32>
    %596 = tpu.matmul %588, %379, %cst_156 {dimension_numbers = #tpu.dot_dimension_numbers<[1], [0], [0], [1], [0, 0, 1, 1], [], []>} : vector<2x32xf32>, vector<32x32xf32>, vector<2x32xf32> -> vector<2x32xf32>
    %597 = arith.addf %323, %596 : vector<2x32xf32>
    %598 = arith.negf %597 : vector<2x32xf32>
    %599 = math.exp %598 : vector<2x32xf32>
    %cst_157 = arith.constant 1.000000e+00 : f32
    %600 = vector.broadcast %cst_157 : f32 to vector<2x32xf32>
    %601 = arith.addf %600, %599 : vector<2x32xf32>
    %602 = arith.divf %600, %601 : vector<2x32xf32>
    %cst_158 = arith.constant dense<0.000000e+00> : vector<2x32xf32>
    %603 = tpu.matmul %588, %381, %cst_158 {dimension_numbers = #tpu.dot_dimension_numbers<[1], [0], [0], [1], [0, 0, 1, 1], [], []>} : vector<2x32xf32>, vector<32x32xf32>, vector<2x32xf32> -> vector<2x32xf32>
    %604 = arith.addf %324, %603 : vector<2x32xf32>
    %605 = math.tanh %604 : vector<2x32xf32>
    %cst_159 = arith.constant dense<0.000000e+00> : vector<2x32xf32>
    %606 = tpu.matmul %588, %383, %cst_159 {dimension_numbers = #tpu.dot_dimension_numbers<[1], [0], [0], [1], [0, 0, 1, 1], [], []>} : vector<2x32xf32>, vector<32x32xf32>, vector<2x32xf32> -> vector<2x32xf32>
    %607 = arith.addf %325, %606 : vector<2x32xf32>
    %608 = arith.negf %607 : vector<2x32xf32>
    %609 = math.exp %608 : vector<2x32xf32>
    %cst_160 = arith.constant 1.000000e+00 : f32
    %610 = vector.broadcast %cst_160 : f32 to vector<2x32xf32>
    %611 = arith.addf %610, %609 : vector<2x32xf32>
    %612 = arith.divf %610, %611 : vector<2x32xf32>
    %613 = arith.mulf %602, %586 : vector<2x32xf32>
    %614 = arith.mulf %595, %605 : vector<2x32xf32>
    %615 = arith.addf %613, %614 : vector<2x32xf32>
    %616 = math.tanh %615 : vector<2x32xf32>
    %617 = arith.mulf %612, %616 : vector<2x32xf32>
    %c0_161 = arith.constant 0 : index
    %c0_162 = arith.constant 0 : index
    %618 = vector.load %arg7[%c0_161, %c0_162] : memref<64x128xf32, #tpu.memory_space<vmem>>, vector<64x128xf32>
    %c0_163 = arith.constant 0 : index
    %c0_164 = arith.constant 0 : index
    %619 = vector.load %arg9[%c0_163, %c0_164] : memref<1x128xf32, #tpu.memory_space<vmem>>, vector<1x128xf32>
    %620 = vector.extract_strided_slice %618 {offsets = [0, 0], sizes = [32, 128], strides = [1, 1]} : vector<64x128xf32> to vector<32x128xf32>
    %621 = vector.extract_strided_slice %618 {offsets = [32, 0], sizes = [32, 128], strides = [1, 1]} : vector<64x128xf32> to vector<32x128xf32>
    %cst_165 = arith.constant dense<0.000000e+00> : vector<2x128xf32>
    %622 = tpu.matmul %113, %620, %cst_165 {dimension_numbers = #tpu.dot_dimension_numbers<[1], [0], [0], [1], [0, 0, 1, 1], [], []>} : vector<2x32xf32>, vector<32x128xf32>, vector<2x128xf32> -> vector<2x128xf32>
    %623 = vector.broadcast %619 : vector<1x128xf32> to vector<2x128xf32>
    %624 = arith.addf %623, %622 : vector<2x128xf32>
    %cst_166 = arith.constant dense<0.000000e+00> : vector<2x128xf32>
    %625 = tpu.matmul %617, %621, %cst_166 {dimension_numbers = #tpu.dot_dimension_numbers<[1], [0], [0], [1], [0, 0, 1, 1], [], []>} : vector<2x32xf32>, vector<32x128xf32>, vector<2x128xf32> -> vector<2x128xf32>
    %626 = arith.addf %624, %625 : vector<2x128xf32>
    %627 = vector.extract_strided_slice %626 {offsets = [0, 0], sizes = [2, 32], strides = [1, 1]} : vector<2x128xf32> to vector<2x32xf32>
    %628 = vector.extract_strided_slice %626 {offsets = [0, 32], sizes = [2, 32], strides = [1, 1]} : vector<2x128xf32> to vector<2x32xf32>
    %629 = vector.extract_strided_slice %626 {offsets = [0, 64], sizes = [2, 32], strides = [1, 1]} : vector<2x128xf32> to vector<2x32xf32>
    %630 = vector.extract_strided_slice %626 {offsets = [0, 96], sizes = [2, 32], strides = [1, 1]} : vector<2x128xf32> to vector<2x32xf32>
    %cst_167 = arith.constant dense<0.000000e+00> : vector<2x128xf32>
    %631 = tpu.matmul %142, %620, %cst_167 {dimension_numbers = #tpu.dot_dimension_numbers<[1], [0], [0], [1], [0, 0, 1, 1], [], []>} : vector<2x32xf32>, vector<32x128xf32>, vector<2x128xf32> -> vector<2x128xf32>
    %632 = vector.broadcast %619 : vector<1x128xf32> to vector<2x128xf32>
    %633 = arith.addf %632, %631 : vector<2x128xf32>
    %cst_168 = arith.constant dense<0.000000e+00> : vector<2x128xf32>
    %634 = tpu.matmul %588, %621, %cst_168 {dimension_numbers = #tpu.dot_dimension_numbers<[1], [0], [0], [1], [0, 0, 1, 1], [], []>} : vector<2x32xf32>, vector<32x128xf32>, vector<2x128xf32> -> vector<2x128xf32>
    %635 = arith.addf %633, %634 : vector<2x128xf32>
    %636 = vector.extract_strided_slice %635 {offsets = [0, 0], sizes = [2, 32], strides = [1, 1]} : vector<2x128xf32> to vector<2x32xf32>
    %637 = vector.extract_strided_slice %635 {offsets = [0, 32], sizes = [2, 32], strides = [1, 1]} : vector<2x128xf32> to vector<2x32xf32>
    %638 = vector.extract_strided_slice %635 {offsets = [0, 64], sizes = [2, 32], strides = [1, 1]} : vector<2x128xf32> to vector<2x32xf32>
    %639 = vector.extract_strided_slice %635 {offsets = [0, 96], sizes = [2, 32], strides = [1, 1]} : vector<2x128xf32> to vector<2x32xf32>
    %cst_169 = arith.constant dense<0.000000e+00> : vector<2x128xf32>
    %640 = tpu.matmul %171, %620, %cst_169 {dimension_numbers = #tpu.dot_dimension_numbers<[1], [0], [0], [1], [0, 0, 1, 1], [], []>} : vector<2x32xf32>, vector<32x128xf32>, vector<2x128xf32> -> vector<2x128xf32>
    %641 = vector.broadcast %619 : vector<1x128xf32> to vector<2x128xf32>
    %642 = arith.addf %641, %640 : vector<2x128xf32>
    %cst_170 = arith.constant dense<0.000000e+00> : vector<2x128xf32>
    %643 = tpu.matmul %559, %621, %cst_170 {dimension_numbers = #tpu.dot_dimension_numbers<[1], [0], [0], [1], [0, 0, 1, 1], [], []>} : vector<2x32xf32>, vector<32x128xf32>, vector<2x128xf32> -> vector<2x128xf32>
    %644 = arith.addf %642, %643 : vector<2x128xf32>
    %645 = vector.extract_strided_slice %644 {offsets = [0, 0], sizes = [2, 32], strides = [1, 1]} : vector<2x128xf32> to vector<2x32xf32>
    %646 = vector.extract_strided_slice %644 {offsets = [0, 32], sizes = [2, 32], strides = [1, 1]} : vector<2x128xf32> to vector<2x32xf32>
    %647 = vector.extract_strided_slice %644 {offsets = [0, 64], sizes = [2, 32], strides = [1, 1]} : vector<2x128xf32> to vector<2x32xf32>
    %648 = vector.extract_strided_slice %644 {offsets = [0, 96], sizes = [2, 32], strides = [1, 1]} : vector<2x128xf32> to vector<2x32xf32>
    %cst_171 = arith.constant dense<0.000000e+00> : vector<2x128xf32>
    %649 = tpu.matmul %200, %620, %cst_171 {dimension_numbers = #tpu.dot_dimension_numbers<[1], [0], [0], [1], [0, 0, 1, 1], [], []>} : vector<2x32xf32>, vector<32x128xf32>, vector<2x128xf32> -> vector<2x128xf32>
    %650 = vector.broadcast %619 : vector<1x128xf32> to vector<2x128xf32>
    %651 = arith.addf %650, %649 : vector<2x128xf32>
    %cst_172 = arith.constant dense<0.000000e+00> : vector<2x128xf32>
    %652 = tpu.matmul %530, %621, %cst_172 {dimension_numbers = #tpu.dot_dimension_numbers<[1], [0], [0], [1], [0, 0, 1, 1], [], []>} : vector<2x32xf32>, vector<32x128xf32>, vector<2x128xf32> -> vector<2x128xf32>
    %653 = arith.addf %651, %652 : vector<2x128xf32>
    %654 = vector.extract_strided_slice %653 {offsets = [0, 0], sizes = [2, 32], strides = [1, 1]} : vector<2x128xf32> to vector<2x32xf32>
    %655 = vector.extract_strided_slice %653 {offsets = [0, 32], sizes = [2, 32], strides = [1, 1]} : vector<2x128xf32> to vector<2x32xf32>
    %656 = vector.extract_strided_slice %653 {offsets = [0, 64], sizes = [2, 32], strides = [1, 1]} : vector<2x128xf32> to vector<2x32xf32>
    %657 = vector.extract_strided_slice %653 {offsets = [0, 96], sizes = [2, 32], strides = [1, 1]} : vector<2x128xf32> to vector<2x32xf32>
    %cst_173 = arith.constant dense<0.000000e+00> : vector<2x128xf32>
    %658 = tpu.matmul %229, %620, %cst_173 {dimension_numbers = #tpu.dot_dimension_numbers<[1], [0], [0], [1], [0, 0, 1, 1], [], []>} : vector<2x32xf32>, vector<32x128xf32>, vector<2x128xf32> -> vector<2x128xf32>
    %659 = vector.broadcast %619 : vector<1x128xf32> to vector<2x128xf32>
    %660 = arith.addf %659, %658 : vector<2x128xf32>
    %cst_174 = arith.constant dense<0.000000e+00> : vector<2x128xf32>
    %661 = tpu.matmul %501, %621, %cst_174 {dimension_numbers = #tpu.dot_dimension_numbers<[1], [0], [0], [1], [0, 0, 1, 1], [], []>} : vector<2x32xf32>, vector<32x128xf32>, vector<2x128xf32> -> vector<2x128xf32>
    %662 = arith.addf %660, %661 : vector<2x128xf32>
    %663 = vector.extract_strided_slice %662 {offsets = [0, 0], sizes = [2, 32], strides = [1, 1]} : vector<2x128xf32> to vector<2x32xf32>
    %664 = vector.extract_strided_slice %662 {offsets = [0, 32], sizes = [2, 32], strides = [1, 1]} : vector<2x128xf32> to vector<2x32xf32>
    %665 = vector.extract_strided_slice %662 {offsets = [0, 64], sizes = [2, 32], strides = [1, 1]} : vector<2x128xf32> to vector<2x32xf32>
    %666 = vector.extract_strided_slice %662 {offsets = [0, 96], sizes = [2, 32], strides = [1, 1]} : vector<2x128xf32> to vector<2x32xf32>
    %cst_175 = arith.constant dense<0.000000e+00> : vector<2x128xf32>
    %667 = tpu.matmul %258, %620, %cst_175 {dimension_numbers = #tpu.dot_dimension_numbers<[1], [0], [0], [1], [0, 0, 1, 1], [], []>} : vector<2x32xf32>, vector<32x128xf32>, vector<2x128xf32> -> vector<2x128xf32>
    %668 = vector.broadcast %619 : vector<1x128xf32> to vector<2x128xf32>
    %669 = arith.addf %668, %667 : vector<2x128xf32>
    %cst_176 = arith.constant dense<0.000000e+00> : vector<2x128xf32>
    %670 = tpu.matmul %472, %621, %cst_176 {dimension_numbers = #tpu.dot_dimension_numbers<[1], [0], [0], [1], [0, 0, 1, 1], [], []>} : vector<2x32xf32>, vector<32x128xf32>, vector<2x128xf32> -> vector<2x128xf32>
    %671 = arith.addf %669, %670 : vector<2x128xf32>
    %672 = vector.extract_strided_slice %671 {offsets = [0, 0], sizes = [2, 32], strides = [1, 1]} : vector<2x128xf32> to vector<2x32xf32>
    %673 = vector.extract_strided_slice %671 {offsets = [0, 32], sizes = [2, 32], strides = [1, 1]} : vector<2x128xf32> to vector<2x32xf32>
    %674 = vector.extract_strided_slice %671 {offsets = [0, 64], sizes = [2, 32], strides = [1, 1]} : vector<2x128xf32> to vector<2x32xf32>
    %675 = vector.extract_strided_slice %671 {offsets = [0, 96], sizes = [2, 32], strides = [1, 1]} : vector<2x128xf32> to vector<2x32xf32>
    %cst_177 = arith.constant dense<0.000000e+00> : vector<2x128xf32>
    %676 = tpu.matmul %287, %620, %cst_177 {dimension_numbers = #tpu.dot_dimension_numbers<[1], [0], [0], [1], [0, 0, 1, 1], [], []>} : vector<2x32xf32>, vector<32x128xf32>, vector<2x128xf32> -> vector<2x128xf32>
    %677 = vector.broadcast %619 : vector<1x128xf32> to vector<2x128xf32>
    %678 = arith.addf %677, %676 : vector<2x128xf32>
    %cst_178 = arith.constant dense<0.000000e+00> : vector<2x128xf32>
    %679 = tpu.matmul %443, %621, %cst_178 {dimension_numbers = #tpu.dot_dimension_numbers<[1], [0], [0], [1], [0, 0, 1, 1], [], []>} : vector<2x32xf32>, vector<32x128xf32>, vector<2x128xf32> -> vector<2x128xf32>
    %680 = arith.addf %678, %679 : vector<2x128xf32>
    %681 = vector.extract_strided_slice %680 {offsets = [0, 0], sizes = [2, 32], strides = [1, 1]} : vector<2x128xf32> to vector<2x32xf32>
    %682 = vector.extract_strided_slice %680 {offsets = [0, 32], sizes = [2, 32], strides = [1, 1]} : vector<2x128xf32> to vector<2x32xf32>
    %683 = vector.extract_strided_slice %680 {offsets = [0, 64], sizes = [2, 32], strides = [1, 1]} : vector<2x128xf32> to vector<2x32xf32>
    %684 = vector.extract_strided_slice %680 {offsets = [0, 96], sizes = [2, 32], strides = [1, 1]} : vector<2x128xf32> to vector<2x32xf32>
    %cst_179 = arith.constant dense<0.000000e+00> : vector<2x128xf32>
    %685 = tpu.matmul %316, %620, %cst_179 {dimension_numbers = #tpu.dot_dimension_numbers<[1], [0], [0], [1], [0, 0, 1, 1], [], []>} : vector<2x32xf32>, vector<32x128xf32>, vector<2x128xf32> -> vector<2x128xf32>
    %686 = vector.broadcast %619 : vector<1x128xf32> to vector<2x128xf32>
    %687 = arith.addf %686, %685 : vector<2x128xf32>
    %cst_180 = arith.constant dense<0.000000e+00> : vector<2x128xf32>
    %688 = tpu.matmul %414, %621, %cst_180 {dimension_numbers = #tpu.dot_dimension_numbers<[1], [0], [0], [1], [0, 0, 1, 1], [], []>} : vector<2x32xf32>, vector<32x128xf32>, vector<2x128xf32> -> vector<2x128xf32>
    %689 = arith.addf %687, %688 : vector<2x128xf32>
    %690 = vector.extract_strided_slice %689 {offsets = [0, 0], sizes = [2, 32], strides = [1, 1]} : vector<2x128xf32> to vector<2x32xf32>
    %691 = vector.extract_strided_slice %689 {offsets = [0, 32], sizes = [2, 32], strides = [1, 1]} : vector<2x128xf32> to vector<2x32xf32>
    %692 = vector.extract_strided_slice %689 {offsets = [0, 64], sizes = [2, 32], strides = [1, 1]} : vector<2x128xf32> to vector<2x32xf32>
    %693 = vector.extract_strided_slice %689 {offsets = [0, 96], sizes = [2, 32], strides = [1, 1]} : vector<2x128xf32> to vector<2x32xf32>
    %c0_181 = arith.constant 0 : index
    %c0_182 = arith.constant 0 : index
    %c0_183 = arith.constant 0 : index
    %694 = vector.load %arg8[%c0_181, %c0_182, %c0_183] : memref<4x32x32xf32, #tpu.memory_space<vmem>>, vector<4x32x32xf32>
    %695 = vector.extract_strided_slice %694 {offsets = [0, 0, 0], sizes = [1, 32, 32], strides = [1, 1, 1]} : vector<4x32x32xf32> to vector<1x32x32xf32>
    %696 = vector.shape_cast %695 : vector<1x32x32xf32> to vector<32x32xf32>
    %697 = vector.extract_strided_slice %694 {offsets = [1, 0, 0], sizes = [1, 32, 32], strides = [1, 1, 1]} : vector<4x32x32xf32> to vector<1x32x32xf32>
    %698 = vector.shape_cast %697 : vector<1x32x32xf32> to vector<32x32xf32>
    %699 = vector.extract_strided_slice %694 {offsets = [2, 0, 0], sizes = [1, 32, 32], strides = [1, 1, 1]} : vector<4x32x32xf32> to vector<1x32x32xf32>
    %700 = vector.shape_cast %699 : vector<1x32x32xf32> to vector<32x32xf32>
    %701 = vector.extract_strided_slice %694 {offsets = [3, 0, 0], sizes = [1, 32, 32], strides = [1, 1, 1]} : vector<4x32x32xf32> to vector<1x32x32xf32>
    %702 = vector.shape_cast %701 : vector<1x32x32xf32> to vector<32x32xf32>
    %cst_184 = arith.constant 0.000000e+00 : f32
    %703 = vector.broadcast %cst_184 : f32 to vector<2x32xf32>
    %cst_185 = arith.constant 0.000000e+00 : f32
    %704 = vector.broadcast %cst_185 : f32 to vector<2x32xf32>
    %cst_186 = arith.constant dense<0.000000e+00> : vector<2x32xf32>
    %705 = tpu.matmul %703, %696, %cst_186 {dimension_numbers = #tpu.dot_dimension_numbers<[1], [0], [0], [1], [0, 0, 1, 1], [], []>} : vector<2x32xf32>, vector<32x32xf32>, vector<2x32xf32> -> vector<2x32xf32>
    %706 = arith.addf %627, %705 : vector<2x32xf32>
    %707 = arith.negf %706 : vector<2x32xf32>
    %708 = math.exp %707 : vector<2x32xf32>
    %cst_187 = arith.constant 1.000000e+00 : f32
    %709 = vector.broadcast %cst_187 : f32 to vector<2x32xf32>
    %710 = arith.addf %709, %708 : vector<2x32xf32>
    %711 = arith.divf %709, %710 : vector<2x32xf32>
    %cst_188 = arith.constant dense<0.000000e+00> : vector<2x32xf32>
    %712 = tpu.matmul %703, %698, %cst_188 {dimension_numbers = #tpu.dot_dimension_numbers<[1], [0], [0], [1], [0, 0, 1, 1], [], []>} : vector<2x32xf32>, vector<32x32xf32>, vector<2x32xf32> -> vector<2x32xf32>
    %713 = arith.addf %628, %712 : vector<2x32xf32>
    %714 = arith.negf %713 : vector<2x32xf32>
    %715 = math.exp %714 : vector<2x32xf32>
    %cst_189 = arith.constant 1.000000e+00 : f32
    %716 = vector.broadcast %cst_189 : f32 to vector<2x32xf32>
    %717 = arith.addf %716, %715 : vector<2x32xf32>
    %718 = arith.divf %716, %717 : vector<2x32xf32>
    %cst_190 = arith.constant dense<0.000000e+00> : vector<2x32xf32>
    %719 = tpu.matmul %703, %700, %cst_190 {dimension_numbers = #tpu.dot_dimension_numbers<[1], [0], [0], [1], [0, 0, 1, 1], [], []>} : vector<2x32xf32>, vector<32x32xf32>, vector<2x32xf32> -> vector<2x32xf32>
    %720 = arith.addf %629, %719 : vector<2x32xf32>
    %721 = math.tanh %720 : vector<2x32xf32>
    %cst_191 = arith.constant dense<0.000000e+00> : vector<2x32xf32>
    %722 = tpu.matmul %703, %702, %cst_191 {dimension_numbers = #tpu.dot_dimension_numbers<[1], [0], [0], [1], [0, 0, 1, 1], [], []>} : vector<2x32xf32>, vector<32x32xf32>, vector<2x32xf32> -> vector<2x32xf32>
    %723 = arith.addf %630, %722 : vector<2x32xf32>
    %724 = arith.negf %723 : vector<2x32xf32>
    %725 = math.exp %724 : vector<2x32xf32>
    %cst_192 = arith.constant 1.000000e+00 : f32
    %726 = vector.broadcast %cst_192 : f32 to vector<2x32xf32>
    %727 = arith.addf %726, %725 : vector<2x32xf32>
    %728 = arith.divf %726, %727 : vector<2x32xf32>
    %729 = arith.mulf %718, %704 : vector<2x32xf32>
    %730 = arith.mulf %711, %721 : vector<2x32xf32>
    %731 = arith.addf %729, %730 : vector<2x32xf32>
    %732 = math.tanh %731 : vector<2x32xf32>
    %733 = arith.mulf %728, %732 : vector<2x32xf32>
    %cst_193 = arith.constant dense<0.000000e+00> : vector<2x32xf32>
    %734 = tpu.matmul %733, %696, %cst_193 {dimension_numbers = #tpu.dot_dimension_numbers<[1], [0], [0], [1], [0, 0, 1, 1], [], []>} : vector<2x32xf32>, vector<32x32xf32>, vector<2x32xf32> -> vector<2x32xf32>
    %735 = arith.addf %636, %734 : vector<2x32xf32>
    %736 = arith.negf %735 : vector<2x32xf32>
    %737 = math.exp %736 : vector<2x32xf32>
    %cst_194 = arith.constant 1.000000e+00 : f32
    %738 = vector.broadcast %cst_194 : f32 to vector<2x32xf32>
    %739 = arith.addf %738, %737 : vector<2x32xf32>
    %740 = arith.divf %738, %739 : vector<2x32xf32>
    %cst_195 = arith.constant dense<0.000000e+00> : vector<2x32xf32>
    %741 = tpu.matmul %733, %698, %cst_195 {dimension_numbers = #tpu.dot_dimension_numbers<[1], [0], [0], [1], [0, 0, 1, 1], [], []>} : vector<2x32xf32>, vector<32x32xf32>, vector<2x32xf32> -> vector<2x32xf32>
    %742 = arith.addf %637, %741 : vector<2x32xf32>
    %743 = arith.negf %742 : vector<2x32xf32>
    %744 = math.exp %743 : vector<2x32xf32>
    %cst_196 = arith.constant 1.000000e+00 : f32
    %745 = vector.broadcast %cst_196 : f32 to vector<2x32xf32>
    %746 = arith.addf %745, %744 : vector<2x32xf32>
    %747 = arith.divf %745, %746 : vector<2x32xf32>
    %cst_197 = arith.constant dense<0.000000e+00> : vector<2x32xf32>
    %748 = tpu.matmul %733, %700, %cst_197 {dimension_numbers = #tpu.dot_dimension_numbers<[1], [0], [0], [1], [0, 0, 1, 1], [], []>} : vector<2x32xf32>, vector<32x32xf32>, vector<2x32xf32> -> vector<2x32xf32>
    %749 = arith.addf %638, %748 : vector<2x32xf32>
    %750 = math.tanh %749 : vector<2x32xf32>
    %cst_198 = arith.constant dense<0.000000e+00> : vector<2x32xf32>
    %751 = tpu.matmul %733, %702, %cst_198 {dimension_numbers = #tpu.dot_dimension_numbers<[1], [0], [0], [1], [0, 0, 1, 1], [], []>} : vector<2x32xf32>, vector<32x32xf32>, vector<2x32xf32> -> vector<2x32xf32>
    %752 = arith.addf %639, %751 : vector<2x32xf32>
    %753 = arith.negf %752 : vector<2x32xf32>
    %754 = math.exp %753 : vector<2x32xf32>
    %cst_199 = arith.constant 1.000000e+00 : f32
    %755 = vector.broadcast %cst_199 : f32 to vector<2x32xf32>
    %756 = arith.addf %755, %754 : vector<2x32xf32>
    %757 = arith.divf %755, %756 : vector<2x32xf32>
    %758 = arith.mulf %747, %731 : vector<2x32xf32>
    %759 = arith.mulf %740, %750 : vector<2x32xf32>
    %760 = arith.addf %758, %759 : vector<2x32xf32>
    %761 = math.tanh %760 : vector<2x32xf32>
    %762 = arith.mulf %757, %761 : vector<2x32xf32>
    %cst_200 = arith.constant dense<0.000000e+00> : vector<2x32xf32>
    %763 = tpu.matmul %762, %696, %cst_200 {dimension_numbers = #tpu.dot_dimension_numbers<[1], [0], [0], [1], [0, 0, 1, 1], [], []>} : vector<2x32xf32>, vector<32x32xf32>, vector<2x32xf32> -> vector<2x32xf32>
    %764 = arith.addf %645, %763 : vector<2x32xf32>
    %765 = arith.negf %764 : vector<2x32xf32>
    %766 = math.exp %765 : vector<2x32xf32>
    %cst_201 = arith.constant 1.000000e+00 : f32
    %767 = vector.broadcast %cst_201 : f32 to vector<2x32xf32>
    %768 = arith.addf %767, %766 : vector<2x32xf32>
    %769 = arith.divf %767, %768 : vector<2x32xf32>
    %cst_202 = arith.constant dense<0.000000e+00> : vector<2x32xf32>
    %770 = tpu.matmul %762, %698, %cst_202 {dimension_numbers = #tpu.dot_dimension_numbers<[1], [0], [0], [1], [0, 0, 1, 1], [], []>} : vector<2x32xf32>, vector<32x32xf32>, vector<2x32xf32> -> vector<2x32xf32>
    %771 = arith.addf %646, %770 : vector<2x32xf32>
    %772 = arith.negf %771 : vector<2x32xf32>
    %773 = math.exp %772 : vector<2x32xf32>
    %cst_203 = arith.constant 1.000000e+00 : f32
    %774 = vector.broadcast %cst_203 : f32 to vector<2x32xf32>
    %775 = arith.addf %774, %773 : vector<2x32xf32>
    %776 = arith.divf %774, %775 : vector<2x32xf32>
    %cst_204 = arith.constant dense<0.000000e+00> : vector<2x32xf32>
    %777 = tpu.matmul %762, %700, %cst_204 {dimension_numbers = #tpu.dot_dimension_numbers<[1], [0], [0], [1], [0, 0, 1, 1], [], []>} : vector<2x32xf32>, vector<32x32xf32>, vector<2x32xf32> -> vector<2x32xf32>
    %778 = arith.addf %647, %777 : vector<2x32xf32>
    %779 = math.tanh %778 : vector<2x32xf32>
    %cst_205 = arith.constant dense<0.000000e+00> : vector<2x32xf32>
    %780 = tpu.matmul %762, %702, %cst_205 {dimension_numbers = #tpu.dot_dimension_numbers<[1], [0], [0], [1], [0, 0, 1, 1], [], []>} : vector<2x32xf32>, vector<32x32xf32>, vector<2x32xf32> -> vector<2x32xf32>
    %781 = arith.addf %648, %780 : vector<2x32xf32>
    %782 = arith.negf %781 : vector<2x32xf32>
    %783 = math.exp %782 : vector<2x32xf32>
    %cst_206 = arith.constant 1.000000e+00 : f32
    %784 = vector.broadcast %cst_206 : f32 to vector<2x32xf32>
    %785 = arith.addf %784, %783 : vector<2x32xf32>
    %786 = arith.divf %784, %785 : vector<2x32xf32>
    %787 = arith.mulf %776, %760 : vector<2x32xf32>
    %788 = arith.mulf %769, %779 : vector<2x32xf32>
    %789 = arith.addf %787, %788 : vector<2x32xf32>
    %790 = math.tanh %789 : vector<2x32xf32>
    %791 = arith.mulf %786, %790 : vector<2x32xf32>
    %cst_207 = arith.constant dense<0.000000e+00> : vector<2x32xf32>
    %792 = tpu.matmul %791, %696, %cst_207 {dimension_numbers = #tpu.dot_dimension_numbers<[1], [0], [0], [1], [0, 0, 1, 1], [], []>} : vector<2x32xf32>, vector<32x32xf32>, vector<2x32xf32> -> vector<2x32xf32>
    %793 = arith.addf %654, %792 : vector<2x32xf32>
    %794 = arith.negf %793 : vector<2x32xf32>
    %795 = math.exp %794 : vector<2x32xf32>
    %cst_208 = arith.constant 1.000000e+00 : f32
    %796 = vector.broadcast %cst_208 : f32 to vector<2x32xf32>
    %797 = arith.addf %796, %795 : vector<2x32xf32>
    %798 = arith.divf %796, %797 : vector<2x32xf32>
    %cst_209 = arith.constant dense<0.000000e+00> : vector<2x32xf32>
    %799 = tpu.matmul %791, %698, %cst_209 {dimension_numbers = #tpu.dot_dimension_numbers<[1], [0], [0], [1], [0, 0, 1, 1], [], []>} : vector<2x32xf32>, vector<32x32xf32>, vector<2x32xf32> -> vector<2x32xf32>
    %800 = arith.addf %655, %799 : vector<2x32xf32>
    %801 = arith.negf %800 : vector<2x32xf32>
    %802 = math.exp %801 : vector<2x32xf32>
    %cst_210 = arith.constant 1.000000e+00 : f32
    %803 = vector.broadcast %cst_210 : f32 to vector<2x32xf32>
    %804 = arith.addf %803, %802 : vector<2x32xf32>
    %805 = arith.divf %803, %804 : vector<2x32xf32>
    %cst_211 = arith.constant dense<0.000000e+00> : vector<2x32xf32>
    %806 = tpu.matmul %791, %700, %cst_211 {dimension_numbers = #tpu.dot_dimension_numbers<[1], [0], [0], [1], [0, 0, 1, 1], [], []>} : vector<2x32xf32>, vector<32x32xf32>, vector<2x32xf32> -> vector<2x32xf32>
    %807 = arith.addf %656, %806 : vector<2x32xf32>
    %808 = math.tanh %807 : vector<2x32xf32>
    %cst_212 = arith.constant dense<0.000000e+00> : vector<2x32xf32>
    %809 = tpu.matmul %791, %702, %cst_212 {dimension_numbers = #tpu.dot_dimension_numbers<[1], [0], [0], [1], [0, 0, 1, 1], [], []>} : vector<2x32xf32>, vector<32x32xf32>, vector<2x32xf32> -> vector<2x32xf32>
    %810 = arith.addf %657, %809 : vector<2x32xf32>
    %811 = arith.negf %810 : vector<2x32xf32>
    %812 = math.exp %811 : vector<2x32xf32>
    %cst_213 = arith.constant 1.000000e+00 : f32
    %813 = vector.broadcast %cst_213 : f32 to vector<2x32xf32>
    %814 = arith.addf %813, %812 : vector<2x32xf32>
    %815 = arith.divf %813, %814 : vector<2x32xf32>
    %816 = arith.mulf %805, %789 : vector<2x32xf32>
    %817 = arith.mulf %798, %808 : vector<2x32xf32>
    %818 = arith.addf %816, %817 : vector<2x32xf32>
    %819 = math.tanh %818 : vector<2x32xf32>
    %820 = arith.mulf %815, %819 : vector<2x32xf32>
    %cst_214 = arith.constant dense<0.000000e+00> : vector<2x32xf32>
    %821 = tpu.matmul %820, %696, %cst_214 {dimension_numbers = #tpu.dot_dimension_numbers<[1], [0], [0], [1], [0, 0, 1, 1], [], []>} : vector<2x32xf32>, vector<32x32xf32>, vector<2x32xf32> -> vector<2x32xf32>
    %822 = arith.addf %663, %821 : vector<2x32xf32>
    %823 = arith.negf %822 : vector<2x32xf32>
    %824 = math.exp %823 : vector<2x32xf32>
    %cst_215 = arith.constant 1.000000e+00 : f32
    %825 = vector.broadcast %cst_215 : f32 to vector<2x32xf32>
    %826 = arith.addf %825, %824 : vector<2x32xf32>
    %827 = arith.divf %825, %826 : vector<2x32xf32>
    %cst_216 = arith.constant dense<0.000000e+00> : vector<2x32xf32>
    %828 = tpu.matmul %820, %698, %cst_216 {dimension_numbers = #tpu.dot_dimension_numbers<[1], [0], [0], [1], [0, 0, 1, 1], [], []>} : vector<2x32xf32>, vector<32x32xf32>, vector<2x32xf32> -> vector<2x32xf32>
    %829 = arith.addf %664, %828 : vector<2x32xf32>
    %830 = arith.negf %829 : vector<2x32xf32>
    %831 = math.exp %830 : vector<2x32xf32>
    %cst_217 = arith.constant 1.000000e+00 : f32
    %832 = vector.broadcast %cst_217 : f32 to vector<2x32xf32>
    %833 = arith.addf %832, %831 : vector<2x32xf32>
    %834 = arith.divf %832, %833 : vector<2x32xf32>
    %cst_218 = arith.constant dense<0.000000e+00> : vector<2x32xf32>
    %835 = tpu.matmul %820, %700, %cst_218 {dimension_numbers = #tpu.dot_dimension_numbers<[1], [0], [0], [1], [0, 0, 1, 1], [], []>} : vector<2x32xf32>, vector<32x32xf32>, vector<2x32xf32> -> vector<2x32xf32>
    %836 = arith.addf %665, %835 : vector<2x32xf32>
    %837 = math.tanh %836 : vector<2x32xf32>
    %cst_219 = arith.constant dense<0.000000e+00> : vector<2x32xf32>
    %838 = tpu.matmul %820, %702, %cst_219 {dimension_numbers = #tpu.dot_dimension_numbers<[1], [0], [0], [1], [0, 0, 1, 1], [], []>} : vector<2x32xf32>, vector<32x32xf32>, vector<2x32xf32> -> vector<2x32xf32>
    %839 = arith.addf %666, %838 : vector<2x32xf32>
    %840 = arith.negf %839 : vector<2x32xf32>
    %841 = math.exp %840 : vector<2x32xf32>
    %cst_220 = arith.constant 1.000000e+00 : f32
    %842 = vector.broadcast %cst_220 : f32 to vector<2x32xf32>
    %843 = arith.addf %842, %841 : vector<2x32xf32>
    %844 = arith.divf %842, %843 : vector<2x32xf32>
    %845 = arith.mulf %834, %818 : vector<2x32xf32>
    %846 = arith.mulf %827, %837 : vector<2x32xf32>
    %847 = arith.addf %845, %846 : vector<2x32xf32>
    %848 = math.tanh %847 : vector<2x32xf32>
    %849 = arith.mulf %844, %848 : vector<2x32xf32>
    %cst_221 = arith.constant dense<0.000000e+00> : vector<2x32xf32>
    %850 = tpu.matmul %849, %696, %cst_221 {dimension_numbers = #tpu.dot_dimension_numbers<[1], [0], [0], [1], [0, 0, 1, 1], [], []>} : vector<2x32xf32>, vector<32x32xf32>, vector<2x32xf32> -> vector<2x32xf32>
    %851 = arith.addf %672, %850 : vector<2x32xf32>
    %852 = arith.negf %851 : vector<2x32xf32>
    %853 = math.exp %852 : vector<2x32xf32>
    %cst_222 = arith.constant 1.000000e+00 : f32
    %854 = vector.broadcast %cst_222 : f32 to vector<2x32xf32>
    %855 = arith.addf %854, %853 : vector<2x32xf32>
    %856 = arith.divf %854, %855 : vector<2x32xf32>
    %cst_223 = arith.constant dense<0.000000e+00> : vector<2x32xf32>
    %857 = tpu.matmul %849, %698, %cst_223 {dimension_numbers = #tpu.dot_dimension_numbers<[1], [0], [0], [1], [0, 0, 1, 1], [], []>} : vector<2x32xf32>, vector<32x32xf32>, vector<2x32xf32> -> vector<2x32xf32>
    %858 = arith.addf %673, %857 : vector<2x32xf32>
    %859 = arith.negf %858 : vector<2x32xf32>
    %860 = math.exp %859 : vector<2x32xf32>
    %cst_224 = arith.constant 1.000000e+00 : f32
    %861 = vector.broadcast %cst_224 : f32 to vector<2x32xf32>
    %862 = arith.addf %861, %860 : vector<2x32xf32>
    %863 = arith.divf %861, %862 : vector<2x32xf32>
    %cst_225 = arith.constant dense<0.000000e+00> : vector<2x32xf32>
    %864 = tpu.matmul %849, %700, %cst_225 {dimension_numbers = #tpu.dot_dimension_numbers<[1], [0], [0], [1], [0, 0, 1, 1], [], []>} : vector<2x32xf32>, vector<32x32xf32>, vector<2x32xf32> -> vector<2x32xf32>
    %865 = arith.addf %674, %864 : vector<2x32xf32>
    %866 = math.tanh %865 : vector<2x32xf32>
    %cst_226 = arith.constant dense<0.000000e+00> : vector<2x32xf32>
    %867 = tpu.matmul %849, %702, %cst_226 {dimension_numbers = #tpu.dot_dimension_numbers<[1], [0], [0], [1], [0, 0, 1, 1], [], []>} : vector<2x32xf32>, vector<32x32xf32>, vector<2x32xf32> -> vector<2x32xf32>
    %868 = arith.addf %675, %867 : vector<2x32xf32>
    %869 = arith.negf %868 : vector<2x32xf32>
    %870 = math.exp %869 : vector<2x32xf32>
    %cst_227 = arith.constant 1.000000e+00 : f32
    %871 = vector.broadcast %cst_227 : f32 to vector<2x32xf32>
    %872 = arith.addf %871, %870 : vector<2x32xf32>
    %873 = arith.divf %871, %872 : vector<2x32xf32>
    %874 = arith.mulf %863, %847 : vector<2x32xf32>
    %875 = arith.mulf %856, %866 : vector<2x32xf32>
    %876 = arith.addf %874, %875 : vector<2x32xf32>
    %877 = math.tanh %876 : vector<2x32xf32>
    %878 = arith.mulf %873, %877 : vector<2x32xf32>
    %cst_228 = arith.constant dense<0.000000e+00> : vector<2x32xf32>
    %879 = tpu.matmul %878, %696, %cst_228 {dimension_numbers = #tpu.dot_dimension_numbers<[1], [0], [0], [1], [0, 0, 1, 1], [], []>} : vector<2x32xf32>, vector<32x32xf32>, vector<2x32xf32> -> vector<2x32xf32>
    %880 = arith.addf %681, %879 : vector<2x32xf32>
    %881 = arith.negf %880 : vector<2x32xf32>
    %882 = math.exp %881 : vector<2x32xf32>
    %cst_229 = arith.constant 1.000000e+00 : f32
    %883 = vector.broadcast %cst_229 : f32 to vector<2x32xf32>
    %884 = arith.addf %883, %882 : vector<2x32xf32>
    %885 = arith.divf %883, %884 : vector<2x32xf32>
    %cst_230 = arith.constant dense<0.000000e+00> : vector<2x32xf32>
    %886 = tpu.matmul %878, %698, %cst_230 {dimension_numbers = #tpu.dot_dimension_numbers<[1], [0], [0], [1], [0, 0, 1, 1], [], []>} : vector<2x32xf32>, vector<32x32xf32>, vector<2x32xf32> -> vector<2x32xf32>
    %887 = arith.addf %682, %886 : vector<2x32xf32>
    %888 = arith.negf %887 : vector<2x32xf32>
    %889 = math.exp %888 : vector<2x32xf32>
    %cst_231 = arith.constant 1.000000e+00 : f32
    %890 = vector.broadcast %cst_231 : f32 to vector<2x32xf32>
    %891 = arith.addf %890, %889 : vector<2x32xf32>
    %892 = arith.divf %890, %891 : vector<2x32xf32>
    %cst_232 = arith.constant dense<0.000000e+00> : vector<2x32xf32>
    %893 = tpu.matmul %878, %700, %cst_232 {dimension_numbers = #tpu.dot_dimension_numbers<[1], [0], [0], [1], [0, 0, 1, 1], [], []>} : vector<2x32xf32>, vector<32x32xf32>, vector<2x32xf32> -> vector<2x32xf32>
    %894 = arith.addf %683, %893 : vector<2x32xf32>
    %895 = math.tanh %894 : vector<2x32xf32>
    %cst_233 = arith.constant dense<0.000000e+00> : vector<2x32xf32>
    %896 = tpu.matmul %878, %702, %cst_233 {dimension_numbers = #tpu.dot_dimension_numbers<[1], [0], [0], [1], [0, 0, 1, 1], [], []>} : vector<2x32xf32>, vector<32x32xf32>, vector<2x32xf32> -> vector<2x32xf32>
    %897 = arith.addf %684, %896 : vector<2x32xf32>
    %898 = arith.negf %897 : vector<2x32xf32>
    %899 = math.exp %898 : vector<2x32xf32>
    %cst_234 = arith.constant 1.000000e+00 : f32
    %900 = vector.broadcast %cst_234 : f32 to vector<2x32xf32>
    %901 = arith.addf %900, %899 : vector<2x32xf32>
    %902 = arith.divf %900, %901 : vector<2x32xf32>
    %903 = arith.mulf %892, %876 : vector<2x32xf32>
    %904 = arith.mulf %885, %895 : vector<2x32xf32>
    %905 = arith.addf %903, %904 : vector<2x32xf32>
    %906 = math.tanh %905 : vector<2x32xf32>
    %907 = arith.mulf %902, %906 : vector<2x32xf32>
    %cst_235 = arith.constant dense<0.000000e+00> : vector<2x32xf32>
    %908 = tpu.matmul %907, %696, %cst_235 {dimension_numbers = #tpu.dot_dimension_numbers<[1], [0], [0], [1], [0, 0, 1, 1], [], []>} : vector<2x32xf32>, vector<32x32xf32>, vector<2x32xf32> -> vector<2x32xf32>
    %909 = arith.addf %690, %908 : vector<2x32xf32>
    %910 = arith.negf %909 : vector<2x32xf32>
    %911 = math.exp %910 : vector<2x32xf32>
    %cst_236 = arith.constant 1.000000e+00 : f32
    %912 = vector.broadcast %cst_236 : f32 to vector<2x32xf32>
    %913 = arith.addf %912, %911 : vector<2x32xf32>
    %914 = arith.divf %912, %913 : vector<2x32xf32>
    %cst_237 = arith.constant dense<0.000000e+00> : vector<2x32xf32>
    %915 = tpu.matmul %907, %698, %cst_237 {dimension_numbers = #tpu.dot_dimension_numbers<[1], [0], [0], [1], [0, 0, 1, 1], [], []>} : vector<2x32xf32>, vector<32x32xf32>, vector<2x32xf32> -> vector<2x32xf32>
    %916 = arith.addf %691, %915 : vector<2x32xf32>
    %917 = arith.negf %916 : vector<2x32xf32>
    %918 = math.exp %917 : vector<2x32xf32>
    %cst_238 = arith.constant 1.000000e+00 : f32
    %919 = vector.broadcast %cst_238 : f32 to vector<2x32xf32>
    %920 = arith.addf %919, %918 : vector<2x32xf32>
    %921 = arith.divf %919, %920 : vector<2x32xf32>
    %cst_239 = arith.constant dense<0.000000e+00> : vector<2x32xf32>
    %922 = tpu.matmul %907, %700, %cst_239 {dimension_numbers = #tpu.dot_dimension_numbers<[1], [0], [0], [1], [0, 0, 1, 1], [], []>} : vector<2x32xf32>, vector<32x32xf32>, vector<2x32xf32> -> vector<2x32xf32>
    %923 = arith.addf %692, %922 : vector<2x32xf32>
    %924 = math.tanh %923 : vector<2x32xf32>
    %cst_240 = arith.constant dense<0.000000e+00> : vector<2x32xf32>
    %925 = tpu.matmul %907, %702, %cst_240 {dimension_numbers = #tpu.dot_dimension_numbers<[1], [0], [0], [1], [0, 0, 1, 1], [], []>} : vector<2x32xf32>, vector<32x32xf32>, vector<2x32xf32> -> vector<2x32xf32>
    %926 = arith.addf %693, %925 : vector<2x32xf32>
    %927 = arith.negf %926 : vector<2x32xf32>
    %928 = math.exp %927 : vector<2x32xf32>
    %cst_241 = arith.constant 1.000000e+00 : f32
    %929 = vector.broadcast %cst_241 : f32 to vector<2x32xf32>
    %930 = arith.addf %929, %928 : vector<2x32xf32>
    %931 = arith.divf %929, %930 : vector<2x32xf32>
    %932 = arith.mulf %921, %905 : vector<2x32xf32>
    %933 = arith.mulf %914, %924 : vector<2x32xf32>
    %934 = arith.addf %932, %933 : vector<2x32xf32>
    %935 = math.tanh %934 : vector<2x32xf32>
    %936 = arith.mulf %931, %935 : vector<2x32xf32>
    %c0_242 = arith.constant 0 : index
    %c0_243 = arith.constant 0 : index
    %937 = vector.load %arg10[%c0_242, %c0_243] : memref<64x128xf32, #tpu.memory_space<vmem>>, vector<64x128xf32>
    %c0_244 = arith.constant 0 : index
    %c0_245 = arith.constant 0 : index
    %938 = vector.load %arg12[%c0_244, %c0_245] : memref<1x128xf32, #tpu.memory_space<vmem>>, vector<1x128xf32>
    %939 = vector.extract_strided_slice %937 {offsets = [0, 0], sizes = [32, 128], strides = [1, 1]} : vector<64x128xf32> to vector<32x128xf32>
    %940 = vector.extract_strided_slice %937 {offsets = [32, 0], sizes = [32, 128], strides = [1, 1]} : vector<64x128xf32> to vector<32x128xf32>
    %cst_246 = arith.constant dense<0.000000e+00> : vector<2x128xf32>
    %941 = tpu.matmul %316, %939, %cst_246 {dimension_numbers = #tpu.dot_dimension_numbers<[1], [0], [0], [1], [0, 0, 1, 1], [], []>} : vector<2x32xf32>, vector<32x128xf32>, vector<2x128xf32> -> vector<2x128xf32>
    %942 = vector.broadcast %938 : vector<1x128xf32> to vector<2x128xf32>
    %943 = arith.addf %942, %941 : vector<2x128xf32>
    %cst_247 = arith.constant dense<0.000000e+00> : vector<2x128xf32>
    %944 = tpu.matmul %414, %940, %cst_247 {dimension_numbers = #tpu.dot_dimension_numbers<[1], [0], [0], [1], [0, 0, 1, 1], [], []>} : vector<2x32xf32>, vector<32x128xf32>, vector<2x128xf32> -> vector<2x128xf32>
    %945 = arith.addf %943, %944 : vector<2x128xf32>
    %946 = vector.extract_strided_slice %945 {offsets = [0, 0], sizes = [2, 32], strides = [1, 1]} : vector<2x128xf32> to vector<2x32xf32>
    %947 = vector.extract_strided_slice %945 {offsets = [0, 32], sizes = [2, 32], strides = [1, 1]} : vector<2x128xf32> to vector<2x32xf32>
    %948 = vector.extract_strided_slice %945 {offsets = [0, 64], sizes = [2, 32], strides = [1, 1]} : vector<2x128xf32> to vector<2x32xf32>
    %949 = vector.extract_strided_slice %945 {offsets = [0, 96], sizes = [2, 32], strides = [1, 1]} : vector<2x128xf32> to vector<2x32xf32>
    %c0_248 = arith.constant 0 : index
    %c0_249 = arith.constant 0 : index
    %c0_250 = arith.constant 0 : index
    %950 = vector.load %arg11[%c0_248, %c0_249, %c0_250] : memref<4x32x32xf32, #tpu.memory_space<vmem>>, vector<4x32x32xf32>
    %951 = vector.extract_strided_slice %950 {offsets = [0, 0, 0], sizes = [1, 32, 32], strides = [1, 1, 1]} : vector<4x32x32xf32> to vector<1x32x32xf32>
    %952 = vector.shape_cast %951 : vector<1x32x32xf32> to vector<32x32xf32>
    %953 = vector.extract_strided_slice %950 {offsets = [1, 0, 0], sizes = [1, 32, 32], strides = [1, 1, 1]} : vector<4x32x32xf32> to vector<1x32x32xf32>
    %954 = vector.shape_cast %953 : vector<1x32x32xf32> to vector<32x32xf32>
    %955 = vector.extract_strided_slice %950 {offsets = [2, 0, 0], sizes = [1, 32, 32], strides = [1, 1, 1]} : vector<4x32x32xf32> to vector<1x32x32xf32>
    %956 = vector.shape_cast %955 : vector<1x32x32xf32> to vector<32x32xf32>
    %957 = vector.extract_strided_slice %950 {offsets = [3, 0, 0], sizes = [1, 32, 32], strides = [1, 1, 1]} : vector<4x32x32xf32> to vector<1x32x32xf32>
    %958 = vector.shape_cast %957 : vector<1x32x32xf32> to vector<32x32xf32>
    %cst_251 = arith.constant 0.000000e+00 : f32
    %959 = vector.broadcast %cst_251 : f32 to vector<2x32xf32>
    %cst_252 = arith.constant 0.000000e+00 : f32
    %960 = vector.broadcast %cst_252 : f32 to vector<2x32xf32>
    %cst_253 = arith.constant dense<0.000000e+00> : vector<2x32xf32>
    %961 = tpu.matmul %959, %952, %cst_253 {dimension_numbers = #tpu.dot_dimension_numbers<[1], [0], [0], [1], [0, 0, 1, 1], [], []>} : vector<2x32xf32>, vector<32x32xf32>, vector<2x32xf32> -> vector<2x32xf32>
    %962 = arith.addf %946, %961 : vector<2x32xf32>
    %963 = arith.negf %962 : vector<2x32xf32>
    %964 = math.exp %963 : vector<2x32xf32>
    %cst_254 = arith.constant 1.000000e+00 : f32
    %965 = vector.broadcast %cst_254 : f32 to vector<2x32xf32>
    %966 = arith.addf %965, %964 : vector<2x32xf32>
    %967 = arith.divf %965, %966 : vector<2x32xf32>
    %cst_255 = arith.constant dense<0.000000e+00> : vector<2x32xf32>
    %968 = tpu.matmul %959, %954, %cst_255 {dimension_numbers = #tpu.dot_dimension_numbers<[1], [0], [0], [1], [0, 0, 1, 1], [], []>} : vector<2x32xf32>, vector<32x32xf32>, vector<2x32xf32> -> vector<2x32xf32>
    %969 = arith.addf %947, %968 : vector<2x32xf32>
    %970 = arith.negf %969 : vector<2x32xf32>
    %971 = math.exp %970 : vector<2x32xf32>
    %cst_256 = arith.constant 1.000000e+00 : f32
    %972 = vector.broadcast %cst_256 : f32 to vector<2x32xf32>
    %973 = arith.addf %972, %971 : vector<2x32xf32>
    %974 = arith.divf %972, %973 : vector<2x32xf32>
    %cst_257 = arith.constant dense<0.000000e+00> : vector<2x32xf32>
    %975 = tpu.matmul %959, %956, %cst_257 {dimension_numbers = #tpu.dot_dimension_numbers<[1], [0], [0], [1], [0, 0, 1, 1], [], []>} : vector<2x32xf32>, vector<32x32xf32>, vector<2x32xf32> -> vector<2x32xf32>
    %976 = arith.addf %948, %975 : vector<2x32xf32>
    %977 = math.tanh %976 : vector<2x32xf32>
    %cst_258 = arith.constant dense<0.000000e+00> : vector<2x32xf32>
    %978 = tpu.matmul %959, %958, %cst_258 {dimension_numbers = #tpu.dot_dimension_numbers<[1], [0], [0], [1], [0, 0, 1, 1], [], []>} : vector<2x32xf32>, vector<32x32xf32>, vector<2x32xf32> -> vector<2x32xf32>
    %979 = arith.addf %949, %978 : vector<2x32xf32>
    %980 = arith.negf %979 : vector<2x32xf32>
    %981 = math.exp %980 : vector<2x32xf32>
    %cst_259 = arith.constant 1.000000e+00 : f32
    %982 = vector.broadcast %cst_259 : f32 to vector<2x32xf32>
    %983 = arith.addf %982, %981 : vector<2x32xf32>
    %984 = arith.divf %982, %983 : vector<2x32xf32>
    %985 = arith.mulf %974, %960 : vector<2x32xf32>
    %986 = arith.mulf %967, %977 : vector<2x32xf32>
    %987 = arith.addf %985, %986 : vector<2x32xf32>
    %988 = math.tanh %987 : vector<2x32xf32>
    %989 = arith.mulf %984, %988 : vector<2x32xf32>
    %c0_260 = arith.constant 0 : index
    %c0_261 = arith.constant 0 : index
    %990 = vector.load %arg13[%c0_260, %c0_261] : memref<64x6xf32, #tpu.memory_space<vmem>>, vector<64x6xf32>
    %991 = vector.extract_strided_slice %990 {offsets = [0, 0], sizes = [32, 6], strides = [1, 1]} : vector<64x6xf32> to vector<32x6xf32>
    %cst_262 = arith.constant dense<0.000000e+00> : vector<2x6xf32>
    %992 = tpu.matmul %936, %991, %cst_262 {dimension_numbers = #tpu.dot_dimension_numbers<[1], [0], [0], [1], [0, 0, 1, 1], [], []>} : vector<2x32xf32>, vector<32x6xf32>, vector<2x6xf32> -> vector<2x6xf32>
    %993 = vector.extract_strided_slice %990 {offsets = [32, 0], sizes = [32, 6], strides = [1, 1]} : vector<64x6xf32> to vector<32x6xf32>
    %cst_263 = arith.constant dense<0.000000e+00> : vector<2x6xf32>
    %994 = tpu.matmul %989, %993, %cst_263 {dimension_numbers = #tpu.dot_dimension_numbers<[1], [0], [0], [1], [0, 0, 1, 1], [], []>} : vector<2x32xf32>, vector<32x6xf32>, vector<2x6xf32> -> vector<2x6xf32>
    %995 = arith.addf %992, %994 : vector<2x6xf32>
    %c0_264 = arith.constant 0 : index
    %c0_265 = arith.constant 0 : index
    %996 = vector.load %arg14[%c0_264, %c0_265] : memref<1x6xf32, #tpu.memory_space<vmem>>, vector<1x6xf32>
    %997 = vector.broadcast %996 : vector<1x6xf32> to vector<2x6xf32>
    %998 = arith.addf %995, %997 : vector<2x6xf32>
    %c0_266 = arith.constant 0 : index
    %c0_267 = arith.constant 0 : index
    %999 = vector.load %arg15[%c0_266, %c0_267] : memref<2x6xf32, #tpu.memory_space<vmem>>, vector<2x6xf32>
    tpu.vector_store %arg15[%c0_266, %c0_267], %998 {strides = array<i32>} : memref<2x6xf32, #tpu.memory_space<vmem>>, vector<2x6xf32>,
    return
  }
}

</mosaic_0001>

<bundles_post_ra>
// kernel: enhanced_bilstm_forward.1
= control target key start
LH: loop header
LB: loop body
LE: loop exit
PB: predicated region body
PF: predicated region fallthrough
CT: control target
= control target key end

     0   :  { %20 = vsyncpa [#allocation3], 0  ;;  %s16495_s0 = inlined_call_operand.vmem [shape: f32[8,2,4], index: 0, kind: input, shape index: {}]   ;;  %s16496_s1 = inlined_call_operand.vmem [shape: f32[4,128], index: 1, kind: input, shape index: {}]   ;;  %s16497_s2 = inlined_call_operand.hbm [shape: f32[4,32,32], index: 2, kind: input, shape index: {}]   ;;  %s16498_s3 = inlined_call_operand.vmem [shape: f32[1,128], index: 3, kind: input, shape index: {}]   ;;  %s16499_s4 = inlined_call_operand.vmem [shape: f32[4,128], index: 4, kind: input, shape index: {}]   ;;  %s16500_s5 = inlined_call_operand.hbm [shape: f32[4,32,32], index: 5, kind: input, shape index: {}]   ;;  %s16501_s6 = inlined_call_operand.vmem [shape: f32[1,128], index: 6, kind: input, shape index: {}]   ;;  %s16502_s7 = inlined_call_operand.vmem [shape: f32[64,128], index: 7, kind: input, shape index: {}]   ;;  %s16503_s8 = inlined_call_operand.hbm [shape: f32[4,32,32], index: 8, kind: input, shape index: {}]   ;;  %s16504_s9 = inlined_call_operand.vmem [shape: f32[1,128], index: 9, kind: input, shape index: {}]   ;;  %s16505_s10 = inlined_call_operand.hbm [shape: f32[64,128], index: 10, kind: input, shape index: {}]   ;;  %s16506_s11 = inlined_call_operand.hbm [shape: f32[4,32,32], index: 11, kind: input, shape index: {}]   ;;  %s16507_s12 = inlined_call_operand.vmem [shape: f32[1,128], index: 12, kind: input, shape index: {}]   ;;  %s16508_s13 = inlined_call_operand.vmem [shape: f32[64,6], index: 13, kind: input, shape index: {}]   ;;  %s16509_s14 = inlined_call_operand.vmem [shape: f32[1,6], index: 14, kind: input, shape index: {}]   ;;  %s16510_s15 = inlined_call_operand.hbm [shape: f32[2,6], index: 15, kind: output, shape index: {}]  }
   0x1   :  { %21 = vsyncpa [#allocation6], 0 }
   0x2   :  { %22 = vsyncpa [#allocation9], 0 }
   0x3   :  { %23 = vsyncpa [#allocation4], 0  ;;  %s14146_s18 = smov [#allocation5]   ;;  %s14147_s20 = smov [#allocation8]  }
   0x4   :  { %s49_s19 = sshll.u32 %s14146_s18, 4  ;;  %s79_s21 = sshll.u32 %s14147_s20, 4  ;;  %s50_s19 = int_to_ptr.vmem [resolvable:$true] %s49_s19  ;;  %s80_s21 = int_to_ptr.vmem [resolvable:$true] %s79_s21 }
   0x5   :  { %s14026_s22 = scalar_lea.vmem %s50_s19, 2048  ;;  %p14031_p1 = scmp.lt.s32.totalorder %s50_s19, %s50_s19 }
   0x6   :  { %p14027_p0 = scmp.ne.s32.totalorder %s50_s19, %s14026_s22  ;;  %p14032_p2 = scmp.lt.s32.totalorder %s14026_s22, %s14026_s22 }
   0x8   :  { %p14033_p3 = por %p14032_p2, %p14031_p1 }
   0xa   :  { %p14034_p4 = pnand %p14033_p3, %p14027_p0 }
   0xc   :  { %14037 = shalt.err (!%p14034_p4)
}
   0xd   :  { %s14148_s23 = smov 128   ;;  %s14149_s24 = smov 8  }
   0xe   :  { %55 = dma.hbm_to_vmem [thread:$0]  %s16500_s5, 2048, %s50_s19, [#allocation6], %s14148_s23, %s14148_s23, %s14149_s24  }
   0xf   :  { %s14046_s27 = scalar_lea.vmem %s80_s21, 1024  ;;  %p14051_p6 = scmp.lt.s32.totalorder %s80_s21, %s80_s21 }
  0x10   :  { %p14047_p5 = scmp.ne.s32.totalorder %s80_s21, %s14046_s27  ;;  %p14052_p7 = scmp.lt.s32.totalorder %s14046_s27, %s14046_s27 }
  0x12   :  { %p14053_p8 = por %p14052_p7, %p14051_p6 }
  0x14   :  { %p14054_p9 = pnand %p14053_p8, %p14047_p5 }
  0x16   :  { %14057 = shalt.err (!%p14054_p9)
}
  0x17   :  { %85 = dma.hbm_to_vmem [thread:$0]  %s16505_s10, 1024, %s80_s21, [#allocation9], %s14148_s23, %s14148_s23, %s14149_s24  }
  0x18   :  { %s14150_s30 = smov [#allocation2]   ;;  %s14151_s17 = smov [#allocation7]  }
  0x19   :  { %s33_s16 = sshll.u32 %s14150_s30, 4  ;;  %s65_s18 = sshll.u32 %s14151_s17, 4  ;;  %s34_s16 = int_to_ptr.vmem [resolvable:$true] %s33_s16  ;;  %s66_s18 = int_to_ptr.vmem [resolvable:$true] %s65_s18 }
  0x1a   :  { %s14066_s5 = scalar_lea.vmem %s34_s16, 2048  ;;  %p14071_p11 = scmp.lt.s32.totalorder %s34_s16, %s34_s16 }
  0x1b   :  { %p14067_p10 = scmp.ne.s32.totalorder %s34_s16, %s14066_s5  ;;  %p14072_p12 = scmp.lt.s32.totalorder %s14066_s5, %s14066_s5 }
  0x1d   :  { %p14073_p13 = por %p14072_p12, %p14071_p11 }
  0x1f   :  { %p14074_p0 = pnand %p14073_p13, %p14067_p10 }
  0x21   :  { %14077 = shalt.err (!%p14074_p0)
}
  0x22   :  { %39 = dma.hbm_to_vmem [thread:$0]  %s16497_s2, 2048, %s34_s16, [#allocation3], %s14148_s23, %s14148_s23, %s14149_s24  }
  0x23   :  { %s14086_s10 = scalar_lea.vmem %s66_s18, 2048  ;;  %p14091_p2 = scmp.lt.s32.totalorder %s66_s18, %s66_s18 }
  0x24   :  { %p14087_p1 = scmp.ne.s32.totalorder %s66_s18, %s14086_s10  ;;  %p14092_p3 = scmp.lt.s32.totalorder %s14086_s10, %s14086_s10 }
  0x26   :  { %p14093_p4 = por %p14092_p3, %p14091_p2 }
  0x28   :  { %p14094_p5 = pnand %p14093_p4, %p14087_p1 }
  0x2a   :  { %14097 = shalt.err (!%p14094_p5)
}
  0x2b   :  { %71 = dma.hbm_to_vmem [thread:$0]  %s16503_s8, 2048, %s66_s18, [#allocation6], %s14148_s23, %s14148_s23, %s14149_s24  }
  0x2c   :  { %s14152_s25 = smov [#allocation10]  }
  0x2d   :  { %s91_s26 = sshll.u32 %s14152_s25, 4  ;;  %s92_s26 = int_to_ptr.vmem [resolvable:$true] %s91_s26 }
  0x2e   :  { %s14106_s27 = scalar_lea.vmem %s92_s26, 2048  ;;  %p14111_p7 = scmp.lt.s32.totalorder %s92_s26, %s92_s26 }
  0x2f   :  { %p14107_p6 = scmp.ne.s32.totalorder %s92_s26, %s14106_s27  ;;  %p14112_p8 = scmp.lt.s32.totalorder %s14106_s27, %s14106_s27 }
  0x31   :  { %p14113_p9 = por %p14112_p8, %p14111_p7 }
  0x33   :  { %p14114_p10 = pnand %p14113_p9, %p14107_p6 }
  0x35   :  { %14117 = shalt.err (!%p14114_p10)
}
  0x36   :  { %97 = dma.hbm_to_vmem [thread:$0]  %s16506_s11, 2048, %s92_s26, [#allocation9], %s14148_s23, %s14148_s23, %s14149_s24  }
  0x37   :  { %14138 = dma.done.wait [#allocation3], 2048  }
  0x38   :  { %14139 = vsyncadd [#allocation3], 4294965248 }
  0x39   :  { %14140 = dma.done.wait [#allocation6], 4096  }
  0x3a   :  { %14141 = vsyncadd [#allocation6], 4294963200 }
  0x3b   :  { %14142 = dma.done.wait [#allocation9], 3072  }
  0x3c   :  { %14143 = vsyncadd [#allocation9], 4294964224  ;;  %v14153_v0 = vmov 0.0   ;;  %vm14154_vm0 = vmmov 0   ;;  %vm140_vm1 = vcmask 1043456   ;;  %vm136_vm2 = vcmask 31744  }
  0x3d   :  { %12149 = vmatprep.subr.mxu0 %v14153_v0  ;;  %12154 = vmatprep.subr.mxu1 %v14153_v0  ;;  %v134_v1 = vld [vmem:[%s16496_s1] sm:$0xf]  ;;  %v11295_v4 = vld [vmem:[%s16495_s0 + $0x4] sm:$0x3]  ;;  %v11296_v5 = vld [vmem:[%s16495_s0 + $0x6] sm:$0x3] }
  0x3e   :  { %12151 = vmatprep.mubr.msk.f32.mxu0 %vm14154_vm0, %v14153_v0  ;;  %12156 = vmatprep.mubr.msk.f32.mxu1 %vm14154_vm0, %v14153_v0  ;;  %v119_v2 = vld [vmem:[%s16495_s0] sm:$0x3]  ;;  %v11294_v3 = vld [vmem:[%s16495_s0 + $0x2] sm:$0x3]  ;;  %v11297_v6 = vld [vmem:[%s16495_s0 + $0x8] sm:$0x3] }
  0x3f   :  { %12150 = vmatpush3.msk.msra.mxu0 %vm140_vm1, %v134_v1  ;;  %12155 = vmatpush3.msk.msra.mxu1 %vm140_vm1, %v134_v1  ;;  %v11298_v7 = vld [vmem:[%s16495_s0 + $0xa] sm:$0x3]  ;;  %v11299_v8 = vld [vmem:[%s16495_s0 + $0xc] sm:$0x3]  ;;  %v11300_v9 = vld [vmem:[%s16495_s0 + $0xe] sm:$0x3] }
  0x40   :  { %12152 = vmatmul.mubr.msk.f32.vlgmr.msra.gmra.mxu0 %vm136_vm2, %v119_v2  ;;  %12157 = vmatmul.mubr.msk.f32.vlgmr.msra.gmra.mxu1 %vm136_vm2, %v11294_v3  ;;  %v14334_v10 = vld [vmem:[#allocation2 + $0x18] sm:$0xff]  ;;  %v14342_v12 = vld [vmem:[#allocation2 + $0x10] sm:$0xff]  ;;  %v14350_v14 = vld [vmem:[#allocation2 + $0x8] sm:$0xff]  ;;  %s14156_s28 = smov 64   ;;  %s14157_s8 = smov 96   ;;  %vm755_vm3 = vcmask 261120  }
  0x41   :  { %12159 = vmatprep.subr.mxu0 %v14153_v0  ;;  %12164 = vmatprep.subr.mxu1 %v14153_v0  ;;  %v14336_v11 = vld [vmem:[#allocation2 + $0x38] sm:$0xff]  ;;  %v14344_v13 = vld [vmem:[#allocation2 + $0x30] sm:$0xff]  ;;  %v14352_v15 = vld [vmem:[#allocation2 + $0x28] sm:$0xff]  ;;  %s14158_s17 = smov [#allocation11]   ;;  %vm11275_vm4 = vcmask 41984  }
  0x42   :  { %12160 = vmatpush3.msk.msra.mxu0 %vm140_vm1, %v134_v1  ;;  %12161 = vmatprep.mubr.msk.f32.mxu0 %vm14154_vm0, %v14153_v0  ;;  %v14358_v16 = vld [vmem:[#allocation2] sm:$0xff]  ;;  %v14372_v18 = vld [vmem:[#allocation2 + $0x58] sm:$0xff]  ;;  %v14379_v20 = vld [vmem:[#allocation2 + $0x50] sm:$0xff]  ;;  %s11283_s18 = sshll.u32 %s14158_s17, 4  ;;  %s11284_s18 = int_to_ptr.vmem [resolvable:$true] %s11283_s18 }
  0x43   :  { %12165 = vmatpush3.msk.msra.mxu1 %vm140_vm1, %v134_v1  ;;  %12166 = vmatprep.mubr.msk.f32.mxu1 %vm14154_vm0, %v14153_v0  ;;  %v14362_v17 = vld [vmem:[#allocation2 + $0x20] sm:$0xff]  ;;  %v14376_v19 = vld [vmem:[#allocation2 + $0x78] sm:$0xff]  ;;  %v14385_v21 = vld [vmem:[#allocation2 + $0x70] sm:$0xff]  ;;  %p14123_p12 = scmp.lt.s32.totalorder %s11284_s18, %s11284_s18 }
  0x44   :  { %12162 = vmatmul.mubr.msk.f32.vlgmr.msra.gmra.mxu0 %vm136_vm2, %v11295_v4  ;;  %12167 = vmatmul.mubr.msk.f32.vlgmr.msra.gmra.mxu1 %vm136_vm2, %v11296_v5  ;;  %v14388_v22 = vld [vmem:[#allocation2 + $0x48] sm:$0xff]  ;;  %v14396_v24 = vld [vmem:[#allocation2 + $0x40] sm:$0xff] }
  0x45   :  { %12169 = vmatprep.subr.mxu0 %v14153_v0  ;;  %12174 = vmatprep.subr.mxu1 %v14153_v0  ;;  %v14393_v23 = vld [vmem:[#allocation2 + $0x68] sm:$0xff]  ;;  %v14401_v25 = vld [vmem:[#allocation2 + $0x60] sm:$0xff] }
  0x46   :  { %12170 = vmatpush3.msk.msra.mxu0 %vm140_vm1, %v134_v1  ;;  %12171 = vmatprep.mubr.msk.f32.mxu0 %vm14154_vm0, %v14153_v0  ;;  %v11303_v26 = vld [vmem:[%s16498_s3] ss:$0 sm:$0xff]  ;;  %s14155_s3 = smov 32  }
  0x47   :  { %12175 = vmatpush3.msk.msra.mxu1 %vm140_vm1, %v134_v1  ;;  %12176 = vmatprep.mubr.msk.f32.mxu1 %vm14154_vm0, %v14153_v0 }
  0x48   :  { %12172 = vmatmul.mubr.msk.f32.vlgmr.msra.gmra.mxu0 %vm136_vm2, %v11297_v6  ;;  %12177 = vmatmul.mubr.msk.f32.vlgmr.msra.gmra.mxu1 %vm136_vm2, %v11298_v7 }
  0x49   :  { %12179 = vmatprep.subr.mxu0 %v14153_v0  ;;  %12184 = vmatprep.subr.mxu1 %v14153_v0 }
  0x4a   :  { %12180 = vmatpush3.msk.msra.mxu0 %vm140_vm1, %v134_v1  ;;  %12185 = vmatpush3.msk.msra.mxu1 %vm140_vm1, %v134_v1 }
  0x4b   :  { %12181 = vmatprep.mubr.msk.f32.mxu0 %vm14154_vm0, %v14153_v0  ;;  %12186 = vmatprep.mubr.msk.f32.mxu1 %vm14154_vm0, %v14153_v0 }
  0x4c   :  { %12189 = vmatprep.subr.mxu0 %v14153_v0  ;;  %12200 = vmatprep.subr.mxu1 %v14153_v0 }
  0x4d   :  { %12182 = vmatmul.mubr.msk.f32.vlgmr.msra.gmra.mxu0 %vm136_vm2, %v11299_v8  ;;  %12187 = vmatmul.mubr.msk.f32.vlgmr.msra.gmra.mxu1 %vm136_vm2, %v11300_v9 }
  0x4e   :  { %12190 = vmatpush3.msra.mxu0 %v14334_v10  ;;  %12201 = vmatpush3.msra.mxu1 %v14336_v11 }
  0x4f   :  { %12191 = vmatprep.subr.mxu0 %v14153_v0  ;;  %12202 = vmatprep.subr.mxu1 %v14153_v0 }
  0x50   :  { %12192 = vmatpush3.msra.mxu0 %v14342_v12  ;;  %12203 = vmatpush3.msra.mxu1 %v14344_v13 }
  0x51   :  { %12193 = vmatprep.subr.mxu0 %v14153_v0  ;;  %12204 = vmatprep.subr.mxu1 %v14153_v0 }
  0x52   :  { %12194 = vmatpush3.msra.mxu0 %v14350_v14  ;;  %12205 = vmatpush3.msra.mxu1 %v14352_v15 }
  0x53   :  { %12195 = vmatprep.subr.mxu0 %v14153_v0  ;;  %12206 = vmatprep.subr.mxu1 %v14153_v0 }
  0x54   :  { %12196 = vmatpush3.msra.mxu0 %v14358_v16  ;;  %12197 = vmatprep.mubr.msk.f32.mxu0 %vm14154_vm0, %v14153_v0 }
  0x55   :  { %12207 = vmatpush3.msra.mxu1 %v14362_v17  ;;  %12208 = vmatprep.mubr.msk.f32.mxu1 %vm14154_vm0, %v14153_v0 }
  0x56   :  { %12198 = vmatmul.mubr.f32.vlgmr.msra.gmra.mxu0 %v14153_v0  ;;  %12209 = vmatmul.mubr.f32.vlgmr.msra.gmra.mxu1 %v14153_v0 }
  0x57   :  { %12211 = vmatprep.subr.mxu0 %v14153_v0  ;;  %12219 = vmatprep.mubr.msk.f32.mxu0 %vm14154_vm0, %v14153_v0 }
  0x58   :  { %12212 = vmatpush3.msra.mxu0 %v14372_v18  ;;  %12222 = vmatprep.subr.mxu1 %v14153_v0 }
  0x59   :  { %12213 = vmatprep.subr.mxu0 %v14153_v0  ;;  %12223 = vmatpush3.msra.mxu1 %v14376_v19 }
  0x5a   :  { %12214 = vmatpush3.msra.mxu0 %v14379_v20  ;;  %12224 = vmatprep.subr.mxu1 %v14153_v0 }
  0x5b   :  { %12215 = vmatprep.subr.mxu0 %v14153_v0  ;;  %12225 = vmatpush3.msra.mxu1 %v14385_v21 }
  0x5c   :  { %12216 = vmatpush3.msra.mxu0 %v14388_v22  ;;  %12226 = vmatprep.subr.mxu1 %v14153_v0 }
  0x5d   :  { %12217 = vmatprep.subr.mxu0 %v14153_v0  ;;  %12227 = vmatpush3.msra.mxu1 %v14393_v23 }
  0x5e   :  { %12218 = vmatpush3.msra.mxu0 %v14396_v24  ;;  %12228 = vmatprep.subr.mxu1 %v14153_v0 }
  0x5f   :  { %12220 = vmatmul.mubr.f32.vlgmr.msra.gmra.mxu0 %v14153_v0  ;;  %12229 = vmatpush3.msra.mxu1 %v14401_v25 }
  0x60   :  { %12230 = vmatprep.mubr.msk.f32.mxu1 %vm14154_vm0, %v14153_v0  ;;  %12233 = vmatprep.subr.mxu0 %v14153_v0 }
  0x61   :  { %12231 = vmatmul.mubr.f32.vlgmr.msra.gmra.mxu1 %v14153_v0  ;;  %12244 = vmatprep.subr.mxu1 %v14153_v0 }
  0x62   :  { %12234 = vmatpush3.msra.mxu0 %v14334_v10  ;;  %12245 = vmatpush3.msra.mxu1 %v14336_v11 }
  0x63   :  { %12235 = vmatprep.subr.mxu0 %v14153_v0  ;;  %12246 = vmatprep.subr.mxu1 %v14153_v0 }
  0x64   :  { %12236 = vmatpush3.msra.mxu0 %v14342_v12  ;;  %12247 = vmatpush3.msra.mxu1 %v14344_v13 }
  0x65   :  { %12237 = vmatprep.subr.mxu0 %v14153_v0  ;;  %12248 = vmatprep.subr.mxu1 %v14153_v0 }
  0x66   :  { %12238 = vmatpush3.msra.mxu0 %v14350_v14  ;;  %12249 = vmatpush3.msra.mxu1 %v14352_v15 }
  0x67   :  { %12239 = vmatprep.subr.mxu0 %v14153_v0  ;;  %12250 = vmatprep.subr.mxu1 %v14153_v0 }
  0x68   :  { %12240 = vmatpush3.msra.mxu0 %v14358_v16  ;;  %12251 = vmatpush3.msra.mxu1 %v14362_v17 }
  0x69   :  { %12241 = vmatprep.mubr.msk.f32.mxu0 %vm14154_vm0, %v14153_v0  ;;  %12252 = vmatprep.mubr.msk.f32.mxu1 %vm14154_vm0, %v14153_v0 }
  0x6a   :  { %12255 = vmatprep.subr.mxu0 %v14153_v0  ;;  %12266 = vmatprep.subr.mxu1 %v14153_v0 }
 0x100   :  { %v210_v27 = vpop.f32.mrf.mxu0  ;;  %v290_v28 = vpop.f32.mrf.mxu1 }
 0x101   :  { %v14437_v29 = vadd.f32 %v11303_v26, %v290_v28  ;;  %v220_v58 = vadd.f32 %v11303_v26, %v210_v27 }
 0x102   :  { %v12153_v30 = vpop.f32.mrf.mxu0  ;;  %v12158_v31 = vpop.f32.mrf.mxu1 }
 0x104   :  { %v364_v32 = vpop.f32.mrf.mxu0  ;;  %v438_v33 = vpop.f32.mrf.mxu1 }
 0x105   :  { %v14439_v34 = vadd.f32 %v11303_v26, %v364_v32  ;;  %v14441_v35 = vadd.f32 %v11303_v26, %v438_v33 }
 0x106   :  { %v12163_v36 = vpop.f32.mrf.mxu0  ;;  %v12168_v37 = vpop.f32.mrf.mxu1 }
 0x108   :  { %v512_v38 = vpop.f32.mrf.mxu0  ;;  %v586_v39 = vpop.f32.mrf.mxu1 }
 0x109   :  { %v14443_v40 = vadd.f32 %v11303_v26, %v512_v38  ;;  %v14445_v41 = vadd.f32 %v11303_v26, %v586_v39 }
 0x10a   :  { %v12173_v42 = vpop.f32.mrf.mxu0  ;;  %v12178_v43 = vpop.f32.mrf.mxu1 }
 0x10d   :  { %v660_v44 = vpop.f32.mrf.mxu0  ;;  %v734_v45 = vpop.f32.mrf.mxu1 }
 0x10e   :  { %v14447_v46 = vadd.f32 %v11303_v26, %v660_v44  ;;  %v14449_v47 = vadd.f32 %v11303_v26, %v734_v45 }
 0x10f   :  { %v12183_v48 = vpop.f32.mrf.mxu0  ;;  %v12188_v49 = vpop.f32.mrf.mxu1 }
 0x116   :  { %v825_v50 = vpop.f32.mrf.mxu0  ;;  %v902_v51 = vpop.f32.mrf.mxu1 }
 0x117   :  { %907 = vrot.lane.b32.xlu1 %v902_v51, %s14155_s3  ;;  %v829_v62 = vadd.f32 %v825_v50, %v220_v58 }
 0x118   :  { %v12199_v52 = vpop.f32.mrf.mxu0  ;;  %v12210_v53 = vpop.f32.mrf.mxu1 }
 0x119   :  { %v11318_v63 = vmul.f32 -1.442695, %v829_v62 }
 0x11f   :  { %v983_v54 = vpop.f32.mrf.mxu0 }
 0x120   :  { %988 = vrot.lane.b32.xlu0 %v983_v54, %s14156_s28 }
 0x121   :  { %v12221_v55 = vpop.f32.mrf.mxu0  ;;  %v1059_v56 = vpop.f32.mrf.mxu1 }
 0x123   :  { %v12232_v57 = vpop.f32.mrf.mxu1 }
 0x189   :  { %v908_v6 = vpop.permute.xlu1 %907 }
 0x18a   :  { %v910_v7 = vadd.f32 %v908_v6, %v220_v58 }
 0x18c   :  { %v11319_v8 = vmul.f32 -1.442695, %v910_v7 }
 0x192   :  { %v989_v59 = vpop.permute.xlu0 %988 }
 0x193   :  { %v991_v60 = vadd.f32 %v989_v59, %v220_v58 }
 0x195   :  { %13562 = vtanh.f32 %v991_v60 }
 0x196   :  { %13564 = vpow2.f32 %v11318_v63 }
 0x1a2   :  { %v13563_v61 = vpop.eup %13562 }
 0x1a3   :  { %1076 = vrot.lane.b32.xlu0 %v13563_v61, %s14156_s28  ;;  %v13565_v1 = vpop.eup %13564 }
 0x1a4   :  { %v833_v2 = vadd.f32 1.0, %v13565_v1 }
 0x1a6   :  { %13566 = vrcp.f32 %v833_v2 }
 0x1a7   :  { %1064 = vrot.lane.b32.xlu0 %v1059_v56, %s14157_s8  ;;  %13568 = vpow2.f32 %v11319_v8 }
 0x1b3   :  { %v13567_v3 = vpop.eup %13566 }
 0x1b4   :  { %v13569_v9 = vpop.eup %13568 }
 0x1b5   :  { %v914_v26 = vadd.f32 1.0, %v13569_v9 }
 0x1b7   :  { %13570 = vrcp.f32 %v914_v26 }
 0x1c4   :  { %v13571_v27 = vpop.eup %13570 }
 0x1c5   :  { %v1074_v28 = vmul.f32 0.0, %v13571_v27 }
 0x215   :  { %v1077_v4 = vpop.permute.xlu0 %1076 }
 0x216   :  { %v1079_v5 = vmul.f32 %v13567_v3, %v1077_v4 }
 0x218   :  { %1081 = vrot.lane.b32.xlu1 %v1079_v5, %s14155_s3 }
 0x219   :  { %v1065_v33 = vpop.permute.xlu0 %1064 }
 0x21a   :  { %v1067_v36 = vadd.f32 %v1065_v33, %v220_v58 }
 0x21c   :  { %v11320_v37 = vmul.f32 -1.442695, %v1067_v36 }
 0x28a   :  { %v1082_v30 = vpop.permute.xlu1 %1081 }
 0x28b   :  { %v14456_v31 = vadd.f32 %v1082_v30, %v1074_v28 }
 0x28d   :  { %13572 = vtanh.f32 %v14456_v31 }
 0x28e   :  { %13574 = vpow2.f32 %v11320_v37 }
 0x29a   :  { %v13573_v32 = vpop.eup %13572 }
 0x29b   :  { %1087 = vrot.lane.b32.xlu1 %v13573_v32, %s14156_s28  ;;  %v13575_v38 = vpop.eup %13574 }
 0x29c   :  { %v1071_v39 = vadd.f32 1.0, %v13575_v38 }
 0x29e   :  { %13576 = vrcp.f32 %v1071_v39 }
 0x2ab   :  { %v13577_v42 = vpop.eup %13576 }
 0x30d   :  { %v1088_v43 = vpop.permute.xlu1 %1087 }
 0x30e   :  { %v1090_v44 = vmul.f32 %v13577_v42, %v1088_v43 }
 0x310   :  { %1092 = vrot.lane.b32.xlu0 %v1090_v44, %s14155_s3 }
 0x382   :  { %v14461_v45 = vpop.permute.xlu0 %1092 }
 0x383   :  { %12242 = vmatmul.mubr.msk.f32.vlgmr.msra.gmra.mxu0 %vm755_vm3, %v14461_v45  ;;  %12253 = vmatmul.mubr.msk.f32.vlgmr.msra.gmra.mxu1 %vm755_vm3, %v14461_v45 }
 0x384   :  { %12256 = vmatpush3.msra.mxu0 %v14372_v18  ;;  %12267 = vmatpush3.msra.mxu1 %v14376_v19 }
 0x385   :  { %12257 = vmatprep.subr.mxu0 %v14153_v0  ;;  %12268 = vmatprep.subr.mxu1 %v14153_v0 }
 0x386   :  { %12258 = vmatpush3.msra.mxu0 %v14379_v20  ;;  %12269 = vmatpush3.msra.mxu1 %v14385_v21 }
 0x387   :  { %12259 = vmatprep.subr.mxu0 %v14153_v0  ;;  %12270 = vmatprep.subr.mxu1 %v14153_v0 }
 0x388   :  { %12260 = vmatpush3.msra.mxu0 %v14388_v22  ;;  %12271 = vmatpush3.msra.mxu1 %v14393_v23 }
 0x389   :  { %12261 = vmatprep.subr.mxu0 %v14153_v0  ;;  %12272 = vmatprep.subr.mxu1 %v14153_v0 }
 0x38a   :  { %12262 = vmatpush3.msra.mxu0 %v14396_v24  ;;  %12263 = vmatprep.mubr.msk.f32.mxu0 %vm14154_vm0, %v14153_v0 }
 0x38b   :  { %12273 = vmatpush3.msra.mxu1 %v14401_v25  ;;  %12274 = vmatprep.mubr.msk.f32.mxu1 %vm14154_vm0, %v14153_v0 }
 0x38c   :  { %12264 = vmatmul.mubr.msk.f32.vlgmr.msra.gmra.mxu0 %vm755_vm3, %v14461_v45  ;;  %12275 = vmatmul.mubr.msk.f32.vlgmr.msra.gmra.mxu1 %vm755_vm3, %v14461_v45 }
 0x38d   :  { %12277 = vmatprep.subr.mxu0 %v14153_v0  ;;  %12288 = vmatprep.subr.mxu1 %v14153_v0 }
 0x38e   :  { %12278 = vmatpush3.msra.mxu0 %v14334_v10  ;;  %12289 = vmatpush3.msra.mxu1 %v14336_v11 }
 0x38f   :  { %12279 = vmatprep.subr.mxu0 %v14153_v0  ;;  %12290 = vmatprep.subr.mxu1 %v14153_v0 }
 0x390   :  { %12280 = vmatpush3.msra.mxu0 %v14342_v12  ;;  %12291 = vmatpush3.msra.mxu1 %v14344_v13 }
 0x391   :  { %12281 = vmatprep.subr.mxu0 %v14153_v0  ;;  %12292 = vmatprep.subr.mxu1 %v14153_v0 }
 0x392   :  { %12282 = vmatpush3.msra.mxu0 %v14350_v14  ;;  %12293 = vmatpush3.msra.mxu1 %v14352_v15 }
 0x393   :  { %12283 = vmatprep.subr.mxu0 %v14153_v0  ;;  %12294 = vmatprep.subr.mxu1 %v14153_v0 }
 0x394   :  { %12284 = vmatpush3.msra.mxu0 %v14358_v16  ;;  %12295 = vmatpush3.msra.mxu1 %v14362_v17 }
 0x395   :  { %12285 = vmatprep.mubr.msk.f32.mxu0 %vm14154_vm0, %v14153_v0  ;;  %12296 = vmatprep.mubr.msk.f32.mxu1 %vm14154_vm0, %v14153_v0 }
 0x396   :  { %12299 = vmatprep.subr.mxu0 %v14153_v0  ;;  %12310 = vmatprep.subr.mxu1 %v14153_v0 }
 0x443   :  { %v1162_v48 = vpop.f32.mrf.mxu0  ;;  %v1239_v49 = vpop.f32.mrf.mxu1 }
 0x444   :  { %v1166_v59 = vadd.f32 %v1162_v48, %v14437_v29 }
 0x445   :  { %v12243_v50 = vpop.f32.mrf.mxu0  ;;  %v12254_v51 = vpop.f32.mrf.mxu1 }
 0x446   :  { %v11322_v60 = vmul.f32 -1.442695, %v1166_v59 }
 0x44c   :  { %v1320_v52 = vpop.f32.mrf.mxu0  ;;  %v1396_v53 = vpop.f32.mrf.mxu1 }
 0x44d   :  { %1325 = vrot.lane.b32.xlu1 %v1320_v52, %s14156_s28 }
 0x44e   :  { %v12265_v54 = vpop.f32.mrf.mxu0  ;;  %v12276_v55 = vpop.f32.mrf.mxu1 }
 0x451   :  { %1244 = vrot.lane.b32.xlu1 %v1239_v49, %s14155_s3 }
 0x455   :  { %1401 = vrot.lane.b32.xlu1 %v1396_v53, %s14157_s8 }
 0x4bf   :  { %v1326_v56 = vpop.permute.xlu1 %1325 }
 0x4c0   :  { %v1328_v57 = vadd.f32 %v1326_v56, %v14437_v29 }
 0x4c2   :  { %13578 = vtanh.f32 %v1328_v57 }
 0x4c3   :  { %13580 = vpow2.f32 %v11322_v60  ;;  %v1245_v3 = vpop.permute.xlu1 %1244 }
 0x4c4   :  { %v1247_v4 = vadd.f32 %v1245_v3, %v14437_v29 }
 0x4c6   :  { %v11324_v5 = vmul.f32 -1.442695, %v1247_v4 }
 0x4c7   :  { %v1402_v30 = vpop.permute.xlu1 %1401 }
 0x4c8   :  { %v1404_v32 = vadd.f32 %v1402_v30, %v14437_v29 }
 0x4ca   :  { %v11327_v33 = vmul.f32 -1.442695, %v1404_v32 }
 0x4cf   :  { %v13579_v58 = vpop.eup %13578 }
 0x4d0   :  { %1413 = vrot.lane.b32.xlu0 %v13579_v58, %s14156_s28  ;;  %v13581_v61 = vpop.eup %13580 }
 0x4d1   :  { %v1170_v62 = vadd.f32 1.0, %v13581_v61 }
 0x4d3   :  { %13582 = vrcp.f32 %v1170_v62 }
 0x4d4   :  { %13584 = vpow2.f32 %v11324_v5 }
 0x4e0   :  { %v13583_v63 = vpop.eup %13582 }
 0x4e1   :  { %v13585_v6 = vpop.eup %13584 }
 0x4e2   :  { %v1251_v7 = vadd.f32 1.0, %v13585_v6 }
 0x4e4   :  { %13586 = vrcp.f32 %v1251_v7 }
 0x4f1   :  { %v13587_v8 = vpop.eup %13586 }
 0x4f2   :  { %v1411_v9 = vmul.f32 %v13587_v8, %v14456_v31 }
 0x542   :  { %v1414_v1 = vpop.permute.xlu0 %1413 }
 0x543   :  { %v1416_v2 = vmul.f32 %v13583_v63, %v1414_v1 }
 0x545   :  { %1418 = vrot.lane.b32.xlu0 %v1416_v2, %s14155_s3 }
 0x5b7   :  { %v1419_v26 = vpop.permute.xlu0 %1418 }
 0x5b8   :  { %v14520_v27 = vadd.f32 %v1419_v26, %v1411_v9 }
 0x5ba   :  { %13588 = vtanh.f32 %v14520_v27 }
 0x5bb   :  { %13590 = vpow2.f32 %v11327_v33 }
 0x5c7   :  { %v13589_v28 = vpop.eup %13588 }
 0x5c8   :  { %1424 = vrot.lane.b32.xlu0 %v13589_v28, %s14156_s28  ;;  %v13591_v36 = vpop.eup %13590 }
 0x5c9   :  { %v1408_v37 = vadd.f32 1.0, %v13591_v36 }
 0x5cb   :  { %13592 = vrcp.f32 %v1408_v37 }
 0x5d8   :  { %v13593_v38 = vpop.eup %13592 }
 0x63a   :  { %v1425_v39 = vpop.permute.xlu0 %1424 }
 0x63b   :  { %v1427_v42 = vmul.f32 %v13593_v38, %v1425_v39 }
 0x63d   :  { %1429 = vrot.lane.b32.xlu1 %v1427_v42, %s14155_s3 }
 0x6af   :  { %v14526_v31 = vpop.permute.xlu1 %1429 }
 0x6b0   :  { %12286 = vmatmul.mubr.msk.f32.vlgmr.msra.gmra.mxu0 %vm755_vm3, %v14526_v31  ;;  %12297 = vmatmul.mubr.msk.f32.vlgmr.msra.gmra.mxu1 %vm755_vm3, %v14526_v31 }
 0x6b1   :  { %12300 = vmatpush3.msra.mxu0 %v14372_v18  ;;  %12311 = vmatpush3.msra.mxu1 %v14376_v19 }
 0x6b2   :  { %12301 = vmatprep.subr.mxu0 %v14153_v0  ;;  %12312 = vmatprep.subr.mxu1 %v14153_v0 }
 0x6b3   :  { %12302 = vmatpush3.msra.mxu0 %v14379_v20  ;;  %12313 = vmatpush3.msra.mxu1 %v14385_v21 }
 0x6b4   :  { %12303 = vmatprep.subr.mxu0 %v14153_v0  ;;  %12314 = vmatprep.subr.mxu1 %v14153_v0 }
 0x6b5   :  { %12304 = vmatpush3.msra.mxu0 %v14388_v22  ;;  %12315 = vmatpush3.msra.mxu1 %v14393_v23 }
 0x6b6   :  { %12305 = vmatprep.subr.mxu0 %v14153_v0  ;;  %12316 = vmatprep.subr.mxu1 %v14153_v0 }
 0x6b7   :  { %12306 = vmatpush3.msra.mxu0 %v14396_v24  ;;  %12307 = vmatprep.mubr.msk.f32.mxu0 %vm14154_vm0, %v14153_v0 }
 0x6b8   :  { %12317 = vmatpush3.msra.mxu1 %v14401_v25  ;;  %12318 = vmatprep.mubr.msk.f32.mxu1 %vm14154_vm0, %v14153_v0 }
 0x6b9   :  { %12308 = vmatmul.mubr.msk.f32.vlgmr.msra.gmra.mxu0 %vm755_vm3, %v14526_v31  ;;  %12319 = vmatmul.mubr.msk.f32.vlgmr.msra.gmra.mxu1 %vm755_vm3, %v14526_v31 }
 0x6ba   :  { %12321 = vmatprep.subr.mxu0 %v14153_v0  ;;  %12332 = vmatprep.subr.mxu1 %v14153_v0 }
 0x6bb   :  { %12322 = vmatpush3.msra.mxu0 %v14334_v10  ;;  %12333 = vmatpush3.msra.mxu1 %v14336_v11 }
 0x6bc   :  { %12323 = vmatprep.subr.mxu0 %v14153_v0  ;;  %12334 = vmatprep.subr.mxu1 %v14153_v0 }
 0x6bd   :  { %12324 = vmatpush3.msra.mxu0 %v14342_v12  ;;  %12335 = vmatpush3.msra.mxu1 %v14344_v13 }
 0x6be   :  { %12325 = vmatprep.subr.mxu0 %v14153_v0  ;;  %12336 = vmatprep.subr.mxu1 %v14153_v0 }
 0x6bf   :  { %12326 = vmatpush3.msra.mxu0 %v14350_v14  ;;  %12337 = vmatpush3.msra.mxu1 %v14352_v15 }
 0x6c0   :  { %12327 = vmatprep.subr.mxu0 %v14153_v0  ;;  %12338 = vmatprep.subr.mxu1 %v14153_v0 }
 0x6c1   :  { %12328 = vmatpush3.msra.mxu0 %v14358_v16  ;;  %12339 = vmatpush3.msra.mxu1 %v14362_v17 }
 0x6c2   :  { %12329 = vmatprep.mubr.msk.f32.mxu0 %vm14154_vm0, %v14153_v0  ;;  %12340 = vmatprep.mubr.msk.f32.mxu1 %vm14154_vm0, %v14153_v0 }
 0x6c3   :  { %12343 = vmatprep.subr.mxu0 %v14153_v0  ;;  %12354 = vmatprep.subr.mxu1 %v14153_v0 }
 0x770   :  { %v1499_v29 = vpop.f32.mrf.mxu0  ;;  %v1576_v43 = vpop.f32.mrf.mxu1 }
 0x771   :  { %v1503_v56 = vadd.f32 %v1499_v29, %v14439_v34 }
 0x772   :  { %v12287_v44 = vpop.f32.mrf.mxu0  ;;  %v12298_v48 = vpop.f32.mrf.mxu1 }
 0x773   :  { %v11329_v57 = vmul.f32 -1.442695, %v1503_v56 }
 0x779   :  { %v1657_v49 = vpop.f32.mrf.mxu0  ;;  %v1733_v50 = vpop.f32.mrf.mxu1 }
 0x77a   :  { %1662 = vrot.lane.b32.xlu0 %v1657_v49, %s14156_s28 }
 0x77b   :  { %v12309_v51 = vpop.f32.mrf.mxu0  ;;  %v12320_v52 = vpop.f32.mrf.mxu1 }
 0x77e   :  { %1581 = vrot.lane.b32.xlu0 %v1576_v43, %s14155_s3 }
 0x782   :  { %1738 = vrot.lane.b32.xlu0 %v1733_v50, %s14157_s8 }
 0x7ec   :  { %v1663_v53 = vpop.permute.xlu0 %1662 }
 0x7ed   :  { %v1665_v54 = vadd.f32 %v1663_v53, %v14439_v34 }
 0x7ef   :  { %13594 = vtanh.f32 %v1665_v54 }
 0x7f0   :  { %13596 = vpow2.f32 %v11329_v57  ;;  %v1582_v63 = vpop.permute.xlu0 %1581 }
 0x7f1   :  { %v1584_v1 = vadd.f32 %v1582_v63, %v14439_v34 }
 0x7f3   :  { %v11331_v2 = vmul.f32 -1.442695, %v1584_v1 }
 0x7f4   :  { %v1739_v26 = vpop.permute.xlu0 %1738 }
 0x7f5   :  { %v1741_v28 = vadd.f32 %v1739_v26, %v14439_v34 }
 0x7f7   :  { %v11334_v30 = vmul.f32 -1.442695, %v1741_v28 }
 0x7fc   :  { %v13595_v55 = vpop.eup %13594 }
 0x7fd   :  { %1750 = vrot.lane.b32.xlu1 %v13595_v55, %s14156_s28  ;;  %v13597_v58 = vpop.eup %13596 }
 0x7fe   :  { %v1507_v59 = vadd.f32 1.0, %v13597_v58 }
 0x800   :  { %13598 = vrcp.f32 %v1507_v59 }
 0x801   :  { %13600 = vpow2.f32 %v11331_v2 }
 0x80d   :  { %v13599_v60 = vpop.eup %13598 }
 0x80e   :  { %v13601_v3 = vpop.eup %13600 }
 0x80f   :  { %v1588_v4 = vadd.f32 1.0, %v13601_v3 }
 0x811   :  { %13602 = vrcp.f32 %v1588_v4 }
 0x81e   :  { %v13603_v5 = vpop.eup %13602 }
 0x81f   :  { %v1748_v6 = vmul.f32 %v13603_v5, %v14520_v27 }
 0x86f   :  { %v1751_v61 = vpop.permute.xlu1 %1750 }
 0x870   :  { %v1753_v62 = vmul.f32 %v13599_v60, %v1751_v61 }
 0x872   :  { %1755 = vrot.lane.b32.xlu1 %v1753_v62, %s14155_s3 }
 0x8e4   :  { %v1756_v7 = vpop.permute.xlu1 %1755 }
 0x8e5   :  { %v14585_v8 = vadd.f32 %v1756_v7, %v1748_v6 }
 0x8e7   :  { %13604 = vtanh.f32 %v14585_v8 }
 0x8e8   :  { %13606 = vpow2.f32 %v11334_v30 }
 0x8f4   :  { %v13605_v9 = vpop.eup %13604 }
 0x8f5   :  { %1761 = vrot.lane.b32.xlu1 %v13605_v9, %s14156_s28  ;;  %v13607_v32 = vpop.eup %13606 }
 0x8f6   :  { %v1745_v33 = vadd.f32 1.0, %v13607_v32 }
 0x8f8   :  { %13608 = vrcp.f32 %v1745_v33 }
 0x905   :  { %v13609_v36 = vpop.eup %13608 }
 0x967   :  { %v1762_v37 = vpop.permute.xlu1 %1761 }
 0x968   :  { %v1764_v38 = vmul.f32 %v13609_v36, %v1762_v37 }
 0x96a   :  { %1766 = vrot.lane.b32.xlu0 %v1764_v38, %s14155_s3 }
 0x9dc   :  { %v14591_v27 = vpop.permute.xlu0 %1766 }
 0x9dd   :  { %12330 = vmatmul.mubr.msk.f32.vlgmr.msra.gmra.mxu0 %vm755_vm3, %v14591_v27  ;;  %12341 = vmatmul.mubr.msk.f32.vlgmr.msra.gmra.mxu1 %vm755_vm3, %v14591_v27 }
 0x9de   :  { %12344 = vmatpush3.msra.mxu0 %v14372_v18  ;;  %12355 = vmatpush3.msra.mxu1 %v14376_v19 }
 0x9df   :  { %12345 = vmatprep.subr.mxu0 %v14153_v0  ;;  %12356 = vmatprep.subr.mxu1 %v14153_v0 }
 0x9e0   :  { %12346 = vmatpush3.msra.mxu0 %v14379_v20  ;;  %12357 = vmatpush3.msra.mxu1 %v14385_v21 }
 0x9e1   :  { %12347 = vmatprep.subr.mxu0 %v14153_v0  ;;  %12358 = vmatprep.subr.mxu1 %v14153_v0 }
 0x9e2   :  { %12348 = vmatpush3.msra.mxu0 %v14388_v22  ;;  %12359 = vmatpush3.msra.mxu1 %v14393_v23 }
 0x9e3   :  { %12349 = vmatprep.subr.mxu0 %v14153_v0  ;;  %12360 = vmatprep.subr.mxu1 %v14153_v0 }
 0x9e4   :  { %12350 = vmatpush3.msra.mxu0 %v14396_v24  ;;  %12351 = vmatprep.mubr.msk.f32.mxu0 %vm14154_vm0, %v14153_v0 }
 0x9e5   :  { %12361 = vmatpush3.msra.mxu1 %v14401_v25  ;;  %12362 = vmatprep.mubr.msk.f32.mxu1 %vm14154_vm0, %v14153_v0 }
 0x9e6   :  { %12352 = vmatmul.mubr.msk.f32.vlgmr.msra.gmra.mxu0 %vm755_vm3, %v14591_v27  ;;  %12363 = vmatmul.mubr.msk.f32.vlgmr.msra.gmra.mxu1 %vm755_vm3, %v14591_v27 }
 0x9e7   :  { %12365 = vmatprep.subr.mxu0 %v14153_v0  ;;  %12376 = vmatprep.subr.mxu1 %v14153_v0 }
 0x9e8   :  { %12366 = vmatpush3.msra.mxu0 %v14334_v10  ;;  %12377 = vmatpush3.msra.mxu1 %v14336_v11 }
 0x9e9   :  { %12367 = vmatprep.subr.mxu0 %v14153_v0  ;;  %12378 = vmatprep.subr.mxu1 %v14153_v0 }
 0x9ea   :  { %12368 = vmatpush3.msra.mxu0 %v14342_v12  ;;  %12379 = vmatpush3.msra.mxu1 %v14344_v13 }
 0x9eb   :  { %12369 = vmatprep.subr.mxu0 %v14153_v0  ;;  %12380 = vmatprep.subr.mxu1 %v14153_v0 }
 0x9ec   :  { %12370 = vmatpush3.msra.mxu0 %v14350_v14  ;;  %12381 = vmatpush3.msra.mxu1 %v14352_v15 }
 0x9ed   :  { %12371 = vmatprep.subr.mxu0 %v14153_v0  ;;  %12382 = vmatprep.subr.mxu1 %v14153_v0 }
 0x9ee   :  { %12372 = vmatpush3.msra.mxu0 %v14358_v16  ;;  %12383 = vmatpush3.msra.mxu1 %v14362_v17 }
 0x9ef   :  { %12373 = vmatprep.mubr.msk.f32.mxu0 %vm14154_vm0, %v14153_v0  ;;  %12384 = vmatprep.mubr.msk.f32.mxu1 %vm14154_vm0, %v14153_v0 }
 0x9f0   :  { %12387 = vmatprep.subr.mxu0 %v14153_v0  ;;  %12398 = vmatprep.subr.mxu1 %v14153_v0 }
 0xa9d   :  { %v1836_v34 = vpop.f32.mrf.mxu0  ;;  %v1913_v39 = vpop.f32.mrf.mxu1 }
 0xa9e   :  { %v1840_v53 = vadd.f32 %v1836_v34, %v14441_v35 }
 0xa9f   :  { %v12331_v42 = vpop.f32.mrf.mxu0  ;;  %v12342_v29 = vpop.f32.mrf.mxu1 }
 0xaa0   :  { %v11336_v54 = vmul.f32 -1.442695, %v1840_v53 }
 0xaa6   :  { %v1994_v43 = vpop.f32.mrf.mxu0  ;;  %v2070_v44 = vpop.f32.mrf.mxu1 }
 0xaa7   :  { %1999 = vrot.lane.b32.xlu1 %v1994_v43, %s14156_s28 }
 0xaa8   :  { %v12353_v48 = vpop.f32.mrf.mxu0  ;;  %v12364_v49 = vpop.f32.mrf.mxu1 }
 0xaab   :  { %1918 = vrot.lane.b32.xlu1 %v1913_v39, %s14155_s3 }
 0xaaf   :  { %2075 = vrot.lane.b32.xlu1 %v2070_v44, %s14157_s8 }
 0xb19   :  { %v2000_v50 = vpop.permute.xlu1 %1999 }
 0xb1a   :  { %v2002_v51 = vadd.f32 %v2000_v50, %v14441_v35 }
 0xb1c   :  { %13610 = vtanh.f32 %v2002_v51 }
 0xb1d   :  { %13612 = vpow2.f32 %v11336_v54  ;;  %v1919_v60 = vpop.permute.xlu1 %1918 }
 0xb1e   :  { %v1921_v61 = vadd.f32 %v1919_v60, %v14441_v35 }
 0xb20   :  { %v11338_v62 = vmul.f32 -1.442695, %v1921_v61 }
 0xb21   :  { %v2076_v7 = vpop.permute.xlu1 %2075 }
 0xb22   :  { %v2078_v9 = vadd.f32 %v2076_v7, %v14441_v35 }
 0xb24   :  { %v11341_v26 = vmul.f32 -1.442695, %v2078_v9 }
 0xb29   :  { %v13611_v52 = vpop.eup %13610 }
 0xb2a   :  { %2087 = vrot.lane.b32.xlu0 %v13611_v52, %s14156_s28  ;;  %v13613_v55 = vpop.eup %13612 }
 0xb2b   :  { %v1844_v56 = vadd.f32 1.0, %v13613_v55 }
 0xb2d   :  { %13614 = vrcp.f32 %v1844_v56 }
 0xb2e   :  { %13616 = vpow2.f32 %v11338_v62 }
 0xb3a   :  { %v13615_v57 = vpop.eup %13614 }
 0xb3b   :  { %v13617_v63 = vpop.eup %13616 }
 0xb3c   :  { %v1925_v1 = vadd.f32 1.0, %v13617_v63 }
 0xb3e   :  { %13618 = vrcp.f32 %v1925_v1 }
 0xb4b   :  { %v13619_v2 = vpop.eup %13618 }
 0xb4c   :  { %v2085_v3 = vmul.f32 %v13619_v2, %v14585_v8 }
 0xb9c   :  { %v2088_v58 = vpop.permute.xlu0 %2087 }
 0xb9d   :  { %v2090_v59 = vmul.f32 %v13615_v57, %v2088_v58 }
 0xb9f   :  { %2092 = vrot.lane.b32.xlu0 %v2090_v59, %s14155_s3 }
 0xc11   :  { %v2093_v4 = vpop.permute.xlu0 %2092 }
 0xc12   :  { %v14650_v5 = vadd.f32 %v2093_v4, %v2085_v3 }
 0xc14   :  { %13620 = vtanh.f32 %v14650_v5 }
 0xc15   :  { %13622 = vpow2.f32 %v11341_v26 }
 0xc21   :  { %v13621_v6 = vpop.eup %13620 }
 0xc22   :  { %2098 = vrot.lane.b32.xlu0 %v13621_v6, %s14156_s28  ;;  %v13623_v28 = vpop.eup %13622 }
 0xc23   :  { %v2082_v30 = vadd.f32 1.0, %v13623_v28 }
 0xc25   :  { %13624 = vrcp.f32 %v2082_v30 }
 0xc32   :  { %v13625_v32 = vpop.eup %13624 }
 0xc94   :  { %v2099_v33 = vpop.permute.xlu0 %2098 }
 0xc95   :  { %v2101_v36 = vmul.f32 %v13625_v32, %v2099_v33 }
 0xc97   :  { %2103 = vrot.lane.b32.xlu1 %v2101_v36, %s14155_s3 }
 0xd09   :  { %v14656_v8 = vpop.permute.xlu1 %2103 }
 0xd0a   :  { %12374 = vmatmul.mubr.msk.f32.vlgmr.msra.gmra.mxu0 %vm755_vm3, %v14656_v8  ;;  %12385 = vmatmul.mubr.msk.f32.vlgmr.msra.gmra.mxu1 %vm755_vm3, %v14656_v8 }
 0xd0b   :  { %12388 = vmatpush3.msra.mxu0 %v14372_v18  ;;  %12399 = vmatpush3.msra.mxu1 %v14376_v19 }
 0xd0c   :  { %12389 = vmatprep.subr.mxu0 %v14153_v0  ;;  %12400 = vmatprep.subr.mxu1 %v14153_v0 }
 0xd0d   :  { %12390 = vmatpush3.msra.mxu0 %v14379_v20  ;;  %12401 = vmatpush3.msra.mxu1 %v14385_v21 }
 0xd0e   :  { %12391 = vmatprep.subr.mxu0 %v14153_v0  ;;  %12402 = vmatprep.subr.mxu1 %v14153_v0 }
 0xd0f   :  { %12392 = vmatpush3.msra.mxu0 %v14388_v22  ;;  %12403 = vmatpush3.msra.mxu1 %v14393_v23 }
 0xd10   :  { %12393 = vmatprep.subr.mxu0 %v14153_v0  ;;  %12404 = vmatprep.subr.mxu1 %v14153_v0 }
 0xd11   :  { %12394 = vmatpush3.msra.mxu0 %v14396_v24  ;;  %12395 = vmatprep.mubr.msk.f32.mxu0 %vm14154_vm0, %v14153_v0 }
 0xd12   :  { %12405 = vmatpush3.msra.mxu1 %v14401_v25  ;;  %12406 = vmatprep.mubr.msk.f32.mxu1 %vm14154_vm0, %v14153_v0 }
 0xd13   :  { %12396 = vmatmul.mubr.msk.f32.vlgmr.msra.gmra.mxu0 %vm755_vm3, %v14656_v8  ;;  %12407 = vmatmul.mubr.msk.f32.vlgmr.msra.gmra.mxu1 %vm755_vm3, %v14656_v8 }
 0xd14   :  { %12409 = vmatprep.subr.mxu0 %v14153_v0  ;;  %12420 = vmatprep.subr.mxu1 %v14153_v0 }
 0xd15   :  { %12410 = vmatpush3.msra.mxu0 %v14334_v10  ;;  %12421 = vmatpush3.msra.mxu1 %v14336_v11 }
 0xd16   :  { %12411 = vmatprep.subr.mxu0 %v14153_v0  ;;  %12422 = vmatprep.subr.mxu1 %v14153_v0 }
 0xd17   :  { %12412 = vmatpush3.msra.mxu0 %v14342_v12  ;;  %12423 = vmatpush3.msra.mxu1 %v14344_v13 }
 0xd18   :  { %12413 = vmatprep.subr.mxu0 %v14153_v0  ;;  %12424 = vmatprep.subr.mxu1 %v14153_v0 }
 0xd19   :  { %12414 = vmatpush3.msra.mxu0 %v14350_v14  ;;  %12425 = vmatpush3.msra.mxu1 %v14352_v15 }
 0xd1a   :  { %12415 = vmatprep.subr.mxu0 %v14153_v0  ;;  %12426 = vmatprep.subr.mxu1 %v14153_v0 }
 0xd1b   :  { %12416 = vmatpush3.msra.mxu0 %v14358_v16  ;;  %12427 = vmatpush3.msra.mxu1 %v14362_v17 }
 0xd1c   :  { %12417 = vmatprep.mubr.msk.f32.mxu0 %vm14154_vm0, %v14153_v0  ;;  %12428 = vmatprep.mubr.msk.f32.mxu1 %vm14154_vm0, %v14153_v0 }
 0xd1d   :  { %12431 = vmatprep.subr.mxu0 %v14153_v0  ;;  %12442 = vmatprep.subr.mxu1 %v14153_v0 }
 0xdca   :  { %v2173_v10 = vpop.f32.mrf.mxu0  ;;  %v2250_v11 = vpop.f32.mrf.mxu1 }
 0xdcb   :  { %v2177_v34 = vadd.f32 %v2173_v10, %v14443_v40 }
 0xdcc   :  { %v12375_v12 = vpop.f32.mrf.mxu0  ;;  %v12386_v13 = vpop.f32.mrf.mxu1 }
 0xdcd   :  { %v11343_v39 = vmul.f32 -1.442695, %v2177_v34 }
 0xdd3   :  { %v2331_v14 = vpop.f32.mrf.mxu0  ;;  %v2407_v15 = vpop.f32.mrf.mxu1 }
 0xdd4   :  { %2336 = vrot.lane.b32.xlu0 %v2331_v14, %s14156_s28 }
 0xdd5   :  { %v12397_v16 = vpop.f32.mrf.mxu0  ;;  %v12408_v17 = vpop.f32.mrf.mxu1 }
 0xdd8   :  { %2255 = vrot.lane.b32.xlu0 %v2250_v11, %s14155_s3 }
 0xddc   :  { %2412 = vrot.lane.b32.xlu0 %v2407_v15, %s14157_s8 }
 0xe46   :  { %v2337_v35 = vpop.permute.xlu0 %2336 }
 0xe47   :  { %v2339_v37 = vadd.f32 %v2337_v35, %v14443_v40 }
 0xe49   :  { %13626 = vtanh.f32 %v2339_v37 }
 0xe4a   :  { %13628 = vpow2.f32 %v11343_v39  ;;  %v2256_v49 = vpop.permute.xlu0 %2255 }
 0xe4b   :  { %v2258_v50 = vadd.f32 %v2256_v49, %v14443_v40 }
 0xe4d   :  { %v11345_v51 = vmul.f32 -1.442695, %v2258_v50 }
 0xe4e   :  { %v2413_v59 = vpop.permute.xlu0 %2412 }
 0xe4f   :  { %v2415_v60 = vadd.f32 %v2413_v59, %v14443_v40  ;;  %v14819_v59 = vld [vmem:[#allocation2 + $0x70] sm:$0xff] }
 0xe51   :  { %v11348_v61 = vmul.f32 -1.442695, %v2415_v60  ;;  %v14824_v60 = vld [vmem:[#allocation2 + $0x48] sm:$0xff] }
 0xe56   :  { %v13627_v38 = vpop.eup %13626 }
 0xe57   :  { %2424 = vrot.lane.b32.xlu1 %v13627_v38, %s14156_s28  ;;  %v13629_v42 = vpop.eup %13628 }
 0xe58   :  { %v2181_v29 = vadd.f32 1.0, %v13629_v42 }
 0xe5a   :  { %13630 = vrcp.f32 %v2181_v29 }
 0xe5b   :  { %13632 = vpow2.f32 %v11345_v51 }
 0xe67   :  { %v13631_v43 = vpop.eup %13630 }
 0xe68   :  { %v13633_v52 = vpop.eup %13632 }
 0xe69   :  { %v2262_v53 = vadd.f32 1.0, %v13633_v52 }
 0xe6b   :  { %13634 = vrcp.f32 %v2262_v53 }
 0xe78   :  { %v13635_v54 = vpop.eup %13634 }
 0xe79   :  { %v2422_v55 = vmul.f32 %v13635_v54, %v14650_v5 }
 0xec9   :  { %v2425_v44 = vpop.permute.xlu1 %2424 }
 0xeca   :  { %v2427_v48 = vmul.f32 %v13631_v43, %v2425_v44 }
 0xecc   :  { %2429 = vrot.lane.b32.xlu1 %v2427_v48, %s14155_s3 }
 0xf3e   :  { %v2430_v56 = vpop.permute.xlu1 %2429 }
 0xf3f   :  { %v14715_v57 = vadd.f32 %v2430_v56, %v2422_v55 }
 0xf41   :  { %13636 = vtanh.f32 %v14715_v57 }
 0xf42   :  { %13638 = vpow2.f32 %v11348_v61  ;;  %v14827_v61 = vld [vmem:[#allocation2 + $0x68] sm:$0xff] }
 0xf4e   :  { %v13637_v58 = vpop.eup %13636 }
 0xf4f   :  { %2435 = vrot.lane.b32.xlu1 %v13637_v58, %s14156_s28  ;;  %v13639_v62 = vpop.eup %13638  ;;  %v14816_v58 = vld [vmem:[#allocation2 + $0x50] sm:$0xff] }
 0xf50   :  { %v2419_v63 = vadd.f32 1.0, %v13639_v62  ;;  %v14832_v62 = vld [vmem:[#allocation2 + $0x40] sm:$0xff] }
 0xf52   :  { %13640 = vrcp.f32 %v2419_v63  ;;  %v14837_v63 = vld [vmem:[#allocation2 + $0x60] sm:$0xff] }
 0xf5f   :  { %v13641_v1 = vpop.eup %13640 }
 0xfc1   :  { %v2436_v2 = vpop.permute.xlu1 %2435 }
 0xfc2   :  { %v2438_v3 = vmul.f32 %v13641_v1, %v2436_v2 }
 0xfc4   :  { %2440 = vrot.lane.b32.xlu0 %v2438_v3, %s14155_s3 }
0x1036   :  { %v14721_v4 = vpop.permute.xlu0 %2440 }
0x1037   :  { %12418 = vmatmul.mubr.msk.f32.vlgmr.msra.gmra.mxu0 %vm755_vm3, %v14721_v4  ;;  %12429 = vmatmul.mubr.msk.f32.vlgmr.msra.gmra.mxu1 %vm755_vm3, %v14721_v4 }
0x1038   :  { %12432 = vmatpush3.msra.mxu0 %v14372_v18  ;;  %12443 = vmatpush3.msra.mxu1 %v14376_v19  ;;  %v14751_v18 = vld [vmem:[#allocation2 + $0x18] sm:$0xff] }
0x1039   :  { %12433 = vmatprep.subr.mxu0 %v14153_v0  ;;  %12444 = vmatprep.subr.mxu1 %v14153_v0  ;;  %v14754_v19 = vld [vmem:[#allocation2 + $0x38] sm:$0xff] }
0x103a   :  { %12434 = vmatpush3.msra.mxu0 %v14379_v20  ;;  %12445 = vmatpush3.msra.mxu1 %v14385_v21  ;;  %v14759_v20 = vld [vmem:[#allocation2 + $0x10] sm:$0xff] }
0x103b   :  { %12435 = vmatprep.subr.mxu0 %v14153_v0  ;;  %12446 = vmatprep.subr.mxu1 %v14153_v0  ;;  %v14762_v21 = vld [vmem:[#allocation2 + $0x30] sm:$0xff] }
0x103c   :  { %12436 = vmatpush3.msra.mxu0 %v14388_v22  ;;  %12447 = vmatpush3.msra.mxu1 %v14393_v23  ;;  %v14767_v22 = vld [vmem:[#allocation2 + $0x8] sm:$0xff] }
0x103d   :  { %12437 = vmatprep.subr.mxu0 %v14153_v0  ;;  %12448 = vmatprep.subr.mxu1 %v14153_v0  ;;  %v14770_v23 = vld [vmem:[#allocation2 + $0x28] sm:$0xff] }
0x103e   :  { %12438 = vmatpush3.msra.mxu0 %v14396_v24  ;;  %12439 = vmatprep.mubr.msk.f32.mxu0 %vm14154_vm0, %v14153_v0  ;;  %v14775_v24 = vld [vmem:[#allocation2] sm:$0xff] }
0x103f   :  { %12449 = vmatpush3.msra.mxu1 %v14401_v25  ;;  %12450 = vmatprep.mubr.msk.f32.mxu1 %vm14154_vm0, %v14153_v0  ;;  %v14778_v25 = vld [vmem:[#allocation2 + $0x20] sm:$0xff] }
0x1040   :  { %12440 = vmatmul.mubr.msk.f32.vlgmr.msra.gmra.mxu0 %vm755_vm3, %v14721_v4  ;;  %12451 = vmatmul.mubr.msk.f32.vlgmr.msra.gmra.mxu1 %vm755_vm3, %v14721_v4 }
0x1041   :  { %12453 = vmatprep.subr.mxu0 %v14153_v0  ;;  %12464 = vmatprep.subr.mxu1 %v14153_v0 }
0x1042   :  { %12454 = vmatpush3.msra.mxu0 %v14751_v18  ;;  %12465 = vmatpush3.msra.mxu1 %v14754_v19 }
0x1043   :  { %12455 = vmatprep.subr.mxu0 %v14153_v0  ;;  %12466 = vmatprep.subr.mxu1 %v14153_v0 }
0x1044   :  { %12456 = vmatpush3.msra.mxu0 %v14759_v20  ;;  %12467 = vmatpush3.msra.mxu1 %v14762_v21 }
0x1045   :  { %12457 = vmatprep.subr.mxu0 %v14153_v0  ;;  %12468 = vmatprep.subr.mxu1 %v14153_v0 }
0x1046   :  { %12458 = vmatpush3.msra.mxu0 %v14767_v22  ;;  %12469 = vmatpush3.msra.mxu1 %v14770_v23 }
0x1047   :  { %12459 = vmatprep.subr.mxu0 %v14153_v0  ;;  %12470 = vmatprep.subr.mxu1 %v14153_v0 }
0x1048   :  { %12460 = vmatpush3.msra.mxu0 %v14775_v24  ;;  %12471 = vmatpush3.msra.mxu1 %v14778_v25 }
0x1049   :  { %12461 = vmatprep.mubr.msk.f32.mxu0 %vm14154_vm0, %v14153_v0  ;;  %12472 = vmatprep.mubr.msk.f32.mxu1 %vm14154_vm0, %v14153_v0 }
0x104a   :  { %12475 = vmatprep.subr.mxu0 %v14153_v0  ;;  %12486 = vmatprep.subr.mxu1 %v14153_v0 }
0x10f7   :  { %v2510_v40 = vpop.f32.mrf.mxu0  ;;  %v2587_v5 = vpop.f32.mrf.mxu1 }
0x10f8   :  { %v2514_v10 = vadd.f32 %v2510_v40, %v14445_v41 }
0x10f9   :  { %v12419_v6 = vpop.f32.mrf.mxu0  ;;  %v12430_v7 = vpop.f32.mrf.mxu1 }
0x10fa   :  { %v11350_v11 = vmul.f32 -1.442695, %v2514_v10 }
0x1100   :  { %v2668_v9 = vpop.f32.mrf.mxu0  ;;  %v2744_v26 = vpop.f32.mrf.mxu1 }
0x1101   :  { %2673 = vrot.lane.b32.xlu1 %v2668_v9, %s14156_s28 }
0x1102   :  { %v12441_v28 = vpop.f32.mrf.mxu0  ;;  %v12452_v30 = vpop.f32.mrf.mxu1 }
0x1105   :  { %2592 = vrot.lane.b32.xlu1 %v2587_v5, %s14155_s3 }
0x1109   :  { %2749 = vrot.lane.b32.xlu1 %v2744_v26, %s14157_s8 }
0x1173   :  { %v2674_v32 = vpop.permute.xlu1 %2673 }
0x1174   :  { %v2676_v33 = vadd.f32 %v2674_v32, %v14445_v41 }
0x1176   :  { %13642 = vtanh.f32 %v2676_v33 }
0x1177   :  { %13644 = vpow2.f32 %v11350_v11  ;;  %v2593_v17 = vpop.permute.xlu1 %2592 }
0x1178   :  { %v2595_v35 = vadd.f32 %v2593_v17, %v14445_v41 }
0x117a   :  { %v11352_v37 = vmul.f32 -1.442695, %v2595_v35 }
0x117b   :  { %v2750_v48 = vpop.permute.xlu1 %2749 }
0x117c   :  { %v2752_v49 = vadd.f32 %v2750_v48, %v14445_v41  ;;  %v14811_v41 = vld [vmem:[#allocation2 + $0x78] sm:$0xff]  ;;  %v13980_v48 = vld [vmem:[%s16495_s0 + $0x4] sm:$0x3] }
0x117e   :  { %v11355_v50 = vmul.f32 -1.442695, %v2752_v49  ;;  %v13981_v49 = vld [vmem:[%s16495_s0 + $0x6] sm:$0x3] }
0x1183   :  { %v13643_v36 = vpop.eup %13642 }
0x1184   :  { %2761 = vrot.lane.b32.xlu0 %v13643_v36, %s14156_s28  ;;  %v13645_v12 = vpop.eup %13644 }
0x1185   :  { %v2518_v13 = vadd.f32 1.0, %v13645_v12 }
0x1187   :  { %13646 = vrcp.f32 %v2518_v13 }
0x1188   :  { %13648 = vpow2.f32 %v11352_v37 }
0x1194   :  { %v13647_v14 = vpop.eup %13646 }
0x1195   :  { %v13649_v38 = vpop.eup %13648 }
0x1196   :  { %v2599_v34 = vadd.f32 1.0, %v13649_v38 }
0x1198   :  { %13650 = vrcp.f32 %v2599_v34 }
0x11a5   :  { %v13651_v39 = vpop.eup %13650 }
0x11a6   :  { %v2759_v42 = vmul.f32 %v13651_v39, %v14715_v57  ;;  %v14808_v57 = vld [vmem:[#allocation2 + $0x58] sm:$0xff] }
0x11f6   :  { %v2762_v15 = vpop.permute.xlu0 %2761 }
0x11f7   :  { %v2764_v16 = vmul.f32 %v13647_v14, %v2762_v15 }
0x11f9   :  { %2766 = vrot.lane.b32.xlu0 %v2764_v16, %s14155_s3 }
0x126b   :  { %v2767_v29 = vpop.permute.xlu0 %2766 }
0x126c   :  { %v14796_v43 = vadd.f32 %v2767_v29, %v2759_v42 }
0x126e   :  { %13652 = vtanh.f32 %v14796_v43 }
0x126f   :  { %13654 = vpow2.f32 %v11355_v50  ;;  %v13982_v50 = vld [vmem:[%s16495_s0 + $0x8] sm:$0x3] }
0x127b   :  { %v13653_v44 = vpop.eup %13652 }
0x127c   :  { %2772 = vrot.lane.b32.xlu0 %v13653_v44, %s14156_s28  ;;  %v13655_v51 = vpop.eup %13654  ;;  %v13979_v44 = vld [vmem:[%s16495_s0 + $0x2] sm:$0x3] }
0x127d   :  { %v2756_v52 = vadd.f32 1.0, %v13655_v51  ;;  %v14963_v51 = vld [vmem:[#allocation5 + $0x18] sm:$0xff] }
0x127f   :  { %13656 = vrcp.f32 %v2756_v52  ;;  %v13983_v52 = vld [vmem:[%s16495_s0 + $0xa] sm:$0x3] }
0x128c   :  { %v13657_v53 = vpop.eup %13656 }
0x12ee   :  { %v2773_v54 = vpop.permute.xlu0 %2772 }
0x12ef   :  { %v2775_v55 = vmul.f32 %v13657_v53, %v2773_v54  ;;  %v13984_v53 = vld [vmem:[%s16495_s0 + $0xc] sm:$0x3]  ;;  %v14976_v54 = vld [vmem:[#allocation5 + $0x10] sm:$0xff] }
0x12f1   :  { %2777 = vrot.lane.b32.xlu1 %v2775_v55, %s14155_s3  ;;  %v14982_v55 = vld [vmem:[#allocation5 + $0x38] sm:$0xff] }
0x1363   :  { %v14802_v56 = vpop.permute.xlu1 %2777 }
0x1364   :  { %12462 = vmatmul.mubr.msk.f32.vlgmr.msra.gmra.mxu0 %vm755_vm3, %v14802_v56  ;;  %12473 = vmatmul.mubr.msk.f32.vlgmr.msra.gmra.mxu1 %vm755_vm3, %v14802_v56 }
0x1365   :  { %12476 = vmatpush3.msra.mxu0 %v14808_v57  ;;  %12487 = vmatpush3.msra.mxu1 %v14811_v41 }
0x1366   :  { %12477 = vmatprep.subr.mxu0 %v14153_v0  ;;  %12488 = vmatprep.subr.mxu1 %v14153_v0 }
0x1367   :  { %12478 = vmatpush3.msra.mxu0 %v14816_v58  ;;  %12489 = vmatpush3.msra.mxu1 %v14819_v59 }
0x1368   :  { %12479 = vmatprep.subr.mxu0 %v14153_v0  ;;  %12490 = vmatprep.subr.mxu1 %v14153_v0 }
0x1369   :  { %12480 = vmatpush3.msra.mxu0 %v14824_v60  ;;  %12491 = vmatpush3.msra.mxu1 %v14827_v61 }
0x136a   :  { %12481 = vmatprep.subr.mxu0 %v14153_v0  ;;  %12492 = vmatprep.subr.mxu1 %v14153_v0 }
0x136b   :  { %12482 = vmatpush3.msra.mxu0 %v14832_v62  ;;  %12483 = vmatprep.mubr.msk.f32.mxu0 %vm14154_vm0, %v14153_v0 }
0x136c   :  { %12493 = vmatpush3.msra.mxu1 %v14837_v63  ;;  %12494 = vmatprep.mubr.msk.f32.mxu1 %vm14154_vm0, %v14153_v0 }
0x136d   :  { %12484 = vmatmul.mubr.msk.f32.vlgmr.msra.gmra.mxu0 %vm755_vm3, %v14802_v56  ;;  %12495 = vmatmul.mubr.msk.f32.vlgmr.msra.gmra.mxu1 %vm755_vm3, %v14802_v56 }
0x136e   :  { %12497 = vmatprep.subr.mxu0 %v14153_v0  ;;  %12508 = vmatprep.subr.mxu1 %v14153_v0 }
0x136f   :  { %12498 = vmatpush3.msra.mxu0 %v14751_v18  ;;  %12509 = vmatpush3.msra.mxu1 %v14754_v19 }
0x1370   :  { %12499 = vmatprep.subr.mxu0 %v14153_v0  ;;  %12510 = vmatprep.subr.mxu1 %v14153_v0 }
0x1371   :  { %12500 = vmatpush3.msra.mxu0 %v14759_v20  ;;  %12511 = vmatpush3.msra.mxu1 %v14762_v21 }
0x1372   :  { %12501 = vmatprep.subr.mxu0 %v14153_v0  ;;  %12512 = vmatprep.subr.mxu1 %v14153_v0 }
0x1373   :  { %12502 = vmatpush3.msra.mxu0 %v14767_v22  ;;  %12513 = vmatpush3.msra.mxu1 %v14770_v23 }
0x1374   :  { %12503 = vmatprep.subr.mxu0 %v14153_v0  ;;  %12514 = vmatprep.subr.mxu1 %v14153_v0 }
0x1375   :  { %12504 = vmatpush3.msra.mxu0 %v14775_v24  ;;  %12515 = vmatpush3.msra.mxu1 %v14778_v25 }
0x1376   :  { %12505 = vmatprep.mubr.msk.f32.mxu0 %vm14154_vm0, %v14153_v0  ;;  %12516 = vmatprep.mubr.msk.f32.mxu1 %vm14154_vm0, %v14153_v0 }
0x1377   :  { %12519 = vmatprep.subr.mxu0 %v14153_v0  ;;  %12530 = vmatprep.subr.mxu1 %v14153_v0 }
0x1424   :  { %v2847_v1 = vpop.f32.mrf.mxu0  ;;  %v2924_v2 = vpop.f32.mrf.mxu1 }
0x1425   :  { %v2851_v40 = vadd.f32 %v2847_v1, %v14447_v46  ;;  %v15018_v1 = vld [vmem:[#allocation5 + $0x48] sm:$0xff] }
0x1426   :  { %v12463_v3 = vpop.f32.mrf.mxu0  ;;  %v12474_v18 = vpop.f32.mrf.mxu1 }
0x1427   :  { %v11357_v5 = vmul.f32 -1.442695, %v2851_v40  ;;  %v15031_v3 = vld [vmem:[#allocation5 + $0x78] sm:$0xff]  ;;  %v15037_v18 = vld [vmem:[#allocation5 + $0x70] sm:$0xff] }
0x142d   :  { %v3005_v19 = vpop.f32.mrf.mxu0  ;;  %v3081_v20 = vpop.f32.mrf.mxu1 }
0x142e   :  { %3010 = vrot.lane.b32.xlu0 %v3005_v19, %s14156_s28  ;;  %v15042_v19 = vld [vmem:[#allocation5 + $0x68] sm:$0xff] }
0x142f   :  { %v12485_v21 = vpop.f32.mrf.mxu0  ;;  %v12496_v22 = vpop.f32.mrf.mxu1 }
0x1432   :  { %2929 = vrot.lane.b32.xlu0 %v2924_v2, %s14155_s3  ;;  %v15024_v2 = vld [vmem:[#allocation5 + $0x40] sm:$0xff] }
0x1436   :  { %3086 = vrot.lane.b32.xlu0 %v3081_v20, %s14157_s8  ;;  %v15049_v20 = vld [vmem:[#allocation5 + $0x60] sm:$0xff] }
0x14a0   :  { %v3011_v23 = vpop.permute.xlu0 %3010 }
0x14a1   :  { %v3013_v24 = vadd.f32 %v3011_v23, %v14447_v46 }
0x14a3   :  { %13658 = vtanh.f32 %v3013_v24 }
0x14a4   :  { %13660 = vpow2.f32 %v11357_v5  ;;  %v2930_v30 = vpop.permute.xlu0 %2929 }
0x14a5   :  { %v2932_v32 = vadd.f32 %v2930_v30, %v14447_v46 }
0x14a7   :  { %v11359_v33 = vmul.f32 -1.442695, %v2932_v32 }
0x14a8   :  { %v3087_v16 = vpop.permute.xlu0 %3086 }
0x14a9   :  { %v3089_v17 = vadd.f32 %v3087_v16, %v14447_v46  ;;  %v3450_v46 = vld [vmem:[%s16499_s4] sm:$0xf] }
0x14ab   :  { %v11362_v35 = vmul.f32 -1.442695, %v3089_v17 }
0x14b0   :  { %v13659_v25 = vpop.eup %13658 }
0x14b1   :  { %3098 = vrot.lane.b32.xlu1 %v13659_v25, %s14156_s28  ;;  %v13661_v6 = vpop.eup %13660 }
0x14b2   :  { %v2855_v7 = vadd.f32 1.0, %v13661_v6 }
0x14b4   :  { %13662 = vrcp.f32 %v2855_v7  ;;  %v11372_v7 = vld [vmem:[%s16501_s6] ss:$0 sm:$0xff] }
0x14b5   :  { %13664 = vpow2.f32 %v11359_v33 }
0x14c1   :  { %v13663_v9 = vpop.eup %13662 }
0x14c2   :  { %v13665_v36 = vpop.eup %13664 }
0x14c3   :  { %v2936_v10 = vadd.f32 1.0, %v13665_v36 }
0x14c5   :  { %13666 = vrcp.f32 %v2936_v10 }
0x14d2   :  { %v13667_v11 = vpop.eup %13666 }
0x14d3   :  { %v3096_v12 = vmul.f32 %v13667_v11, %v14796_v43  ;;  %v13978_v43 = vld [vmem:[%s16495_s0] sm:$0x3] }
0x1523   :  { %v3099_v26 = vpop.permute.xlu1 %3098 }
0x1524   :  { %v3101_v28 = vmul.f32 %v13663_v9, %v3099_v26 }
0x1526   :  { %3103 = vrot.lane.b32.xlu1 %v3101_v28, %s14155_s3 }
0x1598   :  { %v3104_v13 = vpop.permute.xlu1 %3103 }
0x1599   :  { %v14877_v14 = vadd.f32 %v3104_v13, %v3096_v12 }
0x159b   :  { %13668 = vtanh.f32 %v14877_v14 }
0x159c   :  { %13670 = vpow2.f32 %v11362_v35 }
0x15a8   :  { %v13669_v15 = vpop.eup %13668 }
0x15a9   :  { %3109 = vrot.lane.b32.xlu1 %v13669_v15, %s14156_s28  ;;  %v13671_v37 = vpop.eup %13670 }
0x15aa   :  { %v3093_v38 = vadd.f32 1.0, %v13671_v37 }
0x15ac   :  { %13672 = vrcp.f32 %v3093_v38 }
0x15b9   :  { %v13673_v34 = vpop.eup %13672 }
0x161b   :  { %v3110_v39 = vpop.permute.xlu1 %3109 }
0x161c   :  { %v3112_v42 = vmul.f32 %v13673_v34, %v3110_v39 }
0x161e   :  { %3114 = vrot.lane.b32.xlu0 %v3112_v42, %s14155_s3 }
0x1690   :  { %v14883_v29 = vpop.permute.xlu0 %3114 }
0x1691   :  { %12506 = vmatmul.mubr.msk.f32.vlgmr.msra.gmra.mxu0 %vm755_vm3, %v14883_v29  ;;  %12517 = vmatmul.mubr.msk.f32.vlgmr.msra.gmra.mxu1 %vm755_vm3, %v14883_v29 }
0x1692   :  { %12520 = vmatpush3.msra.mxu0 %v14808_v57  ;;  %12531 = vmatpush3.msra.mxu1 %v14811_v41  ;;  %v14985_v57 = vld [vmem:[#allocation5 + $0x8] sm:$0xff] }
0x1693   :  { %12521 = vmatprep.subr.mxu0 %v14153_v0  ;;  %12532 = vmatprep.subr.mxu1 %v14153_v0  ;;  %v13985_v41 = vld [vmem:[%s16495_s0 + $0xe] sm:$0x3] }
0x1694   :  { %12522 = vmatpush3.msra.mxu0 %v14816_v58  ;;  %12533 = vmatpush3.msra.mxu1 %v14819_v59  ;;  %v14993_v58 = vld [vmem:[#allocation5 + $0x30] sm:$0xff]  ;;  %v14996_v59 = vld [vmem:[#allocation5] sm:$0xff] }
0x1695   :  { %12523 = vmatprep.subr.mxu0 %v14153_v0  ;;  %12534 = vmatprep.subr.mxu1 %v14153_v0 }
0x1696   :  { %12524 = vmatpush3.msra.mxu0 %v14824_v60  ;;  %12535 = vmatpush3.msra.mxu1 %v14827_v61  ;;  %v15002_v60 = vld [vmem:[#allocation5 + $0x58] sm:$0xff]  ;;  %v15005_v61 = vld [vmem:[#allocation5 + $0x28] sm:$0xff] }
0x1697   :  { %12525 = vmatprep.subr.mxu0 %v14153_v0  ;;  %12536 = vmatprep.subr.mxu1 %v14153_v0 }
0x1698   :  { %12526 = vmatpush3.msra.mxu0 %v14832_v62  ;;  %12527 = vmatprep.mubr.msk.f32.mxu0 %vm14154_vm0, %v14153_v0  ;;  %v15011_v62 = vld [vmem:[#allocation5 + $0x50] sm:$0xff] }
0x1699   :  { %12537 = vmatpush3.msra.mxu1 %v14837_v63  ;;  %12538 = vmatprep.mubr.msk.f32.mxu1 %vm14154_vm0, %v14153_v0  ;;  %v15013_v63 = vld [vmem:[#allocation5 + $0x20] sm:$0xff] }
0x169a   :  { %12528 = vmatmul.mubr.msk.f32.vlgmr.msra.gmra.mxu0 %vm755_vm3, %v14883_v29  ;;  %12539 = vmatmul.mubr.msk.f32.vlgmr.msra.gmra.mxu1 %vm755_vm3, %v14883_v29 }
0x169b   :  { %12541 = vmatprep.subr.mxu0 %v14153_v0  ;;  %12543 = vmatprep.mubr.msk.f32.mxu0 %vm14154_vm0, %v14153_v0 }
0x169c   :  { %12542 = vmatpush3.msk.msra.mxu0 %vm140_vm1, %v3450_v46  ;;  %12546 = vmatprep.subr.mxu1 %v14153_v0 }
0x169d   :  { %12551 = vmatprep.subr.mxu0 %v14153_v0  ;;  %12547 = vmatpush3.msk.msra.mxu1 %vm140_vm1, %v3450_v46 }
0x169e   :  { %12544 = vmatmul.mubr.msk.f32.vlgmr.msra.gmra.mxu0 %vm136_vm2, %v13978_v43  ;;  %12548 = vmatprep.mubr.msk.f32.mxu1 %vm14154_vm0, %v14153_v0 }
0x169f   :  { %12552 = vmatpush3.msk.msra.mxu0 %vm140_vm1, %v3450_v46  ;;  %12553 = vmatprep.mubr.msk.f32.mxu0 %vm14154_vm0, %v14153_v0 }
0x16a0   :  { %12561 = vmatprep.subr.mxu0 %v14153_v0  ;;  %12549 = vmatmul.mubr.msk.f32.vlgmr.msra.gmra.mxu1 %vm136_vm2, %v13979_v44 }
0x16a1   :  { %12556 = vmatprep.subr.mxu1 %v14153_v0  ;;  %12558 = vmatprep.mubr.msk.f32.mxu1 %vm14154_vm0, %v14153_v0 }
0x16a2   :  { %12554 = vmatmul.mubr.msk.f32.vlgmr.msra.gmra.mxu0 %vm136_vm2, %v13980_v48  ;;  %12557 = vmatpush3.msk.msra.mxu1 %vm140_vm1, %v3450_v46 }
0x16a3   :  { %12562 = vmatpush3.msk.msra.mxu0 %vm140_vm1, %v3450_v46  ;;  %12563 = vmatprep.mubr.msk.f32.mxu0 %vm14154_vm0, %v14153_v0 }
0x16a4   :  { %12571 = vmatprep.subr.mxu0 %v14153_v0  ;;  %12559 = vmatmul.mubr.msk.f32.vlgmr.msra.gmra.mxu1 %vm136_vm2, %v13981_v49 }
0x16a5   :  { %12566 = vmatprep.subr.mxu1 %v14153_v0  ;;  %12568 = vmatprep.mubr.msk.f32.mxu1 %vm14154_vm0, %v14153_v0 }
0x16a6   :  { %12564 = vmatmul.mubr.msk.f32.vlgmr.msra.gmra.mxu0 %vm136_vm2, %v13982_v50  ;;  %12567 = vmatpush3.msk.msra.mxu1 %vm140_vm1, %v3450_v46 }
0x16a7   :  { %12572 = vmatpush3.msk.msra.mxu0 %vm140_vm1, %v3450_v46  ;;  %12573 = vmatprep.mubr.msk.f32.mxu0 %vm14154_vm0, %v14153_v0 }
0x16a8   :  { %12581 = vmatprep.subr.mxu0 %v14153_v0  ;;  %12569 = vmatmul.mubr.msk.f32.vlgmr.msra.gmra.mxu1 %vm136_vm2, %v13983_v52 }
0x16a9   :  { %12576 = vmatprep.subr.mxu1 %v14153_v0  ;;  %12578 = vmatprep.mubr.msk.f32.mxu1 %vm14154_vm0, %v14153_v0 }
0x16aa   :  { %12574 = vmatmul.mubr.msk.f32.vlgmr.msra.gmra.mxu0 %vm136_vm2, %v13984_v53  ;;  %12577 = vmatpush3.msk.msra.mxu1 %vm140_vm1, %v3450_v46 }
0x16ab   :  { %12582 = vmatpush3.msra.mxu0 %v14963_v51  ;;  %12589 = vmatprep.mubr.msk.f32.mxu0 %vm14154_vm0, %v14153_v0 }
0x16ac   :  { %12583 = vmatprep.subr.mxu0 %v14153_v0  ;;  %12579 = vmatmul.mubr.msk.f32.vlgmr.msra.gmra.mxu1 %vm136_vm2, %v13985_v41 }
0x16ad   :  { %12584 = vmatpush3.msra.mxu0 %v14976_v54  ;;  %12592 = vmatprep.subr.mxu1 %v14153_v0 }
0x16ae   :  { %12585 = vmatprep.subr.mxu0 %v14153_v0  ;;  %12593 = vmatpush3.msra.mxu1 %v14982_v55 }
0x16af   :  { %12586 = vmatpush3.msra.mxu0 %v14985_v57  ;;  %12594 = vmatprep.subr.mxu1 %v14153_v0 }
0x16b0   :  { %12587 = vmatprep.subr.mxu0 %v14153_v0  ;;  %12595 = vmatpush3.msra.mxu1 %v14993_v58 }
0x16b1   :  { %12588 = vmatpush3.msra.mxu0 %v14996_v59  ;;  %12596 = vmatprep.subr.mxu1 %v14153_v0 }
0x16b2   :  { %12590 = vmatmul.mubr.f32.vlgmr.msra.gmra.mxu0 %v14153_v0  ;;  %12603 = vmatprep.subr.mxu0 %v14153_v0 }
0x16b3   :  { %12604 = vmatpush3.msra.mxu0 %v15002_v60  ;;  %12597 = vmatpush3.msra.mxu1 %v15005_v61 }
0x16b4   :  { %12605 = vmatprep.subr.mxu0 %v14153_v0  ;;  %12598 = vmatprep.subr.mxu1 %v14153_v0 }
0x16b5   :  { %12606 = vmatpush3.msra.mxu0 %v15011_v62  ;;  %12599 = vmatpush3.msra.mxu1 %v15013_v63 }
0x16b6   :  { %12607 = vmatprep.subr.mxu0 %v14153_v0  ;;  %12611 = vmatprep.mubr.msk.f32.mxu0 %vm14154_vm0, %v14153_v0 }
0x16b7   :  { %12608 = vmatpush3.msra.mxu0 %v15018_v1  ;;  %12600 = vmatprep.mubr.msk.f32.mxu1 %vm14154_vm0, %v14153_v0 }
0x16b8   :  { %12609 = vmatprep.subr.mxu0 %v14153_v0  ;;  %12614 = vmatprep.subr.mxu1 %v14153_v0 }
0x16b9   :  { %12610 = vmatpush3.msra.mxu0 %v15024_v2  ;;  %12601 = vmatmul.mubr.f32.vlgmr.msra.gmra.mxu1 %v14153_v0 }
0x16ba   :  { %12612 = vmatmul.mubr.f32.vlgmr.msra.gmra.mxu0 %v14153_v0  ;;  %12615 = vmatpush3.msra.mxu1 %v15031_v3 }
0x16bb   :  { %12616 = vmatprep.subr.mxu1 %v14153_v0  ;;  %12622 = vmatprep.mubr.msk.f32.mxu1 %vm14154_vm0, %v14153_v0 }
0x16bc   :  { %12617 = vmatpush3.msra.mxu1 %v15037_v18  ;;  %12625 = vmatprep.subr.mxu0 %v14153_v0 }
0x16bd   :  { %12618 = vmatprep.subr.mxu1 %v14153_v0  ;;  %12626 = vmatpush3.msra.mxu0 %v14963_v51 }
0x16be   :  { %12619 = vmatpush3.msra.mxu1 %v15042_v19  ;;  %12627 = vmatprep.subr.mxu0 %v14153_v0 }
0x16bf   :  { %12620 = vmatprep.subr.mxu1 %v14153_v0  ;;  %12628 = vmatpush3.msra.mxu0 %v14976_v54 }
0x16c0   :  { %12621 = vmatpush3.msra.mxu1 %v15049_v20  ;;  %12629 = vmatprep.subr.mxu0 %v14153_v0 }
0x16c1   :  { %12623 = vmatmul.mubr.f32.vlgmr.msra.gmra.mxu1 %v14153_v0  ;;  %12636 = vmatprep.subr.mxu1 %v14153_v0 }
0x16c2   :  { %12637 = vmatpush3.msra.mxu1 %v14982_v55  ;;  %12630 = vmatpush3.msra.mxu0 %v14985_v57 }
0x16c3   :  { %12638 = vmatprep.subr.mxu1 %v14153_v0  ;;  %12631 = vmatprep.subr.mxu0 %v14153_v0 }
0x16c4   :  { %12639 = vmatpush3.msra.mxu1 %v14993_v58  ;;  %12632 = vmatpush3.msra.mxu0 %v14996_v59 }
0x16c5   :  { %12640 = vmatprep.subr.mxu1 %v14153_v0  ;;  %12633 = vmatprep.mubr.msk.f32.mxu0 %vm14154_vm0, %v14153_v0 }
0x16c6   :  { %12641 = vmatpush3.msra.mxu1 %v15005_v61  ;;  %12644 = vmatprep.mubr.msk.f32.mxu1 %vm14154_vm0, %v14153_v0 }
0x16c7   :  { %12642 = vmatprep.subr.mxu1 %v14153_v0  ;;  %12647 = vmatprep.subr.mxu0 %v14153_v0 }
0x16c8   :  { %12643 = vmatpush3.msra.mxu1 %v15013_v63 }
0x16c9   :  { %12658 = vmatprep.subr.mxu1 %v14153_v0 }
0x1751   :  { %v15076_v21 = vpop.f32.mrf.mxu0  ;;  %v15078_v22 = vpop.f32.mrf.mxu1 }
0x1753   :  { %v12507_v23 = vpop.f32.mrf.mxu0  ;;  %v12518_v24 = vpop.f32.mrf.mxu1 }
0x175a   :  { %v15080_v25 = vpop.f32.mrf.mxu0  ;;  %v15082_v40 = vpop.f32.mrf.mxu1 }
0x175c   :  { %v12529_v5 = vpop.f32.mrf.mxu0  ;;  %v12540_v6 = vpop.f32.mrf.mxu1 }
0x175e   :  { %v3521_v9 = vpop.f32.mrf.mxu0 }
0x175f   :  { %v15087_v26 = vadd.f32 %v11372_v7, %v3521_v9 }
0x1760   :  { %v12545_v28 = vpop.f32.mrf.mxu0  ;;  %v3598_v30 = vpop.f32.mrf.mxu1 }
0x1761   :  { %v15089_v32 = vadd.f32 %v11372_v7, %v3598_v30 }
0x1762   :  { %v3669_v33 = vpop.f32.mrf.mxu0  ;;  %v12550_v36 = vpop.f32.mrf.mxu1 }
0x1763   :  { %v15091_v10 = vadd.f32 %v11372_v7, %v3669_v33 }
0x1764   :  { %v12555_v11 = vpop.f32.mrf.mxu0  ;;  %v3740_v12 = vpop.f32.mrf.mxu1 }
0x1765   :  { %v15093_v13 = vadd.f32 %v11372_v7, %v3740_v12 }
0x1766   :  { %v3811_v15 = vpop.f32.mrf.mxu0  ;;  %v12560_v16 = vpop.f32.mrf.mxu1 }
0x1767   :  { %v15095_v17 = vadd.f32 %v11372_v7, %v3811_v15 }
0x1768   :  { %v12565_v35 = vpop.f32.mrf.mxu0  ;;  %v3882_v37 = vpop.f32.mrf.mxu1 }
0x1769   :  { %v15097_v38 = vadd.f32 %v11372_v7, %v3882_v37 }
0x176a   :  { %v3953_v34 = vpop.f32.mrf.mxu0  ;;  %v12570_v39 = vpop.f32.mrf.mxu1 }
0x176b   :  { %v15099_v42 = vadd.f32 %v11372_v7, %v3953_v34 }
0x176c   :  { %v12575_v46 = vpop.f32.mrf.mxu0  ;;  %v4024_v43 = vpop.f32.mrf.mxu1 }
0x176d   :  { %v4028_v5 = vadd.f32 %v11372_v7, %v4024_v43 }
0x176e   :  { %v12580_v44 = vpop.f32.mrf.mxu1 }
0x1772   :  { %v4111_v48 = vpop.f32.mrf.mxu0 }
0x1773   :  { %v4115_v30 = vadd.f32 %v4111_v48, %v4028_v5 }
0x1774   :  { %v12591_v49 = vpop.f32.mrf.mxu0 }
0x1775   :  { %v11387_v33 = vmul.f32 -1.442695, %v4115_v30 }
0x1779   :  { %v4188_v50 = vpop.f32.mrf.mxu1 }
0x177a   :  { %v4269_v52 = vpop.f32.mrf.mxu0 }
0x177b   :  { %4274 = vrot.lane.b32.xlu1 %v4269_v52, %s14156_s28  ;;  %v12602_v53 = vpop.f32.mrf.mxu1 }
0x177c   :  { %v12613_v41 = vpop.f32.mrf.mxu0 }
0x177f   :  { %4193 = vrot.lane.b32.xlu1 %v4188_v50, %s14155_s3 }
0x1781   :  { %v4345_v23 = vpop.f32.mrf.mxu1 }
0x1783   :  { %4350 = vrot.lane.b32.xlu1 %v4345_v23, %s14157_s8  ;;  %v12624_v24 = vpop.f32.mrf.mxu1 }
0x17ed   :  { %v4275_v6 = vpop.permute.xlu1 %4274 }
0x17ee   :  { %v4277_v9 = vadd.f32 %v4275_v6, %v4028_v5 }
0x17f0   :  { %13674 = vtanh.f32 %v4277_v9 }
0x17f1   :  { %13676 = vpow2.f32 %v11387_v33  ;;  %v4194_v35 = vpop.permute.xlu1 %4193 }
0x17f2   :  { %v4196_v37 = vadd.f32 %v4194_v35, %v4028_v5 }
0x17f4   :  { %v11388_v7 = vmul.f32 -1.442695, %v4196_v37 }
0x17f5   :  { %v4351_v50 = vpop.permute.xlu1 %4350 }
0x17f6   :  { %v4353_v52 = vadd.f32 %v4351_v50, %v4028_v5 }
0x17f8   :  { %v11389_v53 = vmul.f32 -1.442695, %v4353_v52 }
0x17fd   :  { %v13675_v28 = vpop.eup %13674 }
0x17fe   :  { %4362 = vrot.lane.b32.xlu0 %v13675_v28, %s14156_s28  ;;  %v13677_v36 = vpop.eup %13676 }
0x17ff   :  { %v4119_v11 = vadd.f32 1.0, %v13677_v36 }
0x1801   :  { %13678 = vrcp.f32 %v4119_v11 }
0x1802   :  { %13680 = vpow2.f32 %v11388_v7 }
0x180e   :  { %v13679_v12 = vpop.eup %13678 }
0x180f   :  { %v13681_v34 = vpop.eup %13680 }
0x1810   :  { %v4200_v39 = vadd.f32 1.0, %v13681_v34 }
0x1812   :  { %13682 = vrcp.f32 %v4200_v39 }
0x181f   :  { %v13683_v46 = vpop.eup %13682 }
0x1820   :  { %v4360_v43 = vmul.f32 0.0, %v13683_v46 }
0x1870   :  { %v4363_v15 = vpop.permute.xlu0 %4362 }
0x1871   :  { %v4365_v16 = vmul.f32 %v13679_v12, %v4363_v15 }
0x1873   :  { %4367 = vrot.lane.b32.xlu0 %v4365_v16, %s14155_s3 }
0x18e5   :  { %v4368_v44 = vpop.permute.xlu0 %4367 }
0x18e6   :  { %v15106_v48 = vadd.f32 %v4368_v44, %v4360_v43 }
0x18e8   :  { %13684 = vtanh.f32 %v15106_v48 }
0x18e9   :  { %13686 = vpow2.f32 %v11389_v53 }
0x18f5   :  { %v13685_v49 = vpop.eup %13684 }
0x18f6   :  { %4373 = vrot.lane.b32.xlu0 %v13685_v49, %s14156_s28  ;;  %v13687_v41 = vpop.eup %13686 }
0x18f7   :  { %v4357_v23 = vadd.f32 1.0, %v13687_v41 }
0x18f9   :  { %13688 = vrcp.f32 %v4357_v23 }
0x1906   :  { %v13689_v24 = vpop.eup %13688 }
0x1968   :  { %v4374_v6 = vpop.permute.xlu0 %4373 }
0x1969   :  { %v4376_v9 = vmul.f32 %v13689_v24, %v4374_v6 }
0x196b   :  { %4378 = vrot.lane.b32.xlu1 %v4376_v9, %s14155_s3 }
0x19dd   :  { %v15111_v28 = vpop.permute.xlu1 %4378 }
0x19de   :  { %12634 = vmatmul.mubr.msk.f32.vlgmr.msra.gmra.mxu0 %vm755_vm3, %v15111_v28  ;;  %12645 = vmatmul.mubr.msk.f32.vlgmr.msra.gmra.mxu1 %vm755_vm3, %v15111_v28 }
0x19df   :  { %12648 = vmatpush3.msra.mxu0 %v15002_v60  ;;  %12659 = vmatpush3.msra.mxu1 %v15031_v3 }
0x19e0   :  { %12649 = vmatprep.subr.mxu0 %v14153_v0  ;;  %12660 = vmatprep.subr.mxu1 %v14153_v0 }
0x19e1   :  { %12650 = vmatpush3.msra.mxu0 %v15011_v62  ;;  %12661 = vmatpush3.msra.mxu1 %v15037_v18 }
0x19e2   :  { %12651 = vmatprep.subr.mxu0 %v14153_v0  ;;  %12662 = vmatprep.subr.mxu1 %v14153_v0 }
0x19e3   :  { %12652 = vmatpush3.msra.mxu0 %v15018_v1  ;;  %12663 = vmatpush3.msra.mxu1 %v15042_v19 }
0x19e4   :  { %12653 = vmatprep.subr.mxu0 %v14153_v0  ;;  %12664 = vmatprep.subr.mxu1 %v14153_v0 }
0x19e5   :  { %12654 = vmatpush3.msra.mxu0 %v15024_v2  ;;  %12655 = vmatprep.mubr.msk.f32.mxu0 %vm14154_vm0, %v14153_v0 }
0x19e6   :  { %12665 = vmatpush3.msra.mxu1 %v15049_v20  ;;  %12666 = vmatprep.mubr.msk.f32.mxu1 %vm14154_vm0, %v14153_v0 }
0x19e7   :  { %12656 = vmatmul.mubr.msk.f32.vlgmr.msra.gmra.mxu0 %vm755_vm3, %v15111_v28  ;;  %12667 = vmatmul.mubr.msk.f32.vlgmr.msra.gmra.mxu1 %vm755_vm3, %v15111_v28 }
0x19e8   :  { %12669 = vmatprep.subr.mxu0 %v14153_v0  ;;  %12680 = vmatprep.subr.mxu1 %v14153_v0 }
0x19e9   :  { %12670 = vmatpush3.msra.mxu0 %v14963_v51  ;;  %12681 = vmatpush3.msra.mxu1 %v14982_v55 }
0x19ea   :  { %12671 = vmatprep.subr.mxu0 %v14153_v0  ;;  %12682 = vmatprep.subr.mxu1 %v14153_v0 }
0x19eb   :  { %12672 = vmatpush3.msra.mxu0 %v14976_v54  ;;  %12683 = vmatpush3.msra.mxu1 %v14993_v58 }
0x19ec   :  { %12673 = vmatprep.subr.mxu0 %v14153_v0  ;;  %12684 = vmatprep.subr.mxu1 %v14153_v0 }
0x19ed   :  { %12674 = vmatpush3.msra.mxu0 %v14985_v57  ;;  %12685 = vmatpush3.msra.mxu1 %v15005_v61 }
0x19ee   :  { %12675 = vmatprep.subr.mxu0 %v14153_v0  ;;  %12686 = vmatprep.subr.mxu1 %v14153_v0 }
0x19ef   :  { %12676 = vmatpush3.msra.mxu0 %v14996_v59  ;;  %12687 = vmatpush3.msra.mxu1 %v15013_v63 }
0x19f0   :  { %12677 = vmatprep.mubr.msk.f32.mxu0 %vm14154_vm0, %v14153_v0  ;;  %12688 = vmatprep.mubr.msk.f32.mxu1 %vm14154_vm0, %v14153_v0 }
0x19f1   :  { %12691 = vmatprep.subr.mxu0 %v14153_v0  ;;  %12702 = vmatprep.subr.mxu1 %v14153_v0 }
0x1a9e   :  { %v4448_v5 = vpop.f32.mrf.mxu0  ;;  %v4525_v30 = vpop.f32.mrf.mxu1 }
0x1a9f   :  { %v4452_v34 = vadd.f32 %v4448_v5, %v15099_v42 }
0x1aa0   :  { %v12635_v33 = vpop.f32.mrf.mxu0  ;;  %v12646_v36 = vpop.f32.mrf.mxu1 }
0x1aa1   :  { %v11391_v39 = vmul.f32 -1.442695, %v4452_v34 }
0x1aa7   :  { %v4606_v11 = vpop.f32.mrf.mxu0  ;;  %v4682_v12 = vpop.f32.mrf.mxu1 }
0x1aa8   :  { %4611 = vrot.lane.b32.xlu0 %v4606_v11, %s14156_s28 }
0x1aa9   :  { %v12657_v15 = vpop.f32.mrf.mxu0  ;;  %v12668_v16 = vpop.f32.mrf.mxu1 }
0x1aac   :  { %4530 = vrot.lane.b32.xlu0 %v4525_v30, %s14155_s3 }
0x1ab0   :  { %4687 = vrot.lane.b32.xlu0 %v4682_v12, %s14157_s8 }
0x1b1a   :  { %v4612_v35 = vpop.permute.xlu0 %4611 }
0x1b1b   :  { %v4614_v37 = vadd.f32 %v4612_v35, %v15099_v42 }
0x1b1d   :  { %13690 = vtanh.f32 %v4614_v37 }
0x1b1e   :  { %13692 = vpow2.f32 %v11391_v39  ;;  %v4531_v52 = vpop.permute.xlu0 %4530 }
0x1b1f   :  { %v4533_v53 = vadd.f32 %v4531_v52, %v15099_v42 }
0x1b21   :  { %v11393_v41 = vmul.f32 -1.442695, %v4533_v53 }
0x1b22   :  { %v4688_v36 = vpop.permute.xlu0 %4687 }
0x1b23   :  { %v4690_v11 = vadd.f32 %v4688_v36, %v15099_v42 }
0x1b25   :  { %v11396_v12 = vmul.f32 -1.442695, %v4690_v11 }
0x1b2a   :  { %v13691_v7 = vpop.eup %13690 }
0x1b2b   :  { %4699 = vrot.lane.b32.xlu1 %v13691_v7, %s14156_s28  ;;  %v13693_v46 = vpop.eup %13692 }
0x1b2c   :  { %v4456_v43 = vadd.f32 1.0, %v13693_v46 }
0x1b2e   :  { %13694 = vrcp.f32 %v4456_v43 }
0x1b2f   :  { %13696 = vpow2.f32 %v11393_v41 }
0x1b3b   :  { %v13695_v44 = vpop.eup %13694 }
0x1b3c   :  { %v13697_v23 = vpop.eup %13696 }
0x1b3d   :  { %v4537_v24 = vadd.f32 1.0, %v13697_v23 }
0x1b3f   :  { %13698 = vrcp.f32 %v4537_v24 }
0x1b4c   :  { %v13699_v6 = vpop.eup %13698 }
0x1b4d   :  { %v4697_v9 = vmul.f32 %v13699_v6, %v15106_v48 }
0x1b9d   :  { %v4700_v49 = vpop.permute.xlu1 %4699 }
0x1b9e   :  { %v4702_v50 = vmul.f32 %v13695_v44, %v4700_v49 }
0x1ba0   :  { %4704 = vrot.lane.b32.xlu1 %v4702_v50, %s14155_s3 }
0x1c12   :  { %v4705_v5 = vpop.permute.xlu1 %4704 }
0x1c13   :  { %v15170_v30 = vadd.f32 %v4705_v5, %v4697_v9 }
0x1c15   :  { %13700 = vtanh.f32 %v15170_v30 }
0x1c16   :  { %13702 = vpow2.f32 %v11396_v12 }
0x1c22   :  { %v13701_v33 = vpop.eup %13700 }
0x1c23   :  { %4710 = vrot.lane.b32.xlu1 %v13701_v33, %s14156_s28  ;;  %v13703_v15 = vpop.eup %13702 }
0x1c24   :  { %v4694_v16 = vadd.f32 1.0, %v13703_v15 }
0x1c26   :  { %13704 = vrcp.f32 %v4694_v16 }
0x1c33   :  { %v13705_v35 = vpop.eup %13704 }
0x1c95   :  { %v4711_v37 = vpop.permute.xlu1 %4710 }
0x1c96   :  { %v4713_v7 = vmul.f32 %v13705_v35, %v4711_v37 }
0x1c98   :  { %4715 = vrot.lane.b32.xlu0 %v4713_v7, %s14155_s3 }
0x1d0a   :  { %v15176_v48 = vpop.permute.xlu0 %4715 }
0x1d0b   :  { %12678 = vmatmul.mubr.msk.f32.vlgmr.msra.gmra.mxu0 %vm755_vm3, %v15176_v48  ;;  %12689 = vmatmul.mubr.msk.f32.vlgmr.msra.gmra.mxu1 %vm755_vm3, %v15176_v48 }
0x1d0c   :  { %12692 = vmatpush3.msra.mxu0 %v15002_v60  ;;  %12703 = vmatpush3.msra.mxu1 %v15031_v3 }
0x1d0d   :  { %12693 = vmatprep.subr.mxu0 %v14153_v0  ;;  %12704 = vmatprep.subr.mxu1 %v14153_v0 }
0x1d0e   :  { %12694 = vmatpush3.msra.mxu0 %v15011_v62  ;;  %12705 = vmatpush3.msra.mxu1 %v15037_v18 }
0x1d0f   :  { %12695 = vmatprep.subr.mxu0 %v14153_v0  ;;  %12706 = vmatprep.subr.mxu1 %v14153_v0 }
0x1d10   :  { %12696 = vmatpush3.msra.mxu0 %v15018_v1  ;;  %12707 = vmatpush3.msra.mxu1 %v15042_v19 }
0x1d11   :  { %12697 = vmatprep.subr.mxu0 %v14153_v0  ;;  %12708 = vmatprep.subr.mxu1 %v14153_v0 }
0x1d12   :  { %12698 = vmatpush3.msra.mxu0 %v15024_v2  ;;  %12699 = vmatprep.mubr.msk.f32.mxu0 %vm14154_vm0, %v14153_v0 }
0x1d13   :  { %12709 = vmatpush3.msra.mxu1 %v15049_v20  ;;  %12710 = vmatprep.mubr.msk.f32.mxu1 %vm14154_vm0, %v14153_v0 }
0x1d14   :  { %12700 = vmatmul.mubr.msk.f32.vlgmr.msra.gmra.mxu0 %vm755_vm3, %v15176_v48  ;;  %12711 = vmatmul.mubr.msk.f32.vlgmr.msra.gmra.mxu1 %vm755_vm3, %v15176_v48 }
0x1d15   :  { %12713 = vmatprep.subr.mxu0 %v14153_v0  ;;  %12724 = vmatprep.subr.mxu1 %v14153_v0 }
0x1d16   :  { %12714 = vmatpush3.msra.mxu0 %v14963_v51  ;;  %12725 = vmatpush3.msra.mxu1 %v14982_v55 }
0x1d17   :  { %12715 = vmatprep.subr.mxu0 %v14153_v0  ;;  %12726 = vmatprep.subr.mxu1 %v14153_v0 }
0x1d18   :  { %12716 = vmatpush3.msra.mxu0 %v14976_v54  ;;  %12727 = vmatpush3.msra.mxu1 %v14993_v58 }
0x1d19   :  { %12717 = vmatprep.subr.mxu0 %v14153_v0  ;;  %12728 = vmatprep.subr.mxu1 %v14153_v0 }
0x1d1a   :  { %12718 = vmatpush3.msra.mxu0 %v14985_v57  ;;  %12729 = vmatpush3.msra.mxu1 %v15005_v61 }
0x1d1b   :  { %12719 = vmatprep.subr.mxu0 %v14153_v0  ;;  %12730 = vmatprep.subr.mxu1 %v14153_v0 }
0x1d1c   :  { %12720 = vmatpush3.msra.mxu0 %v14996_v59  ;;  %12731 = vmatpush3.msra.mxu1 %v15013_v63 }
0x1d1d   :  { %12721 = vmatprep.mubr.msk.f32.mxu0 %vm14154_vm0, %v14153_v0  ;;  %12732 = vmatprep.mubr.msk.f32.mxu1 %vm14154_vm0, %v14153_v0 }
0x1d1e   :  { %12735 = vmatprep.subr.mxu0 %v14153_v0  ;;  %12746 = vmatprep.subr.mxu1 %v14153_v0 }
0x1dcb   :  { %v4785_v42 = vpop.f32.mrf.mxu0  ;;  %v4862_v34 = vpop.f32.mrf.mxu1 }
0x1dcc   :  { %v4789_v23 = vadd.f32 %v4785_v42, %v15097_v38 }
0x1dcd   :  { %v12679_v39 = vpop.f32.mrf.mxu0  ;;  %v12690_v46 = vpop.f32.mrf.mxu1 }
0x1dce   :  { %v11398_v24 = vmul.f32 -1.442695, %v4789_v23 }
0x1dd4   :  { %v4943_v43 = vpop.f32.mrf.mxu0  ;;  %v5019_v44 = vpop.f32.mrf.mxu1 }
0x1dd5   :  { %4948 = vrot.lane.b32.xlu1 %v4943_v43, %s14156_s28 }
0x1dd6   :  { %v12701_v49 = vpop.f32.mrf.mxu0  ;;  %v12712_v50 = vpop.f32.mrf.mxu1 }
0x1dd9   :  { %4867 = vrot.lane.b32.xlu1 %v4862_v34, %s14155_s3 }
0x1ddd   :  { %5024 = vrot.lane.b32.xlu1 %v5019_v44, %s14157_s8 }
0x1e47   :  { %v4949_v52 = vpop.permute.xlu1 %4948 }
0x1e48   :  { %v4951_v53 = vadd.f32 %v4949_v52, %v15097_v38 }
0x1e4a   :  { %13706 = vtanh.f32 %v4951_v53 }
0x1e4b   :  { %13708 = vpow2.f32 %v11398_v24  ;;  %v4868_v11 = vpop.permute.xlu1 %4867 }
0x1e4c   :  { %v4870_v12 = vadd.f32 %v4868_v11, %v15097_v38 }
0x1e4e   :  { %v11400_v15 = vmul.f32 -1.442695, %v4870_v12 }
0x1e4f   :  { %v5025_v46 = vpop.permute.xlu1 %5024 }
0x1e50   :  { %v5027_v43 = vadd.f32 %v5025_v46, %v15097_v38 }
0x1e52   :  { %v11403_v44 = vmul.f32 -1.442695, %v5027_v43 }
0x1e57   :  { %v13707_v41 = vpop.eup %13706 }
0x1e58   :  { %5036 = vrot.lane.b32.xlu0 %v13707_v41, %s14156_s28  ;;  %v13709_v6 = vpop.eup %13708 }
0x1e59   :  { %v4793_v9 = vadd.f32 1.0, %v13709_v6 }
0x1e5b   :  { %13710 = vrcp.f32 %v4793_v9 }
0x1e5c   :  { %13712 = vpow2.f32 %v11400_v15 }
0x1e68   :  { %v13711_v5 = vpop.eup %13710 }
0x1e69   :  { %v13713_v16 = vpop.eup %13712 }
0x1e6a   :  { %v4874_v35 = vadd.f32 1.0, %v13713_v16 }
0x1e6c   :  { %13714 = vrcp.f32 %v4874_v35 }
0x1e79   :  { %v13715_v37 = vpop.eup %13714 }
0x1e7a   :  { %v5034_v7 = vmul.f32 %v13715_v37, %v15170_v30 }
0x1eca   :  { %v5037_v33 = vpop.permute.xlu0 %5036 }
0x1ecb   :  { %v5039_v36 = vmul.f32 %v13711_v5, %v5037_v33 }
0x1ecd   :  { %5041 = vrot.lane.b32.xlu0 %v5039_v36, %s14155_s3 }
0x1f3f   :  { %v5042_v42 = vpop.permute.xlu0 %5041 }
0x1f40   :  { %v15235_v34 = vadd.f32 %v5042_v42, %v5034_v7 }
0x1f42   :  { %13716 = vtanh.f32 %v15235_v34 }
0x1f43   :  { %13718 = vpow2.f32 %v11403_v44 }
0x1f4f   :  { %v13717_v39 = vpop.eup %13716 }
0x1f50   :  { %5047 = vrot.lane.b32.xlu0 %v13717_v39, %s14156_s28  ;;  %v13719_v49 = vpop.eup %13718 }
0x1f51   :  { %v5031_v50 = vadd.f32 1.0, %v13719_v49 }
0x1f53   :  { %13720 = vrcp.f32 %v5031_v50 }
0x1f60   :  { %v13721_v52 = vpop.eup %13720 }
0x1fc2   :  { %v5048_v53 = vpop.permute.xlu0 %5047 }
0x1fc3   :  { %v5050_v41 = vmul.f32 %v13721_v52, %v5048_v53 }
0x1fc5   :  { %5052 = vrot.lane.b32.xlu1 %v5050_v41, %s14155_s3 }
0x2037   :  { %v15241_v30 = vpop.permute.xlu1 %5052 }
0x2038   :  { %12722 = vmatmul.mubr.msk.f32.vlgmr.msra.gmra.mxu0 %vm755_vm3, %v15241_v30  ;;  %12733 = vmatmul.mubr.msk.f32.vlgmr.msra.gmra.mxu1 %vm755_vm3, %v15241_v30 }
0x2039   :  { %12736 = vmatpush3.msra.mxu0 %v15002_v60  ;;  %12747 = vmatpush3.msra.mxu1 %v15031_v3 }
0x203a   :  { %12737 = vmatprep.subr.mxu0 %v14153_v0  ;;  %12748 = vmatprep.subr.mxu1 %v14153_v0 }
0x203b   :  { %12738 = vmatpush3.msra.mxu0 %v15011_v62  ;;  %12749 = vmatpush3.msra.mxu1 %v15037_v18 }
0x203c   :  { %12739 = vmatprep.subr.mxu0 %v14153_v0  ;;  %12750 = vmatprep.subr.mxu1 %v14153_v0 }
0x203d   :  { %12740 = vmatpush3.msra.mxu0 %v15018_v1  ;;  %12751 = vmatpush3.msra.mxu1 %v15042_v19 }
0x203e   :  { %12741 = vmatprep.subr.mxu0 %v14153_v0  ;;  %12752 = vmatprep.subr.mxu1 %v14153_v0 }
0x203f   :  { %12742 = vmatpush3.msra.mxu0 %v15024_v2  ;;  %12743 = vmatprep.mubr.msk.f32.mxu0 %vm14154_vm0, %v14153_v0 }
0x2040   :  { %12753 = vmatpush3.msra.mxu1 %v15049_v20  ;;  %12754 = vmatprep.mubr.msk.f32.mxu1 %vm14154_vm0, %v14153_v0 }
0x2041   :  { %12744 = vmatmul.mubr.msk.f32.vlgmr.msra.gmra.mxu0 %vm755_vm3, %v15241_v30  ;;  %12755 = vmatmul.mubr.msk.f32.vlgmr.msra.gmra.mxu1 %vm755_vm3, %v15241_v30 }
0x2042   :  { %12757 = vmatprep.subr.mxu0 %v14153_v0  ;;  %12768 = vmatprep.subr.mxu1 %v14153_v0 }
0x2043   :  { %12758 = vmatpush3.msra.mxu0 %v14963_v51  ;;  %12769 = vmatpush3.msra.mxu1 %v14982_v55 }
0x2044   :  { %12759 = vmatprep.subr.mxu0 %v14153_v0  ;;  %12770 = vmatprep.subr.mxu1 %v14153_v0 }
0x2045   :  { %12760 = vmatpush3.msra.mxu0 %v14976_v54  ;;  %12771 = vmatpush3.msra.mxu1 %v14993_v58 }
0x2046   :  { %12761 = vmatprep.subr.mxu0 %v14153_v0  ;;  %12772 = vmatprep.subr.mxu1 %v14153_v0 }
0x2047   :  { %12762 = vmatpush3.msra.mxu0 %v14985_v57  ;;  %12773 = vmatpush3.msra.mxu1 %v15005_v61 }
0x2048   :  { %12763 = vmatprep.subr.mxu0 %v14153_v0  ;;  %12774 = vmatprep.subr.mxu1 %v14153_v0 }
0x2049   :  { %12764 = vmatpush3.msra.mxu0 %v14996_v59  ;;  %12775 = vmatpush3.msra.mxu1 %v15013_v63 }
0x204a   :  { %12765 = vmatprep.mubr.msk.f32.mxu0 %vm14154_vm0, %v14153_v0  ;;  %12776 = vmatprep.mubr.msk.f32.mxu1 %vm14154_vm0, %v14153_v0 }
0x204b   :  { %12779 = vmatprep.subr.mxu0 %v14153_v0  ;;  %12790 = vmatprep.subr.mxu1 %v14153_v0 }
0x20f8   :  { %v5122_v38 = vpop.f32.mrf.mxu0  ;;  %v5199_v23 = vpop.f32.mrf.mxu1 }
0x20f9   :  { %v5126_v16 = vadd.f32 %v5122_v38, %v15095_v17 }
0x20fa   :  { %v12723_v24 = vpop.f32.mrf.mxu0  ;;  %v12734_v6 = vpop.f32.mrf.mxu1 }
0x20fb   :  { %v11405_v35 = vmul.f32 -1.442695, %v5126_v16 }
0x2101   :  { %v5280_v9 = vpop.f32.mrf.mxu0  ;;  %v5356_v5 = vpop.f32.mrf.mxu1 }
0x2102   :  { %5285 = vrot.lane.b32.xlu0 %v5280_v9, %s14156_s28 }
0x2103   :  { %v12745_v33 = vpop.f32.mrf.mxu0  ;;  %v12756_v36 = vpop.f32.mrf.mxu1 }
0x2106   :  { %5204 = vrot.lane.b32.xlu0 %v5199_v23, %s14155_s3 }
0x210a   :  { %5361 = vrot.lane.b32.xlu0 %v5356_v5, %s14157_s8 }
0x2174   :  { %v5286_v11 = vpop.permute.xlu0 %5285 }
0x2175   :  { %v5288_v12 = vadd.f32 %v5286_v11, %v15095_v17 }
0x2177   :  { %13722 = vtanh.f32 %v5288_v12 }
0x2178   :  { %13724 = vpow2.f32 %v11405_v35  ;;  %v5205_v43 = vpop.permute.xlu0 %5204 }
0x2179   :  { %v5207_v44 = vadd.f32 %v5205_v43, %v15095_v17 }
0x217b   :  { %v11407_v49 = vmul.f32 -1.442695, %v5207_v44 }
0x217c   :  { %v5362_v6 = vpop.permute.xlu0 %5361 }
0x217d   :  { %v5364_v9 = vadd.f32 %v5362_v6, %v15095_v17 }
0x217f   :  { %v11410_v5 = vmul.f32 -1.442695, %v5364_v9 }
0x2184   :  { %v13723_v15 = vpop.eup %13722 }
0x2185   :  { %5373 = vrot.lane.b32.xlu1 %v13723_v15, %s14156_s28  ;;  %v13725_v37 = vpop.eup %13724 }
0x2186   :  { %v5130_v7 = vadd.f32 1.0, %v13725_v37 }
0x2188   :  { %13726 = vrcp.f32 %v5130_v7 }
0x2189   :  { %13728 = vpow2.f32 %v11407_v49 }
0x2195   :  { %v13727_v42 = vpop.eup %13726 }
0x2196   :  { %v13729_v50 = vpop.eup %13728 }
0x2197   :  { %v5211_v52 = vadd.f32 1.0, %v13729_v50 }
0x2199   :  { %13730 = vrcp.f32 %v5211_v52 }
0x21a6   :  { %v13731_v53 = vpop.eup %13730 }
0x21a7   :  { %v5371_v41 = vmul.f32 %v13731_v53, %v15235_v34 }
0x21f7   :  { %v5374_v39 = vpop.permute.xlu1 %5373 }
0x21f8   :  { %v5376_v46 = vmul.f32 %v13727_v42, %v5374_v39 }
0x21fa   :  { %5378 = vrot.lane.b32.xlu1 %v5376_v46, %s14155_s3 }
0x226c   :  { %v5379_v38 = vpop.permute.xlu1 %5378 }
0x226d   :  { %v15300_v23 = vadd.f32 %v5379_v38, %v5371_v41 }
0x226f   :  { %13732 = vtanh.f32 %v15300_v23 }
0x2270   :  { %13734 = vpow2.f32 %v11410_v5 }
0x227c   :  { %v13733_v24 = vpop.eup %13732 }
0x227d   :  { %5384 = vrot.lane.b32.xlu1 %v13733_v24, %s14156_s28  ;;  %v13735_v33 = vpop.eup %13734 }
0x227e   :  { %v5368_v36 = vadd.f32 1.0, %v13735_v33 }
0x2280   :  { %13736 = vrcp.f32 %v5368_v36 }
0x228d   :  { %v13737_v11 = vpop.eup %13736 }
0x22ef   :  { %v5385_v12 = vpop.permute.xlu1 %5384 }
0x22f0   :  { %v5387_v15 = vmul.f32 %v13737_v11, %v5385_v12 }
0x22f2   :  { %5389 = vrot.lane.b32.xlu0 %v5387_v15, %s14155_s3 }
0x2364   :  { %v15306_v34 = vpop.permute.xlu0 %5389 }
0x2365   :  { %12766 = vmatmul.mubr.msk.f32.vlgmr.msra.gmra.mxu0 %vm755_vm3, %v15306_v34  ;;  %12777 = vmatmul.mubr.msk.f32.vlgmr.msra.gmra.mxu1 %vm755_vm3, %v15306_v34 }
0x2366   :  { %12780 = vmatpush3.msra.mxu0 %v15002_v60  ;;  %12791 = vmatpush3.msra.mxu1 %v15031_v3 }
0x2367   :  { %12781 = vmatprep.subr.mxu0 %v14153_v0  ;;  %12792 = vmatprep.subr.mxu1 %v14153_v0 }
0x2368   :  { %12782 = vmatpush3.msra.mxu0 %v15011_v62  ;;  %12793 = vmatpush3.msra.mxu1 %v15037_v18 }
0x2369   :  { %12783 = vmatprep.subr.mxu0 %v14153_v0  ;;  %12794 = vmatprep.subr.mxu1 %v14153_v0 }
0x236a   :  { %12784 = vmatpush3.msra.mxu0 %v15018_v1  ;;  %12795 = vmatpush3.msra.mxu1 %v15042_v19 }
0x236b   :  { %12785 = vmatprep.subr.mxu0 %v14153_v0  ;;  %12796 = vmatprep.subr.mxu1 %v14153_v0 }
0x236c   :  { %12786 = vmatpush3.msra.mxu0 %v15024_v2  ;;  %12787 = vmatprep.mubr.msk.f32.mxu0 %vm14154_vm0, %v14153_v0 }
0x236d   :  { %12797 = vmatpush3.msra.mxu1 %v15049_v20  ;;  %12798 = vmatprep.mubr.msk.f32.mxu1 %vm14154_vm0, %v14153_v0 }
0x236e   :  { %12788 = vmatmul.mubr.msk.f32.vlgmr.msra.gmra.mxu0 %vm755_vm3, %v15306_v34  ;;  %12799 = vmatmul.mubr.msk.f32.vlgmr.msra.gmra.mxu1 %vm755_vm3, %v15306_v34 }
0x236f   :  { %12801 = vmatprep.subr.mxu0 %v14153_v0  ;;  %12812 = vmatprep.subr.mxu1 %v14153_v0 }
0x2370   :  { %12802 = vmatpush3.msra.mxu0 %v14963_v51  ;;  %12813 = vmatpush3.msra.mxu1 %v14982_v55 }
0x2371   :  { %12803 = vmatprep.subr.mxu0 %v14153_v0  ;;  %12814 = vmatprep.subr.mxu1 %v14153_v0 }
0x2372   :  { %12804 = vmatpush3.msra.mxu0 %v14976_v54  ;;  %12815 = vmatpush3.msra.mxu1 %v14993_v58 }
0x2373   :  { %12805 = vmatprep.subr.mxu0 %v14153_v0  ;;  %12816 = vmatprep.subr.mxu1 %v14153_v0 }
0x2374   :  { %12806 = vmatpush3.msra.mxu0 %v14985_v57  ;;  %12817 = vmatpush3.msra.mxu1 %v15005_v61 }
0x2375   :  { %12807 = vmatprep.subr.mxu0 %v14153_v0  ;;  %12818 = vmatprep.subr.mxu1 %v14153_v0 }
0x2376   :  { %12808 = vmatpush3.msra.mxu0 %v14996_v59  ;;  %12819 = vmatpush3.msra.mxu1 %v15013_v63 }
0x2377   :  { %12809 = vmatprep.mubr.msk.f32.mxu0 %vm14154_vm0, %v14153_v0  ;;  %12820 = vmatprep.mubr.msk.f32.mxu1 %vm14154_vm0, %v14153_v0 }
0x2378   :  { %12823 = vmatprep.subr.mxu0 %v14153_v0  ;;  %12834 = vmatprep.subr.mxu1 %v14153_v0 }
0x2425   :  { %v5459_v51 = vpop.f32.mrf.mxu0  ;;  %v5536_v54 = vpop.f32.mrf.mxu1 }
0x2426   :  { %v5463_v35 = vadd.f32 %v5459_v51, %v15093_v13 }
0x2427   :  { %v12767_v55 = vpop.f32.mrf.mxu0  ;;  %v12778_v57 = vpop.f32.mrf.mxu1 }
0x2428   :  { %v11412_v37 = vmul.f32 -1.442695, %v5463_v35  ;;  %v15377_v55 = vld [vmem:[#allocation5 + $0x58] sm:$0xff] }
0x242e   :  { %v5617_v58 = vpop.f32.mrf.mxu0  ;;  %v5693_v60 = vpop.f32.mrf.mxu1 }
0x242f   :  { %5622 = vrot.lane.b32.xlu1 %v5617_v58, %s14156_s28 }
0x2430   :  { %v12789_v59 = vpop.f32.mrf.mxu0  ;;  %v12800_v61 = vpop.f32.mrf.mxu1 }
0x2433   :  { %5541 = vrot.lane.b32.xlu1 %v5536_v54, %s14155_s3 }
0x2437   :  { %5698 = vrot.lane.b32.xlu1 %v5693_v60, %s14157_s8 }
0x24a1   :  { %v5623_v63 = vpop.permute.xlu1 %5622 }
0x24a2   :  { %v5625_v17 = vadd.f32 %v5623_v63, %v15093_v13 }
0x24a4   :  { %13738 = vtanh.f32 %v5625_v17 }
0x24a5   :  { %13740 = vpow2.f32 %v11412_v37  ;;  %v5542_v44 = vpop.permute.xlu1 %5541 }
0x24a6   :  { %v5544_v49 = vadd.f32 %v5542_v44, %v15093_v13 }
0x24a8   :  { %v11414_v50 = vmul.f32 -1.442695, %v5544_v49 }
0x24a9   :  { %v5699_v5 = vpop.permute.xlu1 %5698 }
0x24aa   :  { %v5701_v33 = vadd.f32 %v5699_v5, %v15093_v13  ;;  %v15430_v13 = vld [vmem:[#allocation5 + $0x20] sm:$0xff] }
0x24ac   :  { %v11417_v36 = vmul.f32 -1.442695, %v5701_v33 }
0x24b1   :  { %v13739_v16 = vpop.eup %13738 }
0x24b2   :  { %5710 = vrot.lane.b32.xlu0 %v13739_v16, %s14156_s28  ;;  %v13741_v7 = vpop.eup %13740 }
0x24b3   :  { %v5467_v42 = vadd.f32 1.0, %v13741_v7 }
0x24b5   :  { %13742 = vrcp.f32 %v5467_v42 }
0x24b6   :  { %13744 = vpow2.f32 %v11414_v50 }
0x24c2   :  { %v13743_v39 = vpop.eup %13742 }
0x24c3   :  { %v13745_v52 = vpop.eup %13744 }
0x24c4   :  { %v5548_v53 = vadd.f32 1.0, %v13745_v52 }
0x24c6   :  { %13746 = vrcp.f32 %v5548_v53 }
0x24d3   :  { %v13747_v41 = vpop.eup %13746 }
0x24d4   :  { %v5708_v38 = vmul.f32 %v13747_v41, %v15300_v23 }
0x2524   :  { %v5711_v46 = vpop.permute.xlu0 %5710 }
0x2525   :  { %v5713_v43 = vmul.f32 %v13743_v39, %v5711_v46 }
0x2527   :  { %5715 = vrot.lane.b32.xlu0 %v5713_v43, %s14155_s3 }
0x2599   :  { %v5716_v24 = vpop.permute.xlu0 %5715 }
0x259a   :  { %v15365_v6 = vadd.f32 %v5716_v24, %v5708_v38 }
0x259c   :  { %13748 = vtanh.f32 %v15365_v6 }
0x259d   :  { %13750 = vpow2.f32 %v11417_v36 }
0x25a9   :  { %v13749_v9 = vpop.eup %13748 }
0x25aa   :  { %5721 = vrot.lane.b32.xlu0 %v13749_v9, %s14156_s28  ;;  %v13751_v11 = vpop.eup %13750 }
0x25ab   :  { %v5705_v12 = vadd.f32 1.0, %v13751_v11 }
0x25ad   :  { %13752 = vrcp.f32 %v5705_v12 }
0x25ba   :  { %v13753_v15 = vpop.eup %13752 }
0x261c   :  { %v5722_v51 = vpop.permute.xlu0 %5721 }
0x261d   :  { %v5724_v54 = vmul.f32 %v13753_v15, %v5722_v51 }
0x261f   :  { %5726 = vrot.lane.b32.xlu1 %v5724_v54, %s14155_s3 }
0x2691   :  { %v15371_v23 = vpop.permute.xlu1 %5726 }
0x2692   :  { %12810 = vmatmul.mubr.msk.f32.vlgmr.msra.gmra.mxu0 %vm755_vm3, %v15371_v23  ;;  %12821 = vmatmul.mubr.msk.f32.vlgmr.msra.gmra.mxu1 %vm755_vm3, %v15371_v23 }
0x2693   :  { %12824 = vmatpush3.msra.mxu0 %v15377_v55  ;;  %12835 = vmatpush3.msra.mxu1 %v15031_v3  ;;  %v15414_v3 = vld [vmem:[#allocation5 + $0x30] sm:$0xff] }
0x2694   :  { %12825 = vmatprep.subr.mxu0 %v14153_v0  ;;  %12836 = vmatprep.subr.mxu1 %v14153_v0 }
0x2695   :  { %12826 = vmatpush3.msra.mxu0 %v15011_v62  ;;  %12837 = vmatpush3.msra.mxu1 %v15037_v18  ;;  %v15403_v62 = vld [vmem:[#allocation5 + $0x18] sm:$0xff]  ;;  %v15419_v18 = vld [vmem:[#allocation5 + $0x8] sm:$0xff] }
0x2696   :  { %12827 = vmatprep.subr.mxu0 %v14153_v0  ;;  %12838 = vmatprep.subr.mxu1 %v14153_v0 }
0x2697   :  { %12828 = vmatpush3.msra.mxu0 %v15018_v1  ;;  %12839 = vmatpush3.msra.mxu1 %v15042_v19  ;;  %v15406_v1 = vld [vmem:[#allocation5 + $0x38] sm:$0xff]  ;;  %v15422_v19 = vld [vmem:[#allocation5 + $0x28] sm:$0xff] }
0x2698   :  { %12829 = vmatprep.subr.mxu0 %v14153_v0  ;;  %12840 = vmatprep.subr.mxu1 %v14153_v0 }
0x2699   :  { %12830 = vmatpush3.msra.mxu0 %v15024_v2  ;;  %12831 = vmatprep.mubr.msk.f32.mxu0 %vm14154_vm0, %v14153_v0  ;;  %v15411_v2 = vld [vmem:[#allocation5 + $0x10] sm:$0xff] }
0x269a   :  { %12841 = vmatpush3.msra.mxu1 %v15049_v20  ;;  %12842 = vmatprep.mubr.msk.f32.mxu1 %vm14154_vm0, %v14153_v0  ;;  %v15427_v20 = vld [vmem:[#allocation5] sm:$0xff] }
0x269b   :  { %12832 = vmatmul.mubr.msk.f32.vlgmr.msra.gmra.mxu0 %vm755_vm3, %v15371_v23  ;;  %12843 = vmatmul.mubr.msk.f32.vlgmr.msra.gmra.mxu1 %vm755_vm3, %v15371_v23 }
0x269c   :  { %12845 = vmatprep.subr.mxu0 %v14153_v0  ;;  %12856 = vmatprep.subr.mxu1 %v14153_v0 }
0x269d   :  { %12846 = vmatpush3.msra.mxu0 %v15403_v62  ;;  %12857 = vmatpush3.msra.mxu1 %v15406_v1 }
0x269e   :  { %12847 = vmatprep.subr.mxu0 %v14153_v0  ;;  %12858 = vmatprep.subr.mxu1 %v14153_v0 }
0x269f   :  { %12848 = vmatpush3.msra.mxu0 %v15411_v2  ;;  %12859 = vmatpush3.msra.mxu1 %v15414_v3 }
0x26a0   :  { %12849 = vmatprep.subr.mxu0 %v14153_v0  ;;  %12860 = vmatprep.subr.mxu1 %v14153_v0 }
0x26a1   :  { %12850 = vmatpush3.msra.mxu0 %v15419_v18  ;;  %12861 = vmatpush3.msra.mxu1 %v15422_v19 }
0x26a2   :  { %12851 = vmatprep.subr.mxu0 %v14153_v0  ;;  %12862 = vmatprep.subr.mxu1 %v14153_v0 }
0x26a3   :  { %12852 = vmatpush3.msra.mxu0 %v15427_v20  ;;  %12863 = vmatpush3.msra.mxu1 %v15430_v13 }
0x26a4   :  { %12853 = vmatprep.mubr.msk.f32.mxu0 %vm14154_vm0, %v14153_v0  ;;  %12864 = vmatprep.mubr.msk.f32.mxu1 %vm14154_vm0, %v14153_v0 }
0x26a5   :  { %12867 = vmatprep.subr.mxu0 %v14153_v0  ;;  %12878 = vmatprep.subr.mxu1 %v14153_v0 }
0x2752   :  { %v5796_v57 = vpop.f32.mrf.mxu0  ;;  %v5873_v58 = vpop.f32.mrf.mxu1 }
0x2753   :  { %v5800_v42 = vadd.f32 %v5796_v57, %v15091_v10 }
0x2754   :  { %v12811_v60 = vpop.f32.mrf.mxu0  ;;  %v12822_v59 = vpop.f32.mrf.mxu1 }
0x2755   :  { %v11419_v39 = vmul.f32 -1.442695, %v5800_v42 }
0x275b   :  { %v5954_v61 = vpop.f32.mrf.mxu0  ;;  %v6030_v63 = vpop.f32.mrf.mxu1 }
0x275c   :  { %5959 = vrot.lane.b32.xlu0 %v5954_v61, %s14156_s28  ;;  %v15466_v61 = vld [vmem:[#allocation5 + $0x50] sm:$0xff] }
0x275d   :  { %v12833_v17 = vpop.f32.mrf.mxu0  ;;  %v12844_v16 = vpop.f32.mrf.mxu1 }
0x275e   :  { %v15474_v17 = vld [vmem:[#allocation5 + $0x48] sm:$0xff] }
0x275f   :  { %v15477_v16 = vld [vmem:[#allocation5 + $0x68] sm:$0xff] }
0x2760   :  { %5878 = vrot.lane.b32.xlu0 %v5873_v58, %s14155_s3 }
0x2764   :  { %6035 = vrot.lane.b32.xlu0 %v6030_v63, %s14157_s8  ;;  %v15469_v63 = vld [vmem:[#allocation5 + $0x70] sm:$0xff] }
0x27ce   :  { %v5960_v35 = vpop.permute.xlu0 %5959 }
0x27cf   :  { %v5962_v37 = vadd.f32 %v5960_v35, %v15091_v10  ;;  %v15482_v35 = vld [vmem:[#allocation5 + $0x40] sm:$0xff] }
0x27d1   :  { %13754 = vtanh.f32 %v5962_v37  ;;  %v15487_v37 = vld [vmem:[#allocation5 + $0x60] sm:$0xff] }
0x27d2   :  { %13756 = vpow2.f32 %v11419_v39  ;;  %v5879_v52 = vpop.permute.xlu0 %5878 }
0x27d3   :  { %v5881_v53 = vadd.f32 %v5879_v52, %v15091_v10 }
0x27d5   :  { %v11421_v41 = vmul.f32 -1.442695, %v5881_v53 }
0x27d6   :  { %v6036_v12 = vpop.permute.xlu0 %6035 }
0x27d7   :  { %v6038_v15 = vadd.f32 %v6036_v12, %v15091_v10  ;;  %v15461_v10 = vld [vmem:[#allocation5 + $0x78] sm:$0xff] }
0x27d9   :  { %v11424_v51 = vmul.f32 -1.442695, %v6038_v15 }
0x27de   :  { %v13755_v7 = vpop.eup %13754 }
0x27df   :  { %6047 = vrot.lane.b32.xlu1 %v13755_v7, %s14156_s28  ;;  %v13757_v46 = vpop.eup %13756 }
0x27e0   :  { %v5804_v43 = vadd.f32 1.0, %v13757_v46 }
0x27e2   :  { %13758 = vrcp.f32 %v5804_v43 }
0x27e3   :  { %13760 = vpow2.f32 %v11421_v41 }
0x27ef   :  { %v13759_v44 = vpop.eup %13758 }
0x27f0   :  { %v13761_v38 = vpop.eup %13760 }
0x27f1   :  { %v5885_v24 = vadd.f32 1.0, %v13761_v38 }
0x27f3   :  { %13762 = vrcp.f32 %v5885_v24 }
0x2800   :  { %v13763_v9 = vpop.eup %13762 }
0x2801   :  { %v6045_v5 = vmul.f32 %v13763_v9, %v15365_v6 }
0x2851   :  { %v6048_v49 = vpop.permute.xlu1 %6047 }
0x2852   :  { %v6050_v50 = vmul.f32 %v13759_v44, %v6048_v49 }
0x2854   :  { %6052 = vrot.lane.b32.xlu1 %v6050_v50, %s14155_s3 }
0x28c6   :  { %v6053_v33 = vpop.permute.xlu1 %6052 }
0x28c7   :  { %v15448_v36 = vadd.f32 %v6053_v33, %v6045_v5 }
0x28c9   :  { %13764 = vtanh.f32 %v15448_v36 }
0x28ca   :  { %13766 = vpow2.f32 %v11424_v51 }
0x28d6   :  { %v13765_v11 = vpop.eup %13764 }
0x28d7   :  { %6058 = vrot.lane.b32.xlu1 %v13765_v11, %s14156_s28  ;;  %v13767_v54 = vpop.eup %13766 }
0x28d8   :  { %v6042_v57 = vadd.f32 1.0, %v13767_v54 }
0x28da   :  { %13768 = vrcp.f32 %v6042_v57 }
0x28e7   :  { %v13769_v58 = vpop.eup %13768 }
0x2949   :  { %v6059_v60 = vpop.permute.xlu1 %6058 }
0x294a   :  { %v6061_v59 = vmul.f32 %v13769_v58, %v6059_v60 }
0x294c   :  { %6063 = vrot.lane.b32.xlu0 %v6061_v59, %s14155_s3 }
0x29be   :  { %v15454_v6 = vpop.permute.xlu0 %6063 }
0x29bf   :  { %12854 = vmatmul.mubr.msk.f32.vlgmr.msra.gmra.mxu0 %vm755_vm3, %v15454_v6  ;;  %12865 = vmatmul.mubr.msk.f32.vlgmr.msra.gmra.mxu1 %vm755_vm3, %v15454_v6 }
0x29c0   :  { %12868 = vmatpush3.msra.mxu0 %v15377_v55  ;;  %12879 = vmatpush3.msra.mxu1 %v15461_v10 }
0x29c1   :  { %12869 = vmatprep.subr.mxu0 %v14153_v0  ;;  %12880 = vmatprep.subr.mxu1 %v14153_v0 }
0x29c2   :  { %12870 = vmatpush3.msra.mxu0 %v15466_v61  ;;  %12881 = vmatpush3.msra.mxu1 %v15469_v63 }
0x29c3   :  { %12871 = vmatprep.subr.mxu0 %v14153_v0  ;;  %12882 = vmatprep.subr.mxu1 %v14153_v0 }
0x29c4   :  { %12872 = vmatpush3.msra.mxu0 %v15474_v17  ;;  %12883 = vmatpush3.msra.mxu1 %v15477_v16 }
0x29c5   :  { %12873 = vmatprep.subr.mxu0 %v14153_v0  ;;  %12884 = vmatprep.subr.mxu1 %v14153_v0 }
0x29c6   :  { %12874 = vmatpush3.msra.mxu0 %v15482_v35  ;;  %12875 = vmatprep.mubr.msk.f32.mxu0 %vm14154_vm0, %v14153_v0 }
0x29c7   :  { %12885 = vmatpush3.msra.mxu1 %v15487_v37  ;;  %12886 = vmatprep.mubr.msk.f32.mxu1 %vm14154_vm0, %v14153_v0 }
0x29c8   :  { %12876 = vmatmul.mubr.msk.f32.vlgmr.msra.gmra.mxu0 %vm755_vm3, %v15454_v6  ;;  %12887 = vmatmul.mubr.msk.f32.vlgmr.msra.gmra.mxu1 %vm755_vm3, %v15454_v6 }
0x29c9   :  { %12889 = vmatprep.subr.mxu0 %v14153_v0  ;;  %12900 = vmatprep.subr.mxu1 %v14153_v0 }
0x29ca   :  { %12890 = vmatpush3.msra.mxu0 %v15403_v62  ;;  %12901 = vmatpush3.msra.mxu1 %v15406_v1 }
0x29cb   :  { %12891 = vmatprep.subr.mxu0 %v14153_v0  ;;  %12902 = vmatprep.subr.mxu1 %v14153_v0 }
0x29cc   :  { %12892 = vmatpush3.msra.mxu0 %v15411_v2  ;;  %12903 = vmatpush3.msra.mxu1 %v15414_v3 }
0x29cd   :  { %12893 = vmatprep.subr.mxu0 %v14153_v0  ;;  %12904 = vmatprep.subr.mxu1 %v14153_v0 }
0x29ce   :  { %12894 = vmatpush3.msra.mxu0 %v15419_v18  ;;  %12905 = vmatpush3.msra.mxu1 %v15422_v19 }
0x29cf   :  { %12895 = vmatprep.subr.mxu0 %v14153_v0  ;;  %12906 = vmatprep.subr.mxu1 %v14153_v0 }
0x29d0   :  { %12896 = vmatpush3.msra.mxu0 %v15427_v20  ;;  %12907 = vmatpush3.msra.mxu1 %v15430_v13 }
0x29d1   :  { %12897 = vmatprep.mubr.msk.f32.mxu0 %vm14154_vm0, %v14153_v0  ;;  %12908 = vmatprep.mubr.msk.f32.mxu1 %vm14154_vm0, %v14153_v0 }
0x29d2   :  { %12911 = vmatprep.subr.mxu0 %v14153_v0  ;;  %12922 = vmatprep.subr.mxu1 %v14153_v0 }
0x2a7f   :  { %v6133_v62 = vpop.f32.mrf.mxu0  ;;  %v6210_v1 = vpop.f32.mrf.mxu1 }
0x2a80   :  { %v6137_v46 = vadd.f32 %v6133_v62, %v15089_v32 }
0x2a81   :  { %v12855_v2 = vpop.f32.mrf.mxu0  ;;  %v12866_v3 = vpop.f32.mrf.mxu1 }
0x2a82   :  { %v11426_v43 = vmul.f32 -1.442695, %v6137_v46 }
0x2a88   :  { %v6291_v18 = vpop.f32.mrf.mxu0  ;;  %v6367_v19 = vpop.f32.mrf.mxu1 }
0x2a89   :  { %6296 = vrot.lane.b32.xlu1 %v6291_v18, %s14156_s28 }
0x2a8a   :  { %v12877_v20 = vpop.f32.mrf.mxu0  ;;  %v12888_v13 = vpop.f32.mrf.mxu1 }
0x2a8d   :  { %6215 = vrot.lane.b32.xlu1 %v6210_v1, %s14155_s3 }
0x2a91   :  { %6372 = vrot.lane.b32.xlu1 %v6367_v19, %s14157_s8 }
0x2afb   :  { %v6297_v7 = vpop.permute.xlu1 %6296 }
0x2afc   :  { %v6299_v42 = vadd.f32 %v6297_v7, %v15089_v32 }
0x2afe   :  { %13770 = vtanh.f32 %v6299_v42 }
0x2aff   :  { %13772 = vpow2.f32 %v11426_v43  ;;  %v6216_v41 = vpop.permute.xlu1 %6215 }
0x2b00   :  { %v6218_v38 = vadd.f32 %v6216_v41, %v15089_v32 }
0x2b02   :  { %v11428_v24 = vmul.f32 -1.442695, %v6218_v38 }
0x2b03   :  { %v6373_v54 = vpop.permute.xlu1 %6372 }
0x2b04   :  { %v6375_v57 = vadd.f32 %v6373_v54, %v15089_v32  ;;  %v15564_v32 = vld [vmem:[%s16502_s7 + $0x18] sm:$0xff] }
0x2b06   :  { %v11431_v58 = vmul.f32 -1.442695, %v6375_v57 }
0x2b0b   :  { %v13771_v39 = vpop.eup %13770 }
0x2b0c   :  { %6384 = vrot.lane.b32.xlu0 %v13771_v39, %s14156_s28  ;;  %v13773_v44 = vpop.eup %13772 }
0x2b0d   :  { %v6141_v49 = vadd.f32 1.0, %v13773_v44 }
0x2b0f   :  { %13774 = vrcp.f32 %v6141_v49 }
0x2b10   :  { %13776 = vpow2.f32 %v11428_v24 }
0x2b1c   :  { %v13775_v50 = vpop.eup %13774 }
0x2b1d   :  { %v13777_v9 = vpop.eup %13776 }
0x2b1e   :  { %v6222_v5 = vadd.f32 1.0, %v13777_v9 }
0x2b20   :  { %13778 = vrcp.f32 %v6222_v5 }
0x2b2d   :  { %v13779_v33 = vpop.eup %13778 }
0x2b2e   :  { %v6382_v11 = vmul.f32 %v13779_v33, %v15448_v36 }
0x2b7e   :  { %v6385_v52 = vpop.permute.xlu0 %6384 }
0x2b7f   :  { %v6387_v53 = vmul.f32 %v13775_v50, %v6385_v52 }
0x2b81   :  { %6389 = vrot.lane.b32.xlu0 %v6387_v53, %s14155_s3 }
0x2bf3   :  { %v6390_v12 = vpop.permute.xlu0 %6389 }
0x2bf4   :  { %v15527_v15 = vadd.f32 %v6390_v12, %v6382_v11 }
0x2bf6   :  { %13780 = vtanh.f32 %v15527_v15 }
0x2bf7   :  { %13782 = vpow2.f32 %v11431_v58 }
0x2c03   :  { %v13781_v51 = vpop.eup %13780 }
0x2c04   :  { %6395 = vrot.lane.b32.xlu0 %v13781_v51, %s14156_s28  ;;  %v13783_v60 = vpop.eup %13782 }
0x2c05   :  { %v6379_v59 = vadd.f32 1.0, %v13783_v60 }
0x2c07   :  { %13784 = vrcp.f32 %v6379_v59 }
0x2c08   :  { %3347 = vrot.lane.b32.xlu0 %v15080_v25, %s14156_s28 }
0x2c14   :  { %v13785_v36 = vpop.eup %13784 }
0x2c76   :  { %v6396_v62 = vpop.permute.xlu0 %6395 }
0x2c77   :  { %v6398_v1 = vmul.f32 %v13785_v36, %v6396_v62 }
0x2c79   :  { %6400 = vrot.lane.b32.xlu1 %v6398_v1, %s14155_s3 }
0x2c7a   :  { %v3348_v2 = vpop.permute.xlu0 %3347 }
0x2c7b   :  { %v3350_v3 = vadd.f32 %v3348_v2, %v14449_v47 }
0x2c7d   :  { %13786 = vtanh.f32 %v3350_v3 }
0x2c8a   :  { %v13787_v18 = vpop.eup %13786 }
0x2c8b   :  { %3435 = vrot.lane.b32.xlu0 %v13787_v18, %s14156_s28 }
0x2ceb   :  { %v15537_v25 = vpop.permute.xlu1 %6400 }
0x2cec   :  { %12898 = vmatmul.mubr.msk.f32.vlgmr.msra.gmra.mxu0 %vm755_vm3, %v15537_v25  ;;  %12909 = vmatmul.mubr.msk.f32.vlgmr.msra.gmra.mxu1 %vm755_vm3, %v15537_v25 }
0x2ced   :  { %12912 = vmatpush3.msra.mxu0 %v15377_v55  ;;  %12923 = vmatpush3.msra.mxu1 %v15461_v10  ;;  %v15574_v55 = vld [vmem:[%s16502_s7 + $0x10] sm:$0xff]  ;;  %v15584_v10 = vld [vmem:[%s16502_s7 + $0x8] sm:$0xff] }
0x2cee   :  { %12913 = vmatprep.subr.mxu0 %v14153_v0  ;;  %12924 = vmatprep.subr.mxu1 %v14153_v0 }
0x2cef   :  { %12914 = vmatpush3.msra.mxu0 %v15466_v61  ;;  %12925 = vmatpush3.msra.mxu1 %v15469_v63  ;;  %v15593_v61 = vld [vmem:[%s16502_s7] sm:$0xff] }
0x2cf0   :  { %12915 = vmatprep.subr.mxu0 %v14153_v0  ;;  %12926 = vmatprep.subr.mxu1 %v14153_v0 }
0x2cf1   :  { %12916 = vmatpush3.msra.mxu0 %v15474_v17  ;;  %12927 = vmatpush3.msra.mxu1 %v15477_v16 }
0x2cf2   :  { %12917 = vmatprep.subr.mxu0 %v14153_v0  ;;  %12928 = vmatprep.subr.mxu1 %v14153_v0 }
0x2cf3   :  { %12918 = vmatpush3.msra.mxu0 %v15482_v35  ;;  %12919 = vmatprep.mubr.msk.f32.mxu0 %vm14154_vm0, %v14153_v0 }
0x2cf4   :  { %12929 = vmatpush3.msra.mxu1 %v15487_v37  ;;  %12930 = vmatprep.mubr.msk.f32.mxu1 %vm14154_vm0, %v14153_v0 }
0x2cf5   :  { %12920 = vmatmul.mubr.msk.f32.vlgmr.msra.gmra.mxu0 %vm755_vm3, %v15537_v25  ;;  %12931 = vmatmul.mubr.msk.f32.vlgmr.msra.gmra.mxu1 %vm755_vm3, %v15537_v25 }
0x2cf6   :  { %12933 = vmatprep.subr.mxu0 %v14153_v0  ;;  %12941 = vmatprep.mubr.msk.f32.mxu0 %vm14154_vm0, %v14153_v0 }
0x2cf7   :  { %12934 = vmatpush3.msra.mxu0 %v15564_v32  ;;  %12944 = vmatprep.subr.mxu1 %v14153_v0 }
0x2cf8   :  { %12935 = vmatprep.subr.mxu0 %v14153_v0  ;;  %12952 = vmatprep.mubr.msk.f32.mxu1 %vm14154_vm0, %v14153_v0 }
0x2cf9   :  { %12936 = vmatpush3.msra.mxu0 %v15574_v55 }
0x2cfa   :  { %12937 = vmatprep.subr.mxu0 %v14153_v0 }
0x2cfb   :  { %12938 = vmatpush3.msra.mxu0 %v15584_v10 }
0x2cfc   :  { %12939 = vmatprep.subr.mxu0 %v14153_v0 }
0x2cfd   :  { %12940 = vmatpush3.msra.mxu0 %v15593_v61  ;;  %v3436_v19 = vpop.permute.xlu0 %3435 }
0x2cfe   :  { %12942 = vmatmul.mubr.msk.f32.vlgmr.msra.gmra.mxu0 %vm755_vm3, %v14461_v45  ;;  %12955 = vmatprep.subr.mxu0 %v14153_v0  ;;  %v3188_v45 = vadd.f32 %v15076_v21, %v14449_v47 }
0x2cff   :  { %12956 = vmatpush3.msra.mxu0 %v15564_v32  ;;  %12963 = vmatprep.mubr.msk.f32.mxu0 %vm14154_vm0, %v14153_v0 }
0x2d00   :  { %12957 = vmatprep.subr.mxu0 %v14153_v0 }
0x2d01   :  { %12958 = vmatpush3.msra.mxu0 %v15574_v55 }
0x2d02   :  { %12959 = vmatprep.subr.mxu0 %v14153_v0 }
0x2d03   :  { %12960 = vmatpush3.msra.mxu0 %v15584_v10 }
0x2d04   :  { %12961 = vmatprep.subr.mxu0 %v14153_v0 }
0x2d05   :  { %12962 = vmatpush3.msra.mxu0 %v15593_v61 }
0x2d06   :  { %12964 = vmatmul.mubr.msk.f32.vlgmr.msra.gmra.mxu0 %vm755_vm3, %v14526_v31  ;;  %12977 = vmatprep.subr.mxu0 %v14153_v0  ;;  %v11364_v31 = vmul.f32 -1.442695, %v3188_v45 }
0x2d07   :  { %12978 = vmatpush3.msra.mxu0 %v15564_v32  ;;  %12985 = vmatprep.mubr.msk.f32.mxu0 %vm14154_vm0, %v14153_v0 }
0x2d08   :  { %12979 = vmatprep.subr.mxu0 %v14153_v0  ;;  %13788 = vpow2.f32 %v11364_v31 }
0x2d09   :  { %12980 = vmatpush3.msra.mxu0 %v15574_v55 }
0x2d0a   :  { %12981 = vmatprep.subr.mxu0 %v14153_v0 }
0x2d0b   :  { %12982 = vmatpush3.msra.mxu0 %v15584_v10 }
0x2d0c   :  { %12983 = vmatprep.subr.mxu0 %v14153_v0 }
0x2d0d   :  { %12984 = vmatpush3.msra.mxu0 %v15593_v61 }
0x2d0e   :  { %12986 = vmatmul.mubr.msk.f32.vlgmr.msra.gmra.mxu0 %vm755_vm3, %v14591_v27  ;;  %12999 = vmatprep.subr.mxu0 %v14153_v0 }
0x2d0f   :  { %13000 = vmatpush3.msra.mxu0 %v15564_v32  ;;  %13007 = vmatprep.mubr.msk.f32.mxu0 %vm14154_vm0, %v14153_v0 }
0x2d10   :  { %13001 = vmatprep.subr.mxu0 %v14153_v0 }
0x2d11   :  { %13002 = vmatpush3.msra.mxu0 %v15574_v55 }
0x2d12   :  { %13003 = vmatprep.subr.mxu0 %v14153_v0 }
0x2d13   :  { %13004 = vmatpush3.msra.mxu0 %v15584_v10 }
0x2d14   :  { %13005 = vmatprep.subr.mxu0 %v14153_v0 }
0x2d15   :  { %13006 = vmatpush3.msra.mxu0 %v15593_v61  ;;  %v13789_v27 = vpop.eup %13788 }
0x2d16   :  { %13008 = vmatmul.mubr.msk.f32.vlgmr.msra.gmra.mxu0 %vm755_vm3, %v14656_v8  ;;  %13021 = vmatprep.subr.mxu0 %v14153_v0  ;;  %v3192_v8 = vadd.f32 1.0, %v13789_v27 }
0x2d17   :  { %13022 = vmatpush3.msra.mxu0 %v15564_v32  ;;  %13029 = vmatprep.mubr.msk.f32.mxu0 %vm14154_vm0, %v14153_v0 }
0x2d18   :  { %13023 = vmatprep.subr.mxu0 %v14153_v0  ;;  %13790 = vrcp.f32 %v3192_v8 }
0x2d19   :  { %13024 = vmatpush3.msra.mxu0 %v15574_v55 }
0x2d1a   :  { %13025 = vmatprep.subr.mxu0 %v14153_v0 }
0x2d1b   :  { %13026 = vmatpush3.msra.mxu0 %v15584_v10 }
0x2d1c   :  { %13027 = vmatprep.subr.mxu0 %v14153_v0 }
0x2d1d   :  { %13028 = vmatpush3.msra.mxu0 %v15593_v61 }
0x2d1e   :  { %13030 = vmatmul.mubr.msk.f32.vlgmr.msra.gmra.mxu0 %vm755_vm3, %v14721_v4  ;;  %13043 = vmatprep.subr.mxu0 %v14153_v0 }
0x2d1f   :  { %13044 = vmatpush3.msra.mxu0 %v15564_v32  ;;  %13051 = vmatprep.mubr.msk.f32.mxu0 %vm14154_vm0, %v14153_v0 }
0x2d20   :  { %13045 = vmatprep.subr.mxu0 %v14153_v0 }
0x2d21   :  { %13046 = vmatpush3.msra.mxu0 %v15574_v55 }
0x2d22   :  { %13047 = vmatprep.subr.mxu0 %v14153_v0 }
0x2d23   :  { %13048 = vmatpush3.msra.mxu0 %v15584_v10 }
0x2d24   :  { %13049 = vmatprep.subr.mxu0 %v14153_v0 }
0x2d25   :  { %13050 = vmatpush3.msra.mxu0 %v15593_v61  ;;  %v13791_v21 = vpop.eup %13790 }
0x2d26   :  { %13052 = vmatmul.mubr.msk.f32.vlgmr.msra.gmra.mxu0 %vm755_vm3, %v14802_v56  ;;  %13065 = vmatprep.subr.mxu0 %v14153_v0  ;;  %v3438_v20 = vmul.f32 %v13791_v21, %v3436_v19 }
0x2d27   :  { %13066 = vmatpush3.msra.mxu0 %v15564_v32  ;;  %13073 = vmatprep.mubr.msk.f32.mxu0 %vm14154_vm0, %v14153_v0 }
0x2d28   :  { %13067 = vmatprep.subr.mxu0 %v14153_v0 }
0x2d29   :  { %13068 = vmatpush3.msra.mxu0 %v15574_v55 }
0x2d2a   :  { %13069 = vmatprep.subr.mxu0 %v14153_v0 }
0x2d2b   :  { %13070 = vmatpush3.msra.mxu0 %v15584_v10 }
0x2d2c   :  { %13071 = vmatprep.subr.mxu0 %v14153_v0 }
0x2d2d   :  { %13072 = vmatpush3.msra.mxu0 %v15593_v61 }
0x2d2e   :  { %13074 = vmatmul.mubr.msk.f32.vlgmr.msra.gmra.mxu0 %vm755_vm3, %v14883_v29  ;;  %13087 = vmatprep.subr.mxu0 %v14153_v0 }
0x2d2f   :  { %13088 = vmatpush3.msra.mxu0 %v15564_v32  ;;  %13095 = vmatprep.mubr.msk.f32.mxu0 %vm14154_vm0, %v14153_v0 }
0x2d30   :  { %13089 = vmatprep.subr.mxu0 %v14153_v0 }
0x2d31   :  { %13090 = vmatpush3.msra.mxu0 %v15574_v55 }
0x2d32   :  { %13091 = vmatprep.subr.mxu0 %v14153_v0 }
0x2d33   :  { %13092 = vmatpush3.msra.mxu0 %v15584_v10 }
0x2d34   :  { %13093 = vmatprep.subr.mxu0 %v14153_v0 }
0x2d35   :  { %13094 = vmatpush3.msra.mxu0 %v15593_v61 }
0x2d36   :  { %13109 = vmatprep.subr.mxu0 %v14153_v0 }
0x2dac   :  { %v6470_v4 = vpop.f32.mrf.mxu0  ;;  %v6547_v56 = vpop.f32.mrf.mxu1 }
0x2dad   :  { %v6474_v36 = vadd.f32 %v6470_v4, %v15087_v26 }
0x2dae   :  { %v12899_v29 = vpop.f32.mrf.mxu0  ;;  %v12910_v63 = vpop.f32.mrf.mxu1 }
0x2daf   :  { %v11433_v62 = vmul.f32 -1.442695, %v6474_v36 }
0x2db5   :  { %v6628_v17 = vpop.f32.mrf.mxu0  ;;  %v6704_v16 = vpop.f32.mrf.mxu1 }
0x2db6   :  { %6633 = vrot.lane.b32.xlu1 %v6628_v17, %s14156_s28 }
0x2db7   :  { %v12921_v35 = vpop.f32.mrf.mxu0  ;;  %v12932_v37 = vpop.f32.mrf.mxu1 }
0x2dba   :  { %3266 = vrot.lane.b32.xlu1 %v15078_v22, %s14155_s3 }
0x2dbe   :  { %v15688_v13 = vpop.f32.mrf.mxu0  ;;  %3440 = vrot.lane.b32.xlu1 %v3438_v20, %s14155_s3  ;;  %v15719_v20 = vld [vmem:[#allocation7 + $0x18] sm:$0xff] }
0x2dc0   :  { %v12943_v7 = vpop.f32.mrf.mxu0 }
0x2dc2   :  { %3423 = vrot.lane.b32.xlu1 %v15082_v40, %s14157_s8 }
0x2dc6   :  { %v15693_v42 = vpop.f32.mrf.mxu0 }
0x2dc8   :  { %v12965_v39 = vpop.f32.mrf.mxu0 }
0x2dc9   :  { %v15725_v39 = vld [vmem:[#allocation7 + $0x10] sm:$0xff] }
0x2dce   :  { %v15695_v46 = vpop.f32.mrf.mxu0 }
0x2dd0   :  { %v12987_v43 = vpop.f32.mrf.mxu0 }
0x2dd1   :  { %v15735_v43 = vld [vmem:[#allocation7] sm:$0xff] }
0x2dd6   :  { %v15697_v44 = vpop.f32.mrf.mxu0 }
0x2dd8   :  { %v13009_v49 = vpop.f32.mrf.mxu0 }
0x2dd9   :  { %v15739_v49 = vld [vmem:[#allocation7 + $0x58] sm:$0xff] }
0x2dde   :  { %v15699_v22 = vpop.f32.mrf.mxu0 }
0x2de0   :  { %v13031_v50 = vpop.f32.mrf.mxu0 }
0x2de1   :  { %v15744_v50 = vld [vmem:[#allocation7 + $0x50] sm:$0xff] }
0x2de6   :  { %v15701_v52 = vpop.f32.mrf.mxu0 }
0x2de8   :  { %v13053_v53 = vpop.f32.mrf.mxu0 }
0x2de9   :  { %v15750_v53 = vld [vmem:[#allocation7 + $0x48] sm:$0xff] }
0x2dee   :  { %v15703_v41 = vpop.f32.mrf.mxu0 }
0x2df0   :  { %v13075_v38 = vpop.f32.mrf.mxu0 }
0x2df1   :  { %v15754_v38 = vld [vmem:[#allocation7 + $0x40] sm:$0xff] }
0x2e28   :  { %v6634_v24 = vpop.permute.xlu1 %6633 }
0x2e29   :  { %v6636_v40 = vadd.f32 %v6634_v24, %v15087_v26 }
0x2e2b   :  { %13792 = vtanh.f32 %v6636_v40 }
0x2e2c   :  { %v3267_v9 = vpop.permute.xlu1 %3266 }
0x2e2d   :  { %v3269_v5 = vadd.f32 %v3267_v9, %v14449_v47  ;;  %v15775_v9 = vld [vmem:[%s16502_s7 + $0x38] sm:$0xff] }
0x2e2e   :  { %12945 = vmatpush3.msra.mxu1 %v15775_v9 }
0x2e2f   :  { %v11366_v33 = vmul.f32 -1.442695, %v3269_v5  ;;  %v15780_v5 = vld [vmem:[%s16502_s7 + $0x30] sm:$0xff]  ;;  %12946 = vmatprep.subr.mxu1 %v14153_v0 }
0x2e30   :  { %v3441_v58 = vpop.permute.xlu1 %3440  ;;  %12947 = vmatpush3.msra.mxu1 %v15780_v5 }
0x2e31   :  { %13794 = vpow2.f32 %v11366_v33  ;;  %12948 = vmatprep.subr.mxu1 %v14153_v0 }
0x2e34   :  { %v3424_v3 = vpop.permute.xlu1 %3423 }
0x2e35   :  { %v3426_v18 = vadd.f32 %v3424_v3, %v14449_v47  ;;  %v15918_v3 = vld [vmem:[#allocation7 + $0x68] sm:$0xff] }
0x2e38   :  { %v13793_v11 = vpop.eup %13792 }
0x2e39   :  { %6721 = vrot.lane.b32.xlu0 %v13793_v11, %s14156_s28  ;;  %v15794_v11 = vld [vmem:[%s16502_s7 + $0x20] sm:$0xff] }
0x2e3d   :  { %6552 = vrot.lane.b32.xlu0 %v6547_v56, %s14155_s3 }
0x2e3e   :  { %v13795_v12 = vpop.eup %13794 }
0x2e3f   :  { %v3273_v51 = vadd.f32 1.0, %v13795_v12 }
0x2e41   :  { %13796 = vrcp.f32 %v3273_v51 }
0x2e4e   :  { %v13797_v54 = vpop.eup %13796 }
0x2e4f   :  { %v3433_v57 = vmul.f32 %v13797_v54, %v14877_v14  ;;  %v11369_v14 = vmul.f32 -1.442695, %v3426_v18  ;;  %v15922_v18 = vld [vmem:[#allocation7 + $0x60] sm:$0xff] }
0x2e51   :  { %v3443_v60 = vadd.f32 %v3441_v58, %v3433_v57 }
0x2e53   :  { %13798 = vtanh.f32 %v3443_v60 }
0x2e54   :  { %13800 = vpow2.f32 %v11433_v62 }
0x2e60   :  { %v13799_v59 = vpop.eup %13798 }
0x2e61   :  { %3446 = vrot.lane.b32.xlu1 %v13799_v59, %s14156_s28  ;;  %v13801_v1 = vpop.eup %13800 }
0x2e62   :  { %v6478_v2 = vadd.f32 1.0, %v13801_v1 }
0x2e64   :  { %13802 = vrcp.f32 %v6478_v2 }
0x2e65   :  { %13804 = vpow2.f32 %v11369_v14 }
0x2e71   :  { %v13803_v32 = vpop.eup %13802 }
0x2e72   :  { %v13805_v61 = vpop.eup %13804 }
0x2e73   :  { %v3430_v45 = vadd.f32 1.0, %v13805_v61 }
0x2e75   :  { %13806 = vrcp.f32 %v3430_v45 }
0x2e82   :  { %v13807_v31 = vpop.eup %13806 }
0x2eab   :  { %v6722_v55 = vpop.permute.xlu0 %6721 }
0x2eac   :  { %v6724_v10 = vmul.f32 %v13803_v32, %v6722_v55  ;;  %v11440_v32 = vld [vmem:[%s16504_s9] ss:$0 sm:$0xff] }
0x2ead   :  { %v6821_v55 = vadd.f32 %v11440_v32, %v15688_v13 }
0x2eae   :  { %6726 = vrot.lane.b32.xlu0 %v6724_v10, %s14155_s3 }
0x2eaf   :  { %v6553_v4 = vpop.permute.xlu0 %6552 }
0x2eb0   :  { %v6555_v47 = vadd.f32 %v6553_v4, %v15087_v26 }
0x2eb2   :  { %6709 = vrot.lane.b32.xlu0 %v6704_v16, %s14157_s8  ;;  %v11435_v56 = vmul.f32 -1.442695, %v6555_v47 }
0x2eb4   :  { %13808 = vpow2.f32 %v11435_v56  ;;  %v7110_v56 = vadd.f32 %v11440_v32, %v15695_v46  ;;  %v7536_v46 = vadd.f32 %v11440_v32, %v15701_v52 }
0x2ec1   :  { %v13809_v29 = vpop.eup %13808 }
0x2ec2   :  { %v6559_v63 = vadd.f32 1.0, %v13809_v29 }
0x2ec4   :  { %13810 = vrcp.f32 %v6559_v63 }
0x2ed1   :  { %v13811_v17 = vpop.eup %13810 }
0x2ed2   :  { %v6719_v35 = vmul.f32 %v13811_v17, %v15527_v15  ;;  %v15731_v15 = vld [vmem:[#allocation7 + $0x8] sm:$0xff] }
0x2ed3   :  { %v3447_v27 = vpop.permute.xlu1 %3446 }
0x2ed4   :  { %v3449_v8 = vmul.f32 %v13807_v31, %v3447_v27  ;;  %v6968_v27 = vadd.f32 %v11440_v32, %v15693_v42  ;;  %v7394_v42 = vadd.f32 %v11440_v32, %v15699_v22 }
0x2ed6   :  { %7751 = vrot.lane.b32.xlu0 %v3449_v8, %s14155_s3 }
0x2f20   :  { %v6727_v16 = vpop.permute.xlu0 %6726 }
0x2f21   :  { %v6729_v37 = vadd.f32 %v6727_v16, %v6719_v35  ;;  %v7252_v35 = vadd.f32 %v11440_v32, %v15697_v44 }
0x2f23   :  { %13812 = vtanh.f32 %v6729_v37 }
0x2f24   :  { %v6710_v21 = vpop.permute.xlu0 %6709 }
0x2f25   :  { %v6712_v24 = vadd.f32 %v6710_v21, %v15087_v26  ;;  %v15787_v26 = vld [vmem:[%s16502_s7 + $0x28] sm:$0xff] }
0x2f26   :  { %12949 = vmatpush3.msra.mxu1 %v15787_v26 }
0x2f27   :  { %v11438_v40 = vmul.f32 -1.442695, %v6712_v24  ;;  %12950 = vmatprep.subr.mxu1 %v14153_v0 }
0x2f28   :  { %12951 = vmatpush3.msra.mxu1 %v15794_v11 }
0x2f29   :  { %13814 = vpow2.f32 %v11438_v40  ;;  %12966 = vmatprep.subr.mxu1 %v14153_v0 }
0x2f30   :  { %v13813_v19 = vpop.eup %13812 }
0x2f31   :  { %6732 = vrot.lane.b32.xlu1 %v13813_v19, %s14156_s28 }
0x2f36   :  { %v13815_v33 = vpop.eup %13814 }
0x2f37   :  { %v6716_v12 = vadd.f32 1.0, %v13815_v33  ;;  %v7678_v33 = vadd.f32 %v11440_v32, %v15703_v41 }
0x2f39   :  { %13816 = vrcp.f32 %v6716_v12 }
0x2f46   :  { %v13817_v51 = vpop.eup %13816 }
0x2f48   :  { %v15721_v7 = vpop.permute.xlu0 %7751 }
0x2f49   :  { %13096 = vmatmul.mubr.msk.f32.vlgmr.msra.gmra.mxu0 %vm755_vm3, %v15721_v7 }
0x2f4a   :  { %13110 = vmatpush3.msra.mxu0 %v15719_v20  ;;  %13117 = vmatprep.mubr.msk.f32.mxu0 %vm14154_vm0, %v14153_v0 }
0x2f4b   :  { %13111 = vmatprep.subr.mxu0 %v14153_v0 }
0x2f4c   :  { %13112 = vmatpush3.msra.mxu0 %v15725_v39 }
0x2f4d   :  { %13113 = vmatprep.subr.mxu0 %v14153_v0 }
0x2f4e   :  { %13114 = vmatpush3.msra.mxu0 %v15731_v15 }
0x2f4f   :  { %13115 = vmatprep.subr.mxu0 %v14153_v0 }
0x2f50   :  { %13116 = vmatpush3.msra.mxu0 %v15735_v43 }
0x2f51   :  { %13131 = vmatprep.subr.mxu0 %v14153_v0  ;;  %13118 = vmatmul.mubr.f32.vlgmr.msra.gmra.mxu0 %v14153_v0 }
0x2f52   :  { %13132 = vmatpush3.msra.mxu0 %v15739_v49  ;;  %13139 = vmatprep.mubr.msk.f32.mxu0 %vm14154_vm0, %v14153_v0 }
0x2f53   :  { %13133 = vmatprep.subr.mxu0 %v14153_v0 }
0x2f54   :  { %13134 = vmatpush3.msra.mxu0 %v15744_v50 }
0x2f55   :  { %13135 = vmatprep.subr.mxu0 %v14153_v0 }
0x2f56   :  { %13136 = vmatpush3.msra.mxu0 %v15750_v53 }
0x2f57   :  { %13137 = vmatprep.subr.mxu0 %v14153_v0 }
0x2f58   :  { %13138 = vmatpush3.msra.mxu0 %v15754_v38 }
0x2f59   :  { %13140 = vmatmul.mubr.f32.vlgmr.msra.gmra.mxu0 %v14153_v0  ;;  %13153 = vmatprep.subr.mxu0 %v14153_v0 }
0x2f5a   :  { %13154 = vmatpush3.msra.mxu0 %v15719_v20  ;;  %13161 = vmatprep.mubr.msk.f32.mxu0 %vm14154_vm0, %v14153_v0 }
0x2f5b   :  { %13155 = vmatprep.subr.mxu0 %v14153_v0 }
0x2f5c   :  { %13156 = vmatpush3.msra.mxu0 %v15725_v39 }
0x2f5d   :  { %13157 = vmatprep.subr.mxu0 %v14153_v0 }
0x2f5e   :  { %13158 = vmatpush3.msra.mxu0 %v15731_v15 }
0x2f5f   :  { %13159 = vmatprep.subr.mxu0 %v14153_v0 }
0x2f60   :  { %13160 = vmatpush3.msra.mxu0 %v15735_v43 }
0x2f61   :  { %13175 = vmatprep.subr.mxu0 %v14153_v0 }
0x2fa3   :  { %v6733_v54 = vpop.permute.xlu1 %6732 }
0x2fa4   :  { %v6735_v57 = vmul.f32 %v13817_v51, %v6733_v54 }
0x2fa6   :  { %6823 = vrot.lane.b32.xlu1 %v6735_v57, %s14155_s3 }
0x3009   :  { %v15801_v58 = vpop.f32.mrf.mxu0 }
0x300a   :  { %v7825_v51 = vadd.f32 %v11440_v32, %v15801_v58 }
0x300b   :  { %v13097_v60 = vpop.f32.mrf.mxu0 }
0x3011   :  { %v15803_v59 = vpop.f32.mrf.mxu0 }
0x3013   :  { %v13119_v36 = vpop.f32.mrf.mxu0 }
0x3018   :  { %v6824_v62 = vpop.permute.xlu1 %6823 }
0x3019   :  { %12953 = vmatmul.mubr.msk.f32.vlgmr.msra.gmra.mxu1 %vm755_vm3, %v6824_v62  ;;  %v8137_v1 = vpop.f32.mrf.mxu0 }
0x301a   :  { %12967 = vmatpush3.msra.mxu1 %v15775_v9  ;;  %12974 = vmatprep.mubr.msk.f32.mxu1 %vm14154_vm0, %v14153_v0 }
0x301b   :  { %12968 = vmatprep.subr.mxu1 %v14153_v0  ;;  %8142 = vrot.lane.b32.xlu0 %v8137_v1, %s14156_s28  ;;  %v13141_v2 = vpop.f32.mrf.mxu0 }
0x301c   :  { %12969 = vmatpush3.msra.mxu1 %v15780_v5 }
0x301d   :  { %12970 = vmatprep.subr.mxu1 %v14153_v0 }
0x301e   :  { %12971 = vmatpush3.msra.mxu1 %v15787_v26 }
0x301f   :  { %12972 = vmatprep.subr.mxu1 %v14153_v0 }
0x3020   :  { %12973 = vmatpush3.msra.mxu1 %v15794_v11 }
0x3021   :  { %12975 = vmatmul.mubr.msk.f32.vlgmr.msra.gmra.mxu1 %vm755_vm3, %v15537_v25  ;;  %12988 = vmatprep.subr.mxu1 %v14153_v0  ;;  %v15912_v25 = vld [vmem:[#allocation7 + $0x70] sm:$0xff] }
0x3022   :  { %12989 = vmatpush3.msra.mxu1 %v15775_v9  ;;  %12996 = vmatprep.mubr.msk.f32.mxu1 %vm14154_vm0, %v14153_v0 }
0x3023   :  { %12990 = vmatprep.subr.mxu1 %v14153_v0 }
0x3024   :  { %12991 = vmatpush3.msra.mxu1 %v15780_v5 }
0x3025   :  { %12992 = vmatprep.subr.mxu1 %v14153_v0 }
0x3026   :  { %12993 = vmatpush3.msra.mxu1 %v15787_v26 }
0x3027   :  { %12994 = vmatprep.subr.mxu1 %v14153_v0 }
0x3028   :  { %12995 = vmatpush3.msra.mxu1 %v15794_v11 }
0x3029   :  { %12997 = vmatmul.mubr.msk.f32.vlgmr.msra.gmra.mxu1 %vm755_vm3, %v15454_v6  ;;  %13010 = vmatprep.subr.mxu1 %v14153_v0  ;;  %v15907_v6 = vld [vmem:[#allocation7 + $0x78] sm:$0xff] }
0x302a   :  { %13011 = vmatpush3.msra.mxu1 %v15775_v9  ;;  %13018 = vmatprep.mubr.msk.f32.mxu1 %vm14154_vm0, %v14153_v0 }
0x302b   :  { %13012 = vmatprep.subr.mxu1 %v14153_v0 }
0x302c   :  { %13013 = vmatpush3.msra.mxu1 %v15780_v5 }
0x302d   :  { %13014 = vmatprep.subr.mxu1 %v14153_v0 }
0x302e   :  { %13015 = vmatpush3.msra.mxu1 %v15787_v26 }
0x302f   :  { %13016 = vmatprep.subr.mxu1 %v14153_v0 }
0x3030   :  { %13017 = vmatpush3.msra.mxu1 %v15794_v11 }
0x3031   :  { %13019 = vmatmul.mubr.msk.f32.vlgmr.msra.gmra.mxu1 %vm755_vm3, %v15371_v23  ;;  %13032 = vmatprep.subr.mxu1 %v14153_v0  ;;  %v15903_v23 = vld [vmem:[#allocation7 + $0x20] sm:$0xff] }
0x3032   :  { %13033 = vmatpush3.msra.mxu1 %v15775_v9  ;;  %13040 = vmatprep.mubr.msk.f32.mxu1 %vm14154_vm0, %v14153_v0 }
0x3033   :  { %13034 = vmatprep.subr.mxu1 %v14153_v0 }
0x3034   :  { %13035 = vmatpush3.msra.mxu1 %v15780_v5 }
0x3035   :  { %13036 = vmatprep.subr.mxu1 %v14153_v0 }
0x3036   :  { %13037 = vmatpush3.msra.mxu1 %v15787_v26 }
0x3037   :  { %13038 = vmatprep.subr.mxu1 %v14153_v0 }
0x3038   :  { %13039 = vmatpush3.msra.mxu1 %v15794_v11 }
0x3039   :  { %13041 = vmatmul.mubr.msk.f32.vlgmr.msra.gmra.mxu1 %vm755_vm3, %v15306_v34  ;;  %13054 = vmatprep.subr.mxu1 %v14153_v0  ;;  %v15899_v34 = vld [vmem:[#allocation7 + $0x28] sm:$0xff] }
0x303a   :  { %13055 = vmatpush3.msra.mxu1 %v15775_v9  ;;  %13062 = vmatprep.mubr.msk.f32.mxu1 %vm14154_vm0, %v14153_v0 }
0x303b   :  { %13056 = vmatprep.subr.mxu1 %v14153_v0 }
0x303c   :  { %13057 = vmatpush3.msra.mxu1 %v15780_v5 }
0x303d   :  { %13058 = vmatprep.subr.mxu1 %v14153_v0 }
0x303e   :  { %13059 = vmatpush3.msra.mxu1 %v15787_v26 }
0x303f   :  { %13060 = vmatprep.subr.mxu1 %v14153_v0 }
0x3040   :  { %13061 = vmatpush3.msra.mxu1 %v15794_v11 }
0x3041   :  { %13063 = vmatmul.mubr.msk.f32.vlgmr.msra.gmra.mxu1 %vm755_vm3, %v15241_v30  ;;  %13076 = vmatprep.subr.mxu1 %v14153_v0  ;;  %v15887_v30 = vld [vmem:[#allocation7 + $0x38] sm:$0xff] }
0x3042   :  { %13077 = vmatpush3.msra.mxu1 %v15775_v9  ;;  %13084 = vmatprep.mubr.msk.f32.mxu1 %vm14154_vm0, %v14153_v0 }
0x3043   :  { %13078 = vmatprep.subr.mxu1 %v14153_v0 }
0x3044   :  { %13079 = vmatpush3.msra.mxu1 %v15780_v5 }
0x3045   :  { %13080 = vmatprep.subr.mxu1 %v14153_v0 }
0x3046   :  { %13081 = vmatpush3.msra.mxu1 %v15787_v26 }
0x3047   :  { %13082 = vmatprep.subr.mxu1 %v14153_v0 }
0x3048   :  { %13083 = vmatpush3.msra.mxu1 %v15794_v11 }
0x3049   :  { %13085 = vmatmul.mubr.msk.f32.vlgmr.msra.gmra.mxu1 %vm755_vm3, %v15176_v48  ;;  %13098 = vmatprep.subr.mxu1 %v14153_v0  ;;  %v15893_v48 = vld [vmem:[#allocation7 + $0x30] sm:$0xff] }
0x304a   :  { %13099 = vmatpush3.msra.mxu1 %v15775_v9  ;;  %13106 = vmatprep.mubr.msk.f32.mxu1 %vm14154_vm0, %v14153_v0 }
0x304b   :  { %13100 = vmatprep.subr.mxu1 %v14153_v0 }
0x304c   :  { %13101 = vmatpush3.msra.mxu1 %v15780_v5 }
0x304d   :  { %13102 = vmatprep.subr.mxu1 %v14153_v0 }
0x304e   :  { %13103 = vmatpush3.msra.mxu1 %v15787_v26 }
0x304f   :  { %13104 = vmatprep.subr.mxu1 %v14153_v0 }
0x3050   :  { %13105 = vmatpush3.msra.mxu1 %v15794_v11 }
0x3051   :  { %13107 = vmatmul.mubr.msk.f32.vlgmr.msra.gmra.mxu1 %vm755_vm3, %v15111_v28  ;;  %13120 = vmatprep.subr.mxu1 %v14153_v0 }
0x3052   :  { %13121 = vmatpush3.msra.mxu1 %v15887_v30  ;;  %13128 = vmatprep.mubr.msk.f32.mxu1 %vm14154_vm0, %v14153_v0 }
0x3053   :  { %13122 = vmatprep.subr.mxu1 %v14153_v0 }
0x3054   :  { %13123 = vmatpush3.msra.mxu1 %v15893_v48 }
0x3055   :  { %13124 = vmatprep.subr.mxu1 %v14153_v0 }
0x3056   :  { %13125 = vmatpush3.msra.mxu1 %v15899_v34 }
0x3057   :  { %13126 = vmatprep.subr.mxu1 %v14153_v0 }
0x3058   :  { %13127 = vmatpush3.msra.mxu1 %v15903_v23 }
0x3059   :  { %13129 = vmatmul.mubr.f32.vlgmr.msra.gmra.mxu1 %v14153_v0  ;;  %13142 = vmatprep.subr.mxu1 %v14153_v0 }
0x305a   :  { %13143 = vmatpush3.msra.mxu1 %v15907_v6  ;;  %13150 = vmatprep.mubr.msk.f32.mxu1 %vm14154_vm0, %v14153_v0 }
0x305b   :  { %13144 = vmatprep.subr.mxu1 %v14153_v0 }
0x305c   :  { %13145 = vmatpush3.msra.mxu1 %v15912_v25 }
0x305d   :  { %13146 = vmatprep.subr.mxu1 %v14153_v0 }
0x305e   :  { %13147 = vmatpush3.msra.mxu1 %v15918_v3 }
0x305f   :  { %13148 = vmatprep.subr.mxu1 %v14153_v0 }
0x3060   :  { %13149 = vmatpush3.msra.mxu1 %v15922_v18 }
0x3061   :  { %13151 = vmatmul.mubr.f32.vlgmr.msra.gmra.mxu1 %v14153_v0  ;;  %13164 = vmatprep.subr.mxu1 %v14153_v0 }
0x3062   :  { %13165 = vmatpush3.msra.mxu1 %v15887_v30  ;;  %13172 = vmatprep.mubr.msk.f32.mxu1 %vm14154_vm0, %v14153_v0 }
0x3063   :  { %13166 = vmatprep.subr.mxu1 %v14153_v0 }
0x3064   :  { %13167 = vmatpush3.msra.mxu1 %v15893_v48 }
0x3065   :  { %13168 = vmatprep.subr.mxu1 %v14153_v0 }
0x3066   :  { %13169 = vmatpush3.msra.mxu1 %v15899_v34 }
0x3067   :  { %13170 = vmatprep.subr.mxu1 %v14153_v0 }
0x3068   :  { %13171 = vmatpush3.msra.mxu1 %v15903_v23 }
0x3069   :  { %13186 = vmatprep.subr.mxu1 %v14153_v0 }
0x308d   :  { %v8143_v14 = vpop.permute.xlu0 %8142 }
0x30d9   :  { %v6893_v10 = vpop.f32.mrf.mxu1 }
0x30da   :  { %v15943_v61 = vadd.f32 %v6893_v10, %v6821_v55 }
0x30db   :  { %v12954_v45 = vpop.f32.mrf.mxu1 }
0x30dc   :  { %v8145_v31 = vadd.f32 %v8143_v14, %v15943_v61  ;;  %v7983_v41 = vadd.f32 %v15803_v59, %v15943_v61 }
0x30de   :  { %13818 = vtanh.f32 %v8145_v31  ;;  %v11456_v1 = vmul.f32 -1.442695, %v7983_v41 }
0x30e0   :  { %13820 = vpow2.f32 %v11456_v1 }
0x30e1   :  { %v7035_v8 = vpop.f32.mrf.mxu1 }
0x30e2   :  { %v15947_v4 = vadd.f32 %v7035_v8, %v6968_v27 }
0x30e3   :  { %v12976_v47 = vpop.f32.mrf.mxu1 }
0x30e9   :  { %v7177_v29 = vpop.f32.mrf.mxu1 }
0x30ea   :  { %v15950_v63 = vadd.f32 %v7177_v29, %v7110_v56 }
0x30eb   :  { %v13819_v13 = vpop.eup %13818  ;;  %v12998_v17 = vpop.f32.mrf.mxu1 }
0x30ec   :  { %8230 = vrot.lane.b32.xlu1 %v13819_v13, %s14156_s28 }
0x30ed   :  { %v13821_v2 = vpop.eup %13820 }
0x30ee   :  { %v7987_v55 = vadd.f32 1.0, %v13821_v2 }
0x30f0   :  { %13822 = vrcp.f32 %v7987_v55 }
0x30f1   :  { %v7319_v16 = vpop.f32.mrf.mxu1 }
0x30f2   :  { %v15954_v37 = vadd.f32 %v7319_v16, %v7252_v35 }
0x30f3   :  { %v13020_v19 = vpop.f32.mrf.mxu1 }
0x30f9   :  { %v7461_v21 = vpop.f32.mrf.mxu1 }
0x30fa   :  { %v15957_v24 = vadd.f32 %v7461_v21, %v7394_v42 }
0x30fb   :  { %v13042_v40 = vpop.f32.mrf.mxu1 }
0x30fd   :  { %v13823_v58 = vpop.eup %13822 }
0x3101   :  { %v7603_v9 = vpop.f32.mrf.mxu1 }
0x3102   :  { %v15960_v5 = vadd.f32 %v7603_v9, %v7536_v46 }
0x3103   :  { %v13064_v26 = vpop.f32.mrf.mxu1 }
0x3109   :  { %v7745_v11 = vpop.f32.mrf.mxu1 }
0x310a   :  { %v15963_v44 = vadd.f32 %v7745_v11, %v7678_v33 }
0x310b   :  { %v13086_v12 = vpop.f32.mrf.mxu1 }
0x3111   :  { %v7892_v54 = vpop.f32.mrf.mxu1 }
0x3112   :  { %v15966_v22 = vadd.f32 %v7892_v54, %v7825_v51 }
0x3113   :  { %v13108_v57 = vpop.f32.mrf.mxu1 }
0x3119   :  { %v8056_v60 = vpop.f32.mrf.mxu1 }
0x311a   :  { %8061 = vrot.lane.b32.xlu0 %v8056_v60, %s14155_s3 }
0x311b   :  { %v13130_v52 = vpop.f32.mrf.mxu1 }
0x3121   :  { %v8213_v36 = vpop.f32.mrf.mxu1 }
0x3122   :  { %8218 = vrot.lane.b32.xlu0 %v8213_v36, %s14157_s8 }
0x3123   :  { %v13152_v62 = vpop.f32.mrf.mxu1 }
0x315e   :  { %v8231_v32 = vpop.permute.xlu1 %8230 }
0x315f   :  { %v8233_v10 = vmul.f32 %v13823_v58, %v8231_v32 }
0x3161   :  { %8235 = vrot.lane.b32.xlu1 %v8233_v10, %s14155_s3 }
0x318c   :  { %v8062_v14 = vpop.permute.xlu0 %8061 }
0x318d   :  { %v8064_v45 = vadd.f32 %v8062_v14, %v15943_v61 }
0x318f   :  { %v11457_v31 = vmul.f32 -1.442695, %v8064_v45 }
0x3191   :  { %13824 = vpow2.f32 %v11457_v31 }
0x3194   :  { %v8219_v17 = vpop.permute.xlu0 %8218 }
0x3195   :  { %v8221_v35 = vadd.f32 %v8219_v17, %v15943_v61 }
0x3197   :  { %v11458_v16 = vmul.f32 -1.442695, %v8221_v35 }
0x319e   :  { %v13825_v27 = vpop.eup %13824 }
0x319f   :  { %v8068_v8 = vadd.f32 1.0, %v13825_v27 }
0x31a1   :  { %13826 = vrcp.f32 %v8068_v8 }
0x31ae   :  { %v13827_v47 = vpop.eup %13826 }
0x31af   :  { %v8228_v59 = vmul.f32 0.0, %v13827_v47 }
0x31d3   :  { %v8236_v56 = vpop.permute.xlu1 %8235 }
0x31d4   :  { %v15974_v29 = vadd.f32 %v8236_v56, %v8228_v59 }
0x31d6   :  { %13828 = vtanh.f32 %v15974_v29 }
0x31d7   :  { %13830 = vpow2.f32 %v11458_v16 }
0x31e3   :  { %v13829_v13 = vpop.eup %13828 }
0x31e4   :  { %8241 = vrot.lane.b32.xlu1 %v13829_v13, %s14156_s28  ;;  %v13831_v19 = vpop.eup %13830 }
0x31e5   :  { %v8225_v42 = vadd.f32 1.0, %v13831_v19 }
0x31e7   :  { %13832 = vrcp.f32 %v8225_v42 }
0x31f4   :  { %v13833_v21 = vpop.eup %13832 }
0x3256   :  { %v8242_v40 = vpop.permute.xlu1 %8241 }
0x3257   :  { %v8244_v46 = vmul.f32 %v13833_v21, %v8242_v40 }
0x3259   :  { %8246 = vrot.lane.b32.xlu0 %v8244_v46, %s14155_s3 }
0x32cb   :  { %v8247_v9 = vpop.permute.xlu0 %8246 }
0x32cc   :  { %13162 = vmatmul.mubr.msk.f32.vlgmr.msra.gmra.mxu0 %vm755_vm3, %v8247_v9  ;;  %13173 = vmatmul.mubr.msk.f32.vlgmr.msra.gmra.mxu1 %vm755_vm3, %v8247_v9 }
0x32cd   :  { %13176 = vmatpush3.msra.mxu0 %v15739_v49  ;;  %13187 = vmatpush3.msra.mxu1 %v15907_v6 }
0x32ce   :  { %13177 = vmatprep.subr.mxu0 %v14153_v0  ;;  %13188 = vmatprep.subr.mxu1 %v14153_v0 }
0x32cf   :  { %13178 = vmatpush3.msra.mxu0 %v15744_v50  ;;  %13189 = vmatpush3.msra.mxu1 %v15912_v25 }
0x32d0   :  { %13179 = vmatprep.subr.mxu0 %v14153_v0  ;;  %13190 = vmatprep.subr.mxu1 %v14153_v0 }
0x32d1   :  { %13180 = vmatpush3.msra.mxu0 %v15750_v53  ;;  %13191 = vmatpush3.msra.mxu1 %v15918_v3 }
0x32d2   :  { %13181 = vmatprep.subr.mxu0 %v14153_v0  ;;  %13192 = vmatprep.subr.mxu1 %v14153_v0 }
0x32d3   :  { %13182 = vmatpush3.msra.mxu0 %v15754_v38  ;;  %13183 = vmatprep.mubr.msk.f32.mxu0 %vm14154_vm0, %v14153_v0 }
0x32d4   :  { %13193 = vmatpush3.msra.mxu1 %v15922_v18  ;;  %13194 = vmatprep.mubr.msk.f32.mxu1 %vm14154_vm0, %v14153_v0 }
0x32d5   :  { %13184 = vmatmul.mubr.msk.f32.vlgmr.msra.gmra.mxu0 %vm755_vm3, %v8247_v9  ;;  %13195 = vmatmul.mubr.msk.f32.vlgmr.msra.gmra.mxu1 %vm755_vm3, %v8247_v9 }
0x32d6   :  { %13197 = vmatprep.subr.mxu0 %v14153_v0  ;;  %13208 = vmatprep.subr.mxu1 %v14153_v0 }
0x32d7   :  { %13198 = vmatpush3.msra.mxu0 %v15719_v20  ;;  %13209 = vmatpush3.msra.mxu1 %v15887_v30 }
0x32d8   :  { %13199 = vmatprep.subr.mxu0 %v14153_v0  ;;  %13210 = vmatprep.subr.mxu1 %v14153_v0 }
0x32d9   :  { %13200 = vmatpush3.msra.mxu0 %v15725_v39  ;;  %13211 = vmatpush3.msra.mxu1 %v15893_v48 }
0x32da   :  { %13201 = vmatprep.subr.mxu0 %v14153_v0  ;;  %13212 = vmatprep.subr.mxu1 %v14153_v0 }
0x32db   :  { %13202 = vmatpush3.msra.mxu0 %v15731_v15  ;;  %13213 = vmatpush3.msra.mxu1 %v15899_v34 }
0x32dc   :  { %13203 = vmatprep.subr.mxu0 %v14153_v0  ;;  %13214 = vmatprep.subr.mxu1 %v14153_v0 }
0x32dd   :  { %13204 = vmatpush3.msra.mxu0 %v15735_v43  ;;  %13215 = vmatpush3.msra.mxu1 %v15903_v23 }
0x32de   :  { %13205 = vmatprep.mubr.msk.f32.mxu0 %vm14154_vm0, %v14153_v0  ;;  %13216 = vmatprep.mubr.msk.f32.mxu1 %vm14154_vm0, %v14153_v0 }
0x32df   :  { %13219 = vmatprep.subr.mxu0 %v14153_v0  ;;  %13230 = vmatprep.subr.mxu1 %v14153_v0 }
0x338c   :  { %v8316_v61 = vpop.f32.mrf.mxu0  ;;  %v8393_v26 = vpop.f32.mrf.mxu1 }
0x338d   :  { %v8320_v62 = vadd.f32 %v8316_v61, %v15947_v4 }
0x338e   :  { %v13163_v33 = vpop.f32.mrf.mxu0  ;;  %v13174_v11 = vpop.f32.mrf.mxu1 }
0x338f   :  { %v11460_v41 = vmul.f32 -1.442695, %v8320_v62 }
0x3395   :  { %v8474_v12 = vpop.f32.mrf.mxu0  ;;  %v8550_v51 = vpop.f32.mrf.mxu1 }
0x3396   :  { %8479 = vrot.lane.b32.xlu1 %v8474_v12, %s14156_s28 }
0x3397   :  { %v13185_v54 = vpop.f32.mrf.mxu0  ;;  %v13196_v57 = vpop.f32.mrf.mxu1 }
0x339a   :  { %8398 = vrot.lane.b32.xlu1 %v8393_v26, %s14155_s3 }
0x339e   :  { %8555 = vrot.lane.b32.xlu1 %v8550_v51, %s14157_s8 }
0x3408   :  { %v8480_v60 = vpop.permute.xlu1 %8479 }
0x3409   :  { %v8482_v52 = vadd.f32 %v8480_v60, %v15947_v4 }
0x340b   :  { %13834 = vtanh.f32 %v8482_v52 }
0x340c   :  { %13836 = vpow2.f32 %v11460_v41  ;;  %v8399_v10 = vpop.permute.xlu1 %8398 }
0x340d   :  { %v8401_v14 = vadd.f32 %v8399_v10, %v15947_v4 }
0x340f   :  { %v11462_v45 = vmul.f32 -1.442695, %v8401_v14 }
0x3410   :  { %v8556_v17 = vpop.permute.xlu1 %8555 }
0x3411   :  { %v8558_v35 = vadd.f32 %v8556_v17, %v15947_v4 }
0x3413   :  { %v11465_v16 = vmul.f32 -1.442695, %v8558_v35 }
0x3418   :  { %v13835_v36 = vpop.eup %13834 }
0x3419   :  { %8567 = vrot.lane.b32.xlu0 %v13835_v36, %s14156_s28  ;;  %v13837_v1 = vpop.eup %13836 }
0x341a   :  { %v8324_v2 = vadd.f32 1.0, %v13837_v1 }
0x341c   :  { %13838 = vrcp.f32 %v8324_v2 }
0x341d   :  { %13840 = vpow2.f32 %v11462_v45 }
0x3429   :  { %v13839_v55 = vpop.eup %13838 }
0x342a   :  { %v13841_v31 = vpop.eup %13840 }
0x342b   :  { %v8405_v27 = vadd.f32 1.0, %v13841_v31 }
0x342d   :  { %13842 = vrcp.f32 %v8405_v27 }
0x343a   :  { %v13843_v8 = vpop.eup %13842 }
0x343b   :  { %v8565_v47 = vmul.f32 %v13843_v8, %v15974_v29 }
0x348b   :  { %v8568_v58 = vpop.permute.xlu0 %8567 }
0x348c   :  { %v8570_v32 = vmul.f32 %v13839_v55, %v8568_v58 }
0x348e   :  { %8572 = vrot.lane.b32.xlu0 %v8570_v32, %s14155_s3 }
0x3500   :  { %v8573_v59 = vpop.permute.xlu0 %8572 }
0x3501   :  { %v16033_v56 = vadd.f32 %v8573_v59, %v8565_v47 }
0x3503   :  { %13844 = vtanh.f32 %v16033_v56 }
0x3504   :  { %13846 = vpow2.f32 %v11465_v16 }
0x3510   :  { %v13845_v13 = vpop.eup %13844 }
0x3511   :  { %8578 = vrot.lane.b32.xlu0 %v13845_v13, %s14156_s28  ;;  %v13847_v19 = vpop.eup %13846 }
0x3512   :  { %v8562_v42 = vadd.f32 1.0, %v13847_v19 }
0x3514   :  { %13848 = vrcp.f32 %v8562_v42 }
0x3521   :  { %v13849_v21 = vpop.eup %13848 }
0x3583   :  { %v8579_v40 = vpop.permute.xlu0 %8578 }
0x3584   :  { %v8581_v46 = vmul.f32 %v13849_v21, %v8579_v40 }
0x3586   :  { %8583 = vrot.lane.b32.xlu1 %v8581_v46, %s14155_s3 }
0x35f8   :  { %v8584_v29 = vpop.permute.xlu1 %8583 }
0x35f9   :  { %13206 = vmatmul.mubr.msk.f32.vlgmr.msra.gmra.mxu0 %vm755_vm3, %v8584_v29  ;;  %13217 = vmatmul.mubr.msk.f32.vlgmr.msra.gmra.mxu1 %vm755_vm3, %v8584_v29 }
0x35fa   :  { %13220 = vmatpush3.msra.mxu0 %v15739_v49  ;;  %13231 = vmatpush3.msra.mxu1 %v15907_v6 }
0x35fb   :  { %13221 = vmatprep.subr.mxu0 %v14153_v0  ;;  %13232 = vmatprep.subr.mxu1 %v14153_v0 }
0x35fc   :  { %13222 = vmatpush3.msra.mxu0 %v15744_v50  ;;  %13233 = vmatpush3.msra.mxu1 %v15912_v25 }
0x35fd   :  { %13223 = vmatprep.subr.mxu0 %v14153_v0  ;;  %13234 = vmatprep.subr.mxu1 %v14153_v0 }
0x35fe   :  { %13224 = vmatpush3.msra.mxu0 %v15750_v53  ;;  %13235 = vmatpush3.msra.mxu1 %v15918_v3 }
0x35ff   :  { %13225 = vmatprep.subr.mxu0 %v14153_v0  ;;  %13236 = vmatprep.subr.mxu1 %v14153_v0 }
0x3600   :  { %13226 = vmatpush3.msra.mxu0 %v15754_v38  ;;  %13227 = vmatprep.mubr.msk.f32.mxu0 %vm14154_vm0, %v14153_v0 }
0x3601   :  { %13237 = vmatpush3.msra.mxu1 %v15922_v18  ;;  %13238 = vmatprep.mubr.msk.f32.mxu1 %vm14154_vm0, %v14153_v0 }
0x3602   :  { %13228 = vmatmul.mubr.msk.f32.vlgmr.msra.gmra.mxu0 %vm755_vm3, %v8584_v29  ;;  %13239 = vmatmul.mubr.msk.f32.vlgmr.msra.gmra.mxu1 %vm755_vm3, %v8584_v29 }
0x3603   :  { %13241 = vmatprep.subr.mxu0 %v14153_v0  ;;  %13252 = vmatprep.subr.mxu1 %v14153_v0 }
0x3604   :  { %13242 = vmatpush3.msra.mxu0 %v15719_v20  ;;  %13253 = vmatpush3.msra.mxu1 %v15887_v30 }
0x3605   :  { %13243 = vmatprep.subr.mxu0 %v14153_v0  ;;  %13254 = vmatprep.subr.mxu1 %v14153_v0 }
0x3606   :  { %13244 = vmatpush3.msra.mxu0 %v15725_v39  ;;  %13255 = vmatpush3.msra.mxu1 %v15893_v48 }
0x3607   :  { %13245 = vmatprep.subr.mxu0 %v14153_v0  ;;  %13256 = vmatprep.subr.mxu1 %v14153_v0 }
0x3608   :  { %13246 = vmatpush3.msra.mxu0 %v15731_v15  ;;  %13257 = vmatpush3.msra.mxu1 %v15899_v34 }
0x3609   :  { %13247 = vmatprep.subr.mxu0 %v14153_v0  ;;  %13258 = vmatprep.subr.mxu1 %v14153_v0 }
0x360a   :  { %13248 = vmatpush3.msra.mxu0 %v15735_v43  ;;  %13259 = vmatpush3.msra.mxu1 %v15903_v23 }
0x360b   :  { %13249 = vmatprep.mubr.msk.f32.mxu0 %vm14154_vm0, %v14153_v0  ;;  %13260 = vmatprep.mubr.msk.f32.mxu1 %vm14154_vm0, %v14153_v0 }
0x360c   :  { %13263 = vmatprep.subr.mxu0 %v14153_v0  ;;  %13274 = vmatprep.subr.mxu1 %v14153_v0 }
0x36b9   :  { %v8653_v4 = vpop.f32.mrf.mxu0  ;;  %v8730_v9 = vpop.f32.mrf.mxu1 }
0x36ba   :  { %v8657_v52 = vadd.f32 %v8653_v4, %v15950_v63 }
0x36bb   :  { %v13207_v61 = vpop.f32.mrf.mxu0  ;;  %v13218_v26 = vpop.f32.mrf.mxu1 }
0x36bc   :  { %v11467_v36 = vmul.f32 -1.442695, %v8657_v52 }
0x36c2   :  { %v8811_v33 = vpop.f32.mrf.mxu0  ;;  %v8887_v11 = vpop.f32.mrf.mxu1 }
0x36c3   :  { %8816 = vrot.lane.b32.xlu0 %v8811_v33, %s14156_s28 }
0x36c4   :  { %v13229_v12 = vpop.f32.mrf.mxu0  ;;  %v13240_v51 = vpop.f32.mrf.mxu1 }
0x36c7   :  { %8735 = vrot.lane.b32.xlu0 %v8730_v9, %s14155_s3 }
0x36cb   :  { %8892 = vrot.lane.b32.xlu0 %v8887_v11, %s14157_s8 }
0x3735   :  { %v8817_v54 = vpop.permute.xlu0 %8816 }
0x3736   :  { %v8819_v57 = vadd.f32 %v8817_v54, %v15950_v63 }
0x3738   :  { %13850 = vtanh.f32 %v8819_v57 }
0x3739   :  { %13852 = vpow2.f32 %v11467_v36  ;;  %v8736_v58 = vpop.permute.xlu0 %8735 }
0x373a   :  { %v8738_v32 = vadd.f32 %v8736_v58, %v15950_v63 }
0x373c   :  { %v11469_v10 = vmul.f32 -1.442695, %v8738_v32 }
0x373d   :  { %v8893_v13 = vpop.permute.xlu0 %8892 }
0x373e   :  { %v8895_v17 = vadd.f32 %v8893_v13, %v15950_v63  ;;  %v16177_v13 = vld [vmem:[#allocation7 + $0x40] sm:$0xff] }
0x3740   :  { %v11472_v35 = vmul.f32 -1.442695, %v8895_v17  ;;  %v16189_v17 = vld [vmem:[#allocation7 + $0x18] sm:$0xff] }
0x3745   :  { %v13851_v60 = vpop.eup %13850 }
0x3746   :  { %8904 = vrot.lane.b32.xlu1 %v13851_v60, %s14156_s28  ;;  %v13853_v62 = vpop.eup %13852 }
0x3747   :  { %v8661_v41 = vadd.f32 1.0, %v13853_v62 }
0x3749   :  { %13854 = vrcp.f32 %v8661_v41 }
0x374a   :  { %13856 = vpow2.f32 %v11469_v10 }
0x3756   :  { %v13855_v1 = vpop.eup %13854 }
0x3757   :  { %v13857_v14 = vpop.eup %13856 }
0x3758   :  { %v8742_v45 = vadd.f32 1.0, %v13857_v14 }
0x375a   :  { %13858 = vrcp.f32 %v8742_v45 }
0x3767   :  { %v13859_v31 = vpop.eup %13858 }
0x3768   :  { %v8902_v27 = vmul.f32 %v13859_v31, %v16033_v56 }
0x37b8   :  { %v8905_v2 = vpop.permute.xlu1 %8904 }
0x37b9   :  { %v8907_v55 = vmul.f32 %v13855_v1, %v8905_v2 }
0x37bb   :  { %8909 = vrot.lane.b32.xlu1 %v8907_v55, %s14155_s3 }
0x382d   :  { %v8910_v8 = vpop.permute.xlu1 %8909 }
0x382e   :  { %v16092_v47 = vadd.f32 %v8910_v8, %v8902_v27 }
0x3830   :  { %13860 = vtanh.f32 %v16092_v47 }
0x3831   :  { %13862 = vpow2.f32 %v11472_v35  ;;  %v16195_v35 = vld [vmem:[#allocation7 + $0x10] sm:$0xff] }
0x383d   :  { %v13861_v59 = vpop.eup %13860 }
0x383e   :  { %8915 = vrot.lane.b32.xlu1 %v13861_v59, %s14156_s28  ;;  %v13863_v16 = vpop.eup %13862  ;;  %v16171_v59 = vld [vmem:[#allocation7 + $0x48] sm:$0xff] }
0x383f   :  { %v8899_v19 = vadd.f32 1.0, %v13863_v16  ;;  %v16201_v16 = vld [vmem:[#allocation7 + $0x8] sm:$0xff] }
0x3841   :  { %13864 = vrcp.f32 %v8899_v19  ;;  %v16207_v19 = vld [vmem:[#allocation7] sm:$0xff] }
0x384e   :  { %v13865_v42 = vpop.eup %13864 }
0x38b0   :  { %v8916_v21 = vpop.permute.xlu1 %8915 }
0x38b1   :  { %v8918_v40 = vmul.f32 %v13865_v42, %v8916_v21 }
0x38b3   :  { %8920 = vrot.lane.b32.xlu0 %v8918_v40, %s14155_s3 }
0x3925   :  { %v8921_v56 = vpop.permute.xlu0 %8920 }
0x3926   :  { %13250 = vmatmul.mubr.msk.f32.vlgmr.msra.gmra.mxu0 %vm755_vm3, %v8921_v56  ;;  %13261 = vmatmul.mubr.msk.f32.vlgmr.msra.gmra.mxu1 %vm755_vm3, %v8921_v56 }
0x3927   :  { %13264 = vmatpush3.msra.mxu0 %v15739_v49  ;;  %13275 = vmatpush3.msra.mxu1 %v15907_v6 }
0x3928   :  { %13265 = vmatprep.subr.mxu0 %v14153_v0  ;;  %13276 = vmatprep.subr.mxu1 %v14153_v0 }
0x3929   :  { %13266 = vmatpush3.msra.mxu0 %v15744_v50  ;;  %13277 = vmatpush3.msra.mxu1 %v15912_v25 }
0x392a   :  { %13267 = vmatprep.subr.mxu0 %v14153_v0  ;;  %13278 = vmatprep.subr.mxu1 %v14153_v0 }
0x392b   :  { %13268 = vmatpush3.msra.mxu0 %v15750_v53  ;;  %13279 = vmatpush3.msra.mxu1 %v15918_v3 }
0x392c   :  { %13269 = vmatprep.subr.mxu0 %v14153_v0  ;;  %13280 = vmatprep.subr.mxu1 %v14153_v0 }
0x392d   :  { %13270 = vmatpush3.msra.mxu0 %v15754_v38  ;;  %13271 = vmatprep.mubr.msk.f32.mxu0 %vm14154_vm0, %v14153_v0 }
0x392e   :  { %13281 = vmatpush3.msra.mxu1 %v15922_v18  ;;  %13282 = vmatprep.mubr.msk.f32.mxu1 %vm14154_vm0, %v14153_v0 }
0x392f   :  { %13272 = vmatmul.mubr.msk.f32.vlgmr.msra.gmra.mxu0 %vm755_vm3, %v8921_v56  ;;  %13283 = vmatmul.mubr.msk.f32.vlgmr.msra.gmra.mxu1 %vm755_vm3, %v8921_v56 }
0x3930   :  { %13285 = vmatprep.subr.mxu0 %v14153_v0  ;;  %13296 = vmatprep.subr.mxu1 %v14153_v0 }
0x3931   :  { %13286 = vmatpush3.msra.mxu0 %v15719_v20  ;;  %13297 = vmatpush3.msra.mxu1 %v15887_v30 }
0x3932   :  { %13287 = vmatprep.subr.mxu0 %v14153_v0  ;;  %13298 = vmatprep.subr.mxu1 %v14153_v0 }
0x3933   :  { %13288 = vmatpush3.msra.mxu0 %v15725_v39  ;;  %13299 = vmatpush3.msra.mxu1 %v15893_v48 }
0x3934   :  { %13289 = vmatprep.subr.mxu0 %v14153_v0  ;;  %13300 = vmatprep.subr.mxu1 %v14153_v0 }
0x3935   :  { %13290 = vmatpush3.msra.mxu0 %v15731_v15  ;;  %13301 = vmatpush3.msra.mxu1 %v15899_v34 }
0x3936   :  { %13291 = vmatprep.subr.mxu0 %v14153_v0  ;;  %13302 = vmatprep.subr.mxu1 %v14153_v0 }
0x3937   :  { %13292 = vmatpush3.msra.mxu0 %v15735_v43  ;;  %13303 = vmatpush3.msra.mxu1 %v15903_v23 }
0x3938   :  { %13293 = vmatprep.mubr.msk.f32.mxu0 %vm14154_vm0, %v14153_v0  ;;  %13304 = vmatprep.mubr.msk.f32.mxu1 %vm14154_vm0, %v14153_v0 }
0x3939   :  { %13307 = vmatprep.subr.mxu0 %v14153_v0  ;;  %13318 = vmatprep.subr.mxu1 %v14153_v0 }
0x39e6   :  { %v8990_v20 = vpop.f32.mrf.mxu0  ;;  %v9067_v39 = vpop.f32.mrf.mxu1 }
0x39e7   :  { %v8994_v4 = vadd.f32 %v8990_v20, %v15954_v37 }
0x39e8   :  { %v13251_v15 = vpop.f32.mrf.mxu0  ;;  %v13262_v49 = vpop.f32.mrf.mxu1 }
0x39e9   :  { %v11474_v9 = vmul.f32 -1.442695, %v8994_v4 }
0x39ef   :  { %v9148_v50 = vpop.f32.mrf.mxu0  ;;  %v9224_v53 = vpop.f32.mrf.mxu1 }
0x39f0   :  { %9153 = vrot.lane.b32.xlu1 %v9148_v50, %s14156_s28 }
0x39f1   :  { %v13273_v43 = vpop.f32.mrf.mxu0  ;;  %v13284_v38 = vpop.f32.mrf.mxu1 }
0x39f4   :  { %9072 = vrot.lane.b32.xlu1 %v9067_v39, %s14155_s3 }
0x39f8   :  { %9229 = vrot.lane.b32.xlu1 %v9224_v53, %s14157_s8 }
0x3a62   :  { %v9154_v63 = vpop.permute.xlu1 %9153 }
0x3a63   :  { %v9156_v46 = vadd.f32 %v9154_v63, %v15954_v37 }
0x3a65   :  { %13866 = vtanh.f32 %v9156_v46 }
0x3a66   :  { %13868 = vpow2.f32 %v11474_v9  ;;  %v9073_v51 = vpop.permute.xlu1 %9072 }
0x3a67   :  { %v9075_v54 = vadd.f32 %v9073_v51, %v15954_v37 }
0x3a69   :  { %v11476_v57 = vmul.f32 -1.442695, %v9075_v54 }
0x3a6a   :  { %v9230_v55 = vpop.permute.xlu1 %9229 }
0x3a6b   :  { %v9232_v58 = vadd.f32 %v9230_v55, %v15954_v37  ;;  %v16165_v37 = vld [vmem:[#allocation7 + $0x50] sm:$0xff] }
0x3a6d   :  { %v11479_v32 = vmul.f32 -1.442695, %v9232_v58 }
0x3a72   :  { %v13867_v29 = vpop.eup %13866 }
0x3a73   :  { %9241 = vrot.lane.b32.xlu0 %v13867_v29, %s14156_s28  ;;  %v13869_v61 = vpop.eup %13868 }
0x3a74   :  { %v8998_v26 = vadd.f32 1.0, %v13869_v61 }
0x3a76   :  { %13870 = vrcp.f32 %v8998_v26 }
0x3a77   :  { %13872 = vpow2.f32 %v11476_v57 }
0x3a83   :  { %v13871_v33 = vpop.eup %13870 }
0x3a84   :  { %v13873_v60 = vpop.eup %13872 }
0x3a85   :  { %v9079_v52 = vadd.f32 1.0, %v13873_v60 }
0x3a87   :  { %13874 = vrcp.f32 %v9079_v52 }
0x3a94   :  { %v13875_v36 = vpop.eup %13874 }
0x3a95   :  { %v9239_v62 = vmul.f32 %v13875_v36, %v16092_v47  ;;  %v16159_v47 = vld [vmem:[#allocation7 + $0x58] sm:$0xff] }
0x3ae5   :  { %v9242_v11 = vpop.permute.xlu0 %9241 }
0x3ae6   :  { %v9244_v12 = vmul.f32 %v13871_v33, %v9242_v11 }
0x3ae8   :  { %9246 = vrot.lane.b32.xlu0 %v9244_v12, %s14155_s3 }
0x3b5a   :  { %v9247_v41 = vpop.permute.xlu0 %9246 }
0x3b5b   :  { %v16151_v1 = vadd.f32 %v9247_v41, %v9239_v62 }
0x3b5d   :  { %13876 = vtanh.f32 %v16151_v1 }
0x3b5e   :  { %13878 = vpow2.f32 %v11479_v32 }
0x3b6a   :  { %v13877_v2 = vpop.eup %13876 }
0x3b6b   :  { %9252 = vrot.lane.b32.xlu0 %v13877_v2, %s14156_s28  ;;  %v13879_v10 = vpop.eup %13878 }
0x3b6c   :  { %v9236_v14 = vadd.f32 1.0, %v13879_v10 }
0x3b6e   :  { %13880 = vrcp.f32 %v9236_v14 }
0x3b7b   :  { %v13881_v45 = vpop.eup %13880 }
0x3bdd   :  { %v9253_v31 = vpop.permute.xlu0 %9252 }
0x3bde   :  { %v9255_v27 = vmul.f32 %v13881_v45, %v9253_v31 }
0x3be0   :  { %9257 = vrot.lane.b32.xlu1 %v9255_v27, %s14155_s3 }
0x3c52   :  { %v9258_v8 = vpop.permute.xlu1 %9257 }
0x3c53   :  { %13294 = vmatmul.mubr.msk.f32.vlgmr.msra.gmra.mxu0 %vm755_vm3, %v9258_v8  ;;  %13305 = vmatmul.mubr.msk.f32.vlgmr.msra.gmra.mxu1 %vm755_vm3, %v9258_v8 }
0x3c54   :  { %13308 = vmatpush3.msra.mxu0 %v16159_v47  ;;  %13319 = vmatpush3.msra.mxu1 %v15907_v6 }
0x3c55   :  { %13309 = vmatprep.subr.mxu0 %v14153_v0  ;;  %13320 = vmatprep.subr.mxu1 %v14153_v0 }
0x3c56   :  { %13310 = vmatpush3.msra.mxu0 %v16165_v37  ;;  %13321 = vmatpush3.msra.mxu1 %v15912_v25 }
0x3c57   :  { %13311 = vmatprep.subr.mxu0 %v14153_v0  ;;  %13322 = vmatprep.subr.mxu1 %v14153_v0 }
0x3c58   :  { %13312 = vmatpush3.msra.mxu0 %v16171_v59  ;;  %13323 = vmatpush3.msra.mxu1 %v15918_v3 }
0x3c59   :  { %13313 = vmatprep.subr.mxu0 %v14153_v0  ;;  %13324 = vmatprep.subr.mxu1 %v14153_v0 }
0x3c5a   :  { %13314 = vmatpush3.msra.mxu0 %v16177_v13  ;;  %13315 = vmatprep.mubr.msk.f32.mxu0 %vm14154_vm0, %v14153_v0 }
0x3c5b   :  { %13325 = vmatpush3.msra.mxu1 %v15922_v18  ;;  %13326 = vmatprep.mubr.msk.f32.mxu1 %vm14154_vm0, %v14153_v0 }
0x3c5c   :  { %13316 = vmatmul.mubr.msk.f32.vlgmr.msra.gmra.mxu0 %vm755_vm3, %v9258_v8  ;;  %13327 = vmatmul.mubr.msk.f32.vlgmr.msra.gmra.mxu1 %vm755_vm3, %v9258_v8 }
0x3c5d   :  { %13329 = vmatprep.subr.mxu0 %v14153_v0  ;;  %13340 = vmatprep.subr.mxu1 %v14153_v0 }
0x3c5e   :  { %13330 = vmatpush3.msra.mxu0 %v16189_v17  ;;  %13341 = vmatpush3.msra.mxu1 %v15887_v30 }
0x3c5f   :  { %13331 = vmatprep.subr.mxu0 %v14153_v0  ;;  %13342 = vmatprep.subr.mxu1 %v14153_v0 }
0x3c60   :  { %13332 = vmatpush3.msra.mxu0 %v16195_v35  ;;  %13343 = vmatpush3.msra.mxu1 %v15893_v48 }
0x3c61   :  { %13333 = vmatprep.subr.mxu0 %v14153_v0  ;;  %13344 = vmatprep.subr.mxu1 %v14153_v0 }
0x3c62   :  { %13334 = vmatpush3.msra.mxu0 %v16201_v16  ;;  %13345 = vmatpush3.msra.mxu1 %v15899_v34 }
0x3c63   :  { %13335 = vmatprep.subr.mxu0 %v14153_v0  ;;  %13346 = vmatprep.subr.mxu1 %v14153_v0 }
0x3c64   :  { %13336 = vmatpush3.msra.mxu0 %v16207_v19  ;;  %13347 = vmatpush3.msra.mxu1 %v15903_v23 }
0x3c65   :  { %13337 = vmatprep.mubr.msk.f32.mxu0 %vm14154_vm0, %v14153_v0  ;;  %13348 = vmatprep.mubr.msk.f32.mxu1 %vm14154_vm0, %v14153_v0 }
0x3c66   :  { %13351 = vmatprep.subr.mxu0 %v14153_v0  ;;  %13362 = vmatprep.subr.mxu1 %v14153_v0 }
0x3d13   :  { %v9327_v42 = vpop.f32.mrf.mxu0  ;;  %v9404_v21 = vpop.f32.mrf.mxu1 }
0x3d14   :  { %v9331_v43 = vadd.f32 %v9327_v42, %v15957_v24 }
0x3d15   :  { %v13295_v40 = vpop.f32.mrf.mxu0  ;;  %v13306_v56 = vpop.f32.mrf.mxu1 }
0x3d16   :  { %v11481_v38 = vmul.f32 -1.442695, %v9331_v43 }
0x3d1c   :  { %v9485_v20 = vpop.f32.mrf.mxu0  ;;  %v9561_v39 = vpop.f32.mrf.mxu1 }
0x3d1d   :  { %9490 = vrot.lane.b32.xlu0 %v9485_v20, %s14156_s28 }
0x3d1e   :  { %v13317_v15 = vpop.f32.mrf.mxu0  ;;  %v13328_v23 = vpop.f32.mrf.mxu1 }
0x3d21   :  { %9409 = vrot.lane.b32.xlu0 %v9404_v21, %s14155_s3 }
0x3d25   :  { %9566 = vrot.lane.b32.xlu0 %v9561_v39, %s14157_s8 }
0x3d8f   :  { %v9491_v49 = vpop.permute.xlu0 %9490 }
0x3d90   :  { %v9493_v50 = vadd.f32 %v9491_v49, %v15957_v24 }
0x3d92   :  { %13882 = vtanh.f32 %v9493_v50 }
0x3d93   :  { %13884 = vpow2.f32 %v11481_v38  ;;  %v9410_v61 = vpop.permute.xlu0 %9409 }
0x3d94   :  { %v9412_v26 = vadd.f32 %v9410_v61, %v15957_v24 }
0x3d96   :  { %v11483_v33 = vmul.f32 -1.442695, %v9412_v26 }
0x3d97   :  { %v9567_v36 = vpop.permute.xlu0 %9566 }
0x3d98   :  { %v9569_v62 = vadd.f32 %v9567_v36, %v15957_v24  ;;  %v14015_v36 = vld [vmem:[#allocation7 + $0x38] sm:$0xff] }
0x3d9a   :  { %v11486_v41 = vmul.f32 -1.442695, %v9569_v62  ;;  %v14016_v62 = vld [vmem:[#allocation7 + $0x30] sm:$0xff] }
0x3d9f   :  { %v13883_v53 = vpop.eup %13882 }
0x3da0   :  { %9578 = vrot.lane.b32.xlu1 %v13883_v53, %s14156_s28  ;;  %v13885_v63 = vpop.eup %13884 }
0x3da1   :  { %v9335_v46 = vadd.f32 1.0, %v13885_v63 }
0x3da3   :  { %13886 = vrcp.f32 %v9335_v46 }
0x3da4   :  { %13888 = vpow2.f32 %v11483_v33 }
0x3db0   :  { %v13887_v29 = vpop.eup %13886 }
0x3db1   :  { %v13889_v11 = vpop.eup %13888 }
0x3db2   :  { %v9416_v12 = vadd.f32 1.0, %v13889_v11 }
0x3db4   :  { %13890 = vrcp.f32 %v9416_v12 }
0x3dc1   :  { %v13891_v51 = vpop.eup %13890 }
0x3dc2   :  { %v9576_v54 = vmul.f32 %v13891_v51, %v16151_v1 }
0x3e12   :  { %v9579_v4 = vpop.permute.xlu1 %9578 }
0x3e13   :  { %v9581_v9 = vmul.f32 %v13887_v29, %v9579_v4 }
0x3e15   :  { %9583 = vrot.lane.b32.xlu1 %v9581_v9, %s14155_s3 }
0x3e87   :  { %v9584_v57 = vpop.permute.xlu1 %9583 }
0x3e88   :  { %v16226_v60 = vadd.f32 %v9584_v57, %v9576_v54  ;;  %v16296_v57 = vld [vmem:[#allocation7 + $0x78] sm:$0xff] }
0x3e8a   :  { %13892 = vtanh.f32 %v16226_v60 }
0x3e8b   :  { %13894 = vpow2.f32 %v11486_v41  ;;  %v14017_v41 = vld [vmem:[#allocation7 + $0x28] sm:$0xff] }
0x3e97   :  { %v13893_v52 = vpop.eup %13892 }
0x3e98   :  { %9589 = vrot.lane.b32.xlu1 %v13893_v52, %s14156_s28  ;;  %v13895_v2 = vpop.eup %13894  ;;  %v16316_v52 = vld [vmem:[#allocation7 + $0x60] sm:$0xff] }
0x3e99   :  { %v9573_v55 = vadd.f32 1.0, %v13895_v2 }
0x3e9b   :  { %13896 = vrcp.f32 %v9573_v55 }
0x3ea8   :  { %v13897_v58 = vpop.eup %13896 }
0x3f0a   :  { %v9590_v32 = vpop.permute.xlu1 %9589 }
0x3f0b   :  { %v9592_v10 = vmul.f32 %v13897_v58, %v9590_v32 }
0x3f0d   :  { %9594 = vrot.lane.b32.xlu0 %v9592_v10, %s14155_s3 }
0x3f7f   :  { %v9595_v1 = vpop.permute.xlu0 %9594 }
0x3f80   :  { %13338 = vmatmul.mubr.msk.f32.vlgmr.msra.gmra.mxu0 %vm755_vm3, %v9595_v1  ;;  %13349 = vmatmul.mubr.msk.f32.vlgmr.msra.gmra.mxu1 %vm755_vm3, %v9595_v1 }
0x3f81   :  { %13352 = vmatpush3.msra.mxu0 %v16159_v47  ;;  %13363 = vmatpush3.msra.mxu1 %v15907_v6 }
0x3f82   :  { %13353 = vmatprep.subr.mxu0 %v14153_v0  ;;  %13364 = vmatprep.subr.mxu1 %v14153_v0 }
0x3f83   :  { %13354 = vmatpush3.msra.mxu0 %v16165_v37  ;;  %13365 = vmatpush3.msra.mxu1 %v15912_v25 }
0x3f84   :  { %13355 = vmatprep.subr.mxu0 %v14153_v0  ;;  %13366 = vmatprep.subr.mxu1 %v14153_v0 }
0x3f85   :  { %13356 = vmatpush3.msra.mxu0 %v16171_v59  ;;  %13367 = vmatpush3.msra.mxu1 %v15918_v3 }
0x3f86   :  { %13357 = vmatprep.subr.mxu0 %v14153_v0  ;;  %13368 = vmatprep.subr.mxu1 %v14153_v0 }
0x3f87   :  { %13358 = vmatpush3.msra.mxu0 %v16177_v13  ;;  %13359 = vmatprep.mubr.msk.f32.mxu0 %vm14154_vm0, %v14153_v0 }
0x3f88   :  { %13369 = vmatpush3.msra.mxu1 %v15922_v18  ;;  %13370 = vmatprep.mubr.msk.f32.mxu1 %vm14154_vm0, %v14153_v0 }
0x3f89   :  { %13360 = vmatmul.mubr.msk.f32.vlgmr.msra.gmra.mxu0 %vm755_vm3, %v9595_v1  ;;  %13371 = vmatmul.mubr.msk.f32.vlgmr.msra.gmra.mxu1 %vm755_vm3, %v9595_v1 }
0x3f8a   :  { %13373 = vmatprep.subr.mxu0 %v14153_v0  ;;  %13384 = vmatprep.subr.mxu1 %v14153_v0 }
0x3f8b   :  { %13374 = vmatpush3.msra.mxu0 %v16189_v17  ;;  %13385 = vmatpush3.msra.mxu1 %v15887_v30  ;;  %v16269_v30 = vld [vmem:[#allocation7 + $0x20] sm:$0xff] }
0x3f8c   :  { %13375 = vmatprep.subr.mxu0 %v14153_v0  ;;  %13386 = vmatprep.subr.mxu1 %v14153_v0 }
0x3f8d   :  { %13376 = vmatpush3.msra.mxu0 %v16195_v35  ;;  %13387 = vmatpush3.msra.mxu1 %v15893_v48 }
0x3f8e   :  { %13377 = vmatprep.subr.mxu0 %v14153_v0  ;;  %13388 = vmatprep.subr.mxu1 %v14153_v0 }
0x3f8f   :  { %13378 = vmatpush3.msra.mxu0 %v16201_v16  ;;  %13389 = vmatpush3.msra.mxu1 %v15899_v34 }
0x3f90   :  { %13379 = vmatprep.subr.mxu0 %v14153_v0  ;;  %13390 = vmatprep.subr.mxu1 %v14153_v0 }
0x3f91   :  { %13380 = vmatpush3.msra.mxu0 %v16207_v19  ;;  %13391 = vmatpush3.msra.mxu1 %v16269_v30 }
0x3f92   :  { %13381 = vmatprep.mubr.msk.f32.mxu0 %vm14154_vm0, %v14153_v0  ;;  %13392 = vmatprep.mubr.msk.f32.mxu1 %vm14154_vm0, %v14153_v0 }
0x3f93   :  { %13395 = vmatprep.subr.mxu0 %v14153_v0  ;;  %13406 = vmatprep.subr.mxu1 %v14153_v0 }
0x4040   :  { %v9664_v48 = vpop.f32.mrf.mxu0  ;;  %v9741_v34 = vpop.f32.mrf.mxu1 }
0x4041   :  { %v9668_v8 = vadd.f32 %v9664_v48, %v15960_v5 }
0x4042   :  { %v13339_v6 = vpop.f32.mrf.mxu0  ;;  %v13350_v25 = vpop.f32.mrf.mxu1 }
0x4043   :  { %v11488_v42 = vmul.f32 -1.442695, %v9668_v8 }
0x4049   :  { %v9822_v3 = vpop.f32.mrf.mxu0  ;;  %v9898_v18 = vpop.f32.mrf.mxu1 }
0x404a   :  { %9827 = vrot.lane.b32.xlu1 %v9822_v3, %s14156_s28 }
0x404b   :  { %v13361_v24 = vpop.f32.mrf.mxu0  ;;  %v13372_v14 = vpop.f32.mrf.mxu1 }
0x404e   :  { %9746 = vrot.lane.b32.xlu1 %v9741_v34, %s14155_s3 }
0x4052   :  { %9903 = vrot.lane.b32.xlu1 %v9898_v18, %s14157_s8 }
0x40bc   :  { %v9828_v45 = vpop.permute.xlu1 %9827 }
0x40bd   :  { %v9830_v31 = vadd.f32 %v9828_v45, %v15960_v5 }
0x40bf   :  { %13898 = vtanh.f32 %v9830_v31 }
0x40c0   :  { %13900 = vpow2.f32 %v11488_v42  ;;  %v9747_v15 = vpop.permute.xlu1 %9746 }
0x40c1   :  { %v9749_v23 = vadd.f32 %v9747_v15, %v15960_v5 }
0x40c3   :  { %v11490_v49 = vmul.f32 -1.442695, %v9749_v23 }
0x40c4   :  { %v9904_v4 = vpop.permute.xlu1 %9903 }
0x40c5   :  { %v9906_v9 = vadd.f32 %v9904_v4, %v15960_v5  ;;  %v16302_v5 = vld [vmem:[#allocation7 + $0x70] sm:$0xff]  ;;  %v10608_v4 = vld [vmem:[#allocation8 + $0x20] sm:$0xff] }
0x40c7   :  { %v11493_v61 = vmul.f32 -1.442695, %v9906_v9  ;;  %v10764_v9 = vld [vmem:[#allocation10 + $0x18] sm:$0xff] }
0x40cc   :  { %v13899_v27 = vpop.eup %13898 }
0x40cd   :  { %9915 = vrot.lane.b32.xlu0 %v13899_v27, %s14156_s28  ;;  %v13901_v21 = vpop.eup %13900 }
0x40ce   :  { %v9672_v40 = vadd.f32 1.0, %v13901_v21 }
0x40d0   :  { %13902 = vrcp.f32 %v9672_v40 }
0x40d1   :  { %13904 = vpow2.f32 %v11490_v49 }
0x40dd   :  { %v13903_v56 = vpop.eup %13902 }
0x40de   :  { %v13905_v50 = vpop.eup %13904 }
0x40df   :  { %v9753_v53 = vadd.f32 1.0, %v13905_v50 }
0x40e1   :  { %13906 = vrcp.f32 %v9753_v53 }
0x40ee   :  { %v13907_v43 = vpop.eup %13906 }
0x40ef   :  { %v9913_v38 = vmul.f32 %v13907_v43, %v16226_v60  ;;  %v16308_v60 = vld [vmem:[#allocation7 + $0x68] sm:$0xff] }
0x413f   :  { %v9916_v20 = vpop.permute.xlu0 %9915 }
0x4140   :  { %v9918_v39 = vmul.f32 %v13903_v56, %v9916_v20 }
0x4142   :  { %9920 = vrot.lane.b32.xlu0 %v9918_v39, %s14155_s3 }
0x41b4   :  { %v9921_v63 = vpop.permute.xlu0 %9920 }
0x41b5   :  { %v16287_v46 = vadd.f32 %v9921_v63, %v9913_v38 }
0x41b7   :  { %13908 = vtanh.f32 %v16287_v46 }
0x41b8   :  { %13910 = vpow2.f32 %v11493_v61  ;;  %v10768_v61 = vld [vmem:[#allocation10 + $0x38] sm:$0xff] }
0x41c4   :  { %v13909_v29 = vpop.eup %13908 }
0x41c5   :  { %9926 = vrot.lane.b32.xlu0 %v13909_v29, %s14156_s28  ;;  %v13911_v26 = vpop.eup %13910  ;;  %v10604_v29 = vld [vmem:[#allocation8] sm:$0xff] }
0x41c6   :  { %v9910_v33 = vadd.f32 1.0, %v13911_v26  ;;  %v10763_v26 = vld [vmem:[#allocation10 + $0x10] sm:$0xff] }
0x41c8   :  { %13912 = vrcp.f32 %v9910_v33  ;;  %v10767_v33 = vld [vmem:[#allocation10 + $0x30] sm:$0xff] }
0x41d5   :  { %v13913_v11 = vpop.eup %13912 }
0x4237   :  { %v9927_v12 = vpop.permute.xlu0 %9926 }
0x4238   :  { %v9929_v51 = vmul.f32 %v13913_v11, %v9927_v12  ;;  %v10762_v11 = vld [vmem:[#allocation10 + $0x8] sm:$0xff]  ;;  %v10772_v12 = vld [vmem:[#allocation10 + $0x58] sm:$0xff] }
0x423a   :  { %9931 = vrot.lane.b32.xlu1 %v9929_v51, %s14155_s3  ;;  %v10765_v51 = vld [vmem:[#allocation10 + $0x20] sm:$0xff] }
0x42ac   :  { %v9932_v54 = vpop.permute.xlu1 %9931 }
0x42ad   :  { %13382 = vmatmul.mubr.msk.f32.vlgmr.msra.gmra.mxu0 %vm755_vm3, %v9932_v54  ;;  %13393 = vmatmul.mubr.msk.f32.vlgmr.msra.gmra.mxu1 %vm755_vm3, %v9932_v54 }
0x42ae   :  { %13396 = vmatpush3.msra.mxu0 %v16159_v47  ;;  %13407 = vmatpush3.msra.mxu1 %v16296_v57 }
0x42af   :  { %13397 = vmatprep.subr.mxu0 %v14153_v0  ;;  %13408 = vmatprep.subr.mxu1 %v14153_v0 }
0x42b0   :  { %13398 = vmatpush3.msra.mxu0 %v16165_v37  ;;  %13409 = vmatpush3.msra.mxu1 %v16302_v5 }
0x42b1   :  { %13399 = vmatprep.subr.mxu0 %v14153_v0  ;;  %13410 = vmatprep.subr.mxu1 %v14153_v0 }
0x42b2   :  { %13400 = vmatpush3.msra.mxu0 %v16171_v59  ;;  %13411 = vmatpush3.msra.mxu1 %v16308_v60 }
0x42b3   :  { %13401 = vmatprep.subr.mxu0 %v14153_v0  ;;  %13412 = vmatprep.subr.mxu1 %v14153_v0 }
0x42b4   :  { %13402 = vmatpush3.msra.mxu0 %v16177_v13  ;;  %13403 = vmatprep.mubr.msk.f32.mxu0 %vm14154_vm0, %v14153_v0 }
0x42b5   :  { %13413 = vmatpush3.msra.mxu1 %v16316_v52  ;;  %13414 = vmatprep.mubr.msk.f32.mxu1 %vm14154_vm0, %v14153_v0 }
0x42b6   :  { %13404 = vmatmul.mubr.msk.f32.vlgmr.msra.gmra.mxu0 %vm755_vm3, %v9932_v54  ;;  %13415 = vmatmul.mubr.msk.f32.vlgmr.msra.gmra.mxu1 %vm755_vm3, %v9932_v54  ;;  %v10771_v54 = vld [vmem:[#allocation10 + $0x50] sm:$0xff] }
0x42b7   :  { %13417 = vmatprep.subr.mxu0 %v14153_v0  ;;  %13428 = vmatprep.subr.mxu1 %v14153_v0 }
0x42b8   :  { %13418 = vmatpush3.msra.mxu0 %v16189_v17  ;;  %13429 = vmatpush3.msra.mxu1 %v14015_v36  ;;  %v10774_v36 = vld [vmem:[#allocation10 + $0x68] sm:$0xff] }
0x42b9   :  { %13419 = vmatprep.subr.mxu0 %v14153_v0  ;;  %13430 = vmatprep.subr.mxu1 %v14153_v0 }
0x42ba   :  { %13420 = vmatpush3.msra.mxu0 %v16195_v35  ;;  %13431 = vmatpush3.msra.mxu1 %v14016_v62  ;;  %v10773_v62 = vld [vmem:[#allocation10 + $0x60] sm:$0xff] }
0x42bb   :  { %13421 = vmatprep.subr.mxu0 %v14153_v0  ;;  %13432 = vmatprep.subr.mxu1 %v14153_v0 }
0x42bc   :  { %13422 = vmatpush3.msra.mxu0 %v16201_v16  ;;  %13433 = vmatpush3.msra.mxu1 %v14017_v41 }
0x42bd   :  { %13423 = vmatprep.subr.mxu0 %v14153_v0  ;;  %13434 = vmatprep.subr.mxu1 %v14153_v0 }
0x42be   :  { %13424 = vmatpush3.msra.mxu0 %v16207_v19  ;;  %13435 = vmatpush3.msra.mxu1 %v16269_v30 }
0x42bf   :  { %13425 = vmatprep.mubr.msk.f32.mxu0 %vm14154_vm0, %v14153_v0  ;;  %13436 = vmatprep.mubr.msk.f32.mxu1 %vm14154_vm0, %v14153_v0 }
0x42c0   :  { %13439 = vmatprep.subr.mxu0 %v14153_v0  ;;  %13450 = vmatprep.subr.mxu1 %v14153_v0 }
0x436d   :  { %v10001_v17 = vpop.f32.mrf.mxu0  ;;  %v10078_v35 = vpop.f32.mrf.mxu1 }
0x436e   :  { %v10005_v48 = vadd.f32 %v10001_v17, %v15963_v44 }
0x436f   :  { %v13383_v16 = vpop.f32.mrf.mxu0  ;;  %v13394_v2 = vpop.f32.mrf.mxu1 }
0x4370   :  { %v11495_v34 = vmul.f32 -1.442695, %v10005_v48 }
0x4376   :  { %v10159_v55 = vpop.f32.mrf.mxu0  ;;  %v10235_v58 = vpop.f32.mrf.mxu1 }
0x4377   :  { %10164 = vrot.lane.b32.xlu0 %v10159_v55, %s14156_s28 }
0x4378   :  { %v13405_v19 = vpop.f32.mrf.mxu0  ;;  %v13416_v32 = vpop.f32.mrf.mxu1 }
0x4379   :  { %v11509_v32 = vld [vmem:[%s16507_s12] ss:$0 sm:$0xff] }
0x437b   :  { %10083 = vrot.lane.b32.xlu0 %v10078_v35, %s14155_s3 }
0x437f   :  { %10240 = vrot.lane.b32.xlu0 %v10235_v58, %s14157_s8 }
0x43e9   :  { %v10165_v10 = vpop.permute.xlu0 %10164 }
0x43ea   :  { %v10167_v1 = vadd.f32 %v10165_v10, %v15963_v44 }
0x43ec   :  { %13914 = vtanh.f32 %v10167_v1 }
0x43ed   :  { %13916 = vpow2.f32 %v11495_v34  ;;  %v10084_v14 = vpop.permute.xlu0 %10083 }
0x43ee   :  { %v10086_v45 = vadd.f32 %v10084_v14, %v15963_v44 }
0x43f0   :  { %v11497_v31 = vmul.f32 -1.442695, %v10086_v45 }
0x43f1   :  { %v10241_v39 = vpop.permute.xlu0 %10240 }
0x43f2   :  { %v10243_v15 = vadd.f32 %v10241_v39, %v15963_v44  ;;  %v10607_v44 = vld [vmem:[#allocation8 + $0x18] sm:$0xff] }
0x43f4   :  { %v11500_v23 = vmul.f32 -1.442695, %v10243_v15 }
0x43f9   :  { %v13915_v30 = vpop.eup %13914 }
0x43fa   :  { %10252 = vrot.lane.b32.xlu1 %v13915_v30, %s14156_s28  ;;  %v13917_v6 = vpop.eup %13916 }
0x43fb   :  { %v10009_v25 = vadd.f32 1.0, %v13917_v6 }
0x43fd   :  { %13918 = vrcp.f32 %v10009_v25 }
0x43fe   :  { %13920 = vpow2.f32 %v11497_v31 }
0x440a   :  { %v13919_v3 = vpop.eup %13918 }
0x440b   :  { %v13921_v27 = vpop.eup %13920 }
0x440c   :  { %v10090_v8 = vadd.f32 1.0, %v13921_v27 }
0x440e   :  { %13922 = vrcp.f32 %v10090_v8 }
0x441b   :  { %v13923_v42 = vpop.eup %13922 }
0x441c   :  { %v10250_v21 = vmul.f32 %v13923_v42, %v16287_v46  ;;  %v10609_v46 = vld [vmem:[#allocation8 + $0x28] sm:$0xff] }
0x446c   :  { %v10253_v18 = vpop.permute.xlu1 %10252 }
0x446d   :  { %v10255_v24 = vmul.f32 %v13919_v3, %v10253_v18 }
0x446f   :  { %10257 = vrot.lane.b32.xlu1 %v10255_v24, %s14155_s3 }
0x44e1   :  { %v10258_v40 = vpop.permute.xlu1 %10257 }
0x44e2   :  { %v16351_v56 = vadd.f32 %v10258_v40, %v10250_v21 }
0x44e4   :  { %13924 = vtanh.f32 %v16351_v56 }
0x44e5   :  { %13926 = vpow2.f32 %v11500_v23 }
0x44f1   :  { %v13925_v20 = vpop.eup %13924 }
0x44f2   :  { %10263 = vrot.lane.b32.xlu1 %v13925_v20, %s14156_s28  ;;  %v13927_v49 = vpop.eup %13926 }
0x44f3   :  { %v10247_v50 = vadd.f32 1.0, %v13927_v49 }
0x44f5   :  { %13928 = vrcp.f32 %v10247_v50 }
0x4502   :  { %v13929_v53 = vpop.eup %13928 }
0x4564   :  { %v10264_v43 = vpop.permute.xlu1 %10263 }
0x4565   :  { %v10266_v38 = vmul.f32 %v13929_v53, %v10264_v43 }
0x4567   :  { %10268 = vrot.lane.b32.xlu0 %v10266_v38, %s14155_s3 }
0x45d9   :  { %v10269_v63 = vpop.permute.xlu0 %10268 }
0x45da   :  { %13426 = vmatmul.mubr.msk.f32.vlgmr.msra.gmra.mxu0 %vm755_vm3, %v10269_v63  ;;  %13437 = vmatmul.mubr.msk.f32.vlgmr.msra.gmra.mxu1 %vm755_vm3, %v10269_v63 }
0x45db   :  { %13440 = vmatpush3.msra.mxu0 %v16159_v47  ;;  %13451 = vmatpush3.msra.mxu1 %v16296_v57  ;;  %v10611_v47 = vld [vmem:[#allocation8 + $0x38] sm:$0xff]  ;;  %v10770_v57 = vld [vmem:[#allocation10 + $0x48] sm:$0xff] }
0x45dc   :  { %13441 = vmatprep.subr.mxu0 %v14153_v0  ;;  %13452 = vmatprep.subr.mxu1 %v14153_v0 }
0x45dd   :  { %13442 = vmatpush3.msra.mxu0 %v16165_v37  ;;  %13453 = vmatpush3.msra.mxu1 %v16302_v5  ;;  %v10606_v37 = vld [vmem:[#allocation8 + $0x10] sm:$0xff]  ;;  %v10769_v5 = vld [vmem:[#allocation10 + $0x40] sm:$0xff] }
0x45de   :  { %13443 = vmatprep.subr.mxu0 %v14153_v0  ;;  %13454 = vmatprep.subr.mxu1 %v14153_v0 }
0x45df   :  { %13444 = vmatpush3.msra.mxu0 %v16171_v59  ;;  %13455 = vmatpush3.msra.mxu1 %v16308_v60  ;;  %v10610_v59 = vld [vmem:[#allocation8 + $0x30] sm:$0xff]  ;;  %v10776_v60 = vld [vmem:[#allocation10 + $0x78] sm:$0xff] }
0x45e0   :  { %13445 = vmatprep.subr.mxu0 %v14153_v0  ;;  %13456 = vmatprep.subr.mxu1 %v14153_v0 }
0x45e1   :  { %13446 = vmatpush3.msra.mxu0 %v16177_v13  ;;  %13447 = vmatprep.mubr.msk.f32.mxu0 %vm14154_vm0, %v14153_v0  ;;  %v10605_v13 = vld [vmem:[#allocation8 + $0x8] sm:$0xff] }
0x45e2   :  { %13457 = vmatpush3.msra.mxu1 %v16316_v52  ;;  %13458 = vmatprep.mubr.msk.f32.mxu1 %vm14154_vm0, %v14153_v0  ;;  %v10775_v52 = vld [vmem:[#allocation10 + $0x70] sm:$0xff] }
0x45e3   :  { %13448 = vmatmul.mubr.msk.f32.vlgmr.msra.gmra.mxu0 %vm755_vm3, %v10269_v63  ;;  %13459 = vmatmul.mubr.msk.f32.vlgmr.msra.gmra.mxu1 %vm755_vm3, %v10269_v63 }
0x45e4   :  { %13461 = vmatprep.subr.mxu0 %v14153_v0  ;;  %13472 = vmatprep.subr.mxu1 %v14153_v0 }
0x45e5   :  { %13462 = vmatpush3.msra.mxu0 %v10607_v44  ;;  %13473 = vmatpush3.msra.mxu1 %v10611_v47 }
0x45e6   :  { %13463 = vmatprep.subr.mxu0 %v14153_v0  ;;  %13474 = vmatprep.subr.mxu1 %v14153_v0 }
0x45e7   :  { %13464 = vmatpush3.msra.mxu0 %v10606_v37  ;;  %13475 = vmatpush3.msra.mxu1 %v10610_v59 }
0x45e8   :  { %13465 = vmatprep.subr.mxu0 %v14153_v0  ;;  %13476 = vmatprep.subr.mxu1 %v14153_v0 }
0x45e9   :  { %13466 = vmatpush3.msra.mxu0 %v10605_v13  ;;  %13477 = vmatpush3.msra.mxu1 %v10609_v46 }
0x45ea   :  { %13467 = vmatprep.subr.mxu0 %v14153_v0  ;;  %13478 = vmatprep.subr.mxu1 %v14153_v0 }
0x45eb   :  { %13468 = vmatpush3.msra.mxu0 %v10604_v29  ;;  %13469 = vmatprep.mubr.msk.f32.mxu0 %vm14154_vm0, %v14153_v0 }
0x45ec   :  { %13479 = vmatpush3.msra.mxu1 %v10608_v4  ;;  %13480 = vmatprep.mubr.msk.f32.mxu1 %vm14154_vm0, %v14153_v0 }
0x45ed   :  { %13470 = vmatmul.mubr.msk.f32.vlgmr.msra.gmra.mxu0 %vm755_vm3, %v15721_v7  ;;  %13481 = vmatmul.mubr.msk.f32.vlgmr.msra.gmra.mxu1 %vm755_vm3, %v15111_v28  ;;  %v10766_v7 = vld [vmem:[#allocation10 + $0x28] sm:$0xff]  ;;  %v10761_v28 = vld [vmem:[#allocation10] sm:$0xff] }
0x45ee   :  { %13483 = vmatprep.subr.mxu0 %v14153_v0  ;;  %13491 = vmatprep.mubr.msk.f32.mxu0 %vm14154_vm0, %v14153_v0 }
0x45ef   :  { %13484 = vmatpush3.msra.mxu0 %v10764_v9  ;;  %13494 = vmatprep.subr.mxu1 %v14153_v0 }
0x45f0   :  { %13485 = vmatprep.subr.mxu0 %v14153_v0  ;;  %13495 = vmatpush3.msra.mxu1 %v10768_v61 }
0x45f1   :  { %13486 = vmatpush3.msra.mxu0 %v10763_v26  ;;  %13496 = vmatprep.subr.mxu1 %v14153_v0 }
0x45f2   :  { %13487 = vmatprep.subr.mxu0 %v14153_v0  ;;  %13497 = vmatpush3.msra.mxu1 %v10767_v33 }
0x45f3   :  { %13488 = vmatpush3.msra.mxu0 %v10762_v11  ;;  %13498 = vmatprep.subr.mxu1 %v14153_v0 }
0x45f4   :  { %13489 = vmatprep.subr.mxu0 %v14153_v0  ;;  %13499 = vmatpush3.msra.mxu1 %v10766_v7 }
0x45f5   :  { %13490 = vmatpush3.msra.mxu0 %v10761_v28  ;;  %13500 = vmatprep.subr.mxu1 %v14153_v0 }
0x45f6   :  { %13492 = vmatmul.mubr.f32.vlgmr.msra.gmra.mxu0 %v14153_v0  ;;  %13505 = vmatprep.subr.mxu0 %v14153_v0 }
0x45f7   :  { %13506 = vmatpush3.msra.mxu0 %v10772_v12  ;;  %13513 = vmatprep.mubr.msk.f32.mxu0 %vm14154_vm0, %v14153_v0 }
0x45f8   :  { %13507 = vmatprep.subr.mxu0 %v14153_v0  ;;  %13501 = vmatpush3.msra.mxu1 %v10765_v51 }
0x45f9   :  { %13508 = vmatpush3.msra.mxu0 %v10771_v54  ;;  %13502 = vmatprep.mubr.msk.f32.mxu1 %vm14154_vm0, %v14153_v0 }
0x45fa   :  { %13509 = vmatprep.subr.mxu0 %v14153_v0  ;;  %13503 = vmatmul.mubr.f32.vlgmr.msra.gmra.mxu1 %v14153_v0 }
0x45fb   :  { %13510 = vmatpush3.msra.mxu0 %v10770_v57  ;;  %13516 = vmatprep.subr.mxu1 %v14153_v0 }
0x45fc   :  { %13511 = vmatprep.subr.mxu0 %v14153_v0  ;;  %13524 = vmatprep.mubr.msk.f32.mxu1 %vm14154_vm0, %v14153_v0 }
0x45fd   :  { %13512 = vmatpush3.msra.mxu0 %v10769_v5  ;;  %13517 = vmatpush3.msra.mxu1 %v10776_v60 }
0x45fe   :  { %13514 = vmatmul.mubr.f32.vlgmr.msra.gmra.mxu0 %v14153_v0  ;;  %13527 = vmatprep.subr.mxu0 %v14153_v0 }
0x45ff   :  { %13535 = vmatprep.mubr.msk.f32.mxu0 %vm14154_vm0, %v14153_v0  ;;  %13518 = vmatprep.subr.mxu1 %v14153_v0 }
0x4600   :  { %13519 = vmatpush3.msra.mxu1 %v10775_v52 }
0x4601   :  { %13520 = vmatprep.subr.mxu1 %v14153_v0 }
0x4602   :  { %13521 = vmatpush3.msra.mxu1 %v10774_v36 }
0x4603   :  { %13522 = vmatprep.subr.mxu1 %v14153_v0 }
0x4604   :  { %13523 = vmatpush3.msra.mxu1 %v10773_v62 }
0x4605   :  { %13525 = vmatmul.mubr.f32.vlgmr.msra.gmra.mxu1 %v14153_v0  ;;  %13538 = vmatprep.subr.mxu1 %v14153_v0 }
0x4606   :  { %13546 = vmatprep.mubr.msk.f32.mxu1 %vm14154_vm0, %v14153_v0 }
0x469a   :  { %v10338_v41 = vpop.f32.mrf.mxu0  ;;  %v10415_v17 = vpop.f32.mrf.mxu1 }
0x469b   :  { %v10342_v15 = vadd.f32 %v10338_v41, %v15966_v22 }
0x469c   :  { %v13427_v35 = vpop.f32.mrf.mxu0  ;;  %v13438_v16 = vpop.f32.mrf.mxu1 }
0x469d   :  { %v11502_v23 = vmul.f32 -1.442695, %v10342_v15  ;;  %v11110_v35 = vld [vmem:[%s16508_s13 + $0x8] sm:$0xff]  ;;  %v11109_v16 = vld [vmem:[%s16508_s13] sm:$0xff] }
0x46a3   :  { %v10496_v2 = vpop.f32.mrf.mxu0  ;;  %v10572_v55 = vpop.f32.mrf.mxu1 }
0x46a4   :  { %10501 = vrot.lane.b32.xlu1 %v10496_v2, %s14156_s28 }
0x46a5   :  { %v13449_v58 = vpop.f32.mrf.mxu0  ;;  %v13460_v19 = vpop.f32.mrf.mxu1 }
0x46ad   :  { %v10679_v10 = vpop.f32.mrf.mxu0  ;;  %v10756_v1 = vpop.f32.mrf.mxu1 }
0x46ae   :  { %v10689_v30 = vadd.f32 %v11509_v32, %v10679_v10 }
0x46af   :  { %v13471_v48 = vpop.f32.mrf.mxu0  ;;  %v13482_v34 = vpop.f32.mrf.mxu1 }
0x46b0   :  { %v16433_v6 = vadd.f32 %v10756_v1, %v10689_v30  ;;  %v11116_v34 = vld [vmem:[%s16508_s13 + $0x38] sm:$0xff] }
0x46b1   :  { %13528 = vmatpush3.msra.mxu0 %v11116_v34 }
0x46b2   :  { %13529 = vmatprep.subr.mxu0 %v14153_v0 }
0x46b6   :  { %v10843_v25 = vpop.f32.mrf.mxu0 }
0x46b7   :  { %v10847_v53 = vadd.f32 %v10843_v25, %v16433_v6  ;;  %v11115_v25 = vld [vmem:[%s16508_s13 + $0x30] sm:$0xff] }
0x46b8   :  { %v13493_v3 = vpop.f32.mrf.mxu0  ;;  %13530 = vmatpush3.msra.mxu0 %v11115_v25 }
0x46b9   :  { %v11511_v43 = vmul.f32 -1.442695, %v10847_v53  ;;  %13531 = vmatprep.subr.mxu0 %v14153_v0 }
0x46ba   :  { %v10920_v14 = vpop.f32.mrf.mxu1 }
0x46bc   :  { %v13504_v45 = vpop.f32.mrf.mxu1 }
0x46be   :  { %v11001_v18 = vpop.f32.mrf.mxu0 }
0x46bf   :  { %11006 = vrot.lane.b32.xlu0 %v11001_v18, %s14156_s28 }
0x46c0   :  { %v13515_v24 = vpop.f32.mrf.mxu0 }
0x46c5   :  { %v11077_v40 = vpop.f32.mrf.mxu1 }
0x46c7   :  { %v13526_v20 = vpop.f32.mrf.mxu1 }
0x4716   :  { %v10502_v31 = vpop.permute.xlu1 %10501 }
0x4717   :  { %v10504_v27 = vadd.f32 %v10502_v31, %v15966_v22 }
0x4719   :  { %13930 = vtanh.f32 %v10504_v27 }
0x4726   :  { %v13931_v8 = vpop.eup %13930 }
0x4727   :  { %10589 = vrot.lane.b32.xlu1 %v13931_v8, %s14156_s28 }
0x472b   :  { %10420 = vrot.lane.b32.xlu1 %v10415_v17, %s14155_s3  ;;  %v11112_v17 = vld [vmem:[%s16508_s13 + $0x18] sm:$0xff] }
0x472c   :  { %13539 = vmatpush3.msra.mxu1 %v11112_v17 }
0x472d   :  { %13540 = vmatprep.subr.mxu1 %v14153_v0 }
0x4731   :  { %v11007_v42 = vpop.permute.xlu0 %11006 }
0x4732   :  { %v11009_v21 = vadd.f32 %v11007_v42, %v16433_v6 }
0x4734   :  { %13932 = vtanh.f32 %v11009_v21 }
0x4735   :  { %13934 = vpow2.f32 %v11502_v23 }
0x4741   :  { %v13933_v39 = vpop.eup %13932 }
0x4742   :  { %11094 = vrot.lane.b32.xlu0 %v13933_v39, %s14156_s28  ;;  %v13935_v49 = vpop.eup %13934  ;;  %v11516_v39 = vld [vmem:[%s16509_s14] ss:$0 sm:$0xff] }
0x4743   :  { %v10346_v50 = vadd.f32 1.0, %v13935_v49 }
0x4745   :  { %13936 = vrcp.f32 %v10346_v50 }
0x4746   :  { %10925 = vrot.lane.b32.xlu0 %v10920_v14, %s14155_s3  ;;  %13938 = vpow2.f32 %v11511_v43 }
0x4752   :  { %v13937_v38 = vpop.eup %13936 }
0x4753   :  { %v13939_v47 = vpop.eup %13938 }
0x4754   :  { %v10851_v37 = vadd.f32 1.0, %v13939_v47 }
0x4756   :  { %13940 = vrcp.f32 %v10851_v37 }
0x4763   :  { %v13941_v59 = vpop.eup %13940 }
0x4799   :  { %v10590_v63 = vpop.permute.xlu1 %10589 }
0x479a   :  { %v10592_v44 = vmul.f32 %v13937_v38, %v10590_v63 }
0x479c   :  { %10594 = vrot.lane.b32.xlu1 %v10592_v44, %s14155_s3 }
0x479d   :  { %v10421_v29 = vpop.permute.xlu1 %10420 }
0x479e   :  { %v10423_v4 = vadd.f32 %v10421_v29, %v15966_v22 }
0x47a0   :  { %10577 = vrot.lane.b32.xlu1 %v10572_v55, %s14157_s8  ;;  %v11504_v9 = vmul.f32 -1.442695, %v10423_v4 }
0x47a2   :  { %13942 = vpow2.f32 %v11504_v9 }
0x47af   :  { %v13943_v61 = vpop.eup %13942 }
0x47b0   :  { %v10427_v26 = vadd.f32 1.0, %v13943_v61 }
0x47b2   :  { %13944 = vrcp.f32 %v10427_v26 }
0x47b4   :  { %v11095_v13 = vpop.permute.xlu0 %11094 }
0x47b5   :  { %v11097_v46 = vmul.f32 %v13941_v59, %v11095_v13 }
0x47b7   :  { %11099 = vrot.lane.b32.xlu0 %v11097_v46, %s14155_s3 }
0x47b8   :  { %v10926_v33 = vpop.permute.xlu0 %10925 }
0x47b9   :  { %v10928_v11 = vadd.f32 %v10926_v33, %v16433_v6 }
0x47bb   :  { %11082 = vrot.lane.b32.xlu0 %v11077_v40, %s14157_s8  ;;  %v11512_v7 = vmul.f32 -1.442695, %v10928_v11 }
0x47bd   :  { %13946 = vpow2.f32 %v11512_v7 }
0x47bf   :  { %v13945_v28 = vpop.eup %13944 }
0x47c0   :  { %v10587_v12 = vmul.f32 %v13945_v28, %v16351_v56  ;;  %v11111_v56 = vld [vmem:[%s16508_s13 + $0x10] sm:$0xff] }
0x47c1   :  { %13541 = vmatpush3.msra.mxu1 %v11111_v56 }
0x47c2   :  { %13542 = vmatprep.subr.mxu1 %v14153_v0 }
0x47c3   :  { %13543 = vmatpush3.msra.mxu1 %v11110_v35 }
0x47c4   :  { %13544 = vmatprep.subr.mxu1 %v14153_v0 }
0x47c5   :  { %13545 = vmatpush3.msra.mxu1 %v11109_v16 }
0x47ca   :  { %v13947_v57 = vpop.eup %13946 }
0x47cb   :  { %v10932_v5 = vadd.f32 1.0, %v13947_v57 }
0x480e   :  { %v10595_v51 = vpop.permute.xlu1 %10594 }
0x480f   :  { %v10597_v54 = vadd.f32 %v10595_v51, %v10587_v12 }
0x4811   :  { %13948 = vtanh.f32 %v10597_v54 }
0x4812   :  { %13950 = vrcp.f32 %v10932_v5  ;;  %v10578_v55 = vpop.permute.xlu1 %10577 }
0x4813   :  { %v10580_v58 = vadd.f32 %v10578_v55, %v15966_v22  ;;  %v11114_v22 = vld [vmem:[%s16508_s13 + $0x28] sm:$0xff] }
0x4814   :  { %13532 = vmatpush3.msra.mxu0 %v11114_v22 }
0x4815   :  { %v11507_v19 = vmul.f32 -1.442695, %v10580_v58  ;;  %13533 = vmatprep.subr.mxu0 %v14153_v0 }
0x481e   :  { %v13949_v60 = vpop.eup %13948 }
0x481f   :  { %10600 = vrot.lane.b32.xlu1 %v13949_v60, %s14156_s28  ;;  %v13951_v52 = vpop.eup %13950 }
0x4820   :  { %v11092_v36 = vmul.f32 0.0, %v13951_v52 }
0x4829   :  { %v11100_v62 = vpop.permute.xlu0 %11099 }
0x482a   :  { %v11102_v41 = vadd.f32 %v11100_v62, %v11092_v36 }
0x482c   :  { %13952 = vtanh.f32 %v11102_v41 }
0x482d   :  { %13954 = vpow2.f32 %v11507_v19  ;;  %v11083_v1 = vpop.permute.xlu0 %11082 }
0x482e   :  { %v11085_v30 = vadd.f32 %v11083_v1, %v16433_v6  ;;  %v11113_v6 = vld [vmem:[%s16508_s13 + $0x20] sm:$0xff] }
0x482f   :  { %13534 = vmatpush3.msra.mxu0 %v11113_v6 }
0x4830   :  { %v11513_v48 = vmul.f32 -1.442695, %v11085_v30 }
0x4839   :  { %v13953_v2 = vpop.eup %13952 }
0x483a   :  { %11105 = vrot.lane.b32.xlu0 %v13953_v2, %s14156_s28  ;;  %v13955_v32 = vpop.eup %13954 }
0x483b   :  { %v10584_v10 = vadd.f32 1.0, %v13955_v32 }
0x483d   :  { %13956 = vrcp.f32 %v10584_v10 }
0x483e   :  { %13958 = vpow2.f32 %v11513_v48 }
0x484a   :  { %v13957_v3 = vpop.eup %13956 }
0x484b   :  { %v13959_v14 = vpop.eup %13958 }
0x484c   :  { %v11089_v45 = vadd.f32 1.0, %v13959_v14 }
0x484e   :  { %13960 = vrcp.f32 %v11089_v45 }
0x485b   :  { %v13961_v31 = vpop.eup %13960 }
0x4891   :  { %v10601_v18 = vpop.permute.xlu1 %10600 }
0x4892   :  { %v10603_v24 = vmul.f32 %v13957_v3, %v10601_v18 }
0x4894   :  { %11193 = vrot.lane.b32.xlu0 %v10603_v24, %s14155_s3 }
0x48ac   :  { %v11106_v27 = vpop.permute.xlu0 %11105 }
0x48ad   :  { %v11108_v8 = vmul.f32 %v13961_v31, %v11106_v27 }
0x48af   :  { %11118 = vrot.lane.b32.xlu1 %v11108_v8, %s14155_s3  ;;  %s14118_s3 = scalar_lea.vmem %s11284_s18, 32 }
0x48b0   :  { %p14119_p11 = scmp.ne.s32.totalorder %s11284_s18, %s14118_s3  ;;  %p14124_p13 = scmp.lt.s32.totalorder %s14118_s3, %s14118_s3 }
0x48b2   :  { %p14125_p0 = por %p14124_p13, %p14123_p12 }
0x48b4   :  { %p14126_p1 = pnand %p14125_p0, %p14119_p11 }
0x4906   :  { %v11194_v42 = vpop.permute.xlu0 %11193 }
0x4907   :  { %13547 = vmatmul.mubr.msk.f32.vlgmr.msra.gmra.mxu1 %vm755_vm3, %v11194_v42 }
0x4921   :  { %v11119_v21 = vpop.permute.xlu1 %11118 }
0x4922   :  { %13536 = vmatmul.mubr.msk.f32.vlgmr.msra.gmra.mxu0 %vm755_vm3, %v11119_v21 }
0x49c7   :  { %v11263_v0 = vpop.f32.mrf.mxu1 }
0x49c9   :  { %v13548_v40 = vpop.f32.mrf.mxu1 }
0x49e2   :  { %v11188_v20 = vpop.f32.mrf.mxu0 }
0x49e3   :  { %v11264_v15 = vadd.f32 %v11263_v0, %v11188_v20 }
0x49e4   :  { %v13537_v23 = vpop.f32.mrf.mxu0 }
0x49e5   :  { %v11274_v49 = vadd.f32 %v11516_v39, %v11264_v15 }
0x49e7   :  { %11276 = vst.msk [vmem:[#allocation11] sm:$0x3] %vm11275_vm4, %v11274_v49 }
0x49e8   :  { %14129 = shalt.err (!%p14126_p1)
}
0x49e9   :  { %11286 = dma.vmem_to_hbm [thread:$0]  %s11284_s18, 32, %s16510_s15, [#allocation4]  }
0x49ea   :  { %14144 = dma.done.wait [#allocation4], 32  }
0x49eb   :  { %14145 = vsyncadd [#allocation4], 4294967264 }
0x49ec   :  { %11290 = vsyncpa [#allocation3], 1 }
0x49ed   :  { %11291 = vsyncpa [#allocation6], 1 }
0x49ee   :  { %11292 = vsyncpa [#allocation9], 1 }
0x49ef   :  { %11293 = vsyncpa [#allocation4], 1 }

</bundles_post_ra>
